<compile_context>
chip_gen: v5e
topology: v5e:2x2
jax: 0.10.0
libtpu: 0.0.40
codegen_flags: <defaults>
</compile_context>

<pallas_src>
import functools

import numpy as np
import jax
import jax.numpy as jnp
from jax.experimental import pallas as pl
from jax.experimental.pallas import tpu as pltpu

_LANE = 128

# Spatial sizes implied by fc4.in_features == 960 == 64*3*5 (=> 48x64 input):
#   input 48x64 -> conv1 11x15 -> conv2 5x7 -> conv3 3x5
_H1, _W1 = 11, 15
_H2, _W2 = 5, 7
_H3, _W3 = 3, 5
_P3 = _H3 * _W3            # 15 spatial positions feeding the flatten


def _zero_index_map(ndim):
    return lambda i, _n=ndim: (0,) * _n


def _full_spec(shape):
    """Whole-array VMEM block (grid=(1,))."""
    return pl.BlockSpec(tuple(shape), _zero_index_map(len(shape)))


# -----------------------------------------------------------------------------
# The fused kernel: conv1 -> conv2 -> conv3 -> flatten -> fc4 -> fc5
# -----------------------------------------------------------------------------
def _net_kernel(x1_ref, w1_ref, b1_ref, w2_ref, b2_ref, g2_ref,
                w3_ref, b3_ref, g3_ref, w4_ref, b4_ref, w5_ref, b5_ref,
                o_ref, *, n_batch):
    f32 = jnp.float32
    bf16 = jnp.bfloat16

    # ---- conv1: one matmul over the (wrapper-side) im2col patch matrix ------
    a1 = jnp.dot(x1_ref[...], w1_ref[...], preferred_element_type=f32)
    a1 = jnp.maximum(a1 + b1_ref[...], 0.0).astype(bf16)          # [N*165, 32]

    # ---- conv2 (3x3, s2): weight-first matmul + 9 constant gather matmuls ---
    t2 = jnp.dot(a1, w2_ref[...], preferred_element_type=f32).astype(bf16)  # [N*165, 9*128]
    acc2 = jnp.dot(g2_ref[0], t2[:, :_LANE], preferred_element_type=f32)
    for ij in range(1, 9):
        acc2 = acc2 + jnp.dot(g2_ref[ij], t2[:, ij * _LANE:(ij + 1) * _LANE],
                              preferred_element_type=f32)
    a2 = jnp.maximum(acc2 + b2_ref[...], 0.0).astype(bf16)        # [N*35, 128]

    # ---- conv3 (3x3, s1): same formulation -----------------------------------
    t3 = jnp.dot(a2, w3_ref[...], preferred_element_type=f32).astype(bf16)  # [N*35, 9*128]
    acc3 = jnp.dot(g3_ref[0], t3[:, :_LANE], preferred_element_type=f32)
    for ij in range(1, 9):
        acc3 = acc3 + jnp.dot(g3_ref[ij], t3[:, ij * _LANE:(ij + 1) * _LANE],
                              preferred_element_type=f32)
    a3 = jnp.maximum(acc3 + b3_ref[...], 0.0)                     # [15*N, 128] f32
    # a3 rows are ordered (spatial p, batch n); channels live on lanes
    # (64 real channels + 64 zero padding).

    # ---- flatten: the PyTorch NCHW channel-major order is folded into w4's
    #      row permutation, so here we only concat per-position row blocks. ----
    feat = jnp.concatenate(
        [a3[p * n_batch:(p + 1) * n_batch, :] for p in range(_P3)], axis=1
    ).astype(bf16)                                                 # [N, 15*128]

    # ---- fc4 + ReLU, fc5 ------------------------------------------------------
    h = jnp.dot(feat, w4_ref[...], preferred_element_type=f32)
    h = jnp.maximum(h + b4_ref[...], 0.0).astype(bf16)            # [N, 512]
    out = jnp.dot(h, w5_ref[...], preferred_element_type=f32) + b5_ref[...]
    o_ref[...] = out                                               # [N, 128] f32


# -----------------------------------------------------------------------------
# conv1 im2col via space-to-depth (stride 4 divides kernel 8 => 2x2 block concat)
# Feature order per patch: (bi, bj, di, dj, ci), matched by w1 in prepare_constants.
# -----------------------------------------------------------------------------
def _conv1_patches(x_nchw):
    n, c, h, w = x_nchw.shape
    assert (h // 4 - 1, w // 4 - 1) == (_H1, _W1), "Net requires a 48x64 input"
    x = jnp.transpose(x_nchw, (0, 2, 3, 1))                        # NHWC
    hb, wb = h // 4, w // 4
    blocks = x.reshape(n, hb, 4, wb, 4, c)
    blocks = blocks.transpose(0, 1, 3, 2, 4, 5).reshape(n, hb, wb, 16 * c)
    parts = [blocks[:, bi:bi + _H1, bj:bj + _W1, :] for bi in (0, 1) for bj in (0, 1)]
    patches = jnp.concatenate(parts, axis=-1).reshape(n * _H1 * _W1, 64 * c)
    return patches.astype(jnp.bfloat16)


# -----------------------------------------------------------------------------
# One-time parameter preprocessing (done once, outside the per-step path):
# transposes / pads / bf16 casts and the constant conv gather matrices.
# -----------------------------------------------------------------------------
def prepare_constants(params, *, batch):
    bf16 = jnp.bfloat16
    f32 = jnp.float32

    # conv1 -> [256, 32]; row order (bi, bj, di, dj, ci) matches _conv1_patches.
    w1 = jnp.transpose(params["conv1_w"], (2, 3, 1, 0))            # [8, 8, ci, co]
    w1 = w1.reshape(2, 4, 2, 4, 4, 32).transpose(0, 2, 1, 3, 4, 5).reshape(256, 32)
    b1 = params["conv1_b"].reshape(1, 32)

    # conv2 -> W2cat [32, 9*128]: block (i,j) holds w2[:, :, i, j].T padded to 128 lanes.
    w2 = jnp.transpose(params["conv2_w"], (1, 2, 3, 0))            # [ci, i, j, co]
    w2 = jnp.pad(w2, ((0, 0), (0, 0), (0, 0), (0, _LANE - 64))).reshape(32, 9 * _LANE)
    b2 = jnp.pad(params["conv2_b"], (0, _LANE - 64)).reshape(1, _LANE)

    # conv3 -> W3cat [128, 9*128] (input channels zero-padded 64 -> 128).
    w3 = jnp.transpose(params["conv3_w"], (1, 2, 3, 0))            # [ci, i, j, co]
    w3 = jnp.pad(w3, ((0, 0), (0, 0), (0, 0), (0, _LANE - 64))).reshape(64, 9 * _LANE)
    w3 = jnp.pad(w3, ((0, _LANE - 64), (0, 0)))
    b3 = jnp.pad(params["conv3_b"], (0, _LANE - 64)).reshape(1, _LANE)

    # fc4 -> [15*128, 512]: row p*128+c <- fc4_w[o, c*15+p] (folds the NCHW flatten).
    w4 = params["fc4_w"].reshape(512, 64, _P3).transpose(2, 1, 0)  # (p, c, o)
    w4 = jnp.pad(w4, ((0, 0), (0, _LANE - 64), (0, 0))).reshape(_P3 * _LANE, 512)
    b4 = params["fc4_b"].reshape(1, 512)

    # fc5 -> [512, 128] (out features zero-padded to a lane-dense 128).
    n_out = params["fc5_w"].shape[0]
    w5 = jnp.pad(params["fc5_w"].T, ((0, 0), (0, _LANE - n_out)))
    b5 = jnp.pad(params["fc5_b"], (0, _LANE - n_out)).reshape(1, _LANE)

    # Constant 0/1 gather matrices: conv2/conv3's strided im2col becomes plain
    # MXU matmuls inside the kernel (no strided VMEM reads, no HBM patch slabs).
    m1, m2, m3 = batch * _H1 * _W1, batch * _H2 * _W2, batch * _P3
    g2 = np.zeros((9, m2, m1), np.float32)
    for n in range(batch):
        for ho in range(_H2):
            for wo in range(_W2):
                row = n * _H2 * _W2 + ho * _W2 + wo
                for i in range(3):
                    for j in range(3):
                        col = n * _H1 * _W1 + (2 * ho + i) * _W1 + (2 * wo + j)
                        g2[i * 3 + j, row, col] = 1.0
    g3 = np.zeros((9, m3, m2), np.float32)
    for n in range(batch):
        for ho in range(_H3):
            for wo in range(_W3):
                row = (ho * _W3 + wo) * batch + n          # (spatial, batch) order
                for i in range(3):
                    for j in range(3):
                        col = n * _H2 * _W2 + (ho + i) * _W2 + (wo + j)
                        g3[i * 3 + j, row, col] = 1.0

    return {
        "w1": w1.astype(bf16), "b1": b1.astype(f32),
        "w2": w2.astype(bf16), "b2": b2.astype(f32), "g2": jnp.asarray(g2, bf16),
        "w3": w3.astype(bf16), "b3": b3.astype(f32), "g3": jnp.asarray(g3, bf16),
        "w4": w4.astype(bf16), "b4": b4.astype(f32),
        "w5": w5.astype(bf16), "b5": b5.astype(f32),
    }


# -----------------------------------------------------------------------------
# Forward pass: conv1 im2col (layout plumbing) + ONE fused pallas_call.
# -----------------------------------------------------------------------------
def net_forward(consts, x_nchw, *, n_out):
    n = x_nchw.shape[0]
    assert consts["g2"].shape[1] == n * _H2 * _W2, "constants built for a different batch"
    x1 = _conv1_patches(x_nchw)                                    # [N*165, 256] bf16

    args = (x1, consts["w1"], consts["b1"], consts["w2"], consts["b2"],
            consts["g2"], consts["w3"], consts["b3"], consts["g3"],
            consts["w4"], consts["b4"], consts["w5"], consts["b5"])

    out = pl.pallas_call(
        functools.partial(_net_kernel, n_batch=n),
        out_shape=jax.ShapeDtypeStruct((n, _LANE), jnp.float32),   # f32 logits, lane-dense
        grid=(1,),
        in_specs=[_full_spec(a.shape) for a in args],
        out_specs=_full_spec((n, _LANE)),
        compiler_params=pltpu.CompilerParams(
            dimension_semantics=("arbitrary",),
            # True footprint ~10 MiB (inputs ~3.4 MiB double-buffered + resident
            # activation values); 32 MiB leaves headroom on v5e/v6e/v7x.
            vmem_limit_bytes=32 * 1024 * 1024,
        ),
    )(*args)
    return out[:, :n_out]


# -----------------------------------------------------------------------------
# Pure-JAX f32 reference (no Pallas) for a numerical sanity check.
# -----------------------------------------------------------------------------
def net_forward_reference(params, x):
    def conv(x, w, b, stride):
        y = jax.lax.conv_general_dilated(
            x, w, window_strides=(stride, stride), padding="VALID",
            dimension_numbers=("NCHW", "OIHW", "NCHW"))
        return jax.nn.relu(y + b[None, :, None, None])

    x = conv(x, params["conv1_w"], params["conv1_b"], 4)
    x = conv(x, params["conv2_w"], params["conv2_b"], 2)
    x = conv(x, params["conv3_w"], params["conv3_b"], 1)
    feat = x.reshape(x.shape[0], -1)
    h = jax.nn.relu(feat @ params["fc4_w"].T + params["fc4_b"])
    return h @ params["fc5_w"].T + params["fc5_b"]


if __name__ == "__main__":
    # Spatial size is fixed by the architecture (fc4 expects 960 = 64*3*5,
    # which implies a 48x64 input). Keep batch / channels / n_out small.
    batch, n_channel, n_out = 2, 4, 6

    key = jax.random.PRNGKey(0)
    ks = jax.random.split(key, 11)

    def kaiming(k, shape, fan_in):
        return jax.random.normal(k, shape, jnp.float32) * jnp.sqrt(2.0 / fan_in)

    params = {
        "conv1_w": kaiming(ks[0], (32, n_channel, 8, 8), n_channel * 8 * 8),
        "conv1_b": 0.01 * jax.random.normal(ks[1], (32,), jnp.float32),
        "conv2_w": kaiming(ks[2], (64, 32, 3, 3), 32 * 3 * 3),
        "conv2_b": 0.01 * jax.random.normal(ks[3], (64,), jnp.float32),
        "conv3_w": kaiming(ks[4], (64, 64, 3, 3), 64 * 3 * 3),
        "conv3_b": 0.01 * jax.random.normal(ks[5], (64,), jnp.float32),
        "fc4_w": kaiming(ks[6], (512, 960), 960),
        "fc4_b": 0.01 * jax.random.normal(ks[7], (512,), jnp.float32),
        "fc5_w": kaiming(ks[8], (n_out, 512), 512),
        "fc5_b": 0.01 * jax.random.normal(ks[9], (n_out,), jnp.float32),
    }
    x = jax.random.normal(ks[10], (batch, n_channel, 48, 64), jnp.float32)

    # One-time weight preprocessing (outside the per-step path).
    consts = prepare_constants(params, batch=batch)
    fwd = jax.jit(functools.partial(net_forward, n_out=n_out))

    out = jax.block_until_ready(fwd(consts, x))
    ref = jax.block_until_ready(jax.jit(net_forward_reference)(params, x))

    assert out.shape == (batch, n_out), out.shape
    assert bool(jnp.isfinite(out).all())
    # bf16 MXU inputs with f32 accumulation: expected max relative error ~1e-3,
    # well under 3e-2 (an all-f32 path would be ~1e-6).
    rel_err = float(jnp.max(jnp.abs(out - ref)) / (jnp.max(jnp.abs(ref)) + 1e-6))
    assert rel_err < 3e-2, f"mismatch vs reference: rel_err={rel_err}"

    print("KERNEL_OK")
</pallas_src>

<mosaic_0001>
module attributes {stable_mosaic.version = 11 : i64} {
  func.func @_net_kernel(%arg0: i32, %arg1: memref<330x256xbf16, #tpu.memory_space<vmem>>, %arg2: memref<256x32xbf16, #tpu.memory_space<vmem>>, %arg3: memref<1x32xf32, #tpu.memory_space<vmem>>, %arg4: memref<32x1152xbf16, #tpu.memory_space<vmem>>, %arg5: memref<1x128xf32, #tpu.memory_space<vmem>>, %arg6: memref<9x70x330xbf16, #tpu.memory_space<vmem>>, %arg7: memref<128x1152xbf16, #tpu.memory_space<vmem>>, %arg8: memref<1x128xf32, #tpu.memory_space<vmem>>, %arg9: memref<9x30x70xbf16, #tpu.memory_space<vmem>>, %arg10: memref<1920x512xbf16, #tpu.memory_space<vmem>>, %arg11: memref<1x512xf32, #tpu.memory_space<vmem>>, %arg12: memref<512x128xbf16, #tpu.memory_space<vmem>>, %arg13: memref<1x128xf32, #tpu.memory_space<vmem>>, %arg14: memref<2x128xf32, #tpu.memory_space<vmem>>) attributes {dimension_semantics = [#tpu.dimension_semantics<arbitrary>], iteration_bounds = array<i64: 1>, scalar_prefetch = 0 : i64, scratch_operands = 0 : i64, tpu.core_type = #tpu.core_type<tc>, window_params = [{pipeline_mode = #tpu.pipeline_mode<synchronous>, transform_indices = @transform_0, window_bounds = array<i64: 330, 256>}, {pipeline_mode = #tpu.pipeline_mode<synchronous>, transform_indices = @transform_1, window_bounds = array<i64: 256, 32>}, {pipeline_mode = #tpu.pipeline_mode<synchronous>, transform_indices = @transform_2, window_bounds = array<i64: 1, 32>}, {pipeline_mode = #tpu.pipeline_mode<synchronous>, transform_indices = @transform_3, window_bounds = array<i64: 32, 1152>}, {pipeline_mode = #tpu.pipeline_mode<synchronous>, transform_indices = @transform_4, window_bounds = array<i64: 1, 128>}, {pipeline_mode = #tpu.pipeline_mode<synchronous>, transform_indices = @transform_5, window_bounds = array<i64: 9, 70, 330>}, {pipeline_mode = #tpu.pipeline_mode<synchronous>, transform_indices = @transform_6, window_bounds = array<i64: 128, 1152>}, {pipeline_mode = #tpu.pipeline_mode<synchronous>, transform_indices = @transform_7, window_bounds = array<i64: 1, 128>}, {pipeline_mode = #tpu.pipeline_mode<synchronous>, transform_indices = @transform_8, window_bounds = array<i64: 9, 30, 70>}, {pipeline_mode = #tpu.pipeline_mode<synchronous>, transform_indices = @transform_9, window_bounds = array<i64: 1920, 512>}, {pipeline_mode = #tpu.pipeline_mode<synchronous>, transform_indices = @transform_10, window_bounds = array<i64: 1, 512>}, {pipeline_mode = #tpu.pipeline_mode<synchronous>, transform_indices = @transform_11, window_bounds = array<i64: 512, 128>}, {pipeline_mode = #tpu.pipeline_mode<synchronous>, transform_indices = @transform_12, window_bounds = array<i64: 1, 128>}, {pipeline_mode = #tpu.pipeline_mode<synchronous>, transform_indices = @transform_13, window_bounds = array<i64: 2, 128>}]} {
    %c0 = arith.constant 0 : index
    %c0_0 = arith.constant 0 : index
    %0 = vector.load %arg1[%c0, %c0_0] : memref<330x256xbf16, #tpu.memory_space<vmem>>, vector<330x256xbf16>
    %c0_1 = arith.constant 0 : index
    %c0_2 = arith.constant 0 : index
    %1 = vector.load %arg2[%c0_1, %c0_2] : memref<256x32xbf16, #tpu.memory_space<vmem>>, vector<256x32xbf16>
    %cst = arith.constant dense<0.000000e+00> : vector<330x32xf32>
    %2 = tpu.matmul %0, %1, %cst {dimension_numbers = #tpu.dot_dimension_numbers<[1], [0], [0], [1], [0, 0, 1, 1], [], []>} : vector<330x256xbf16>, vector<256x32xbf16>, vector<330x32xf32> -> vector<330x32xf32>
    %c0_3 = arith.constant 0 : index
    %c0_4 = arith.constant 0 : index
    %3 = vector.load %arg3[%c0_3, %c0_4] : memref<1x32xf32, #tpu.memory_space<vmem>>, vector<1x32xf32>
    %4 = vector.broadcast %3 : vector<1x32xf32> to vector<330x32xf32>
    %5 = arith.addf %2, %4 : vector<330x32xf32>
    %cst_5 = arith.constant 0.000000e+00 : f32
    %6 = vector.broadcast %cst_5 : f32 to vector<330x32xf32>
    %7 = arith.maximumf %5, %6 : vector<330x32xf32>
    %8 = arith.truncf %7 : vector<330x32xf32> to vector<330x32xbf16>
    %c0_6 = arith.constant 0 : index
    %c0_7 = arith.constant 0 : index
    %9 = vector.load %arg4[%c0_6, %c0_7] : memref<32x1152xbf16, #tpu.memory_space<vmem>>, vector<32x1152xbf16>
    %cst_8 = arith.constant dense<0.000000e+00> : vector<330x1152xf32>
    %10 = tpu.matmul %8, %9, %cst_8 {dimension_numbers = #tpu.dot_dimension_numbers<[1], [0], [0], [1], [0, 0, 1, 1], [], []>} : vector<330x32xbf16>, vector<32x1152xbf16>, vector<330x1152xf32> -> vector<330x1152xf32>
    %11 = arith.truncf %10 : vector<330x1152xf32> to vector<330x1152xbf16>
    %c0_9 = arith.constant 0 : index
    %c0_10 = arith.constant 0 : index
    %c0_11 = arith.constant 0 : index
    %12 = vector.load %arg6[%c0_9, %c0_10, %c0_11] : memref<9x70x330xbf16, #tpu.memory_space<vmem>>, vector<1x70x330xbf16>
    %13 = vector.shape_cast %12 : vector<1x70x330xbf16> to vector<70x330xbf16>
    %14 = vector.extract_strided_slice %11 {offsets = [0, 0], sizes = [330, 128], strides = [1, 1]} : vector<330x1152xbf16> to vector<330x128xbf16>
    %cst_12 = arith.constant dense<0.000000e+00> : vector<70x128xf32>
    %15 = tpu.matmul %13, %14, %cst_12 {dimension_numbers = #tpu.dot_dimension_numbers<[1], [0], [0], [1], [0, 0, 1, 1], [], []>} : vector<70x330xbf16>, vector<330x128xbf16>, vector<70x128xf32> -> vector<70x128xf32>
    %c1 = arith.constant 1 : index
    %c0_13 = arith.constant 0 : index
    %c0_14 = arith.constant 0 : index
    %16 = vector.load %arg6[%c1, %c0_13, %c0_14] : memref<9x70x330xbf16, #tpu.memory_space<vmem>>, vector<1x70x330xbf16>
    %17 = vector.shape_cast %16 : vector<1x70x330xbf16> to vector<70x330xbf16>
    %18 = vector.extract_strided_slice %11 {offsets = [0, 128], sizes = [330, 128], strides = [1, 1]} : vector<330x1152xbf16> to vector<330x128xbf16>
    %cst_15 = arith.constant dense<0.000000e+00> : vector<70x128xf32>
    %19 = tpu.matmul %17, %18, %cst_15 {dimension_numbers = #tpu.dot_dimension_numbers<[1], [0], [0], [1], [0, 0, 1, 1], [], []>} : vector<70x330xbf16>, vector<330x128xbf16>, vector<70x128xf32> -> vector<70x128xf32>
    %20 = arith.addf %15, %19 : vector<70x128xf32>
    %c2 = arith.constant 2 : index
    %c0_16 = arith.constant 0 : index
    %c0_17 = arith.constant 0 : index
    %21 = vector.load %arg6[%c2, %c0_16, %c0_17] : memref<9x70x330xbf16, #tpu.memory_space<vmem>>, vector<1x70x330xbf16>
    %22 = vector.shape_cast %21 : vector<1x70x330xbf16> to vector<70x330xbf16>
    %23 = vector.extract_strided_slice %11 {offsets = [0, 256], sizes = [330, 128], strides = [1, 1]} : vector<330x1152xbf16> to vector<330x128xbf16>
    %cst_18 = arith.constant dense<0.000000e+00> : vector<70x128xf32>
    %24 = tpu.matmul %22, %23, %cst_18 {dimension_numbers = #tpu.dot_dimension_numbers<[1], [0], [0], [1], [0, 0, 1, 1], [], []>} : vector<70x330xbf16>, vector<330x128xbf16>, vector<70x128xf32> -> vector<70x128xf32>
    %25 = arith.addf %20, %24 : vector<70x128xf32>
    %c3 = arith.constant 3 : index
    %c0_19 = arith.constant 0 : index
    %c0_20 = arith.constant 0 : index
    %26 = vector.load %arg6[%c3, %c0_19, %c0_20] : memref<9x70x330xbf16, #tpu.memory_space<vmem>>, vector<1x70x330xbf16>
    %27 = vector.shape_cast %26 : vector<1x70x330xbf16> to vector<70x330xbf16>
    %28 = vector.extract_strided_slice %11 {offsets = [0, 384], sizes = [330, 128], strides = [1, 1]} : vector<330x1152xbf16> to vector<330x128xbf16>
    %cst_21 = arith.constant dense<0.000000e+00> : vector<70x128xf32>
    %29 = tpu.matmul %27, %28, %cst_21 {dimension_numbers = #tpu.dot_dimension_numbers<[1], [0], [0], [1], [0, 0, 1, 1], [], []>} : vector<70x330xbf16>, vector<330x128xbf16>, vector<70x128xf32> -> vector<70x128xf32>
    %30 = arith.addf %25, %29 : vector<70x128xf32>
    %c4 = arith.constant 4 : index
    %c0_22 = arith.constant 0 : index
    %c0_23 = arith.constant 0 : index
    %31 = vector.load %arg6[%c4, %c0_22, %c0_23] : memref<9x70x330xbf16, #tpu.memory_space<vmem>>, vector<1x70x330xbf16>
    %32 = vector.shape_cast %31 : vector<1x70x330xbf16> to vector<70x330xbf16>
    %33 = vector.extract_strided_slice %11 {offsets = [0, 512], sizes = [330, 128], strides = [1, 1]} : vector<330x1152xbf16> to vector<330x128xbf16>
    %cst_24 = arith.constant dense<0.000000e+00> : vector<70x128xf32>
    %34 = tpu.matmul %32, %33, %cst_24 {dimension_numbers = #tpu.dot_dimension_numbers<[1], [0], [0], [1], [0, 0, 1, 1], [], []>} : vector<70x330xbf16>, vector<330x128xbf16>, vector<70x128xf32> -> vector<70x128xf32>
    %35 = arith.addf %30, %34 : vector<70x128xf32>
    %c5 = arith.constant 5 : index
    %c0_25 = arith.constant 0 : index
    %c0_26 = arith.constant 0 : index
    %36 = vector.load %arg6[%c5, %c0_25, %c0_26] : memref<9x70x330xbf16, #tpu.memory_space<vmem>>, vector<1x70x330xbf16>
    %37 = vector.shape_cast %36 : vector<1x70x330xbf16> to vector<70x330xbf16>
    %38 = vector.extract_strided_slice %11 {offsets = [0, 640], sizes = [330, 128], strides = [1, 1]} : vector<330x1152xbf16> to vector<330x128xbf16>
    %cst_27 = arith.constant dense<0.000000e+00> : vector<70x128xf32>
    %39 = tpu.matmul %37, %38, %cst_27 {dimension_numbers = #tpu.dot_dimension_numbers<[1], [0], [0], [1], [0, 0, 1, 1], [], []>} : vector<70x330xbf16>, vector<330x128xbf16>, vector<70x128xf32> -> vector<70x128xf32>
    %40 = arith.addf %35, %39 : vector<70x128xf32>
    %c6 = arith.constant 6 : index
    %c0_28 = arith.constant 0 : index
    %c0_29 = arith.constant 0 : index
    %41 = vector.load %arg6[%c6, %c0_28, %c0_29] : memref<9x70x330xbf16, #tpu.memory_space<vmem>>, vector<1x70x330xbf16>
    %42 = vector.shape_cast %41 : vector<1x70x330xbf16> to vector<70x330xbf16>
    %43 = vector.extract_strided_slice %11 {offsets = [0, 768], sizes = [330, 128], strides = [1, 1]} : vector<330x1152xbf16> to vector<330x128xbf16>
    %cst_30 = arith.constant dense<0.000000e+00> : vector<70x128xf32>
    %44 = tpu.matmul %42, %43, %cst_30 {dimension_numbers = #tpu.dot_dimension_numbers<[1], [0], [0], [1], [0, 0, 1, 1], [], []>} : vector<70x330xbf16>, vector<330x128xbf16>, vector<70x128xf32> -> vector<70x128xf32>
    %45 = arith.addf %40, %44 : vector<70x128xf32>
    %c7 = arith.constant 7 : index
    %c0_31 = arith.constant 0 : index
    %c0_32 = arith.constant 0 : index
    %46 = vector.load %arg6[%c7, %c0_31, %c0_32] : memref<9x70x330xbf16, #tpu.memory_space<vmem>>, vector<1x70x330xbf16>
    %47 = vector.shape_cast %46 : vector<1x70x330xbf16> to vector<70x330xbf16>
    %48 = vector.extract_strided_slice %11 {offsets = [0, 896], sizes = [330, 128], strides = [1, 1]} : vector<330x1152xbf16> to vector<330x128xbf16>
    %cst_33 = arith.constant dense<0.000000e+00> : vector<70x128xf32>
    %49 = tpu.matmul %47, %48, %cst_33 {dimension_numbers = #tpu.dot_dimension_numbers<[1], [0], [0], [1], [0, 0, 1, 1], [], []>} : vector<70x330xbf16>, vector<330x128xbf16>, vector<70x128xf32> -> vector<70x128xf32>
    %50 = arith.addf %45, %49 : vector<70x128xf32>
    %c8 = arith.constant 8 : index
    %c0_34 = arith.constant 0 : index
    %c0_35 = arith.constant 0 : index
    %51 = vector.load %arg6[%c8, %c0_34, %c0_35] : memref<9x70x330xbf16, #tpu.memory_space<vmem>>, vector<1x70x330xbf16>
    %52 = vector.shape_cast %51 : vector<1x70x330xbf16> to vector<70x330xbf16>
    %53 = vector.extract_strided_slice %11 {offsets = [0, 1024], sizes = [330, 128], strides = [1, 1]} : vector<330x1152xbf16> to vector<330x128xbf16>
    %cst_36 = arith.constant dense<0.000000e+00> : vector<70x128xf32>
    %54 = tpu.matmul %52, %53, %cst_36 {dimension_numbers = #tpu.dot_dimension_numbers<[1], [0], [0], [1], [0, 0, 1, 1], [], []>} : vector<70x330xbf16>, vector<330x128xbf16>, vector<70x128xf32> -> vector<70x128xf32>
    %55 = arith.addf %50, %54 : vector<70x128xf32>
    %c0_37 = arith.constant 0 : index
    %c0_38 = arith.constant 0 : index
    %56 = vector.load %arg5[%c0_37, %c0_38] : memref<1x128xf32, #tpu.memory_space<vmem>>, vector<1x128xf32>
    %57 = vector.broadcast %56 : vector<1x128xf32> to vector<70x128xf32>
    %58 = arith.addf %55, %57 : vector<70x128xf32>
    %cst_39 = arith.constant 0.000000e+00 : f32
    %59 = vector.broadcast %cst_39 : f32 to vector<70x128xf32>
    %60 = arith.maximumf %58, %59 : vector<70x128xf32>
    %61 = arith.truncf %60 : vector<70x128xf32> to vector<70x128xbf16>
    %c0_40 = arith.constant 0 : index
    %c0_41 = arith.constant 0 : index
    %62 = vector.load %arg7[%c0_40, %c0_41] : memref<128x1152xbf16, #tpu.memory_space<vmem>>, vector<128x1152xbf16>
    %cst_42 = arith.constant dense<0.000000e+00> : vector<70x1152xf32>
    %63 = tpu.matmul %61, %62, %cst_42 {dimension_numbers = #tpu.dot_dimension_numbers<[1], [0], [0], [1], [0, 0, 1, 1], [], []>} : vector<70x128xbf16>, vector<128x1152xbf16>, vector<70x1152xf32> -> vector<70x1152xf32>
    %64 = arith.truncf %63 : vector<70x1152xf32> to vector<70x1152xbf16>
    %c0_43 = arith.constant 0 : index
    %c0_44 = arith.constant 0 : index
    %c0_45 = arith.constant 0 : index
    %65 = vector.load %arg9[%c0_43, %c0_44, %c0_45] : memref<9x30x70xbf16, #tpu.memory_space<vmem>>, vector<1x30x70xbf16>
    %66 = vector.shape_cast %65 : vector<1x30x70xbf16> to vector<30x70xbf16>
    %67 = vector.extract_strided_slice %64 {offsets = [0, 0], sizes = [70, 128], strides = [1, 1]} : vector<70x1152xbf16> to vector<70x128xbf16>
    %cst_46 = arith.constant dense<0.000000e+00> : vector<30x128xf32>
    %68 = tpu.matmul %66, %67, %cst_46 {dimension_numbers = #tpu.dot_dimension_numbers<[1], [0], [0], [1], [0, 0, 1, 1], [], []>} : vector<30x70xbf16>, vector<70x128xbf16>, vector<30x128xf32> -> vector<30x128xf32>
    %c1_47 = arith.constant 1 : index
    %c0_48 = arith.constant 0 : index
    %c0_49 = arith.constant 0 : index
    %69 = vector.load %arg9[%c1_47, %c0_48, %c0_49] : memref<9x30x70xbf16, #tpu.memory_space<vmem>>, vector<1x30x70xbf16>
    %70 = vector.shape_cast %69 : vector<1x30x70xbf16> to vector<30x70xbf16>
    %71 = vector.extract_strided_slice %64 {offsets = [0, 128], sizes = [70, 128], strides = [1, 1]} : vector<70x1152xbf16> to vector<70x128xbf16>
    %cst_50 = arith.constant dense<0.000000e+00> : vector<30x128xf32>
    %72 = tpu.matmul %70, %71, %cst_50 {dimension_numbers = #tpu.dot_dimension_numbers<[1], [0], [0], [1], [0, 0, 1, 1], [], []>} : vector<30x70xbf16>, vector<70x128xbf16>, vector<30x128xf32> -> vector<30x128xf32>
    %73 = arith.addf %68, %72 : vector<30x128xf32>
    %c2_51 = arith.constant 2 : index
    %c0_52 = arith.constant 0 : index
    %c0_53 = arith.constant 0 : index
    %74 = vector.load %arg9[%c2_51, %c0_52, %c0_53] : memref<9x30x70xbf16, #tpu.memory_space<vmem>>, vector<1x30x70xbf16>
    %75 = vector.shape_cast %74 : vector<1x30x70xbf16> to vector<30x70xbf16>
    %76 = vector.extract_strided_slice %64 {offsets = [0, 256], sizes = [70, 128], strides = [1, 1]} : vector<70x1152xbf16> to vector<70x128xbf16>
    %cst_54 = arith.constant dense<0.000000e+00> : vector<30x128xf32>
    %77 = tpu.matmul %75, %76, %cst_54 {dimension_numbers = #tpu.dot_dimension_numbers<[1], [0], [0], [1], [0, 0, 1, 1], [], []>} : vector<30x70xbf16>, vector<70x128xbf16>, vector<30x128xf32> -> vector<30x128xf32>
    %78 = arith.addf %73, %77 : vector<30x128xf32>
    %c3_55 = arith.constant 3 : index
    %c0_56 = arith.constant 0 : index
    %c0_57 = arith.constant 0 : index
    %79 = vector.load %arg9[%c3_55, %c0_56, %c0_57] : memref<9x30x70xbf16, #tpu.memory_space<vmem>>, vector<1x30x70xbf16>
    %80 = vector.shape_cast %79 : vector<1x30x70xbf16> to vector<30x70xbf16>
    %81 = vector.extract_strided_slice %64 {offsets = [0, 384], sizes = [70, 128], strides = [1, 1]} : vector<70x1152xbf16> to vector<70x128xbf16>
    %cst_58 = arith.constant dense<0.000000e+00> : vector<30x128xf32>
    %82 = tpu.matmul %80, %81, %cst_58 {dimension_numbers = #tpu.dot_dimension_numbers<[1], [0], [0], [1], [0, 0, 1, 1], [], []>} : vector<30x70xbf16>, vector<70x128xbf16>, vector<30x128xf32> -> vector<30x128xf32>
    %83 = arith.addf %78, %82 : vector<30x128xf32>
    %c4_59 = arith.constant 4 : index
    %c0_60 = arith.constant 0 : index
    %c0_61 = arith.constant 0 : index
    %84 = vector.load %arg9[%c4_59, %c0_60, %c0_61] : memref<9x30x70xbf16, #tpu.memory_space<vmem>>, vector<1x30x70xbf16>
    %85 = vector.shape_cast %84 : vector<1x30x70xbf16> to vector<30x70xbf16>
    %86 = vector.extract_strided_slice %64 {offsets = [0, 512], sizes = [70, 128], strides = [1, 1]} : vector<70x1152xbf16> to vector<70x128xbf16>
    %cst_62 = arith.constant dense<0.000000e+00> : vector<30x128xf32>
    %87 = tpu.matmul %85, %86, %cst_62 {dimension_numbers = #tpu.dot_dimension_numbers<[1], [0], [0], [1], [0, 0, 1, 1], [], []>} : vector<30x70xbf16>, vector<70x128xbf16>, vector<30x128xf32> -> vector<30x128xf32>
    %88 = arith.addf %83, %87 : vector<30x128xf32>
    %c5_63 = arith.constant 5 : index
    %c0_64 = arith.constant 0 : index
    %c0_65 = arith.constant 0 : index
    %89 = vector.load %arg9[%c5_63, %c0_64, %c0_65] : memref<9x30x70xbf16, #tpu.memory_space<vmem>>, vector<1x30x70xbf16>
    %90 = vector.shape_cast %89 : vector<1x30x70xbf16> to vector<30x70xbf16>
    %91 = vector.extract_strided_slice %64 {offsets = [0, 640], sizes = [70, 128], strides = [1, 1]} : vector<70x1152xbf16> to vector<70x128xbf16>
    %cst_66 = arith.constant dense<0.000000e+00> : vector<30x128xf32>
    %92 = tpu.matmul %90, %91, %cst_66 {dimension_numbers = #tpu.dot_dimension_numbers<[1], [0], [0], [1], [0, 0, 1, 1], [], []>} : vector<30x70xbf16>, vector<70x128xbf16>, vector<30x128xf32> -> vector<30x128xf32>
    %93 = arith.addf %88, %92 : vector<30x128xf32>
    %c6_67 = arith.constant 6 : index
    %c0_68 = arith.constant 0 : index
    %c0_69 = arith.constant 0 : index
    %94 = vector.load %arg9[%c6_67, %c0_68, %c0_69] : memref<9x30x70xbf16, #tpu.memory_space<vmem>>, vector<1x30x70xbf16>
    %95 = vector.shape_cast %94 : vector<1x30x70xbf16> to vector<30x70xbf16>
    %96 = vector.extract_strided_slice %64 {offsets = [0, 768], sizes = [70, 128], strides = [1, 1]} : vector<70x1152xbf16> to vector<70x128xbf16>
    %cst_70 = arith.constant dense<0.000000e+00> : vector<30x128xf32>
    %97 = tpu.matmul %95, %96, %cst_70 {dimension_numbers = #tpu.dot_dimension_numbers<[1], [0], [0], [1], [0, 0, 1, 1], [], []>} : vector<30x70xbf16>, vector<70x128xbf16>, vector<30x128xf32> -> vector<30x128xf32>
    %98 = arith.addf %93, %97 : vector<30x128xf32>
    %c7_71 = arith.constant 7 : index
    %c0_72 = arith.constant 0 : index
    %c0_73 = arith.constant 0 : index
    %99 = vector.load %arg9[%c7_71, %c0_72, %c0_73] : memref<9x30x70xbf16, #tpu.memory_space<vmem>>, vector<1x30x70xbf16>
    %100 = vector.shape_cast %99 : vector<1x30x70xbf16> to vector<30x70xbf16>
    %101 = vector.extract_strided_slice %64 {offsets = [0, 896], sizes = [70, 128], strides = [1, 1]} : vector<70x1152xbf16> to vector<70x128xbf16>
    %cst_74 = arith.constant dense<0.000000e+00> : vector<30x128xf32>
    %102 = tpu.matmul %100, %101, %cst_74 {dimension_numbers = #tpu.dot_dimension_numbers<[1], [0], [0], [1], [0, 0, 1, 1], [], []>} : vector<30x70xbf16>, vector<70x128xbf16>, vector<30x128xf32> -> vector<30x128xf32>
    %103 = arith.addf %98, %102 : vector<30x128xf32>
    %c8_75 = arith.constant 8 : index
    %c0_76 = arith.constant 0 : index
    %c0_77 = arith.constant 0 : index
    %104 = vector.load %arg9[%c8_75, %c0_76, %c0_77] : memref<9x30x70xbf16, #tpu.memory_space<vmem>>, vector<1x30x70xbf16>
    %105 = vector.shape_cast %104 : vector<1x30x70xbf16> to vector<30x70xbf16>
    %106 = vector.extract_strided_slice %64 {offsets = [0, 1024], sizes = [70, 128], strides = [1, 1]} : vector<70x1152xbf16> to vector<70x128xbf16>
    %cst_78 = arith.constant dense<0.000000e+00> : vector<30x128xf32>
    %107 = tpu.matmul %105, %106, %cst_78 {dimension_numbers = #tpu.dot_dimension_numbers<[1], [0], [0], [1], [0, 0, 1, 1], [], []>} : vector<30x70xbf16>, vector<70x128xbf16>, vector<30x128xf32> -> vector<30x128xf32>
    %108 = arith.addf %103, %107 : vector<30x128xf32>
    %c0_79 = arith.constant 0 : index
    %c0_80 = arith.constant 0 : index
    %109 = vector.load %arg8[%c0_79, %c0_80] : memref<1x128xf32, #tpu.memory_space<vmem>>, vector<1x128xf32>
    %110 = vector.broadcast %109 : vector<1x128xf32> to vector<30x128xf32>
    %111 = arith.addf %108, %110 : vector<30x128xf32>
    %cst_81 = arith.constant 0.000000e+00 : f32
    %112 = vector.broadcast %cst_81 : f32 to vector<30x128xf32>
    %113 = arith.maximumf %111, %112 : vector<30x128xf32>
    %114 = vector.extract_strided_slice %113 {offsets = [0, 0], sizes = [2, 128], strides = [1, 1]} : vector<30x128xf32> to vector<2x128xf32>
    %115 = vector.extract_strided_slice %113 {offsets = [2, 0], sizes = [2, 128], strides = [1, 1]} : vector<30x128xf32> to vector<2x128xf32>
    %116 = vector.extract_strided_slice %113 {offsets = [4, 0], sizes = [2, 128], strides = [1, 1]} : vector<30x128xf32> to vector<2x128xf32>
    %117 = vector.extract_strided_slice %113 {offsets = [6, 0], sizes = [2, 128], strides = [1, 1]} : vector<30x128xf32> to vector<2x128xf32>
    %118 = vector.extract_strided_slice %113 {offsets = [8, 0], sizes = [2, 128], strides = [1, 1]} : vector<30x128xf32> to vector<2x128xf32>
    %119 = vector.extract_strided_slice %113 {offsets = [10, 0], sizes = [2, 128], strides = [1, 1]} : vector<30x128xf32> to vector<2x128xf32>
    %120 = vector.extract_strided_slice %113 {offsets = [12, 0], sizes = [2, 128], strides = [1, 1]} : vector<30x128xf32> to vector<2x128xf32>
    %121 = vector.extract_strided_slice %113 {offsets = [14, 0], sizes = [2, 128], strides = [1, 1]} : vector<30x128xf32> to vector<2x128xf32>
    %122 = vector.extract_strided_slice %113 {offsets = [16, 0], sizes = [2, 128], strides = [1, 1]} : vector<30x128xf32> to vector<2x128xf32>
    %123 = vector.extract_strided_slice %113 {offsets = [18, 0], sizes = [2, 128], strides = [1, 1]} : vector<30x128xf32> to vector<2x128xf32>
    %124 = vector.extract_strided_slice %113 {offsets = [20, 0], sizes = [2, 128], strides = [1, 1]} : vector<30x128xf32> to vector<2x128xf32>
    %125 = vector.extract_strided_slice %113 {offsets = [22, 0], sizes = [2, 128], strides = [1, 1]} : vector<30x128xf32> to vector<2x128xf32>
    %126 = vector.extract_strided_slice %113 {offsets = [24, 0], sizes = [2, 128], strides = [1, 1]} : vector<30x128xf32> to vector<2x128xf32>
    %127 = vector.extract_strided_slice %113 {offsets = [26, 0], sizes = [2, 128], strides = [1, 1]} : vector<30x128xf32> to vector<2x128xf32>
    %128 = vector.extract_strided_slice %113 {offsets = [28, 0], sizes = [2, 128], strides = [1, 1]} : vector<30x128xf32> to vector<2x128xf32>
    %129 = tpu.concatenate %114, %115, %116, %117, %118, %119, %120, %121, %122, %123, %124, %125, %126, %127, %128 in 1 : vector<2x128xf32>, vector<2x128xf32>, vector<2x128xf32>, vector<2x128xf32>, vector<2x128xf32>, vector<2x128xf32>, vector<2x128xf32>, vector<2x128xf32>, vector<2x128xf32>, vector<2x128xf32>, vector<2x128xf32>, vector<2x128xf32>, vector<2x128xf32>, vector<2x128xf32>, vector<2x128xf32> -> vector<2x1920xf32>
    %130 = arith.truncf %129 : vector<2x1920xf32> to vector<2x1920xbf16>
    %c0_82 = arith.constant 0 : index
    %c0_83 = arith.constant 0 : index
    %131 = vector.load %arg10[%c0_82, %c0_83] : memref<1920x512xbf16, #tpu.memory_space<vmem>>, vector<1920x512xbf16>
    %cst_84 = arith.constant dense<0.000000e+00> : vector<2x512xf32>
    %132 = tpu.matmul %130, %131, %cst_84 {dimension_numbers = #tpu.dot_dimension_numbers<[1], [0], [0], [1], [0, 0, 1, 1], [], []>} : vector<2x1920xbf16>, vector<1920x512xbf16>, vector<2x512xf32> -> vector<2x512xf32>
    %c0_85 = arith.constant 0 : index
    %c0_86 = arith.constant 0 : index
    %133 = vector.load %arg11[%c0_85, %c0_86] : memref<1x512xf32, #tpu.memory_space<vmem>>, vector<1x512xf32>
    %134 = vector.broadcast %133 : vector<1x512xf32> to vector<2x512xf32>
    %135 = arith.addf %132, %134 : vector<2x512xf32>
    %cst_87 = arith.constant 0.000000e+00 : f32
    %136 = vector.broadcast %cst_87 : f32 to vector<2x512xf32>
    %137 = arith.maximumf %135, %136 : vector<2x512xf32>
    %138 = arith.truncf %137 : vector<2x512xf32> to vector<2x512xbf16>
    %c0_88 = arith.constant 0 : index
    %c0_89 = arith.constant 0 : index
    %139 = vector.load %arg12[%c0_88, %c0_89] : memref<512x128xbf16, #tpu.memory_space<vmem>>, vector<512x128xbf16>
    %cst_90 = arith.constant dense<0.000000e+00> : vector<2x128xf32>
    %140 = tpu.matmul %138, %139, %cst_90 {dimension_numbers = #tpu.dot_dimension_numbers<[1], [0], [0], [1], [0, 0, 1, 1], [], []>} : vector<2x512xbf16>, vector<512x128xbf16>, vector<2x128xf32> -> vector<2x128xf32>
    %c0_91 = arith.constant 0 : index
    %c0_92 = arith.constant 0 : index
    %141 = vector.load %arg13[%c0_91, %c0_92] : memref<1x128xf32, #tpu.memory_space<vmem>>, vector<1x128xf32>
    %142 = vector.broadcast %141 : vector<1x128xf32> to vector<2x128xf32>
    %143 = arith.addf %140, %142 : vector<2x128xf32>
    %c0_93 = arith.constant 0 : index
    %c0_94 = arith.constant 0 : index
    %144 = vector.load %arg14[%c0_93, %c0_94] : memref<2x128xf32, #tpu.memory_space<vmem>>, vector<2x128xf32>
    tpu.vector_store %arg14[%c0_93, %c0_94], %143 {strides = array<i32>} : memref<2x128xf32, #tpu.memory_space<vmem>>, vector<2x128xf32>,
    return
  }
  func.func @transform_0(%arg0: i32) -> (i32, i32) {
    %c0_i32 = arith.constant 0 : i32
    %c0_i32_0 = arith.constant 0 : i32
    %c0_i32_1 = arith.constant 0 : i32
    return %c0_i32, %c0_i32_0 : i32, i32
  }
  func.func @transform_1(%arg0: i32) -> (i32, i32) {
    %c0_i32 = arith.constant 0 : i32
    %c0_i32_0 = arith.constant 0 : i32
    %c0_i32_1 = arith.constant 0 : i32
    return %c0_i32, %c0_i32_0 : i32, i32
  }
  func.func @transform_2(%arg0: i32) -> (i32, i32) {
    %c0_i32 = arith.constant 0 : i32
    %c0_i32_0 = arith.constant 0 : i32
    %c0_i32_1 = arith.constant 0 : i32
    return %c0_i32, %c0_i32_0 : i32, i32
  }
  func.func @transform_3(%arg0: i32) -> (i32, i32) {
    %c0_i32 = arith.constant 0 : i32
    %c0_i32_0 = arith.constant 0 : i32
    %c0_i32_1 = arith.constant 0 : i32
    return %c0_i32, %c0_i32_0 : i32, i32
  }
  func.func @transform_4(%arg0: i32) -> (i32, i32) {
    %c0_i32 = arith.constant 0 : i32
    %c0_i32_0 = arith.constant 0 : i32
    %c0_i32_1 = arith.constant 0 : i32
    return %c0_i32, %c0_i32_0 : i32, i32
  }
  func.func @transform_5(%arg0: i32) -> (i32, i32, i32) {
    %c0_i32 = arith.constant 0 : i32
    %c0_i32_0 = arith.constant 0 : i32
    %c0_i32_1 = arith.constant 0 : i32
    %c0_i32_2 = arith.constant 0 : i32
    return %c0_i32, %c0_i32_0, %c0_i32_1 : i32, i32, i32
  }
  func.func @transform_6(%arg0: i32) -> (i32, i32) {
    %c0_i32 = arith.constant 0 : i32
    %c0_i32_0 = arith.constant 0 : i32
    %c0_i32_1 = arith.constant 0 : i32
    return %c0_i32, %c0_i32_0 : i32, i32
  }
  func.func @transform_7(%arg0: i32) -> (i32, i32) {
    %c0_i32 = arith.constant 0 : i32
    %c0_i32_0 = arith.constant 0 : i32
    %c0_i32_1 = arith.constant 0 : i32
    return %c0_i32, %c0_i32_0 : i32, i32
  }
  func.func @transform_8(%arg0: i32) -> (i32, i32, i32) {
    %c0_i32 = arith.constant 0 : i32
    %c0_i32_0 = arith.constant 0 : i32
    %c0_i32_1 = arith.constant 0 : i32
    %c0_i32_2 = arith.constant 0 : i32
    return %c0_i32, %c0_i32_0, %c0_i32_1 : i32, i32, i32
  }
  func.func @transform_9(%arg0: i32) -> (i32, i32) {
    %c0_i32 = arith.constant 0 : i32
    %c0_i32_0 = arith.constant 0 : i32
    %c0_i32_1 = arith.constant 0 : i32
    return %c0_i32, %c0_i32_0 : i32, i32
  }
  func.func @transform_10(%arg0: i32) -> (i32, i32) {
    %c0_i32 = arith.constant 0 : i32
    %c0_i32_0 = arith.constant 0 : i32
    %c0_i32_1 = arith.constant 0 : i32
    return %c0_i32, %c0_i32_0 : i32, i32
  }
  func.func @transform_11(%arg0: i32) -> (i32, i32) {
    %c0_i32 = arith.constant 0 : i32
    %c0_i32_0 = arith.constant 0 : i32
    %c0_i32_1 = arith.constant 0 : i32
    return %c0_i32, %c0_i32_0 : i32, i32
  }
  func.func @transform_12(%arg0: i32) -> (i32, i32) {
    %c0_i32 = arith.constant 0 : i32
    %c0_i32_0 = arith.constant 0 : i32
    %c0_i32_1 = arith.constant 0 : i32
    return %c0_i32, %c0_i32_0 : i32, i32
  }
  func.func @transform_13(%arg0: i32) -> (i32, i32) {
    %c0_i32 = arith.constant 0 : i32
    %c0_i32_0 = arith.constant 0 : i32
    %c0_i32_1 = arith.constant 0 : i32
    return %c0_i32, %c0_i32_0 : i32, i32
  }
}

</mosaic_0001>

<bundles_post_ra>
// kernel: net_forward.1
= control target key start
LH: loop header
LB: loop body
LE: loop exit
PB: predicated region body
PF: predicated region fallthrough
CT: control target
= control target key end

     0   :  { %s22020_s0 = inlined_call_operand.vmem [shape: bf16[330,256], index: 0, kind: input, shape index: {}]   ;;  %s22021_s1 = inlined_call_operand.vmem [shape: bf16[256,32], index: 1, kind: input, shape index: {}]   ;;  %s22022_s2 = inlined_call_operand.vmem [shape: f32[1,32], index: 2, kind: input, shape index: {}]   ;;  %s22023_s3 = inlined_call_operand.vmem [shape: bf16[32,1152], index: 3, kind: input, shape index: {}]   ;;  %s22024_s4 = inlined_call_operand.vmem [shape: f32[1,128], index: 4, kind: input, shape index: {}]   ;;  %s22025_s5 = inlined_call_operand.vmem [shape: bf16[9,70,330], index: 5, kind: input, shape index: {}]   ;;  %s22026_s6 = inlined_call_operand.vmem [shape: bf16[128,1152], index: 6, kind: input, shape index: {}]   ;;  %s22027_s7 = inlined_call_operand.vmem [shape: f32[1,128], index: 7, kind: input, shape index: {}]   ;;  %s22028_s8 = inlined_call_operand.vmem [shape: bf16[9,30,70], index: 8, kind: input, shape index: {}]   ;;  %s22029_s9 = inlined_call_operand.vmem [shape: bf16[1920,512], index: 9, kind: input, shape index: {}]   ;;  %s22030_s10 = inlined_call_operand.vmem [shape: f32[1,512], index: 10, kind: input, shape index: {}]   ;;  %s22031_s11 = inlined_call_operand.vmem [shape: bf16[512,128], index: 11, kind: input, shape index: {}]   ;;  %s22032_s12 = inlined_call_operand.vmem [shape: f32[1,128], index: 12, kind: input, shape index: {}]   ;;  %s22033_s13 = inlined_call_operand.hbm [shape: f32[2,128], index: 13, kind: output, shape index: {}]  }
   0x1   :  { %v14129_v0 = vld [vmem:[%s22021_s1 + $0x38] sm:$0xff]  ;;  %v14128_v2 = vld [vmem:[%s22021_s1 + $0x30] sm:$0xff]  ;;  %v14127_v4 = vld [vmem:[%s22021_s1 + $0x28] sm:$0xff] }
   0x2   :  { %v14137_v1 = vld [vmem:[%s22021_s1 + $0x78] sm:$0xff]  ;;  %430 = vmatpush.bf16.msra.mxu0 %v14129_v0  ;;  %v14136_v3 = vld [vmem:[%s22021_s1 + $0x70] sm:$0xff]  ;;  %v14135_v5 = vld [vmem:[%s22021_s1 + $0x68] sm:$0xff] }
   0x3   :  { %544 = vmatpush.bf16.msra.mxu1 %v14137_v1 }
   0x6   :  { %431 = vmatpush.bf16.msra.mxu0 %v14128_v2 }
   0x7   :  { %545 = vmatpush.bf16.msra.mxu1 %v14136_v3 }
   0x8   :  { %18 = vsyncpa [#allocation3], 0  ;;  %v14126_v6 = vld [vmem:[%s22021_s1 + $0x20] sm:$0xff]  ;;  %v14125_v8 = vld [vmem:[%s22021_s1 + $0x18] sm:$0xff]  ;;  %vm833_vm0 = vcmask 261120   ;;  %vm2381_vm1 = vcmask 1044480  }
   0x9   :  { %v14134_v7 = vld [vmem:[%s22021_s1 + $0x60] sm:$0xff]  ;;  %v14133_v9 = vld [vmem:[%s22021_s1 + $0x58] sm:$0xff]  ;;  %v14124_v10 = vld [vmem:[%s22021_s1 + $0x10] sm:$0xff]  ;;  %vm2365_vm2 = vcmask 605184   ;;  %vm5878_vm3 = vcmask 1042432   ;;  %vm5871_vm4 = vcmask 572416  }
   0xa   :  { %432 = vmatpush.bf16.msra.mxu0 %v14127_v4  ;;  %v14132_v11 = vld [vmem:[%s22021_s1 + $0x50] sm:$0xff]  ;;  %v14123_v12 = vld [vmem:[%s22021_s1 + $0x8] sm:$0xff]  ;;  %v14122_v14 = vld [vmem:[%s22021_s1] sm:$0xff]  ;;  %s10499_s16 = sshll.u32 %s22033_s13, 4  ;;  %s10500_s16 = int_to_ptr.hbm [resolvable:$true] %s10499_s16 }
   0xb   :  { %546 = vmatpush.bf16.msra.mxu1 %v14135_v5  ;;  %v14131_v13 = vld [vmem:[%s22021_s1 + $0x48] sm:$0xff]  ;;  %v14130_v15 = vld [vmem:[%s22021_s1 + $0x40] sm:$0xff]  ;;  %v10518_v22 = vld [vmem:[%s22020_s0 + $0x10] sm:$0xf] }
   0xc   :  { %v10510_v16 = vld [vmem:[%s22020_s0] sm:$0xf]  ;;  %v14081_v17 = vld [vmem:[%s22020_s0 + $0x4] sm:$0xf0]  ;;  %v14080_v18 = vld [vmem:[%s22020_s0 + $0x4] sm:$0xf] }
   0xd   :  { %v10512_v19 = vld [vmem:[%s22020_s0 + $0x8] sm:$0xf0]  ;;  %v10511_v20 = vor.u32 %v14081_v17, %v10510_v16  ;;  %v14083_v23 = vld [vmem:[%s22020_s0 + $0x14] sm:$0xf0]  ;;  %v14082_v24 = vld [vmem:[%s22020_s0 + $0x14] sm:$0xf] }
   0xe   :  { %433 = vmatpush.bf16.msra.mxu0 %v14126_v6  ;;  %v10515_v21 = vor.u32 %v14080_v18, %v10512_v19  ;;  %v10520_v25 = vld [vmem:[%s22020_s0 + $0x18] sm:$0xf0]  ;;  %v10519_v26 = vor.u32 %v14083_v23, %v10518_v22  ;;  %v10526_v28 = vld [vmem:[%s22020_s0 + $0x20] sm:$0xf]  ;;  %v14085_v29 = vld [vmem:[%s22020_s0 + $0x24] sm:$0xf0] }
   0xf   :  { %547 = vmatpush.bf16.msra.mxu1 %v14134_v7  ;;  %v10523_v27 = vor.u32 %v14082_v24, %v10520_v25  ;;  %v14084_v30 = vld [vmem:[%s22020_s0 + $0x24] sm:$0xf]  ;;  %v10528_v31 = vld [vmem:[%s22020_s0 + $0x28] sm:$0xf0]  ;;  %v10527_v32 = vor.u32 %v14085_v29, %v10526_v28  ;;  %v10534_v34 = vld [vmem:[%s22020_s0 + $0x30] sm:$0xf] }
  0x10   :  { %v10531_v33 = vor.u32 %v14084_v30, %v10528_v31  ;;  %v14087_v35 = vld [vmem:[%s22020_s0 + $0x34] sm:$0xf0]  ;;  %v14086_v36 = vld [vmem:[%s22020_s0 + $0x34] sm:$0xf]  ;;  %v10536_v37 = vld [vmem:[%s22020_s0 + $0x38] sm:$0xf0] }
  0x11   :  { %v10535_v38 = vor.u32 %v14087_v35, %v10534_v34  ;;  %v10539_v39 = vor.u32 %v14086_v36, %v10536_v37  ;;  %v10542_v40 = vld [vmem:[%s22020_s0 + $0x40] sm:$0xf]  ;;  %v14089_v41 = vld [vmem:[%s22020_s0 + $0x44] sm:$0xf0]  ;;  %v14088_v42 = vld [vmem:[%s22020_s0 + $0x44] sm:$0xf] }
  0x12   :  { %434 = vmatpush.bf16.msra.mxu0 %v14125_v8  ;;  %v10544_v43 = vld [vmem:[%s22020_s0 + $0x48] sm:$0xf0]  ;;  %v10543_v44 = vor.u32 %v14089_v41, %v10542_v40  ;;  %v10550_v46 = vld [vmem:[%s22020_s0 + $0x50] sm:$0xf]  ;;  %v14091_v47 = vld [vmem:[%s22020_s0 + $0x54] sm:$0xf0] }
  0x13   :  { %548 = vmatpush.bf16.msra.mxu1 %v14133_v9  ;;  %v10547_v45 = vor.u32 %v14088_v42, %v10544_v43  ;;  %v14090_v48 = vld [vmem:[%s22020_s0 + $0x54] sm:$0xf]  ;;  %v10552_v49 = vld [vmem:[%s22020_s0 + $0x58] sm:$0xf0]  ;;  %v10551_v50 = vor.u32 %v14091_v47, %v10550_v46  ;;  %v10558_v52 = vld [vmem:[%s22020_s0 + $0x60] sm:$0xf] }
  0x14   :  { %v10555_v51 = vor.u32 %v14090_v48, %v10552_v49  ;;  %v14093_v53 = vld [vmem:[%s22020_s0 + $0x64] sm:$0xf0]  ;;  %v14092_v54 = vld [vmem:[%s22020_s0 + $0x64] sm:$0xf]  ;;  %v10560_v55 = vld [vmem:[%s22020_s0 + $0x68] sm:$0xf0] }
  0x15   :  { %v10559_v56 = vor.u32 %v14093_v53, %v10558_v52  ;;  %v10563_v57 = vor.u32 %v14092_v54, %v10560_v55  ;;  %v10778_v58 = vld [vmem:[%s22023_s3 + $0x48] sm:$0xf]  ;;  %v14151_v59 = vld [vmem:[%s22023_s3 + $0x68] sm:$0xf0]  ;;  %v10566_v61 = vld [vmem:[%s22020_s0 + $0x70] sm:$0xf] }
  0x16   :  { %435 = vmatpush.bf16.msra.mxu0 %v14124_v10  ;;  %v10779_v60 = vor.u32 %v14151_v59, %v10778_v58  ;;  %v10742_v62 = vld [vmem:[%s22023_s3] sm:$0xf]  ;;  %v14142_v63 = vld [vmem:[%s22023_s3 + $0x20] sm:$0xf0]  ;;  %v14095_v0 = vld [vmem:[%s22020_s0 + $0x74] sm:$0xf0] }
  0x17   :  { %549 = vmatpush.bf16.msra.mxu1 %v14132_v11  ;;  %v14094_v1 = vld [vmem:[%s22020_s0 + $0x74] sm:$0xf]  ;;  %v10568_v2 = vld [vmem:[%s22020_s0 + $0x78] sm:$0xf0]  ;;  %v10743_v3 = vor.u32 %v14142_v63, %v10742_v62  ;;  %v10567_v4 = vor.u32 %v14095_v0, %v10566_v61  ;;  %v10574_v6 = vld [vmem:[%s22020_s0 + $0x80] sm:$0xf] }
  0x18   :  { %903 = vmatpush.bf16.msra.mxu2 %v10779_v60  ;;  %14866 = vmatpush.bf16.msra.mxu3 %v10779_v60  ;;  %v10571_v5 = vor.u32 %v14094_v1, %v10568_v2  ;;  %v14097_v7 = vld [vmem:[%s22020_s0 + $0x84] sm:$0xf0]  ;;  %v14096_v8 = vld [vmem:[%s22020_s0 + $0x84] sm:$0xf]  ;;  %v10576_v9 = vld [vmem:[%s22020_s0 + $0x88] sm:$0xf0] }
  0x19   :  { %v10575_v10 = vor.u32 %v14097_v7, %v10574_v6  ;;  %v10579_v11 = vor.u32 %v14096_v8, %v10576_v9  ;;  %v14099_v22 = vld [vmem:[%s22020_s0 + $0x94] sm:$0xf0]  ;;  %v14098_v23 = vld [vmem:[%s22020_s0 + $0x94] sm:$0xf]  ;;  %v10584_v24 = vld [vmem:[%s22020_s0 + $0x98] sm:$0xf0] }
  0x1a   :  { %436 = vmatpush.bf16.msra.mxu0 %v14123_v12  ;;  %v10587_v29 = vor.u32 %v14098_v23, %v10584_v24  ;;  %v14100_v40 = vld [vmem:[%s22020_s0 + $0xa4] sm:$0xf]  ;;  %v10592_v41 = vld [vmem:[%s22020_s0 + $0xa8] sm:$0xf0]  ;;  %v10598_v55 = vld [vmem:[%s22020_s0 + $0xb0] sm:$0xf] }
  0x1b   :  { %550 = vmatpush.bf16.msra.mxu1 %v14131_v13  ;;  %v10595_v46 = vor.u32 %v14100_v40, %v10592_v41  ;;  %v10600_v58 = vld [vmem:[%s22020_s0 + $0xb8] sm:$0xf0]  ;;  %v10606_v8 = vld [vmem:[%s22020_s0 + $0xc0] sm:$0xf]  ;;  %v14105_v9 = vld [vmem:[%s22020_s0 + $0xc4] sm:$0xf0] }
  0x1c   :  { %904 = vmatpush.bf16.msra.mxu2 %v10743_v3  ;;  %14867 = vmatpush.bf16.msra.mxu3 %v10743_v3 }
  0x1e   :  { %437 = vmatpush.bf16.msra.mxu0 %v14122_v14  ;;  %v15142_v14 = vld [vmem:[%s22022_s2] ss:$0 sm:$0xff] }
  0x1f   :  { %551 = vmatpush.bf16.msra.mxu1 %v14130_v15 }
  0x21   :  { %438 = vmatmul.bf16.vlgmr.msra.gmra.mxu0 %v10511_v20 }
  0x22   :  { %552 = vmatmul.bf16.vlgmr.msra.gmra.mxu1 %v10515_v21  ;;  %v10582_v21 = vld [vmem:[%s22020_s0 + $0x90] sm:$0xf] }
  0x23   :  { %v10583_v28 = vor.u32 %v14099_v22, %v10582_v21 }
  0x31   :  { %443 = vmatmul.bf16.gmra.mxu0 %v10519_v26 }
  0x32   :  { %557 = vmatmul.bf16.gmra.mxu1 %v10523_v27 }
  0x41   :  { %448 = vmatmul.bf16.gmra.mxu0 %v10527_v32 }
  0x42   :  { %562 = vmatmul.bf16.gmra.mxu1 %v10531_v33 }
  0x51   :  { %453 = vmatmul.bf16.gmra.mxu0 %v10535_v38  ;;  %v10590_v38 = vld [vmem:[%s22020_s0 + $0xa0] sm:$0xf] }
  0x52   :  { %567 = vmatmul.bf16.gmra.mxu1 %v10539_v39  ;;  %v14101_v39 = vld [vmem:[%s22020_s0 + $0xa4] sm:$0xf0] }
  0x61   :  { %458 = vmatmul.bf16.gmra.mxu0 %v10543_v44 }
  0x62   :  { %572 = vmatmul.bf16.gmra.mxu1 %v10547_v45  ;;  %v10591_v45 = vor.u32 %v14101_v39, %v10590_v38 }
  0x71   :  { %463 = vmatmul.bf16.gmra.mxu0 %v10551_v50 }
  0x72   :  { %577 = vmatmul.bf16.gmra.mxu1 %v10555_v51 }
  0x81   :  { %468 = vmatmul.bf16.gmra.mxu0 %v10559_v56  ;;  %v14103_v56 = vld [vmem:[%s22020_s0 + $0xb4] sm:$0xf0] }
  0x82   :  { %582 = vmatmul.bf16.gmra.mxu1 %v10563_v57  ;;  %v14102_v57 = vld [vmem:[%s22020_s0 + $0xb4] sm:$0xf]  ;;  %v10599_v62 = vor.u32 %v14103_v56, %v10598_v55 }
  0x83   :  { %v10603_v63 = vor.u32 %v14102_v57, %v10600_v58 }
  0x91   :  { %473 = vmatmul.bf16.gmra.mxu0 %v10567_v4 }
  0x92   :  { %587 = vmatmul.bf16.gmra.mxu1 %v10571_v5 }
  0x9e   :  { %v439_v12 = vpop.f32.mrf.mxu0 }
  0x9f   :  { %v553_v13 = vpop.f32.mrf.mxu1  ;;  %v440_v15 = vadd.f32 %v15142_v14, %v439_v12 }
  0xa1   :  { %478 = vmatmul.bf16.gmra.mxu0 %v10575_v10  ;;  %v554_v18 = vadd.f32 %v553_v13, %v440_v15  ;;  %v14104_v10 = vld [vmem:[%s22020_s0 + $0xc4] sm:$0xf] }
  0xa2   :  { %592 = vmatmul.bf16.gmra.mxu1 %v10579_v11  ;;  %v10608_v11 = vld [vmem:[%s22020_s0 + $0xc8] sm:$0xf0] }
  0xa3   :  { %v658_v25 = vmax.f32 %v554_v18, 0.0 }
  0xa6   :  { %v441_v16 = vpop.f32.mrf.mxu0 }
  0xa7   :  { %v555_v17 = vpop.f32.mrf.mxu1  ;;  %v442_v19 = vadd.f32 %v15142_v14, %v441_v16  ;;  %v10607_v16 = vor.u32 %v14105_v9, %v10606_v8 }
  0xa9   :  { %v556_v20 = vadd.f32 %v555_v17, %v442_v19  ;;  %v10611_v17 = vor.u32 %v14104_v10, %v10608_v11 }
  0xab   :  { %v659_v26 = vmax.f32 %v556_v20, 0.0 }
  0xad   :  { %v15158_v27 = vpack.c.bf16 %v659_v26, %v658_v25  ;;  %v10614_v26 = vld [vmem:[%s22020_s0 + $0xd0] sm:$0xf] }
  0xae   :  { %v444_v30 = vpop.f32.mrf.mxu0 }
  0xaf   :  { %22063 = vst [vmem:[#allocation5_spill] sm:$0xff] %v15158_v27  ;;  %v558_v31 = vpop.f32.mrf.mxu1  ;;  %10812 = vmatmul.msk.bf16.vlgmr.msra.gmra.mxu2 %vm833_vm0, %v15158_v27  ;;  %v445_v32 = vadd.f32 %v15142_v14, %v444_v30  ;;  %v10616_v30 = vld [vmem:[%s22020_s0 + $0xd8] sm:$0xf0] }
  0xb1   :  { %483 = vmatmul.bf16.gmra.mxu0 %v10583_v28  ;;  %v559_v35 = vadd.f32 %v558_v31, %v445_v32  ;;  %v14107_v28 = vld [vmem:[%s22020_s0 + $0xd4] sm:$0xf0] }
  0xb2   :  { %597 = vmatmul.bf16.gmra.mxu1 %v10587_v29  ;;  %v14106_v29 = vld [vmem:[%s22020_s0 + $0xd4] sm:$0xf] }
  0xb3   :  { %v660_v42 = vmax.f32 %v559_v35, 0.0  ;;  %v10619_v35 = vor.u32 %v14106_v29, %v10616_v30 }
  0xb6   :  { %v446_v33 = vpop.f32.mrf.mxu0 }
  0xb7   :  { %v560_v34 = vpop.f32.mrf.mxu1  ;;  %v447_v36 = vadd.f32 %v15142_v14, %v446_v33 }
  0xb9   :  { %v561_v37 = vadd.f32 %v560_v34, %v447_v36  ;;  %v10615_v34 = vor.u32 %v14107_v28, %v10614_v26 }
  0xbb   :  { %v661_v43 = vmax.f32 %v561_v37, 0.0 }
  0xbd   :  { %v15176_v44 = vpack.c.bf16 %v661_v43, %v660_v42 }
  0xbe   :  { %v449_v47 = vpop.f32.mrf.mxu0 }
  0xbf   :  { %22064 = vst [vmem:[#allocation6_spill] sm:$0xff] %v15176_v44  ;;  %v563_v48 = vpop.f32.mrf.mxu1  ;;  %10813 = vmatmul.msk.bf16.gmra.mxu2 %vm833_vm0, %v15176_v44  ;;  %v450_v49 = vadd.f32 %v15142_v14, %v449_v47  ;;  %v14108_v47 = vld [vmem:[%s22020_s0 + $0xe4] sm:$0xf] }
  0xc1   :  { %488 = vmatmul.bf16.gmra.mxu0 %v10591_v45  ;;  %v564_v52 = vadd.f32 %v563_v48, %v450_v49  ;;  %v10622_v45 = vld [vmem:[%s22020_s0 + $0xe0] sm:$0xf]  ;;  %v10624_v48 = vld [vmem:[%s22020_s0 + $0xe8] sm:$0xf0] }
  0xc2   :  { %602 = vmatmul.bf16.gmra.mxu1 %v10595_v46  ;;  %v14109_v46 = vld [vmem:[%s22020_s0 + $0xe4] sm:$0xf0] }
  0xc3   :  { %v662_v59 = vmax.f32 %v564_v52, 0.0  ;;  %v10623_v52 = vor.u32 %v14109_v46, %v10622_v45 }
  0xc6   :  { %v451_v50 = vpop.f32.mrf.mxu0 }
  0xc7   :  { %v565_v51 = vpop.f32.mrf.mxu1  ;;  %v452_v53 = vadd.f32 %v15142_v14, %v451_v50 }
  0xc9   :  { %v566_v54 = vadd.f32 %v565_v51, %v452_v53  ;;  %v10627_v53 = vor.u32 %v14108_v47, %v10624_v48 }
  0xcb   :  { %v663_v60 = vmax.f32 %v566_v54, 0.0 }
  0xcd   :  { %v15194_v61 = vpack.c.bf16 %v663_v60, %v662_v59 }
  0xce   :  { %v454_v0 = vpop.f32.mrf.mxu0 }
  0xcf   :  { %22065 = vst [vmem:[#allocation7_spill] sm:$0xff] %v15194_v61  ;;  %v568_v1 = vpop.f32.mrf.mxu1  ;;  %10814 = vmatmul.msk.bf16.gmra.mxu2 %vm833_vm0, %v15194_v61  ;;  %v455_v2 = vadd.f32 %v15142_v14, %v454_v0  ;;  %v14111_v0 = vld [vmem:[%s22020_s0 + $0xf4] sm:$0xf0] }
  0xd1   :  { %493 = vmatmul.bf16.gmra.mxu0 %v10599_v62  ;;  %v569_v5 = vadd.f32 %v568_v1, %v455_v2  ;;  %v14110_v1 = vld [vmem:[%s22020_s0 + $0xf4] sm:$0xf]  ;;  %v10632_v2 = vld [vmem:[%s22020_s0 + $0xf8] sm:$0xf0] }
  0xd2   :  { %607 = vmatmul.bf16.gmra.mxu1 %v10603_v63  ;;  %v10630_v63 = vld [vmem:[%s22020_s0 + $0xf0] sm:$0xf] }
  0xd3   :  { %v664_v12 = vmax.f32 %v569_v5, 0.0 }
  0xd6   :  { %v456_v3 = vpop.f32.mrf.mxu0 }
  0xd7   :  { %v570_v4 = vpop.f32.mrf.mxu1  ;;  %v457_v6 = vadd.f32 %v15142_v14, %v456_v3 }
  0xd9   :  { %v571_v7 = vadd.f32 %v570_v4, %v457_v6  ;;  %v10631_v6 = vor.u32 %v14111_v0, %v10630_v63 }
  0xdb   :  { %v665_v13 = vmax.f32 %v571_v7, 0.0  ;;  %v10635_v7 = vor.u32 %v14110_v1, %v10632_v2 }
  0xdd   :  { %v15212_v15 = vpack.c.bf16 %v665_v13, %v664_v12 }
  0xde   :  { %v459_v18 = vpop.f32.mrf.mxu0 }
  0xdf   :  { %v573_v19 = vpop.f32.mrf.mxu1  ;;  %10815 = vmatmul.msk.bf16.gmra.mxu2 %vm833_vm0, %v15212_v15  ;;  %v460_v20 = vadd.f32 %v15142_v14, %v459_v18  ;;  %v10638_v18 = vld [vmem:[%s22020_s0 + $0x100] sm:$0xf] }
  0xe1   :  { %498 = vmatmul.bf16.gmra.mxu0 %v10607_v16  ;;  %v574_v23 = vadd.f32 %v573_v19, %v460_v20  ;;  %v14113_v19 = vld [vmem:[%s22020_s0 + $0x104] sm:$0xf0]  ;;  %v14112_v20 = vld [vmem:[%s22020_s0 + $0x104] sm:$0xf] }
  0xe2   :  { %612 = vmatmul.bf16.gmra.mxu1 %v10611_v17 }
  0xe3   :  { %v666_v31 = vmax.f32 %v574_v23, 0.0 }
  0xe6   :  { %v461_v21 = vpop.f32.mrf.mxu0 }
  0xe7   :  { %v575_v22 = vpop.f32.mrf.mxu1  ;;  %v462_v24 = vadd.f32 %v15142_v14, %v461_v21  ;;  %v10640_v21 = vld [vmem:[%s22020_s0 + $0x108] sm:$0xf0] }
  0xe8   :  { %v10643_v26 = vor.u32 %v14112_v20, %v10640_v21  ;;  %v10662_v21 = vld [vmem:[%s22020_s0 + $0x130] sm:$0xf] }
  0xe9   :  { %v576_v25 = vadd.f32 %v575_v22, %v462_v24 }
  0xeb   :  { %v667_v32 = vmax.f32 %v576_v25, 0.0  ;;  %v10639_v25 = vor.u32 %v14113_v19, %v10638_v18  ;;  %v10796_v19 = vld [vmem:[%s22023_s3 + $0x7c] sm:$0xf0] }
  0xed   :  { %v15230_v33 = vpack.c.bf16 %v667_v32, %v666_v31 }
  0xee   :  { %v464_v36 = vpop.f32.mrf.mxu0 }
  0xef   :  { %v578_v37 = vpop.f32.mrf.mxu1  ;;  %10816 = vmatmul.msk.bf16.gmra.mxu2 %vm833_vm0, %v15230_v33  ;;  %v465_v38 = vadd.f32 %v15142_v14, %v464_v36 }
  0xf1   :  { %503 = vmatmul.bf16.gmra.mxu0 %v10615_v34  ;;  %v579_v41 = vadd.f32 %v578_v37, %v465_v38  ;;  %v10646_v37 = vld [vmem:[%s22020_s0 + $0x110] sm:$0xf]  ;;  %v14115_v38 = vld [vmem:[%s22020_s0 + $0x114] sm:$0xf0] }
  0xf2   :  { %617 = vmatmul.bf16.gmra.mxu1 %v10619_v35  ;;  %v10647_v45 = vor.u32 %v14115_v38, %v10646_v37 }
  0xf3   :  { %v668_v49 = vmax.f32 %v579_v41, 0.0 }
  0xf6   :  { %v466_v39 = vpop.f32.mrf.mxu0 }
  0xf7   :  { %v580_v40 = vpop.f32.mrf.mxu1  ;;  %v467_v42 = vadd.f32 %v15142_v14, %v466_v39  ;;  %v14114_v39 = vld [vmem:[%s22020_s0 + $0x114] sm:$0xf] }
  0xf9   :  { %v581_v43 = vadd.f32 %v580_v40, %v467_v42  ;;  %v10648_v40 = vld [vmem:[%s22020_s0 + $0x118] sm:$0xf0] }
  0xfa   :  { %v10651_v46 = vor.u32 %v14114_v39, %v10648_v40 }
  0xfb   :  { %v669_v50 = vmax.f32 %v581_v43, 0.0 }
  0xfd   :  { %v15248_v51 = vpack.c.bf16 %v669_v50, %v668_v49 }
  0xfe   :  { %v469_v54 = vpop.f32.mrf.mxu0 }
  0xff   :  { %v583_v55 = vpop.f32.mrf.mxu1  ;;  %10817 = vmatmul.msk.bf16.gmra.mxu2 %vm833_vm0, %v15248_v51  ;;  %v470_v56 = vadd.f32 %v15142_v14, %v469_v54 }
 0x101   :  { %508 = vmatmul.bf16.gmra.mxu0 %v10623_v52  ;;  %v584_v59 = vadd.f32 %v583_v55, %v470_v56 }
 0x102   :  { %622 = vmatmul.bf16.gmra.mxu1 %v10627_v53 }
 0x103   :  { %v670_v3 = vmax.f32 %v584_v59, 0.0  ;;  %v14117_v59 = vld [vmem:[%s22020_s0 + $0x124] sm:$0xf0] }
 0x106   :  { %v471_v57 = vpop.f32.mrf.mxu0 }
 0x107   :  { %v585_v58 = vpop.f32.mrf.mxu1  ;;  %v472_v60 = vadd.f32 %v15142_v14, %v471_v57  ;;  %v10654_v57 = vld [vmem:[%s22020_s0 + $0x120] sm:$0xf] }
 0x108   :  { %v10655_v2 = vor.u32 %v14117_v59, %v10654_v57  ;;  %v14120_v57 = vld [vmem:[%s22020_s0 + $0x144] sm:$0xf]  ;;  %v10672_v59 = vld [vmem:[%s22020_s0 + $0x148] sm:$0x10] }
 0x109   :  { %v586_v62 = vadd.f32 %v585_v58, %v472_v60  ;;  %v14116_v60 = vld [vmem:[%s22020_s0 + $0x124] sm:$0xf] }
 0x10b   :  { %v671_v4 = vmax.f32 %v586_v62, 0.0  ;;  %v10656_v62 = vld [vmem:[%s22020_s0 + $0x128] sm:$0xf0] }
 0x10d   :  { %v15266_v5 = vpack.c.bf16 %v671_v4, %v670_v3  ;;  %v10659_v3 = vor.u32 %v14116_v60, %v10656_v62 }
 0x10e   :  { %v474_v8 = vpop.f32.mrf.mxu0 }
 0x10f   :  { %v588_v9 = vpop.f32.mrf.mxu1  ;;  %10818 = vmatmul.msk.bf16.gmra.mxu2 %vm833_vm0, %v15266_v5  ;;  %v475_v10 = vadd.f32 %v15142_v14, %v474_v8 }
 0x111   :  { %513 = vmatmul.bf16.gmra.mxu0 %v10631_v6  ;;  %v589_v13 = vadd.f32 %v588_v9, %v475_v10 }
 0x112   :  { %627 = vmatmul.bf16.gmra.mxu1 %v10635_v7 }
 0x113   :  { %v672_v22 = vmax.f32 %v589_v13, 0.0  ;;  %v10794_v13 = vld [vmem:[%s22023_s3 + $0x58] sm:$0xf] }
 0x116   :  { %v476_v11 = vpop.f32.mrf.mxu0 }
 0x117   :  { %v590_v12 = vpop.f32.mrf.mxu1  ;;  %v477_v16 = vadd.f32 %v15142_v14, %v476_v11 }
 0x119   :  { %v591_v17 = vadd.f32 %v590_v12, %v477_v16  ;;  %v14153_v16 = vld [vmem:[%s22023_s3 + $0x78] sm:$0xf0] }
 0x11a   :  { %v10795_v18 = vor.u32 %v14153_v16, %v10794_v13 }
 0x11b   :  { %v673_v23 = vmax.f32 %v591_v17, 0.0  ;;  %v14149_v17 = vld [vmem:[%s22023_s3 + $0x5c] sm:$0xf] }
 0x11c   :  { %1359 = vmatpush.bf16.msrb.mxu0 %v10795_v18 }
 0x11d   :  { %v15284_v24 = vpack.c.bf16 %v673_v23, %v672_v22  ;;  %v10799_v22 = vor.u32 %v14149_v17, %v10796_v19 }
 0x11e   :  { %v479_v28 = vpop.f32.mrf.mxu0 }
 0x11f   :  { %v593_v29 = vpop.f32.mrf.mxu1  ;;  %10819 = vmatmul.msk.bf16.gmra.mxu2 %vm833_vm0, %v15284_v24  ;;  %v480_v30 = vadd.f32 %v15142_v14, %v479_v28  ;;  %v10664_v28 = vld [vmem:[%s22020_s0 + $0x138] sm:$0xf0]  ;;  %1473 = vmatpush.bf16.msrb.mxu1 %v10799_v22 }
 0x121   :  { %518 = vmatmul.bf16.gmra.mxu0 %v10639_v25  ;;  %v594_v34 = vadd.f32 %v593_v29, %v480_v30  ;;  %v14119_v25 = vld [vmem:[%s22020_s0 + $0x134] sm:$0xf0] }
 0x122   :  { %632 = vmatmul.bf16.gmra.mxu1 %v10643_v26  ;;  %v14118_v26 = vld [vmem:[%s22020_s0 + $0x134] sm:$0xf]  ;;  %v10663_v38 = vor.u32 %v14119_v25, %v10662_v21 }
 0x123   :  { %v674_v41 = vmax.f32 %v594_v34, 0.0  ;;  %v10667_v39 = vor.u32 %v14118_v26, %v10664_v28 }
 0x126   :  { %v481_v31 = vpop.f32.mrf.mxu0 }
 0x127   :  { %v595_v32 = vpop.f32.mrf.mxu1  ;;  %v482_v35 = vadd.f32 %v15142_v14, %v481_v31  ;;  %v10758_v31 = vld [vmem:[%s22023_s3 + $0x10] sm:$0xf] }
 0x129   :  { %v596_v36 = vadd.f32 %v595_v32, %v482_v35  ;;  %v14144_v32 = vld [vmem:[%s22023_s3 + $0x30] sm:$0xf0] }
 0x12a   :  { %v10759_v34 = vor.u32 %v14144_v32, %v10758_v31  ;;  %v14140_v35 = vld [vmem:[%s22023_s3 + $0x14] sm:$0xf] }
 0x12b   :  { %v675_v42 = vmax.f32 %v596_v36, 0.0  ;;  %v10760_v36 = vld [vmem:[%s22023_s3 + $0x34] sm:$0xf0] }
 0x12c   :  { %v10763_v40 = vor.u32 %v14140_v35, %v10760_v36  ;;  %1360 = vmatpush.bf16.msrb.mxu0 %v10759_v34 }
 0x12d   :  { %v15302_v43 = vpack.c.bf16 %v675_v42, %v674_v41 }
 0x12e   :  { %v484_v47 = vpop.f32.mrf.mxu0  ;;  %1474 = vmatpush.bf16.msrb.mxu1 %v10763_v40 }
 0x12f   :  { %v598_v48 = vpop.f32.mrf.mxu1  ;;  %10820 = vmatmul.msk.bf16.gmra.mxu2 %vm833_vm0, %v15302_v43  ;;  %v485_v50 = vadd.f32 %v15142_v14, %v484_v47 }
 0x131   :  { %523 = vmatmul.bf16.gmra.mxu0 %v10647_v45  ;;  %v599_v54 = vadd.f32 %v598_v48, %v485_v50 }
 0x132   :  { %637 = vmatmul.bf16.gmra.mxu1 %v10651_v46  ;;  %v15306_v49 = vpop.f32.mrf.mxu2 }
 0x133   :  { %v676_v63 = vmax.f32 %v599_v54, 0.0  ;;  %v10670_v54 = vld [vmem:[%s22020_s0 + $0x140] sm:$0xf] }
 0x136   :  { %v486_v52 = vpop.f32.mrf.mxu0 }
 0x137   :  { %v600_v53 = vpop.f32.mrf.mxu1  ;;  %v487_v55 = vadd.f32 %v15142_v14, %v486_v52 }
 0x139   :  { %v601_v56 = vadd.f32 %v600_v53, %v487_v55 }
 0x13a   :  { %v15313_v58 = vpop.f32.mrf.mxu2 }
 0x13b   :  { %v677_v0 = vmax.f32 %v601_v56, 0.0  ;;  %v14121_v56 = vld [vmem:[%s22020_s0 + $0x144] sm:$0x10] }
 0x13d   :  { %v15324_v1 = vpack.c.bf16 %v677_v0, %v676_v63  ;;  %v10671_v0 = vor.u32 %v14121_v56, %v10670_v54 }
 0x13e   :  { %v489_v4 = vpop.f32.mrf.mxu0 }
 0x13f   :  { %v603_v6 = vpop.f32.mrf.mxu1  ;;  %10821 = vmatmul.msk.bf16.gmra.mxu2 %vm833_vm0, %v15324_v1  ;;  %v490_v8 = vadd.f32 %v15142_v14, %v489_v4 }
 0x141   :  { %528 = vmatmul.bf16.gmra.mxu0 %v10655_v2  ;;  %v604_v11 = vadd.f32 %v603_v6, %v490_v8  ;;  %v10675_v2 = vor.u32 %v14120_v57, %v10672_v59 }
 0x142   :  { %642 = vmatmul.bf16.gmra.mxu1 %v10659_v3  ;;  %v15328_v7 = vpop.f32.mrf.mxu2 }
 0x143   :  { %v678_v29 = vmax.f32 %v604_v11, 0.0 }
 0x146   :  { %v491_v9 = vpop.f32.mrf.mxu0 }
 0x147   :  { %v605_v10 = vpop.f32.mrf.mxu1  ;;  %v492_v12 = vadd.f32 %v15142_v14, %v491_v9 }
 0x149   :  { %v606_v20 = vadd.f32 %v605_v10, %v492_v12 }
 0x14a   :  { %v15347_v23 = vpop.f32.mrf.mxu2 }
 0x14b   :  { %v679_v30 = vmax.f32 %v606_v20, 0.0 }
 0x14d   :  { %v15370_v37 = vpack.c.bf16 %v679_v30, %v678_v29 }
 0x14e   :  { %v494_v41 = vpop.f32.mrf.mxu0 }
 0x14f   :  { %v608_v42 = vpop.f32.mrf.mxu1  ;;  %10822 = vmatmul.msk.bf16.gmra.mxu2 %vm833_vm0, %v15370_v37  ;;  %v495_v46 = vadd.f32 %v15142_v14, %v494_v41 }
 0x151   :  { %533 = vmatmul.bf16.gmra.mxu0 %v10663_v38  ;;  %v609_v50 = vadd.f32 %v608_v42, %v495_v46 }
 0x152   :  { %647 = vmatmul.bf16.gmra.mxu1 %v10667_v39  ;;  %v15374_v45 = vpop.f32.mrf.mxu2 }
 0x153   :  { %v680_v60 = vmax.f32 %v609_v50, 0.0 }
 0x156   :  { %v496_v47 = vpop.f32.mrf.mxu0 }
 0x157   :  { %v610_v48 = vpop.f32.mrf.mxu1  ;;  %v497_v52 = vadd.f32 %v15142_v14, %v496_v47 }
 0x159   :  { %v611_v53 = vadd.f32 %v610_v48, %v497_v52 }
 0x15a   :  { %v15381_v55 = vpop.f32.mrf.mxu2 }
 0x15b   :  { %v681_v62 = vmax.f32 %v611_v53, 0.0 }
 0x15d   :  { %v15392_v63 = vpack.c.bf16 %v681_v62, %v680_v60 }
 0x15e   :  { %v499_v3 = vpop.f32.mrf.mxu0 }
 0x15f   :  { %22066 = vst [vmem:[#allocation8_spill] sm:$0xff] %v15392_v63  ;;  %v613_v4 = vpop.f32.mrf.mxu1  ;;  %10823 = vmatmul.msk.bf16.gmra.mxu2 %vm833_vm0, %v15392_v63  ;;  %v500_v8 = vadd.f32 %v15142_v14, %v499_v3 }
 0x161   :  { %538 = vmatmul.bf16.gmra.mxu0 %v10671_v0  ;;  %v614_v11 = vadd.f32 %v613_v4, %v500_v8 }
 0x162   :  { %652 = vmatmul.bf16.gmra.mxu1 %v10675_v2  ;;  %v15396_v6 = vpop.f32.mrf.mxu2 }
 0x163   :  { %v682_v17 = vmax.f32 %v614_v11, 0.0 }
 0x166   :  { %v501_v9 = vpop.f32.mrf.mxu0 }
 0x167   :  { %v615_v10 = vpop.f32.mrf.mxu1  ;;  %v502_v12 = vadd.f32 %v15142_v14, %v501_v9 }
 0x169   :  { %v616_v13 = vadd.f32 %v615_v10, %v502_v12 }
 0x16a   :  { %v15400_v16 = vpop.f32.mrf.mxu2 }
 0x16b   :  { %v683_v18 = vmax.f32 %v616_v13, 0.0 }
 0x16d   :  { %v15402_v19 = vpack.c.bf16 %v683_v18, %v682_v17 }
 0x16e   :  { %v504_v20 = vpop.f32.mrf.mxu0 }
 0x16f   :  { %22067 = vst [vmem:[#allocation9_spill] sm:$0xff] %v15402_v19  ;;  %v618_v21 = vpop.f32.mrf.mxu1  ;;  %10824 = vmatmul.msk.bf16.gmra.mxu2 %vm833_vm0, %v15402_v19  ;;  %v505_v25 = vadd.f32 %v15142_v14, %v504_v20 }
 0x171   :  { %10896 = vmatmul.msk.bf16.vlgmr.msrb.gmra.mxu0 %vm833_vm0, %v15158_v27  ;;  %v619_v29 = vadd.f32 %v618_v21, %v505_v25 }
 0x172   :  { %10917 = vmatmul.msk.bf16.vlgmr.msrb.gmra.mxu1 %vm833_vm0, %v15158_v27  ;;  %v15410_v22 = vpop.f32.mrf.mxu2 }
 0x173   :  { %v684_v34 = vmax.f32 %v619_v29, 0.0 }
 0x176   :  { %v506_v26 = vpop.f32.mrf.mxu0 }
 0x177   :  { %v620_v28 = vpop.f32.mrf.mxu1  ;;  %v507_v30 = vadd.f32 %v15142_v14, %v506_v26 }
 0x179   :  { %v621_v31 = vadd.f32 %v620_v28, %v507_v30 }
 0x17a   :  { %v15414_v32 = vpop.f32.mrf.mxu2 }
 0x17b   :  { %v685_v35 = vmax.f32 %v621_v31, 0.0 }
 0x17d   :  { %v15416_v36 = vpack.c.bf16 %v685_v35, %v684_v34 }
 0x17e   :  { %v509_v38 = vpop.f32.mrf.mxu0 }
 0x17f   :  { %22068 = vst [vmem:[#allocation10_spill] sm:$0xff] %v15416_v36  ;;  %v623_v39 = vpop.f32.mrf.mxu1  ;;  %10825 = vmatmul.msk.bf16.gmra.mxu2 %vm833_vm0, %v15416_v36  ;;  %v510_v41 = vadd.f32 %v15142_v14, %v509_v38 }
 0x181   :  { %10897 = vmatmul.msk.bf16.gmra.mxu0 %vm833_vm0, %v15176_v44  ;;  %v624_v47 = vadd.f32 %v623_v39, %v510_v41 }
 0x182   :  { %10918 = vmatmul.msk.bf16.gmra.mxu1 %vm833_vm0, %v15176_v44  ;;  %v15424_v40 = vpop.f32.mrf.mxu2 }
 0x183   :  { %v686_v53 = vmax.f32 %v624_v47, 0.0 }
 0x186   :  { %v511_v42 = vpop.f32.mrf.mxu0 }
 0x187   :  { %v625_v46 = vpop.f32.mrf.mxu1  ;;  %v512_v48 = vadd.f32 %v15142_v14, %v511_v42 }
 0x189   :  { %v626_v50 = vadd.f32 %v625_v46, %v512_v48 }
 0x18a   :  { %v15428_v52 = vpop.f32.mrf.mxu2 }
 0x18b   :  { %v687_v54 = vmax.f32 %v626_v50, 0.0 }
 0x18d   :  { %v15430_v56 = vpack.c.bf16 %v687_v54, %v686_v53 }
 0x18e   :  { %v514_v57 = vpop.f32.mrf.mxu0 }
 0x18f   :  { %22069 = vst [vmem:[#allocation11_spill] sm:$0xff] %v15430_v56  ;;  %v628_v59 = vpop.f32.mrf.mxu1  ;;  %10826 = vmatmul.msk.bf16.gmra.mxu2 %vm833_vm0, %v15430_v56  ;;  %v515_v62 = vadd.f32 %v15142_v14, %v514_v57 }
 0x191   :  { %10898 = vmatmul.msk.bf16.gmra.mxu0 %vm833_vm0, %v15194_v61  ;;  %v629_v3 = vadd.f32 %v628_v59, %v515_v62 }
 0x192   :  { %10919 = vmatmul.msk.bf16.gmra.mxu1 %vm833_vm0, %v15194_v61  ;;  %v15438_v60 = vpop.f32.mrf.mxu2 }
 0x193   :  { %v688_v10 = vmax.f32 %v629_v3, 0.0 }
 0x196   :  { %v516_v0 = vpop.f32.mrf.mxu0 }
 0x197   :  { %v630_v2 = vpop.f32.mrf.mxu1  ;;  %v517_v4 = vadd.f32 %v15142_v14, %v516_v0 }
 0x199   :  { %v631_v8 = vadd.f32 %v630_v2, %v517_v4 }
 0x19a   :  { %v15442_v9 = vpop.f32.mrf.mxu2 }
 0x19b   :  { %v689_v11 = vmax.f32 %v631_v8, 0.0  ;;  %v10786_v8 = vld [vmem:[%s22023_s3 + $0x50] sm:$0xf] }
 0x19d   :  { %v15444_v12 = vpack.c.bf16 %v689_v11, %v688_v10  ;;  %v14152_v10 = vld [vmem:[%s22023_s3 + $0x70] sm:$0xf0] }
 0x19e   :  { %v519_v13 = vpop.f32.mrf.mxu0 }
 0x19f   :  { %22070 = vst [vmem:[#allocation12_spill] sm:$0xff] %v15444_v12  ;;  %v633_v17 = vpop.f32.mrf.mxu1  ;;  %10827 = vmatmul.msk.bf16.gmra.mxu2 %vm833_vm0, %v15444_v12  ;;  %v520_v20 = vadd.f32 %v15142_v14, %v519_v13 }
 0x1a1   :  { %10899 = vmatmul.msk.bf16.gmra.mxu0 %vm833_vm0, %v15212_v15  ;;  %v634_v26 = vadd.f32 %v633_v17, %v520_v20  ;;  %v10787_v17 = vor.u32 %v14152_v10, %v10786_v8  ;;  %v14138_v10 = vld [vmem:[%s22023_s3 + $0x4] sm:$0xf] }
 0x1a2   :  { %10920 = vmatmul.msk.bf16.gmra.mxu1 %vm833_vm0, %v15212_v15  ;;  %v15452_v18 = vpop.f32.mrf.mxu2 }
 0x1a3   :  { %v690_v31 = vmax.f32 %v634_v26, 0.0  ;;  %1131 = vmatpush.bf16.msrb.mxu2 %v10787_v17  ;;  %v10750_v26 = vld [vmem:[%s22023_s3 + $0x8] sm:$0xf] }
 0x1a6   :  { %v521_v21 = vpop.f32.mrf.mxu0 }
 0x1a7   :  { %v635_v25 = vpop.f32.mrf.mxu1  ;;  %v522_v28 = vadd.f32 %v15142_v14, %v521_v21 }
 0x1a9   :  { %v636_v29 = vadd.f32 %v635_v25, %v522_v28  ;;  %v14143_v28 = vld [vmem:[%s22023_s3 + $0x28] sm:$0xf0] }
 0x1aa   :  { %v15456_v30 = vpop.f32.mrf.mxu2 }
 0x1ab   :  { %v691_v34 = vmax.f32 %v636_v29, 0.0 }
 0x1ad   :  { %v15458_v35 = vpack.c.bf16 %v691_v34, %v690_v31  ;;  %v10751_v31 = vor.u32 %v14143_v28, %v10750_v26 }
 0x1ae   :  { %v524_v38 = vpop.f32.mrf.mxu0 }
 0x1af   :  { %v638_v39 = vpop.f32.mrf.mxu1  ;;  %10828 = vmatmul.msk.bf16.gmra.mxu2 %vm833_vm0, %v15458_v35  ;;  %v525_v42 = vadd.f32 %v15142_v14, %v524_v38 }
 0x1b0   :  { %1132 = vmatpush.bf16.msrb.mxu2 %v10751_v31 }
 0x1b1   :  { %10900 = vmatmul.msk.bf16.gmra.mxu0 %vm833_vm0, %v15230_v33  ;;  %v639_v48 = vadd.f32 %v638_v39, %v525_v42 }
 0x1b2   :  { %10921 = vmatmul.msk.bf16.gmra.mxu1 %vm833_vm0, %v15230_v33  ;;  %v15466_v41 = vpop.f32.mrf.mxu2 }
 0x1b3   :  { %v692_v57 = vmax.f32 %v639_v48, 0.0 }
 0x1b6   :  { %v526_v46 = vpop.f32.mrf.mxu0 }
 0x1b7   :  { %v640_v47 = vpop.f32.mrf.mxu1  ;;  %v527_v50 = vadd.f32 %v15142_v14, %v526_v46 }
 0x1b9   :  { %v641_v53 = vadd.f32 %v640_v47, %v527_v50  ;;  %v14147_v50 = vld [vmem:[%s22023_s3 + $0x4c] sm:$0xf] }
 0x1ba   :  { %v15470_v54 = vpop.f32.mrf.mxu2 }
 0x1bb   :  { %v693_v59 = vmax.f32 %v641_v53, 0.0  ;;  %v10780_v53 = vld [vmem:[%s22023_s3 + $0x6c] sm:$0xf0] }
 0x1bd   :  { %v15472_v62 = vpack.c.bf16 %v693_v59, %v692_v57 }
 0x1be   :  { %v529_v0 = vpop.f32.mrf.mxu0 }
 0x1bf   :  { %v643_v2 = vpop.f32.mrf.mxu1  ;;  %10829 = vmatmul.msk.bf16.gmra.mxu2 %vm833_vm0, %v15472_v62  ;;  %v530_v4 = vadd.f32 %v15142_v14, %v529_v0  ;;  %v10783_v0 = vor.u32 %v14147_v50, %v10780_v53 }
 0x1c1   :  { %10901 = vmatmul.msk.bf16.gmra.mxu0 %vm833_vm0, %v15248_v51  ;;  %v644_v20 = vadd.f32 %v643_v2, %v530_v4  ;;  %1017 = vmatpush.bf16.msrb.mxu3 %v10783_v0 }
 0x1c2   :  { %10922 = vmatmul.msk.bf16.gmra.mxu1 %vm833_vm0, %v15248_v51  ;;  %v15480_v3 = vpop.f32.mrf.mxu2 }
 0x1c3   :  { %v694_v34 = vmax.f32 %v644_v20, 0.0 }
 0x1c6   :  { %v531_v11 = vpop.f32.mrf.mxu0 }
 0x1c7   :  { %v645_v13 = vpop.f32.mrf.mxu1  ;;  %v532_v21 = vadd.f32 %v15142_v14, %v531_v11  ;;  %v10744_v11 = vld [vmem:[%s22023_s3 + $0x24] sm:$0xf0] }
 0x1c8   :  { %v10747_v17 = vor.u32 %v14138_v10, %v10744_v11 }
 0x1c9   :  { %v646_v25 = vadd.f32 %v645_v13, %v532_v21 }
 0x1ca   :  { %v15496_v29 = vpop.f32.mrf.mxu2  ;;  %1018 = vmatpush.bf16.msrb.mxu3 %v10747_v17 }
 0x1cb   :  { %v695_v38 = vmax.f32 %v646_v25, 0.0 }
 0x1cd   :  { %v15498_v39 = vpack.c.bf16 %v695_v38, %v694_v34 }
 0x1ce   :  { %v534_v42 = vpop.f32.mrf.mxu0 }
 0x1cf   :  { %22071 = vst [vmem:[#allocation13_spill] sm:$0xff] %v15498_v39  ;;  %v648_v46 = vpop.f32.mrf.mxu1  ;;  %10830 = vmatmul.msk.bf16.gmra.mxu2 %vm833_vm0, %v15498_v39  ;;  %v535_v48 = vadd.f32 %v15142_v14, %v534_v42 }
 0x1d1   :  { %10902 = vmatmul.msk.bf16.gmra.mxu0 %vm833_vm0, %v15266_v5  ;;  %v649_v2 = vadd.f32 %v648_v46, %v535_v48 }
 0x1d2   :  { %10923 = vmatmul.msk.bf16.gmra.mxu1 %vm833_vm0, %v15266_v5  ;;  %v15506_v47 = vpop.f32.mrf.mxu2 }
 0x1d3   :  { %v696_v20 = vmax.f32 %v649_v2, 0.0 }
 0x1d6   :  { %v536_v57 = vpop.f32.mrf.mxu0 }
 0x1d7   :  { %v650_v59 = vpop.f32.mrf.mxu1  ;;  %v537_v4 = vadd.f32 %v15142_v14, %v536_v57 }
 0x1d9   :  { %v651_v8 = vadd.f32 %v650_v59, %v537_v4 }
 0x1da   :  { %v15522_v13 = vpop.f32.mrf.mxu2 }
 0x1db   :  { %v697_v21 = vmax.f32 %v651_v8, 0.0 }
 0x1dd   :  { %v15524_v25 = vpack.c.bf16 %v697_v21, %v696_v20 }
 0x1de   :  { %v539_v26 = vpop.f32.mrf.mxu0 }
 0x1df   :  { %22072 = vst [vmem:[#allocation14_spill] sm:$0xff] %v15524_v25  ;;  %v653_v28 = vpop.f32.mrf.mxu1  ;;  %10831 = vmatmul.msk.bf16.gmra.mxu2 %vm833_vm0, %v15524_v25  ;;  %v540_v34 = vadd.f32 %v15142_v14, %v539_v26 }
 0x1e1   :  { %10903 = vmatmul.msk.bf16.gmra.mxu0 %vm833_vm0, %v15284_v24  ;;  %v654_v46 = vadd.f32 %v653_v28, %v540_v34 }
 0x1e2   :  { %10924 = vmatmul.msk.bf16.gmra.mxu1 %vm833_vm0, %v15284_v24  ;;  %v15532_v31 = vpop.f32.mrf.mxu2 }
 0x1e3   :  { %v698_v57 = vmax.f32 %v654_v46, 0.0 }
 0x1e6   :  { %v541_v38 = vpop.f32.mrf.mxu0 }
 0x1e7   :  { %v655_v42 = vpop.f32.mrf.mxu1  ;;  %v542_v48 = vadd.f32 %v15142_v14, %v541_v38 }
 0x1e9   :  { %v656_v50 = vadd.f32 %v655_v42, %v542_v48 }
 0x1ea   :  { %v15536_v53 = vpop.f32.mrf.mxu2 }
 0x1eb   :  { %v699_v59 = vmax.f32 %v656_v50, 0.0 }
 0x1ed   :  { %v15538_v0 = vpack.c.bf16 %v699_v59, %v698_v57 }
 0x1ee   :  { %v1362_v2 = vpop.f32.mrf.mxu0 }
 0x1ef   :  { %22073 = vst [vmem:[#allocation15_spill] sm:$0xff] %v15538_v0  ;;  %v1476_v4 = vpop.f32.mrf.mxu1  ;;  %10832 = vmatmul.msk.bf16.vlgmr.msra.gmra.mxu3 %vm833_vm0, %v15538_v0  ;;  %10854 = vmatmul.msk.bf16.vlgmr.msrb.gmra.mxu2 %vm833_vm0, %v15158_v27 }
 0x1f0   :  { %v1925_v8 = vpack.c.bf16 %v1476_v4, %v1362_v2 }
 0x1f1   :  { %10904 = vmatmul.msk.bf16.gmra.mxu0 %vm833_vm0, %v15302_v43 }
 0x1f2   :  { %10925 = vmatmul.msk.bf16.gmra.mxu1 %vm833_vm0, %v15302_v43  ;;  %v15548_v14 = vpop.f32.mrf.mxu2  ;;  %v3523_v20 = vunpack.c.l.b16 %v1925_v8  ;;  %v3821_v21 = vunpack.c.h.b16 %v1925_v8 }
 0x1f3   :  { %22074 = vst [vmem:[#allocation16_spill] sm:$0xff] %v15548_v14 }
 0x1f6   :  { %v1364_v10 = vpop.f32.mrf.mxu0 }
 0x1f7   :  { %v1478_v11 = vpop.f32.mrf.mxu1 }
 0x1f8   :  { %v1930_v17 = vpack.c.bf16 %v1478_v11, %v1364_v10 }
 0x1fa   :  { %v3524_v26 = vunpack.c.l.b16 %v1930_v17  ;;  %v3822_v28 = vunpack.c.h.b16 %v1930_v17  ;;  %v15550_v34 = vpop.f32.mrf.mxu2 }
 0x1fb   :  { %22075 = vst [vmem:[#allocation17_spill] sm:$0xff] %v15550_v34 }
 0x1fc   :  { %v15552_v38 = vpack.c.b16 %v3524_v26, %v3523_v20  ;;  %v15554_v42 = vpack.c.b16 %v3822_v28, %v3821_v21 }
 0x1fe   :  { %22076 = vst [vmem:[#allocation18_spill] sm:$0xff] %v15552_v38  ;;  %v1367_v46 = vpop.f32.mrf.mxu0 }
 0x1ff   :  { %22077 = vst [vmem:[#allocation19_spill] sm:$0xff] %v15554_v42  ;;  %v1481_v48 = vpop.f32.mrf.mxu1  ;;  %10833 = vmatmul.msk.bf16.vlgmr.msrb.gmra.mxu3 %vm833_vm0, %v15158_v27  ;;  %10855 = vmatmul.msk.bf16.gmra.mxu2 %vm833_vm0, %v15176_v44 }
 0x200   :  { %v1935_v50 = vpack.c.bf16 %v1481_v48, %v1367_v46 }
 0x201   :  { %10905 = vmatmul.msk.bf16.gmra.mxu0 %vm833_vm0, %v15324_v1 }
 0x202   :  { %10926 = vmatmul.msk.bf16.gmra.mxu1 %vm833_vm0, %v15324_v1  ;;  %v15564_v57 = vpop.f32.mrf.mxu2  ;;  %v3525_v8 = vunpack.c.l.b16 %v1935_v50  ;;  %v3823_v10 = vunpack.c.h.b16 %v1935_v50 }
 0x203   :  { %22078 = vst [vmem:[#allocation20_spill] sm:$0xff] %v15564_v57 }
 0x206   :  { %v1369_v59 = vpop.f32.mrf.mxu0 }
 0x207   :  { %v1483_v2 = vpop.f32.mrf.mxu1 }
 0x208   :  { %v1940_v4 = vpack.c.bf16 %v1483_v2, %v1369_v59 }
 0x20a   :  { %v3526_v11 = vunpack.c.l.b16 %v1940_v4  ;;  %v3824_v17 = vunpack.c.h.b16 %v1940_v4  ;;  %v15566_v20 = vpop.f32.mrf.mxu2 }
 0x20b   :  { %22079 = vst [vmem:[#allocation21_spill] sm:$0xff] %v15566_v20 }
 0x20c   :  { %v15568_v21 = vpack.c.b16 %v3526_v11, %v3525_v8  ;;  %v15570_v26 = vpack.c.b16 %v3824_v17, %v3823_v10 }
 0x20e   :  { %22080 = vst [vmem:[#allocation22_spill] sm:$0xff] %v15568_v21  ;;  %v1372_v28 = vpop.f32.mrf.mxu0 }
 0x20f   :  { %22081 = vst [vmem:[#allocation23_spill] sm:$0xff] %v15570_v26  ;;  %v1486_v46 = vpop.f32.mrf.mxu1  ;;  %10834 = vmatmul.msk.bf16.gmra.mxu3 %vm833_vm0, %v15176_v44  ;;  %10856 = vmatmul.msk.bf16.gmra.mxu2 %vm833_vm0, %v15194_v61 }
 0x210   :  { %v1945_v48 = vpack.c.bf16 %v1486_v46, %v1372_v28 }
 0x211   :  { %10906 = vmatmul.msk.bf16.gmra.mxu0 %vm833_vm0, %v15370_v37 }
 0x212   :  { %10927 = vmatmul.msk.bf16.gmra.mxu1 %vm833_vm0, %v15370_v37  ;;  %v15580_v50 = vpop.f32.mrf.mxu2  ;;  %v3527_v8 = vunpack.c.l.b16 %v1945_v48  ;;  %v3825_v10 = vunpack.c.h.b16 %v1945_v48 }
 0x213   :  { %22082 = vst [vmem:[#allocation24_spill] sm:$0xff] %v15580_v50 }
 0x216   :  { %v1374_v59 = vpop.f32.mrf.mxu0 }
 0x217   :  { %v1488_v2 = vpop.f32.mrf.mxu1 }
 0x218   :  { %v1950_v4 = vpack.c.bf16 %v1488_v2, %v1374_v59 }
 0x21a   :  { %v3528_v11 = vunpack.c.l.b16 %v1950_v4  ;;  %v3826_v17 = vunpack.c.h.b16 %v1950_v4  ;;  %v15582_v28 = vpop.f32.mrf.mxu2 }
 0x21b   :  { %22083 = vst [vmem:[#allocation25_spill] sm:$0xff] %v15582_v28 }
 0x21c   :  { %v15584_v46 = vpack.c.b16 %v3528_v11, %v3527_v8  ;;  %v15586_v42 = vpack.c.b16 %v3826_v17, %v3825_v10 }
 0x21e   :  { %22084 = vst [vmem:[#allocation26_spill] sm:$0xff] %v15584_v46  ;;  %v1377_v38 = vpop.f32.mrf.mxu0 }
 0x21f   :  { %22085 = vst [vmem:[#allocation27_spill] sm:$0xff] %v15586_v42  ;;  %v1491_v26 = vpop.f32.mrf.mxu1  ;;  %10835 = vmatmul.msk.bf16.gmra.mxu3 %vm833_vm0, %v15194_v61  ;;  %10857 = vmatmul.msk.bf16.gmra.mxu2 %vm833_vm0, %v15212_v15 }
 0x220   :  { %v1955_v21 = vpack.c.bf16 %v1491_v26, %v1377_v38 }
 0x221   :  { %10907 = vmatmul.msk.bf16.gmra.mxu0 %vm833_vm0, %v15392_v63 }
 0x222   :  { %10928 = vmatmul.msk.bf16.gmra.mxu1 %vm833_vm0, %v15392_v63  ;;  %v15596_v48 = vpop.f32.mrf.mxu2  ;;  %v3529_v8 = vunpack.c.l.b16 %v1955_v21  ;;  %v3827_v10 = vunpack.c.h.b16 %v1955_v21 }
 0x223   :  { %22086 = vst [vmem:[#allocation28_spill] sm:$0xff] %v15596_v48 }
 0x226   :  { %v1379_v59 = vpop.f32.mrf.mxu0 }
 0x227   :  { %v1493_v2 = vpop.f32.mrf.mxu1 }
 0x228   :  { %v1960_v4 = vpack.c.bf16 %v1493_v2, %v1379_v59 }
 0x22a   :  { %v3530_v38 = vunpack.c.l.b16 %v1960_v4  ;;  %v3828_v26 = vunpack.c.h.b16 %v1960_v4  ;;  %v15598_v11 = vpop.f32.mrf.mxu2 }
 0x22b   :  { %22087 = vst [vmem:[#allocation29_spill] sm:$0xff] %v15598_v11 }
 0x22c   :  { %v15600_v17 = vpack.c.b16 %v3530_v38, %v3529_v8  ;;  %v15602_v42 = vpack.c.b16 %v3828_v26, %v3827_v10 }
 0x22e   :  { %22088 = vst [vmem:[#allocation30_spill] sm:$0xff] %v15600_v17  ;;  %v1382_v46 = vpop.f32.mrf.mxu0 }
 0x22f   :  { %22089 = vst [vmem:[#allocation31_spill] sm:$0xff] %v15602_v42  ;;  %v1496_v14 = vpop.f32.mrf.mxu1  ;;  %10836 = vmatmul.msk.bf16.gmra.mxu3 %vm833_vm0, %v15212_v15  ;;  %10858 = vmatmul.msk.bf16.gmra.mxu2 %vm833_vm0, %v15230_v33 }
 0x230   :  { %v1965_v34 = vpack.c.bf16 %v1496_v14, %v1382_v46 }
 0x231   :  { %10908 = vmatmul.msk.bf16.gmra.mxu0 %vm833_vm0, %v15402_v19 }
 0x232   :  { %10929 = vmatmul.msk.bf16.gmra.mxu1 %vm833_vm0, %v15402_v19  ;;  %v15612_v21 = vpop.f32.mrf.mxu2  ;;  %v3531_v8 = vunpack.c.l.b16 %v1965_v34  ;;  %v3829_v10 = vunpack.c.h.b16 %v1965_v34 }
 0x233   :  { %22090 = vst [vmem:[#allocation32_spill] sm:$0xff] %v15612_v21 }
 0x236   :  { %v1384_v59 = vpop.f32.mrf.mxu0 }
 0x237   :  { %v1498_v2 = vpop.f32.mrf.mxu1 }
 0x238   :  { %v1970_v4 = vpack.c.bf16 %v1498_v2, %v1384_v59 }
 0x23a   :  { %v3532_v14 = vunpack.c.l.b16 %v1970_v4  ;;  %v3830_v46 = vunpack.c.h.b16 %v1970_v4  ;;  %v15614_v38 = vpop.f32.mrf.mxu2 }
 0x23b   :  { %22091 = vst [vmem:[#allocation33_spill] sm:$0xff] %v15614_v38 }
 0x23c   :  { %v15616_v26 = vpack.c.b16 %v3532_v14, %v3531_v8  ;;  %v15618_v42 = vpack.c.b16 %v3830_v46, %v3829_v10 }
 0x23e   :  { %22092 = vst [vmem:[#allocation34_spill] sm:$0xff] %v15616_v26  ;;  %v1387_v17 = vpop.f32.mrf.mxu0 }
 0x23f   :  { %22093 = vst [vmem:[#allocation35_spill] sm:$0xff] %v15618_v42  ;;  %v1501_v57 = vpop.f32.mrf.mxu1  ;;  %10837 = vmatmul.msk.bf16.gmra.mxu3 %vm833_vm0, %v15230_v33  ;;  %10859 = vmatmul.msk.bf16.gmra.mxu2 %vm833_vm0, %v15248_v51 }
 0x240   :  { %v1975_v20 = vpack.c.bf16 %v1501_v57, %v1387_v17 }
 0x241   :  { %10909 = vmatmul.msk.bf16.gmra.mxu0 %vm833_vm0, %v15416_v36 }
 0x242   :  { %10930 = vmatmul.msk.bf16.gmra.mxu1 %vm833_vm0, %v15416_v36  ;;  %v15628_v34 = vpop.f32.mrf.mxu2  ;;  %v3533_v8 = vunpack.c.l.b16 %v1975_v20  ;;  %v3831_v10 = vunpack.c.h.b16 %v1975_v20 }
 0x243   :  { %22094 = vst [vmem:[#allocation36_spill] sm:$0xff] %v15628_v34 }
 0x246   :  { %v1389_v59 = vpop.f32.mrf.mxu0 }
 0x247   :  { %v1503_v2 = vpop.f32.mrf.mxu1 }
 0x248   :  { %v1980_v4 = vpack.c.bf16 %v1503_v2, %v1389_v59 }
 0x24a   :  { %v3534_v57 = vunpack.c.l.b16 %v1980_v4  ;;  %v3832_v17 = vunpack.c.h.b16 %v1980_v4  ;;  %v15630_v14 = vpop.f32.mrf.mxu2 }
 0x24b   :  { %22095 = vst [vmem:[#allocation37_spill] sm:$0xff] %v15630_v14 }
 0x24c   :  { %v15632_v46 = vpack.c.b16 %v3534_v57, %v3533_v8  ;;  %v15634_v42 = vpack.c.b16 %v3832_v17, %v3831_v10 }
 0x24e   :  { %22096 = vst [vmem:[#allocation38_spill] sm:$0xff] %v15632_v46  ;;  %v1392_v26 = vpop.f32.mrf.mxu0 }
 0x24f   :  { %22097 = vst [vmem:[#allocation39_spill] sm:$0xff] %v15634_v42  ;;  %v1506_v38 = vpop.f32.mrf.mxu1  ;;  %10838 = vmatmul.msk.bf16.gmra.mxu3 %vm833_vm0, %v15248_v51  ;;  %10860 = vmatmul.msk.bf16.gmra.mxu2 %vm833_vm0, %v15266_v5 }
 0x250   :  { %v1985_v21 = vpack.c.bf16 %v1506_v38, %v1392_v26 }
 0x251   :  { %10910 = vmatmul.msk.bf16.gmra.mxu0 %vm833_vm0, %v15430_v56 }
 0x252   :  { %10931 = vmatmul.msk.bf16.gmra.mxu1 %vm833_vm0, %v15430_v56  ;;  %v15644_v20 = vpop.f32.mrf.mxu2  ;;  %v3535_v8 = vunpack.c.l.b16 %v1985_v21  ;;  %v3833_v10 = vunpack.c.h.b16 %v1985_v21 }
 0x253   :  { %22098 = vst [vmem:[#allocation40_spill] sm:$0xff] %v15644_v20 }
 0x256   :  { %v1394_v59 = vpop.f32.mrf.mxu0 }
 0x257   :  { %v1508_v2 = vpop.f32.mrf.mxu1 }
 0x258   :  { %v1990_v4 = vpack.c.bf16 %v1508_v2, %v1394_v59 }
 0x25a   :  { %v3536_v38 = vunpack.c.l.b16 %v1990_v4  ;;  %v3834_v26 = vunpack.c.h.b16 %v1990_v4  ;;  %v15646_v57 = vpop.f32.mrf.mxu2 }
 0x25b   :  { %22099 = vst [vmem:[#allocation41_spill] sm:$0xff] %v15646_v57 }
 0x25c   :  { %v15648_v17 = vpack.c.b16 %v3536_v38, %v3535_v8  ;;  %v15650_v42 = vpack.c.b16 %v3834_v26, %v3833_v10 }
 0x25e   :  { %22100 = vst [vmem:[#allocation42_spill] sm:$0xff] %v15648_v17  ;;  %v1397_v46 = vpop.f32.mrf.mxu0 }
 0x25f   :  { %22101 = vst [vmem:[#allocation43_spill] sm:$0xff] %v15650_v42  ;;  %v1511_v34 = vpop.f32.mrf.mxu1  ;;  %10839 = vmatmul.msk.bf16.gmra.mxu3 %vm833_vm0, %v15266_v5  ;;  %10861 = vmatmul.msk.bf16.gmra.mxu2 %vm833_vm0, %v15284_v24 }
 0x260   :  { %v1995_v14 = vpack.c.bf16 %v1511_v34, %v1397_v46 }
 0x261   :  { %10911 = vmatmul.msk.bf16.gmra.mxu0 %vm833_vm0, %v15444_v12 }
 0x262   :  { %10932 = vmatmul.msk.bf16.gmra.mxu1 %vm833_vm0, %v15444_v12  ;;  %v15660_v21 = vpop.f32.mrf.mxu2  ;;  %v3537_v8 = vunpack.c.l.b16 %v1995_v14  ;;  %v3835_v10 = vunpack.c.h.b16 %v1995_v14 }
 0x263   :  { %22102 = vst [vmem:[#allocation44_spill] sm:$0xff] %v15660_v21 }
 0x266   :  { %v1399_v59 = vpop.f32.mrf.mxu0 }
 0x267   :  { %v1513_v2 = vpop.f32.mrf.mxu1 }
 0x268   :  { %v2000_v4 = vpack.c.bf16 %v1513_v2, %v1399_v59 }
 0x26a   :  { %v3538_v34 = vunpack.c.l.b16 %v2000_v4  ;;  %v3836_v46 = vunpack.c.h.b16 %v2000_v4  ;;  %v15662_v38 = vpop.f32.mrf.mxu2 }
 0x26b   :  { %22103 = vst [vmem:[#allocation45_spill] sm:$0xff] %v15662_v38  ;;  %v14148_v38 = vld [vmem:[%s22023_s3 + $0x54] sm:$0xf] }
 0x26c   :  { %v15664_v26 = vpack.c.b16 %v3538_v34, %v3537_v8  ;;  %v15666_v42 = vpack.c.b16 %v3836_v46, %v3835_v10 }
 0x26e   :  { %22104 = vst [vmem:[#allocation46_spill] sm:$0xff] %v15664_v26  ;;  %v1402_v17 = vpop.f32.mrf.mxu0 }
 0x26f   :  { %22105 = vst [vmem:[#allocation47_spill] sm:$0xff] %v15666_v42  ;;  %v1516_v20 = vpop.f32.mrf.mxu1  ;;  %10840 = vmatmul.msk.bf16.gmra.mxu3 %vm833_vm0, %v15284_v24  ;;  %10862 = vmatmul.msk.bf16.gmra.mxu2 %vm833_vm0, %v15302_v43 }
 0x270   :  { %v2005_v57 = vpack.c.bf16 %v1516_v20, %v1402_v17 }
 0x271   :  { %10912 = vmatmul.msk.bf16.gmra.mxu0 %vm833_vm0, %v15458_v35 }
 0x272   :  { %10933 = vmatmul.msk.bf16.gmra.mxu1 %vm833_vm0, %v15458_v35  ;;  %v15676_v14 = vpop.f32.mrf.mxu3  ;;  %v15678_v59 = vpop.f32.mrf.mxu2  ;;  %v3539_v20 = vunpack.c.l.b16 %v2005_v57  ;;  %v3837_v17 = vunpack.c.h.b16 %v2005_v57 }
 0x273   :  { %22106 = vst [vmem:[#allocation48_spill] sm:$0xff] %v15676_v14 }
 0x274   :  { %22107 = vst [vmem:[#allocation49_spill] sm:$0xff] %v15678_v59 }
 0x276   :  { %v1404_v2 = vpop.f32.mrf.mxu0 }
 0x277   :  { %v1518_v4 = vpop.f32.mrf.mxu1 }
 0x278   :  { %v2010_v8 = vpack.c.bf16 %v1518_v4, %v1404_v2  ;;  %v10788_v2 = vld [vmem:[%s22023_s3 + $0x74] sm:$0xf0] }
 0x279   :  { %v10791_v59 = vor.u32 %v14148_v38, %v10788_v2 }
 0x27a   :  { %v3540_v10 = vunpack.c.l.b16 %v2010_v8  ;;  %v3838_v34 = vunpack.c.h.b16 %v2010_v8  ;;  %v15680_v46 = vpop.f32.mrf.mxu3  ;;  %v15682_v42 = vpop.f32.mrf.mxu2 }
 0x27b   :  { %22108 = vst [vmem:[#allocation50_spill] sm:$0xff] %v15680_v46  ;;  %1245 = vmatpush.bf16.msra.mxu3 %v10791_v59 }
 0x27c   :  { %22109 = vst [vmem:[#allocation51_spill] sm:$0xff] %v15682_v42  ;;  %v15684_v26 = vpack.c.b16 %v3838_v34, %v3837_v17  ;;  %v15686_v21 = vpack.c.b16 %v3540_v10, %v3539_v20 }
 0x27e   :  { %22110 = vst [vmem:[#allocation52_spill] sm:$0xff] %v15684_v26  ;;  %v1407_v4 = vpop.f32.mrf.mxu0 }
 0x27f   :  { %22111 = vst [vmem:[#allocation53_spill] sm:$0xff] %v15686_v21  ;;  %v1521_v57 = vpop.f32.mrf.mxu1  ;;  %10841 = vmatmul.msk.bf16.gmra.mxu3 %vm833_vm0, %v15302_v43  ;;  %10863 = vmatmul.msk.bf16.gmra.mxu2 %vm833_vm0, %v15324_v1 }
 0x280   :  { %v2015_v8 = vpack.c.bf16 %v1521_v57, %v1407_v4 }
 0x281   :  { %10913 = vmatmul.msk.bf16.gmra.mxu0 %vm833_vm0, %v15472_v62 }
 0x282   :  { %10934 = vmatmul.msk.bf16.gmra.mxu1 %vm833_vm0, %v15472_v62  ;;  %v1020_v20 = vpop.f32.mrf.mxu3  ;;  %v15702_v17 = vpop.f32.mrf.mxu2  ;;  %v3541_v2 = vunpack.c.l.b16 %v2015_v8  ;;  %v3839_v4 = vunpack.c.h.b16 %v2015_v8 }
 0x283   :  { %22112 = vst [vmem:[#allocation54_spill] sm:$0xff] %v15702_v17  ;;  %v1923_v57 = vpack.c.bf16 %v1020_v20, %v15306_v49 }
 0x285   :  { %v2282_v11 = vunpack.c.h.b16 %v1923_v57  ;;  %v2554_v17 = vunpack.c.l.b16 %v1923_v57 }
 0x286   :  { %v1409_v10 = vpop.f32.mrf.mxu0 }
 0x287   :  { %v1523_v34 = vpop.f32.mrf.mxu1 }
 0x288   :  { %v2020_v38 = vpack.c.bf16 %v1523_v34, %v1409_v10 }
 0x28a   :  { %v3542_v21 = vunpack.c.l.b16 %v2020_v38  ;;  %v3840_v26 = vunpack.c.h.b16 %v2020_v38  ;;  %v1022_v42 = vpop.f32.mrf.mxu3  ;;  %v15705_v59 = vpop.f32.mrf.mxu2  ;;  %v10810_v38 = vld [vmem:[%s22023_s3 + $0x68] sm:$0xf] }
 0x28b   :  { %v1928_v46 = vpack.c.bf16 %v1022_v42, %v15313_v58 }
 0x28c   :  { %v15708_v14 = vpack.c.b16 %v3840_v26, %v3839_v4  ;;  %v15710_v50 = vpack.c.b16 %v3542_v21, %v3541_v2 }
 0x28d   :  { %v2283_v28 = vunpack.c.h.b16 %v1928_v46  ;;  %v2555_v48 = vunpack.c.l.b16 %v1928_v46 }
 0x28e   :  { %22113 = vst [vmem:[#allocation55_spill] sm:$0xff] %v15708_v14  ;;  %v1412_v10 = vpop.f32.mrf.mxu0 }
 0x28f   :  { %22114 = vst [vmem:[#allocation56_spill] sm:$0xff] %v15710_v50  ;;  %v1526_v34 = vpop.f32.mrf.mxu1  ;;  %10842 = vmatmul.msk.bf16.gmra.mxu3 %vm833_vm0, %v15324_v1  ;;  %10864 = vmatmul.msk.bf16.gmra.mxu2 %vm833_vm0, %v15370_v37  ;;  %v15716_v49 = vpack.c.b16 %v2283_v28, %v2282_v11  ;;  %v15718_v58 = vpack.c.b16 %v2555_v48, %v2554_v17  ;;  %v14155_v28 = vld [vmem:[%s22023_s3 + $0x88] sm:$0xf0]  ;;  %v14146_v50 = vld [vmem:[%s22023_s3 + $0x40] sm:$0xf0] }
 0x290   :  { %v2025_v8 = vpack.c.bf16 %v1526_v34, %v1412_v10  ;;  %v10811_v11 = vor.u32 %v14155_v28, %v10810_v38 }
 0x291   :  { %22115 = vst [vmem:[#allocation57_spill] sm:$0xff] %v15718_v58  ;;  %10914 = vmatmul.msk.bf16.gmra.mxu0 %vm833_vm0, %v15498_v39 }
 0x292   :  { %10935 = vmatmul.msk.bf16.gmra.mxu1 %vm833_vm0, %v15498_v39  ;;  %v1025_v42 = vpop.f32.mrf.mxu3  ;;  %v15724_v21 = vpop.f32.mrf.mxu2  ;;  %v3543_v48 = vunpack.c.l.b16 %v2025_v8  ;;  %v3841_v17 = vunpack.c.h.b16 %v2025_v8  ;;  %1815 = vmatpush.bf16.msra.mxu0 %v10811_v11 }
 0x293   :  { %22116 = vst [vmem:[#allocation58_spill] sm:$0xff] %v15724_v21  ;;  %v1933_v2 = vpack.c.bf16 %v1025_v42, %v15328_v7 }
 0x295   :  { %v2284_v42 = vunpack.c.h.b16 %v1933_v2 }
 0x296   :  { %v1414_v26 = vpop.f32.mrf.mxu0 }
 0x297   :  { %v1528_v46 = vpop.f32.mrf.mxu1 }
 0x298   :  { %v2030_v20 = vpack.c.bf16 %v1528_v46, %v1414_v26  ;;  %v10774_v46 = vld [vmem:[%s22023_s3 + $0x20] sm:$0xf] }
 0x299   :  { %v10775_v7 = vor.u32 %v14146_v50, %v10774_v46 }
 0x29a   :  { %v3544_v4 = vunpack.c.l.b16 %v2030_v20  ;;  %v3842_v57 = vunpack.c.h.b16 %v2030_v20  ;;  %v1027_v10 = vpop.f32.mrf.mxu3  ;;  %v15733_v34 = vpop.f32.mrf.mxu2  ;;  %v2556_v20 = vunpack.c.l.b16 %v1933_v2 }
 0x29b   :  { %22117 = vst [vmem:[#allocation59_spill] sm:$0xff] %v15733_v34  ;;  %v1938_v26 = vpack.c.bf16 %v1027_v10, %v15347_v23  ;;  %1816 = vmatpush.bf16.msra.mxu0 %v10775_v7 }
 0x29c   :  { %v15742_v38 = vpack.c.b16 %v3842_v57, %v3841_v17  ;;  %v15744_v8 = vpack.c.b16 %v3544_v4, %v3543_v48 }
 0x29d   :  { %v2285_v28 = vunpack.c.h.b16 %v1938_v26  ;;  %v2557_v14 = vunpack.c.l.b16 %v1938_v26 }
 0x29e   :  { %22118 = vst [vmem:[#allocation60_spill] sm:$0xff] %v15742_v38  ;;  %v1417_v11 = vpop.f32.mrf.mxu0 }
 0x29f   :  { %22119 = vst [vmem:[#allocation61_spill] sm:$0xff] %v15744_v8  ;;  %v1531_v58 = vpop.f32.mrf.mxu1  ;;  %10843 = vmatmul.msk.bf16.gmra.mxu3 %vm833_vm0, %v15370_v37  ;;  %10865 = vmatmul.msk.bf16.gmra.mxu2 %vm833_vm0, %v15392_v63  ;;  %v15750_v10 = vpack.c.b16 %v2285_v28, %v2284_v42  ;;  %v15752_v17 = vpack.c.b16 %v2557_v14, %v2556_v20 }
 0x2a0   :  { %v2035_v23 = vpack.c.bf16 %v1531_v58, %v1417_v11 }
 0x2a1   :  { %22120 = vst [vmem:[#allocation62_spill] sm:$0xff] %v15752_v17  ;;  %10915 = vmatmul.msk.bf16.gmra.mxu0 %vm833_vm0, %v15524_v25 }
 0x2a2   :  { %10936 = vmatmul.msk.bf16.gmra.mxu1 %vm833_vm0, %v15524_v25  ;;  %v1030_v50 = vpop.f32.mrf.mxu3  ;;  %v15758_v48 = vpop.f32.mrf.mxu2  ;;  %v3545_v57 = vunpack.c.l.b16 %v2035_v23  ;;  %v3843_v26 = vunpack.c.h.b16 %v2035_v23 }
 0x2a3   :  { %22121 = vst [vmem:[#allocation63_spill] sm:$0xff] %v15758_v48  ;;  %v1943_v46 = vpack.c.bf16 %v1030_v50, %v15374_v45 }
 0x2a5   :  { %v2286_v38 = vunpack.c.h.b16 %v1943_v46  ;;  %v2558_v48 = vunpack.c.l.b16 %v1943_v46 }
 0x2a6   :  { %v1419_v58 = vpop.f32.mrf.mxu0 }
 0x2a7   :  { %v1533_v2 = vpop.f32.mrf.mxu1 }
 0x2a8   :  { %v2040_v4 = vpack.c.bf16 %v1533_v2, %v1419_v58 }
 0x2aa   :  { %v3546_v7 = vunpack.c.l.b16 %v2040_v4  ;;  %v3844_v42 = vunpack.c.h.b16 %v2040_v4  ;;  %v1032_v14 = vpop.f32.mrf.mxu3  ;;  %v15761_v20 = vpop.f32.mrf.mxu2 }
 0x2ab   :  { %22122 = vst [vmem:[#allocation64_spill] sm:$0xff] %v15761_v20  ;;  %v1948_v28 = vpack.c.bf16 %v1032_v14, %v15381_v55 }
 0x2ac   :  { %v15764_v11 = vpack.c.b16 %v3844_v42, %v3843_v26  ;;  %v15766_v8 = vpack.c.b16 %v3546_v7, %v3545_v57 }
 0x2ad   :  { %v2287_v17 = vunpack.c.h.b16 %v1948_v28  ;;  %v2559_v34 = vunpack.c.l.b16 %v1948_v28 }
 0x2ae   :  { %22123 = vst [vmem:[#allocation65_spill] sm:$0xff] %v15764_v11  ;;  %v1422_v58 = vpop.f32.mrf.mxu0 }
 0x2af   :  { %22124 = vst [vmem:[#allocation66_spill] sm:$0xff] %v15766_v8  ;;  %v1536_v2 = vpop.f32.mrf.mxu1  ;;  %10844 = vmatmul.msk.bf16.gmra.mxu3 %vm833_vm0, %v15392_v63  ;;  %10866 = vmatmul.msk.bf16.gmra.mxu2 %vm833_vm0, %v15402_v19  ;;  %v15772_v45 = vpack.c.b16 %v2287_v17, %v2286_v38  ;;  %v15774_v55 = vpack.c.b16 %v2559_v34, %v2558_v48 }
 0x2b0   :  { %v2045_v23 = vpack.c.bf16 %v1536_v2, %v1422_v58 }
 0x2b1   :  { %22125 = vst [vmem:[#allocation67_spill] sm:$0xff] %v15774_v55  ;;  %10916 = vmatmul.msk.bf16.gmra.mxu0 %vm833_vm0, %v15538_v0 }
 0x2b2   :  { %10937 = vmatmul.msk.bf16.gmra.mxu1 %vm833_vm0, %v15538_v0  ;;  %v1035_v50 = vpop.f32.mrf.mxu3  ;;  %v15780_v4 = vpop.f32.mrf.mxu2  ;;  %v3547_v7 = vunpack.c.l.b16 %v2045_v23  ;;  %v3845_v42 = vunpack.c.h.b16 %v2045_v23 }
 0x2b3   :  { %22126 = vst [vmem:[#allocation68_spill] sm:$0xff] %v15780_v4  ;;  %v1953_v14 = vpack.c.bf16 %v1035_v50, %v15396_v6 }
 0x2b5   :  { %v2288_v8 = vunpack.c.h.b16 %v1953_v14  ;;  %v2560_v11 = vunpack.c.l.b16 %v1953_v14 }
 0x2b6   :  { %v1424_v57 = vpop.f32.mrf.mxu0 }
 0x2b7   :  { %v1538_v26 = vpop.f32.mrf.mxu1 }
 0x2b8   :  { %v2050_v46 = vpack.c.bf16 %v1538_v26, %v1424_v57 }
 0x2ba   :  { %v3548_v38 = vunpack.c.l.b16 %v2050_v46  ;;  %v3846_v17 = vunpack.c.h.b16 %v2050_v46  ;;  %v1037_v34 = vpop.f32.mrf.mxu3  ;;  %v15783_v48 = vpop.f32.mrf.mxu2 }
 0x2bb   :  { %22127 = vst [vmem:[#allocation69_spill] sm:$0xff] %v15783_v48  ;;  %v1958_v28 = vpack.c.bf16 %v1037_v34, %v15400_v16 }
 0x2bc   :  { %v15786_v58 = vpack.c.b16 %v3846_v17, %v3845_v42  ;;  %v15788_v2 = vpack.c.b16 %v3548_v38, %v3547_v7 }
 0x2bd   :  { %v2289_v4 = vunpack.c.h.b16 %v1958_v28  ;;  %v2561_v20 = vunpack.c.l.b16 %v1958_v28 }
 0x2be   :  { %22128 = vst [vmem:[#allocation70_spill] sm:$0xff] %v15786_v58  ;;  %v1427_v57 = vpop.f32.mrf.mxu0 }
 0x2bf   :  { %22129 = vst [vmem:[#allocation71_spill] sm:$0xff] %v15788_v2  ;;  %v1541_v26 = vpop.f32.mrf.mxu1  ;;  %10845 = vmatmul.msk.bf16.gmra.mxu3 %vm833_vm0, %v15402_v19  ;;  %10867 = vmatmul.msk.bf16.gmra.mxu2 %vm833_vm0, %v15416_v36  ;;  %v15794_v6 = vpack.c.b16 %v2289_v4, %v2288_v8  ;;  %v15796_v16 = vpack.c.b16 %v2561_v20, %v2560_v11 }
 0x2c0   :  { %v2055_v23 = vpack.c.bf16 %v1541_v26, %v1427_v57 }
 0x2c1   :  { %22130 = vst [vmem:[#allocation72_spill] sm:$0xff] %v15796_v16  ;;  %10980 = vmatmul.msk.bf16.vlgmr.msra.gmra.mxu0 %vm833_vm0, %v15158_v27 }
 0x2c2   :  { %v1040_v50 = vpop.f32.mrf.mxu3  ;;  %v15800_v46 = vpop.f32.mrf.mxu2  ;;  %v3549_v38 = vunpack.c.l.b16 %v2055_v23  ;;  %v3847_v17 = vunpack.c.h.b16 %v2055_v23 }
 0x2c3   :  { %22131 = vst [vmem:[#allocation73_spill] sm:$0xff] %v15800_v46  ;;  %v15803_v34 = vpack.c.bf16 %v1040_v50, %v15410_v22 }
 0x2c5   :  { %v2562_v2 = vunpack.c.l.b16 %v15803_v34 }
 0x2c6   :  { %v1429_v7 = vpop.f32.mrf.mxu0 }
 0x2c7   :  { %v1543_v42 = vpop.f32.mrf.mxu1 }
 0x2c8   :  { %v2060_v14 = vpack.c.bf16 %v1543_v42, %v1429_v7 }
 0x2ca   :  { %v3550_v28 = vunpack.c.l.b16 %v2060_v14  ;;  %v3848_v57 = vunpack.c.h.b16 %v2060_v14  ;;  %v1042_v8 = vpop.f32.mrf.mxu3  ;;  %v15805_v4 = vpop.f32.mrf.mxu2 }
 0x2cb   :  { %22132 = vst [vmem:[#allocation74_spill] sm:$0xff] %v15805_v4  ;;  %v15808_v20 = vpack.c.bf16 %v1042_v8, %v15414_v32 }
 0x2cc   :  { %v15810_v11 = vpack.c.b16 %v3848_v57, %v3847_v17  ;;  %v15812_v26 = vpack.c.b16 %v3550_v28, %v3549_v38 }
 0x2cd   :  { %v2563_v7 = vunpack.c.l.b16 %v15808_v20 }
 0x2ce   :  { %22133 = vst [vmem:[#allocation75_spill] sm:$0xff] %v15810_v11  ;;  %v1432_v23 = vpop.f32.mrf.mxu0 }
 0x2cf   :  { %22134 = vst [vmem:[#allocation76_spill] sm:$0xff] %v15812_v26  ;;  %v1546_v42 = vpop.f32.mrf.mxu1  ;;  %10846 = vmatmul.msk.bf16.gmra.mxu3 %vm833_vm0, %v15416_v36  ;;  %10868 = vmatmul.msk.bf16.gmra.mxu2 %vm833_vm0, %v15430_v56  ;;  %v15820_v50 = vpack.c.b16 %v2563_v7, %v2562_v2 }
 0x2d0   :  { %v2065_v22 = vpack.c.bf16 %v1546_v42, %v1432_v23 }
 0x2d1   :  { %22135 = vst [vmem:[#allocation77_spill] sm:$0xff] %v15820_v50  ;;  %10981 = vmatmul.msk.bf16.gmra.mxu0 %vm833_vm0, %v15176_v44 }
 0x2d2   :  { %v1045_v32 = vpop.f32.mrf.mxu3  ;;  %v15824_v14 = vpop.f32.mrf.mxu2  ;;  %v3551_v57 = vunpack.c.l.b16 %v2065_v22  ;;  %v3849_v8 = vunpack.c.h.b16 %v2065_v22 }
 0x2d3   :  { %22136 = vst [vmem:[#allocation78_spill] sm:$0xff] %v15824_v14  ;;  %v15827_v23 = vpack.c.bf16 %v1045_v32, %v15424_v40 }
 0x2d5   :  { %v2564_v14 = vunpack.c.l.b16 %v15827_v23 }
 0x2d6   :  { %v1434_v38 = vpop.f32.mrf.mxu0 }
 0x2d7   :  { %v1548_v17 = vpop.f32.mrf.mxu1 }
 0x2d8   :  { %v2070_v28 = vpack.c.bf16 %v1548_v17, %v1434_v38 }
 0x2da   :  { %v3552_v42 = vunpack.c.l.b16 %v2070_v28  ;;  %v3850_v26 = vunpack.c.h.b16 %v2070_v28  ;;  %v1047_v58 = vpop.f32.mrf.mxu3  ;;  %v15829_v11 = vpop.f32.mrf.mxu2 }
 0x2db   :  { %22137 = vst [vmem:[#allocation79_spill] sm:$0xff] %v15829_v11  ;;  %v15832_v2 = vpack.c.bf16 %v1047_v58, %v15428_v52 }
 0x2dc   :  { %v15834_v7 = vpack.c.b16 %v3850_v26, %v3849_v8  ;;  %v15836_v4 = vpack.c.b16 %v3552_v42, %v3551_v57 }
 0x2dd   :  { %v2565_v38 = vunpack.c.l.b16 %v15832_v2 }
 0x2de   :  { %22138 = vst [vmem:[#allocation80_spill] sm:$0xff] %v15834_v7  ;;  %v1437_v22 = vpop.f32.mrf.mxu0 }
 0x2df   :  { %22139 = vst [vmem:[#allocation81_spill] sm:$0xff] %v15836_v4  ;;  %v1551_v17 = vpop.f32.mrf.mxu1  ;;  %10847 = vmatmul.msk.bf16.gmra.mxu3 %vm833_vm0, %v15430_v56  ;;  %10869 = vmatmul.msk.bf16.gmra.mxu2 %vm833_vm0, %v15444_v12  ;;  %v15844_v32 = vpack.c.b16 %v2565_v38, %v2564_v14 }
 0x2e0   :  { %v2075_v40 = vpack.c.bf16 %v1551_v17, %v1437_v22 }
 0x2e1   :  { %10982 = vmatmul.msk.bf16.gmra.mxu0 %vm833_vm0, %v15194_v61 }
 0x2e2   :  { %v1050_v52 = vpop.f32.mrf.mxu3  ;;  %v15848_v58 = vpop.f32.mrf.mxu2  ;;  %v3553_v8 = vunpack.c.l.b16 %v2075_v40  ;;  %v3851_v42 = vunpack.c.h.b16 %v2075_v40 }
 0x2e3   :  { %22140 = vst [vmem:[#allocation82_spill] sm:$0xff] %v15848_v58  ;;  %v1983_v22 = vpack.c.bf16 %v1050_v52, %v15438_v60 }
 0x2e5   :  { %v2566_v48 = vunpack.c.l.b16 %v1983_v22 }
 0x2e6   :  { %v1439_v26 = vpop.f32.mrf.mxu0 }
 0x2e7   :  { %v1553_v28 = vpop.f32.mrf.mxu1 }
 0x2e8   :  { %v2080_v57 = vpack.c.bf16 %v1553_v28, %v1439_v26 }
 0x2ea   :  { %v3554_v17 = vunpack.c.l.b16 %v2080_v57  ;;  %v3852_v4 = vunpack.c.h.b16 %v2080_v57  ;;  %v1052_v7 = vpop.f32.mrf.mxu3  ;;  %v15851_v11 = vpop.f32.mrf.mxu2 }
 0x2eb   :  { %22141 = vst [vmem:[#allocation83_spill] sm:$0xff] %v15851_v11  ;;  %v1988_v46 = vpack.c.bf16 %v1052_v7, %v15442_v9 }
 0x2ec   :  { %v15853_v14 = vpack.c.b16 %v3554_v17, %v3553_v8  ;;  %v15855_v38 = vpack.c.b16 %v3852_v4, %v3851_v42 }
 0x2ed   :  { %v2567_v58 = vunpack.c.l.b16 %v1988_v46 }
 0x2ee   :  { %22142 = vst [vmem:[#allocation84_spill] sm:$0xff] %v15853_v14  ;;  %v1442_v55 = vpop.f32.mrf.mxu0 }
 0x2ef   :  { %22143 = vst [vmem:[#allocation85_spill] sm:$0xff] %v15855_v38  ;;  %v1556_v21 = vpop.f32.mrf.mxu1  ;;  %10848 = vmatmul.msk.bf16.gmra.mxu3 %vm833_vm0, %v15444_v12  ;;  %10870 = vmatmul.msk.bf16.gmra.mxu2 %vm833_vm0, %v15458_v35  ;;  %v15862_v60 = vpack.c.b16 %v2567_v58, %v2566_v48 }
 0x2f0   :  { %v2085_v26 = vpack.c.bf16 %v1556_v21, %v1442_v55 }
 0x2f1   :  { %10983 = vmatmul.msk.bf16.gmra.mxu0 %vm833_vm0, %v15212_v15 }
 0x2f2   :  { %v1055_v4 = vpop.f32.mrf.mxu3  ;;  %v15866_v40 = vpop.f32.mrf.mxu2  ;;  %v3555_v28 = vunpack.c.l.b16 %v2085_v26  ;;  %v3853_v57 = vunpack.c.h.b16 %v2085_v26  ;;  %v2295_v26 = vunpack.c.h.b16 %v1988_v46  ;;  %v2293_v46 = vunpack.c.h.b16 %v15832_v2 }
 0x2f3   :  { %22144 = vst [vmem:[#allocation86_spill] sm:$0xff] %v15866_v40  ;;  %v1993_v21 = vpack.c.bf16 %v1055_v4, %v15452_v18 }
 0x2f5   :  { %v2296_v38 = vunpack.c.h.b16 %v1993_v21  ;;  %v2568_v40 = vunpack.c.l.b16 %v1993_v21 }
 0x2f6   :  { %v1444_v9 = vpop.f32.mrf.mxu0 }
 0x2f7   :  { %v1558_v7 = vpop.f32.mrf.mxu1 }
 0x2f8   :  { %v2090_v52 = vpack.c.bf16 %v1558_v7, %v1444_v9 }
 0x2fa   :  { %v3556_v55 = vunpack.c.l.b16 %v2090_v52  ;;  %v3854_v8 = vunpack.c.h.b16 %v2090_v52  ;;  %v1057_v42 = vpop.f32.mrf.mxu3  ;;  %v15869_v17 = vpop.f32.mrf.mxu2 }
 0x2fb   :  { %v1998_v48 = vpack.c.bf16 %v1057_v42, %v15456_v30  ;;  %v2294_v30 = vunpack.c.h.b16 %v1983_v22  ;;  %v2290_v22 = vunpack.c.h.b16 %v15803_v34 }
 0x2fc   :  { %v15872_v58 = vpack.c.b16 %v3556_v55, %v3555_v28  ;;  %v15874_v14 = vpack.c.b16 %v3854_v8, %v3853_v57  ;;  %v2291_v57 = vunpack.c.h.b16 %v15808_v20 }
 0x2fd   :  { %v2297_v11 = vunpack.c.h.b16 %v1998_v48  ;;  %v2569_v16 = vunpack.c.l.b16 %v1998_v48 }
 0x2fe   :  { %22145 = vst [vmem:[#allocation87_spill] sm:$0xff] %v15872_v58  ;;  %v1447_v9 = vpop.f32.mrf.mxu0 }
 0x2ff   :  { %22146 = vst [vmem:[#allocation88_spill] sm:$0xff] %v15874_v14  ;;  %v1561_v7 = vpop.f32.mrf.mxu1  ;;  %v2331_v50 = vpack.c.b16 %v2297_v11, %v2296_v38  ;;  %v15876_v18 = vpack.c.b16 %v2569_v16, %v2568_v40  ;;  %10849 = vmatmul.msk.bf16.gmra.mxu3 %vm833_vm0, %v15458_v35  ;;  %10871 = vmatmul.msk.bf16.gmra.mxu2 %vm833_vm0, %v15472_v62  ;;  %v2292_v16 = vunpack.c.h.b16 %v15827_v23 }
 0x300   :  { %v2095_v4 = vpack.c.bf16 %v1561_v7, %v1447_v9  ;;  %v2330_v11 = vpack.c.b16 %v2295_v26, %v2294_v30  ;;  %v2328_v26 = vpack.c.b16 %v2291_v57, %v2290_v22 }
 0x301   :  { %10984 = vmatmul.msk.bf16.gmra.mxu0 %vm833_vm0, %v15230_v33  ;;  %2385 = vmatpush.bf16.msra.mxu1 %v2331_v50  ;;  %v2329_v55 = vpack.c.b16 %v2293_v46, %v2292_v16 }
 0x302   :  { %v1060_v52 = vpop.f32.mrf.mxu3  ;;  %v15884_v28 = vpop.f32.mrf.mxu2  ;;  %v3557_v8 = vunpack.c.l.b16 %v2095_v4  ;;  %v3855_v42 = vunpack.c.h.b16 %v2095_v4 }
 0x303   :  { %v2003_v50 = vpack.c.bf16 %v1060_v52, %v15466_v41 }
 0x305   :  { %2386 = vmatpush.bf16.msra.mxu1 %v2330_v11  ;;  %v2298_v46 = vunpack.c.h.b16 %v2003_v50  ;;  %v2570_v11 = vunpack.c.l.b16 %v2003_v50 }
 0x306   :  { %v1449_v38 = vpop.f32.mrf.mxu0 }
 0x307   :  { %v1563_v40 = vpop.f32.mrf.mxu1 }
 0x308   :  { %v2100_v21 = vpack.c.bf16 %v1563_v40, %v1449_v38 }
 0x309   :  { %2387 = vmatpush.bf16.msra.mxu1 %v2329_v55  ;;  %v14154_v55 = vld [vmem:[%s22023_s3 + $0x80] sm:$0xf0] }
 0x30a   :  { %v3558_v48 = vunpack.c.l.b16 %v2100_v21  ;;  %v3856_v9 = vunpack.c.h.b16 %v2100_v21  ;;  %v1062_v2 = vpop.f32.mrf.mxu3  ;;  %v15891_v7 = vpop.f32.mrf.mxu2  ;;  %v10802_v21 = vld [vmem:[%s22023_s3 + $0x60] sm:$0xf] }
 0x30b   :  { %v2008_v23 = vpack.c.bf16 %v1062_v2, %v15470_v54 }
 0x30c   :  { %v15894_v30 = vpack.c.b16 %v3558_v48, %v3557_v8  ;;  %v15896_v20 = vpack.c.b16 %v3856_v9, %v3855_v42  ;;  %v10803_v42 = vor.u32 %v14154_v55, %v10802_v21 }
 0x30d   :  { %v2299_v34 = vunpack.c.h.b16 %v2008_v23  ;;  %v2571_v16 = vunpack.c.l.b16 %v2008_v23  ;;  %2388 = vmatpush.bf16.msra.mxu1 %v2328_v26  ;;  %v14145_v26 = vld [vmem:[%s22023_s3 + $0x38] sm:$0xf0] }
 0x30e   :  { %22147 = vst [vmem:[#allocation89_spill] sm:$0xff] %v15894_v30  ;;  %v1452_v4 = vpop.f32.mrf.mxu0  ;;  %1587 = vmatpush.bf16.msra.mxu2 %v10803_v42 }
 0x30f   :  { %22148 = vst [vmem:[#allocation90_spill] sm:$0xff] %v15896_v20  ;;  %v1566_v41 = vpop.f32.mrf.mxu1  ;;  %10850 = vmatmul.msk.bf16.gmra.mxu3 %vm833_vm0, %v15472_v62  ;;  %10872 = vmatmul.msk.bf16.gmra.mxu2 %vm833_vm0, %v15498_v39  ;;  %v15902_v54 = vpack.c.b16 %v2299_v34, %v2298_v46  ;;  %v15904_v38 = vpack.c.b16 %v2571_v16, %v2570_v11 }
 0x310   :  { %v2105_v52 = vpack.c.bf16 %v1566_v41, %v1452_v4 }
 0x311   :  { %10985 = vmatmul.msk.bf16.gmra.mxu0 %vm833_vm0, %v15248_v51  ;;  %2389 = vmatpush.bf16.msra.mxu1 %v15794_v6 }
 0x312   :  { %v1065_v40 = vpop.f32.mrf.mxu3  ;;  %v15909_v57 = vpop.f32.mrf.mxu2  ;;  %v3559_v48 = vunpack.c.l.b16 %v2105_v52  ;;  %v3857_v6 = vunpack.c.h.b16 %v2105_v52 }
 0x313   :  { %v2013_v9 = vpack.c.bf16 %v1065_v40, %v15480_v3 }
 0x315   :  { %2390 = vmatpush.bf16.msra.mxu1 %v15772_v45  ;;  %v10766_v45 = vld [vmem:[%s22023_s3 + $0x18] sm:$0xf]  ;;  %v2572_v41 = vunpack.c.l.b16 %v2013_v9 }
 0x316   :  { %v1454_v22 = vpop.f32.mrf.mxu0  ;;  %v10767_v34 = vor.u32 %v14145_v26, %v10766_v45 }
 0x317   :  { %v1568_v8 = vpop.f32.mrf.mxu1 }
 0x318   :  { %v2110_v50 = vpack.c.bf16 %v1568_v8, %v1454_v22  ;;  %1588 = vmatpush.bf16.msra.mxu2 %v10767_v34 }
 0x319   :  { %2391 = vmatpush.bf16.msra.mxu1 %v15750_v10  ;;  %v2300_v10 = vunpack.c.h.b16 %v2013_v9 }
 0x31a   :  { %v3560_v2 = vunpack.c.l.b16 %v2110_v50  ;;  %v3858_v23 = vunpack.c.h.b16 %v2110_v50  ;;  %v1067_v46 = vpop.f32.mrf.mxu3  ;;  %v15926_v11 = vpop.f32.mrf.mxu2 }
 0x31b   :  { %v2018_v16 = vpack.c.bf16 %v1067_v46, %v15496_v29 }
 0x31c   :  { %v15929_v4 = vpack.c.b16 %v3560_v2, %v3559_v48  ;;  %v15931_v3 = vpack.c.b16 %v3858_v23, %v3857_v6  ;;  %v10752_v48 = vld [vmem:[%s22023_s3 + $0x2c] sm:$0xf0] }
 0x31d   :  { %v2301_v52 = vunpack.c.h.b16 %v2018_v16  ;;  %v2573_v40 = vunpack.c.l.b16 %v2018_v16  ;;  %2392 = vmatpush.bf16.msra.mxu1 %v15716_v49  ;;  %v14139_v49 = vld [vmem:[%s22023_s3 + $0xc] sm:$0xf] }
 0x31e   :  { %22149 = vst [vmem:[#allocation91_spill] sm:$0xff] %v15929_v4  ;;  %v1457_v21 = vpop.f32.mrf.mxu0  ;;  %v10755_v2 = vor.u32 %v14139_v49, %v10752_v48 }
 0x31f   :  { %22150 = vst [vmem:[#allocation92_spill] sm:$0xff] %v15931_v3  ;;  %v1571_v55 = vpop.f32.mrf.mxu1  ;;  %10851 = vmatmul.msk.bf16.gmra.mxu3 %vm833_vm0, %v15498_v39  ;;  %10873 = vmatmul.msk.bf16.gmra.mxu2 %vm833_vm0, %v15524_v25  ;;  %v15938_v29 = vpack.c.b16 %v2301_v52, %v2300_v10  ;;  %v15940_v8 = vpack.c.b16 %v2573_v40, %v2572_v41 }
 0x320   :  { %v2115_v22 = vpack.c.bf16 %v1571_v55, %v1457_v21  ;;  %1246 = vmatpush.bf16.msra.mxu3 %v10755_v2 }
 0x321   :  { %10986 = vmatmul.msk.bf16.gmra.mxu0 %vm833_vm0, %v15266_v5 }
 0x322   :  { %v1070_v42 = vpop.f32.mrf.mxu3  ;;  %v15944_v50 = vpop.f32.mrf.mxu2  ;;  %v3561_v45 = vunpack.c.l.b16 %v2115_v22  ;;  %v3859_v26 = vunpack.c.h.b16 %v2115_v22 }
 0x323   :  { %v2023_v46 = vpack.c.bf16 %v1070_v42, %v15506_v47 }
 0x325   :  { %v2302_v55 = vunpack.c.h.b16 %v2023_v46  ;;  %v2574_v14 = vunpack.c.l.b16 %v2023_v46 }
 0x326   :  { %v1459_v6 = vpop.f32.mrf.mxu0 }
 0x327   :  { %v1573_v9 = vpop.f32.mrf.mxu1 }
 0x328   :  { %v2120_v23 = vpack.c.bf16 %v1573_v9, %v1459_v6 }
 0x32a   :  { %v3562_v34 = vunpack.c.l.b16 %v2120_v23  ;;  %v3860_v16 = vunpack.c.h.b16 %v2120_v23  ;;  %v1072_v10 = vpop.f32.mrf.mxu3  ;;  %v15953_v41 = vpop.f32.mrf.mxu2 }
 0x32b   :  { %22151 = vst [vmem:[#allocation93_spill] sm:$0xff] %v15953_v41  ;;  %v2028_v52 = vpack.c.bf16 %v1072_v10, %v15522_v13 }
 0x32c   :  { %v15956_v40 = vpack.c.b16 %v3562_v34, %v3561_v45  ;;  %v15958_v21 = vpack.c.b16 %v3860_v16, %v3859_v26 }
 0x32d   :  { %v2303_v49 = vunpack.c.h.b16 %v2028_v52  ;;  %v2575_v48 = vunpack.c.l.b16 %v2028_v52 }
 0x32e   :  { %22152 = vst [vmem:[#allocation94_spill] sm:$0xff] %v15956_v40  ;;  %v1462_v6 = vpop.f32.mrf.mxu0 }
 0x32f   :  { %22153 = vst [vmem:[#allocation95_spill] sm:$0xff] %v15958_v21  ;;  %v1576_v9 = vpop.f32.mrf.mxu1  ;;  %10852 = vmatmul.msk.bf16.gmra.mxu3 %vm833_vm0, %v15524_v25  ;;  %10874 = vmatmul.msk.bf16.gmra.mxu2 %vm833_vm0, %v15538_v0  ;;  %v15964_v47 = vpack.c.b16 %v2303_v49, %v2302_v55  ;;  %v15966_v13 = vpack.c.b16 %v2575_v48, %v2574_v14 }
 0x330   :  { %v2125_v22 = vpack.c.bf16 %v1576_v9, %v1462_v6 }
 0x331   :  { %10987 = vmatmul.msk.bf16.gmra.mxu0 %vm833_vm0, %v15284_v24 }
 0x332   :  { %v1075_v42 = vpop.f32.mrf.mxu3  ;;  %v15970_v2 = vpop.f32.mrf.mxu2  ;;  %v3563_v46 = vunpack.c.l.b16 %v2125_v22  ;;  %v3861_v34 = vunpack.c.h.b16 %v2125_v22 }
 0x333   :  { %22154 = vst [vmem:[#allocation96_spill] sm:$0xff] %v15970_v2  ;;  %v2033_v16 = vpack.c.bf16 %v1075_v42, %v15532_v31  ;;  %v22172_v2 = vld [vmem:[#allocation28_spill] sm:$0xff] }
 0x335   :  { %v2304_v9 = vunpack.c.h.b16 %v2033_v16  ;;  %v2576_v20 = vunpack.c.l.b16 %v2033_v16 }
 0x336   :  { %v1464_v23 = vpop.f32.mrf.mxu0 }
 0x337   :  { %v1578_v45 = vpop.f32.mrf.mxu1 }
 0x338   :  { %v2130_v26 = vpack.c.bf16 %v1578_v45, %v1464_v23 }
 0x33a   :  { %v3564_v10 = vunpack.c.l.b16 %v2130_v26  ;;  %v3862_v52 = vunpack.c.h.b16 %v2130_v26  ;;  %v1077_v6 = vpop.f32.mrf.mxu3  ;;  %v15973_v55 = vpop.f32.mrf.mxu2 }
 0x33b   :  { %22155 = vst [vmem:[#allocation97_spill] sm:$0xff] %v15973_v55  ;;  %v2038_v14 = vpack.c.bf16 %v1077_v6, %v15536_v53 }
 0x33c   :  { %v15976_v49 = vpack.c.b16 %v3564_v10, %v3563_v46  ;;  %v15978_v48 = vpack.c.b16 %v3862_v52, %v3861_v34 }
 0x33d   :  { %v2305_v3 = vunpack.c.h.b16 %v2038_v14  ;;  %v2577_v21 = vunpack.c.l.b16 %v2038_v14 }
 0x33e   :  { %22156 = vst [vmem:[#allocation98_spill] sm:$0xff] %v15976_v49  ;;  %v1818_v23 = vpop.f32.mrf.mxu0 }
 0x33f   :  { %22157 = vst [vmem:[#allocation99_spill] sm:$0xff] %v15978_v48  ;;  %10853 = vmatmul.msk.bf16.gmra.mxu3 %vm833_vm0, %v15538_v0  ;;  %10938 = vmatmul.msk.bf16.vlgmr.msra.gmra.mxu2 %vm833_vm0, %v15158_v27  ;;  %v15984_v31 = vpack.c.b16 %v2305_v3, %v2304_v9  ;;  %v15986_v22 = vpack.c.b16 %v2577_v21, %v2576_v20 }
 0x340   :  { %v1927_v45 = vpack.c.bf16 %v1818_v23, %v1818_v23 }
 0x341   :  { %10988 = vmatmul.msk.bf16.gmra.mxu0 %vm833_vm0, %v15302_v43 }
 0x342   :  { %v15990_v53 = vpop.f32.mrf.mxu3  ;;  %v15992_v42 = vpop.f32.mrf.mxu2  ;;  %v15994_v34 = vunpack.c.l.b16 %v1927_v45 }
 0x343   :  { %22158 = vst [vmem:[#allocation100_spill] sm:$0xff] %v15992_v42 }
 0x344   :  { %22159 = vst [vmem:[#allocation101_spill] sm:$0xff] %v15994_v34 }
 0x346   :  { %v1820_v26 = vpop.f32.mrf.mxu0 }
 0x347   :  { %v1932_v46 = vpack.c.bf16 %v1820_v26, %v1820_v26 }
 0x349   :  { %v15996_v16 = vunpack.c.l.b16 %v1932_v46 }
 0x34a   :  { %v15998_v10 = vpop.f32.mrf.mxu3  ;;  %v16000_v3 = vpop.f32.mrf.mxu2 }
 0x34b   :  { %22160 = vst [vmem:[#allocation102_spill] sm:$0xff] %v15996_v16 }
 0x34c   :  { %22161 = vst [vmem:[#allocation103_spill] sm:$0xff] %v16000_v3 }
 0x34e   :  { %v1823_v21 = vpop.f32.mrf.mxu0 }
 0x34f   :  { %10875 = vmatmul.msk.bf16.vlgmr.msra.gmra.mxu3 %vm833_vm0, %v15158_v27  ;;  %10939 = vmatmul.msk.bf16.gmra.mxu2 %vm833_vm0, %v15176_v44  ;;  %v1937_v14 = vpack.c.bf16 %v1823_v21, %v1823_v21 }
 0x351   :  { %10989 = vmatmul.msk.bf16.gmra.mxu0 %vm833_vm0, %v15324_v1  ;;  %v16012_v45 = vunpack.c.l.b16 %v1937_v14 }
 0x352   :  { %v1085_v52 = vpop.f32.mrf.mxu3  ;;  %v16010_v6 = vpop.f32.mrf.mxu2 }
 0x353   :  { %22162 = vst [vmem:[#allocation104_spill] sm:$0xff] %v16010_v6 }
 0x354   :  { %22163 = vst [vmem:[#allocation105_spill] sm:$0xff] %v16012_v45 }
 0x356   :  { %v1825_v9 = vpop.f32.mrf.mxu0 }
 0x357   :  { %v1942_v23 = vpack.c.bf16 %v1825_v9, %v1825_v9 }
 0x359   :  { %v16014_v26 = vunpack.c.l.b16 %v1942_v23 }
 0x35a   :  { %v1087_v46 = vpop.f32.mrf.mxu3  ;;  %v16016_v20 = vpop.f32.mrf.mxu2 }
 0x35b   :  { %22164 = vst [vmem:[#allocation106_spill] sm:$0xff] %v16014_v26 }
 0x35c   :  { %22165 = vst [vmem:[#allocation107_spill] sm:$0xff] %v16016_v20 }
 0x35e   :  { %v1828_v16 = vpop.f32.mrf.mxu0 }
 0x35f   :  { %10876 = vmatmul.msk.bf16.gmra.mxu3 %vm833_vm0, %v15176_v44  ;;  %10940 = vmatmul.msk.bf16.gmra.mxu2 %vm833_vm0, %v15194_v61  ;;  %v1947_v9 = vpack.c.bf16 %v1828_v16, %v1828_v16  ;;  %v14169_v16 = vld [vmem:[%s22025_s5 + $0x74] sm:$0xf0] }
 0x361   :  { %10990 = vmatmul.msk.bf16.gmra.mxu0 %vm833_vm0, %v15370_v37  ;;  %v16028_v58 = vunpack.c.l.b16 %v1947_v9 }
 0x362   :  { %v1090_v21 = vpop.f32.mrf.mxu3  ;;  %v16026_v14 = vpop.f32.mrf.mxu2 }
 0x363   :  { %22166 = vst [vmem:[#allocation108_spill] sm:$0xff] %v16026_v14  ;;  %v22176_v14 = vld [vmem:[#allocation29_spill] sm:$0xff] }
 0x364   :  { %22167 = vst [vmem:[#allocation109_spill] sm:$0xff] %v16028_v58 }
 0x366   :  { %v1830_v23 = vpop.f32.mrf.mxu0 }
 0x367   :  { %v1952_v48 = vpack.c.bf16 %v1830_v23, %v1830_v23 }
 0x369   :  { %v16030_v30 = vunpack.c.l.b16 %v1952_v48  ;;  %v11021_v48 = vld [vmem:[%s22025_s5 + $0x6c] sm:$0xf] }
 0x36a   :  { %v1092_v34 = vpop.f32.mrf.mxu3  ;;  %v16032_v45 = vpop.f32.mrf.mxu2  ;;  %v11022_v26 = vor.u32 %v14169_v16, %v11021_v48 }
 0x36b   :  { %22168 = vst [vmem:[#allocation110_spill] sm:$0xff] %v16030_v30 }
 0x36c   :  { %22169 = vst [vmem:[#allocation111_spill] sm:$0xff] %v16032_v45  ;;  %2393 = vmatmul.bf16.vlgmr.msra.gmra.mxu1 %v11022_v26  ;;  %v22175_v45 = vld [vmem:[#allocation25_spill] sm:$0xff]  ;;  %v22177_v26 = vld [vmem:[#allocation24_spill] sm:$0xff] }
 0x36d   :  { %v2068_v20 = vpack.c.bf16 %v1092_v34, %v22175_v45 }
 0x36e   :  { %v1833_v4 = vpop.f32.mrf.mxu0 }
 0x36f   :  { %10877 = vmatmul.msk.bf16.gmra.mxu3 %vm833_vm0, %v15194_v61  ;;  %10941 = vmatmul.msk.bf16.gmra.mxu2 %vm833_vm0, %v15212_v15  ;;  %v1957_v58 = vpack.c.bf16 %v1833_v4, %v1833_v4  ;;  %v2063_v4 = vpack.c.bf16 %v1090_v21, %v22177_v26  ;;  %v2583_v34 = vunpack.c.l.b16 %v2068_v20 }
 0x371   :  { %10991 = vmatmul.msk.bf16.gmra.mxu0 %vm833_vm0, %v15392_v63  ;;  %v16050_v49 = vunpack.c.l.b16 %v1957_v58  ;;  %v2310_v21 = vunpack.c.h.b16 %v2063_v4 }
 0x372   :  { %v1095_v9 = vpop.f32.mrf.mxu3  ;;  %v16048_v23 = vpop.f32.mrf.mxu2 }
 0x373   :  { %22170 = vst [vmem:[#allocation112_spill] sm:$0xff] %v16048_v23  ;;  %v2073_v55 = vpack.c.bf16 %v1095_v9, %v22172_v2  ;;  %v22178_v2 = vld [vmem:[#allocation21_spill] sm:$0xff]  ;;  %v2311_v9 = vunpack.c.h.b16 %v2068_v20 }
 0x374   :  { %22171 = vst [vmem:[#allocation113_spill] sm:$0xff] %v16050_v49 }
 0x375   :  { %v2312_v16 = vunpack.c.h.b16 %v2073_v55 }
 0x376   :  { %v1835_v30 = vpop.f32.mrf.mxu0 }
 0x377   :  { %v1962_v40 = vpack.c.bf16 %v1835_v30, %v1835_v30  ;;  %v2584_v30 = vunpack.c.l.b16 %v2073_v55  ;;  %v14172_v55 = vld [vmem:[%s22025_s5 + $0x8c] sm:$0xf0] }
 0x379   :  { %v16053_v42 = vunpack.c.l.b16 %v1962_v40  ;;  %v2058_v40 = vpack.c.bf16 %v1087_v46, %v22178_v2  ;;  %v2582_v46 = vunpack.c.l.b16 %v2063_v4  ;;  %v22182_v2 = vld [vmem:[#allocation16_spill] sm:$0xff] }
 0x37a   :  { %v1097_v3 = vpop.f32.mrf.mxu3  ;;  %v16055_v6 = vpop.f32.mrf.mxu2 }
 0x37b   :  { %22173 = vst [vmem:[#allocation28_spill] sm:$0xff] %v16053_v42  ;;  %v2078_v61 = vpack.c.bf16 %v1097_v3, %v22176_v14  ;;  %v22179_v3 = vld [vmem:[#allocation20_spill] sm:$0xff] }
 0x37c   :  { %22174 = vst [vmem:[#allocation114_spill] sm:$0xff] %v16055_v6  ;;  %v2053_v45 = vpack.c.bf16 %v1085_v52, %v22179_v3  ;;  %v22181_v52 = vld [vmem:[#allocation17_spill] sm:$0xff]  ;;  %v2043_v3 = vpack.c.bf16 %v15990_v53, %v22182_v2 }
 0x37d   :  { %v2313_v58 = vunpack.c.h.b16 %v2078_v61  ;;  %v2585_v23 = vunpack.c.l.b16 %v2078_v61  ;;  %v11033_v61 = vld [vmem:[%s22025_s5 + $0x84] sm:$0xf]  ;;  %v2048_v26 = vpack.c.bf16 %v15998_v10, %v22181_v52 }
 0x37e   :  { %v1838_v44 = vpop.f32.mrf.mxu0  ;;  %v11034_v20 = vor.u32 %v14172_v55, %v11033_v61  ;;  %v2308_v48 = vunpack.c.h.b16 %v2053_v45  ;;  %v2580_v4 = vunpack.c.l.b16 %v2053_v45  ;;  %v2306_v10 = vunpack.c.h.b16 %v2043_v3  ;;  %v22187_v45 = vld [vmem:[#allocation33_spill] sm:$0xff] }
 0x37f   :  { %v2339_v27 = vpack.c.b16 %v2313_v58, %v2312_v16  ;;  %v2611_v41 = vpack.c.b16 %v2585_v23, %v2584_v30  ;;  %10878 = vmatmul.msk.bf16.gmra.mxu3 %vm833_vm0, %v15212_v15  ;;  %10942 = vmatmul.msk.bf16.gmra.mxu2 %vm833_vm0, %v15230_v33  ;;  %v2309_v16 = vunpack.c.h.b16 %v2058_v40  ;;  %v2338_v30 = vpack.c.b16 %v2311_v9, %v2310_v21 }
 0x380   :  { %v2610_v58 = vpack.c.b16 %v2583_v34, %v2582_v46  ;;  %2398 = vmatmul.bf16.gmra.mxu1 %v11034_v20  ;;  %v1967_v49 = vpack.c.bf16 %v1838_v44, %v1838_v44  ;;  %v2307_v42 = vunpack.c.h.b16 %v2048_v26  ;;  %v2579_v55 = vunpack.c.l.b16 %v2048_v26 }
 0x381   :  { %10992 = vmatmul.msk.bf16.gmra.mxu0 %vm833_vm0, %v15402_v19  ;;  %2418 = vmatpush.bf16.msrb.mxu1 %v2339_v27  ;;  %v2581_v27 = vunpack.c.l.b16 %v2058_v40  ;;  %v2337_v61 = vpack.c.b16 %v2309_v16, %v2308_v48  ;;  %v22184_v40 = vld [vmem:[#allocation32_spill] sm:$0xff]  ;;  %v2578_v53 = vunpack.c.l.b16 %v2043_v3 }
 0x382   :  { %2688 = vmatpush.bf16.msrb.mxu2 %v2611_v41  ;;  %v1100_v14 = vpop.f32.mrf.mxu3  ;;  %v16076_v23 = vpop.f32.mrf.mxu2  ;;  %v16082_v52 = vunpack.c.l.b16 %v1967_v49  ;;  %v2336_v20 = vpack.c.b16 %v2307_v42, %v2306_v10 }
 0x383   :  { %22180 = vst [vmem:[#allocation25_spill] sm:$0xff] %v16076_v23  ;;  %v2609_v6 = vpack.c.b16 %v2581_v27, %v2580_v4  ;;  %v2083_v9 = vpack.c.bf16 %v1100_v14, %v22184_v40  ;;  %v2608_v26 = vpack.c.b16 %v2579_v55, %v2578_v53 }
 0x384   :  { %22183 = vst [vmem:[#allocation29_spill] sm:$0xff] %v16082_v52 }
 0x385   :  { %2419 = vmatpush.bf16.msrb.mxu1 %v2338_v30  ;;  %v2314_v16 = vunpack.c.h.b16 %v2083_v9  ;;  %v2586_v49 = vunpack.c.l.b16 %v2083_v9 }
 0x386   :  { %2689 = vmatpush.bf16.msrb.mxu2 %v2610_v58  ;;  %v1840_v41 = vpop.f32.mrf.mxu0  ;;  %v14175_v58 = vld [vmem:[%s22025_s5 + $0xa4] sm:$0xf0] }
 0x387   :  { %v1972_v23 = vpack.c.bf16 %v1840_v41, %v1840_v41 }
 0x389   :  { %v16085_v34 = vunpack.c.l.b16 %v1972_v23  ;;  %2420 = vmatpush.bf16.msrb.mxu1 %v2337_v61  ;;  %v11045_v23 = vld [vmem:[%s22025_s5 + $0x9c] sm:$0xf] }
 0x38a   :  { %2690 = vmatpush.bf16.msrb.mxu2 %v2609_v6  ;;  %v1102_v44 = vpop.f32.mrf.mxu3  ;;  %v16087_v21 = vpop.f32.mrf.mxu2  ;;  %v11046_v4 = vor.u32 %v14175_v58, %v11045_v23  ;;  %v14141_v58 = vld [vmem:[%s22023_s3 + $0x1c] sm:$0xf] }
 0x38b   :  { %22185 = vst [vmem:[#allocation24_spill] sm:$0xff] %v16085_v34  ;;  %v2088_v46 = vpack.c.bf16 %v1102_v44, %v22187_v45 }
 0x38c   :  { %22186 = vst [vmem:[#allocation21_spill] sm:$0xff] %v16087_v21 }
 0x38d   :  { %v2315_v30 = vunpack.c.h.b16 %v2088_v46  ;;  %v2587_v27 = vunpack.c.l.b16 %v2088_v46  ;;  %2421 = vmatpush.bf16.msrb.mxu1 %v2336_v20 }
 0x38e   :  { %2691 = vmatpush.bf16.msrb.mxu2 %v2608_v26  ;;  %v1843_v14 = vpop.f32.mrf.mxu0 }
 0x38f   :  { %10879 = vmatmul.msk.bf16.gmra.mxu3 %vm833_vm0, %v15230_v33  ;;  %10943 = vmatmul.msk.bf16.gmra.mxu2 %vm833_vm0, %v15248_v51  ;;  %v16096_v6 = vpack.c.b16 %v2315_v30, %v2314_v16  ;;  %v16098_v42 = vpack.c.b16 %v2587_v27, %v2586_v49  ;;  %v1977_v41 = vpack.c.bf16 %v1843_v14, %v1843_v14  ;;  %v14150_v49 = vld [vmem:[%s22023_s3 + $0x64] sm:$0xf]  ;;  %v10804_v30 = vld [vmem:[%s22023_s3 + $0x84] sm:$0xf0]  ;;  %v22196_v27 = vld [vmem:[#allocation48_spill] sm:$0xff] }
 0x390   :  { %2403 = vmatmul.bf16.gmra.mxu1 %v11046_v4  ;;  %v10807_v14 = vor.u32 %v14150_v49, %v10804_v30  ;;  %v10768_v4 = vld [vmem:[%s22023_s3 + $0x3c] sm:$0xf0] }
 0x391   :  { %10993 = vmatmul.msk.bf16.gmra.mxu0 %vm833_vm0, %v15416_v36  ;;  %2422 = vmatpush.bf16.msrb.mxu1 %v15984_v31  ;;  %v16116_v55 = vunpack.c.l.b16 %v1977_v41  ;;  %v16173_v41 = vld [vmem:[%s22025_s5 + $0xcc] sm:$0x77] }
 0x392   :  { %2692 = vmatpush.bf16.msrb.mxu2 %v15986_v22  ;;  %v16110_v2 = vpop.f32.mrf.mxu3  ;;  %v16112_v3 = vpop.f32.mrf.mxu2  ;;  %1701 = vmatpush.bf16.msrb.mxu3 %v10807_v14 }
 0x393   :  { %22188 = vst [vmem:[#allocation20_spill] sm:$0xff] %v16116_v55 }
 0x395   :  { %2423 = vmatpush.bf16.msrb.mxu1 %v15964_v47 }
 0x396   :  { %2693 = vmatpush.bf16.msrb.mxu2 %v15966_v13  ;;  %v1845_v31 = vpop.f32.mrf.mxu0 }
 0x397   :  { %v1982_v61 = vpack.c.bf16 %v1845_v31, %v1845_v31  ;;  %v10771_v31 = vor.u32 %v14141_v58, %v10768_v4 }
 0x399   :  { %v16118_v10 = vunpack.c.l.b16 %v1982_v61  ;;  %2424 = vmatpush.bf16.msrb.mxu1 %v15938_v29  ;;  %v11057_v29 = vld [vmem:[%s22025_s5 + $0xb4] sm:$0xf]  ;;  %v2212_v61 = vunpack.c.l.b16 %v16173_v41  ;;  %1702 = vmatpush.bf16.msrb.mxu3 %v10771_v31  ;;  %v11023_v31 = vld [vmem:[%s22025_s5 + $0x78] sm:$0xf0] }
 0x39a   :  { %2694 = vmatpush.bf16.msrb.mxu2 %v15940_v8  ;;  %v16122_v22 = vpop.f32.mrf.mxu3  ;;  %v16124_v40 = vpop.f32.mrf.mxu2 }
 0x39b   :  { %22189 = vst [vmem:[#allocation17_spill] sm:$0xff] %v16118_v10  ;;  %v22199_v10 = vld [vmem:[#allocation50_spill] sm:$0xff] }
 0x39d   :  { %2425 = vmatpush.bf16.msrb.mxu1 %v15902_v54  ;;  %v14178_v54 = vld [vmem:[%s22025_s5 + $0xbc] sm:$0xf0] }
 0x39e   :  { %2695 = vmatpush.bf16.msrb.mxu2 %v15904_v38  ;;  %v1848_v47 = vpop.f32.mrf.mxu0  ;;  %v11058_v13 = vor.u32 %v14178_v54, %v11057_v29  ;;  %v2227_v54 = vpack.c.b16 %v2212_v61, %v2212_v61 }
 0x39f   :  { %10880 = vmatmul.msk.bf16.gmra.mxu3 %vm833_vm0, %v15248_v51  ;;  %10944 = vmatmul.msk.bf16.gmra.mxu2 %vm833_vm0, %v15266_v5  ;;  %v1987_v53 = vpack.c.bf16 %v1848_v47, %v1848_v47 }
 0x3a0   :  { %2408 = vmatmul.bf16.gmra.mxu1 %v11058_v13 }
 0x3a1   :  { %10994 = vmatmul.msk.bf16.gmra.mxu0 %vm833_vm0, %v15430_v56  ;;  %v16146_v46 = vunpack.c.l.b16 %v1987_v53 }
 0x3a2   :  { %v16142_v8 = vpop.f32.mrf.mxu3  ;;  %v16144_v38 = vpop.f32.mrf.mxu2 }
 0x3a3   :  { %22190 = vst [vmem:[#allocation16_spill] sm:$0xff] %v16146_v46 }
 0x3a6   :  { %v1850_v44 = vpop.f32.mrf.mxu0 }
 0x3a7   :  { %v1992_v45 = vpack.c.bf16 %v1850_v44, %v1850_v44 }
 0x3a9   :  { %v16148_v20 = vunpack.c.l.b16 %v1992_v45 }
 0x3aa   :  { %v1112_v26 = vpop.f32.mrf.mxu3  ;;  %v16150_v16 = vpop.f32.mrf.mxu2 }
 0x3ab   :  { %22191 = vst [vmem:[#allocation32_spill] sm:$0xff] %v16148_v20 }
 0x3ae   :  { %v1853_v23 = vpop.f32.mrf.mxu0 }
 0x3af   :  { %10881 = vmatmul.msk.bf16.gmra.mxu3 %vm833_vm0, %v15266_v5  ;;  %10945 = vmatmul.msk.bf16.gmra.mxu2 %vm833_vm0, %v15284_v24  ;;  %v1997_v13 = vpack.c.bf16 %v1853_v23, %v1853_v23  ;;  %v14168_v23 = vld [vmem:[%s22025_s5 + $0x70] sm:$0xf] }
 0x3b0   :  { %2413 = vmatmul.bf16.gmra.mxu1 %v2227_v54 }
 0x3b1   :  { %10995 = vmatmul.msk.bf16.gmra.mxu0 %vm833_vm0, %v15444_v12  ;;  %v16180_v45 = vunpack.c.l.b16 %v1997_v13  ;;  %v11026_v13 = vor.u32 %v14168_v23, %v11023_v31 }
 0x3b2   :  { %v1115_v47 = vpop.f32.mrf.mxu3  ;;  %v16178_v29 = vpop.f32.mrf.mxu2 }
 0x3b3   :  { %22192 = vst [vmem:[#allocation33_spill] sm:$0xff] %v16180_v45  ;;  %v22200_v45 = vld [vmem:[#allocation45_spill] sm:$0xff] }
 0x3b6   :  { %v1855_v53 = vpop.f32.mrf.mxu0 }
 0x3b7   :  { %v2002_v44 = vpack.c.bf16 %v1855_v53, %v1855_v53 }
 0x3b9   :  { %v16182_v49 = vunpack.c.l.b16 %v2002_v44 }
 0x3ba   :  { %v1117_v30 = vpop.f32.mrf.mxu3  ;;  %v16184_v14 = vpop.f32.mrf.mxu2 }
 0x3bb   :  { %22193 = vst [vmem:[#allocation115_spill] sm:$0xff] %v16182_v49  ;;  %v2118_v23 = vpack.c.bf16 %v1117_v30, %v22200_v45  ;;  %v22203_v45 = vld [vmem:[#allocation40_spill] sm:$0xff] }
 0x3bc   :  { %v2103_v30 = vpack.c.bf16 %v16142_v8, %v22203_v45 }
 0x3bd   :  { %v2593_v20 = vunpack.c.l.b16 %v2118_v23 }
 0x3be   :  { %v1858_v4 = vpop.f32.mrf.mxu0 }
 0x3bf   :  { %10882 = vmatmul.msk.bf16.gmra.mxu3 %vm833_vm0, %v15284_v24  ;;  %10946 = vmatmul.msk.bf16.gmra.mxu2 %vm833_vm0, %v15302_v43  ;;  %v2007_v53 = vpack.c.bf16 %v1858_v4, %v1858_v4 }
 0x3c0   :  { %2426 = vmatmul.bf16.vlgmr.msrb.gmra.mxu1 %v11026_v13 }
 0x3c1   :  { %10996 = vmatmul.msk.bf16.gmra.mxu0 %vm833_vm0, %v15458_v35  ;;  %v16202_v9 = vunpack.c.l.b16 %v2007_v53  ;;  %v22201_v53 = vld [vmem:[#allocation44_spill] sm:$0xff] }
 0x3c2   :  { %v1120_v61 = vpop.f32.mrf.mxu3  ;;  %v16200_v54 = vpop.f32.mrf.mxu2  ;;  %v2113_v49 = vpack.c.bf16 %v1115_v47, %v22201_v53 }
 0x3c3   :  { %22194 = vst [vmem:[#allocation116_spill] sm:$0xff] %v16200_v54  ;;  %v2123_v58 = vpack.c.bf16 %v1120_v61, %v22196_v27  ;;  %v2321_v61 = vunpack.c.h.b16 %v2118_v23 }
 0x3c4   :  { %22195 = vst [vmem:[#allocation117_spill] sm:$0xff] %v16202_v9  ;;  %v2592_v53 = vunpack.c.l.b16 %v2113_v49 }
 0x3c5   :  { %v2322_v31 = vunpack.c.h.b16 %v2123_v58  ;;  %v2594_v4 = vunpack.c.l.b16 %v2123_v58  ;;  %v2320_v58 = vunpack.c.h.b16 %v2113_v49 }
 0x3c6   :  { %v1860_v44 = vpop.f32.mrf.mxu0 }
 0x3c7   :  { %v2012_v48 = vpack.c.bf16 %v1860_v44, %v1860_v44 }
 0x3c9   :  { %v16205_v52 = vunpack.c.l.b16 %v2012_v48 }
 0x3ca   :  { %v1122_v34 = vpop.f32.mrf.mxu3  ;;  %v16207_v55 = vpop.f32.mrf.mxu2 }
 0x3cb   :  { %22197 = vst [vmem:[#allocation48_spill] sm:$0xff] %v16205_v52  ;;  %v2128_v46 = vpack.c.bf16 %v1122_v34, %v22199_v10  ;;  %v22202_v34 = vld [vmem:[#allocation41_spill] sm:$0xff]  ;;  %v2318_v52 = vunpack.c.h.b16 %v2103_v30 }
 0x3cc   :  { %22198 = vst [vmem:[#allocation118_spill] sm:$0xff] %v16207_v55  ;;  %v2108_v10 = vpack.c.bf16 %v1112_v26, %v22202_v34  ;;  %v22205_v26 = vld [vmem:[#allocation37_spill] sm:$0xff]  ;;  %v2615_v34 = vpack.c.b16 %v2593_v20, %v2592_v53  ;;  %v2590_v55 = vunpack.c.l.b16 %v2103_v30  ;;  %v22208_v20 = vld [vmem:[#allocation51_spill] sm:$0xff] }
 0x3cd   :  { %v2323_v13 = vunpack.c.h.b16 %v2128_v46  ;;  %v2595_v44 = vunpack.c.l.b16 %v2128_v46  ;;  %v2098_v23 = vpack.c.bf16 %v16122_v22, %v22205_v26 }
 0x3cf   :  { %10883 = vmatmul.msk.bf16.gmra.mxu3 %vm833_vm0, %v15302_v43  ;;  %10947 = vmatmul.msk.bf16.gmra.mxu2 %vm833_vm0, %v15324_v1  ;;  %v2344_v48 = vpack.c.b16 %v2323_v13, %v2322_v31  ;;  %v2616_v27 = vpack.c.b16 %v2595_v44, %v2594_v4  ;;  %v2319_v4 = vunpack.c.h.b16 %v2108_v10  ;;  %v2591_v13 = vunpack.c.l.b16 %v2108_v10 }
 0x3d0   :  { %v2343_v44 = vpack.c.b16 %v2321_v61, %v2320_v58  ;;  %v2317_v8 = vunpack.c.h.b16 %v2098_v23  ;;  %v2589_v49 = vunpack.c.l.b16 %v2098_v23 }
 0x3d1   :  { %10997 = vmatmul.msk.bf16.gmra.mxu0 %vm833_vm0, %v15472_v62  ;;  %v2383_v46 = vsel %vm2381_vm1, %v2344_v48, 0  ;;  %v2653_v47 = vsel %vm2381_vm1, %v2616_v27, 0  ;;  %v22206_v48 = vld [vmem:[#allocation36_spill] sm:$0xff]  ;;  %v2342_v45 = vpack.c.b16 %v2319_v4, %v2318_v52 }
 0x3d2   :  { %v1248_v9 = vpop.f32.mrf.mxu3  ;;  %v16225_v31 = vpop.f32.mrf.mxu2  ;;  %2454 = vmatpush.bf16.msra.mxu1 %v2383_v46  ;;  %2724 = vmatpush.bf16.msra.mxu3 %v2653_v47  ;;  %v2093_v27 = vpack.c.bf16 %v16110_v2, %v22206_v48  ;;  %v22207_v46 = vld [vmem:[#allocation49_spill] sm:$0xff] }
 0x3d3   :  { %22204 = vst [vmem:[#allocation50_spill] sm:$0xff] %v16225_v31  ;;  %v2614_v31 = vpack.c.b16 %v2591_v13, %v2590_v55  ;;  %v1924_v47 = vpack.c.bf16 %v1248_v9, %v22207_v46  ;;  %v22212_v46 = vld [vmem:[#allocation72_spill] sm:$0xff] }
 0x3d4   :  { %v2316_v54 = vunpack.c.h.b16 %v2093_v27  ;;  %v2588_v21 = vunpack.c.l.b16 %v2093_v27 }
 0x3d5   :  { %v2885_v30 = vunpack.c.l.b16 %v1924_v47  ;;  %v3183_v58 = vunpack.c.h.b16 %v1924_v47  ;;  %v22213_v47 = vld [vmem:[#allocation58_spill] sm:$0xff] }
 0x3d6   :  { %2455 = vmatpush.bf16.msra.mxu1 %v2343_v44  ;;  %2725 = vmatpush.bf16.msra.mxu3 %v2615_v34  ;;  %v2341_v2 = vpack.c.b16 %v2317_v8, %v2316_v54  ;;  %v2613_v61 = vpack.c.b16 %v2589_v49, %v2588_v21  ;;  %v22209_v54 = vld [vmem:[#allocation54_spill] sm:$0xff]  ;;  %v22210_v8 = vld [vmem:[#allocation77_spill] sm:$0xff] }
 0x3da   :  { %v1250_v22 = vpop.f32.mrf.mxu3  ;;  %v16232_v26 = vpop.f32.mrf.mxu2  ;;  %2456 = vmatpush.bf16.msra.mxu1 %v2342_v45  ;;  %2726 = vmatpush.bf16.msra.mxu3 %v2614_v31 }
 0x3db   :  { %v1929_v10 = vpack.c.bf16 %v1250_v22, %v22208_v20  ;;  %v22214_v20 = vld [vmem:[#allocation67_spill] sm:$0xff] }
 0x3dd   :  { %v2886_v53 = vunpack.c.l.b16 %v1929_v10  ;;  %v3184_v44 = vunpack.c.h.b16 %v1929_v10 }
 0x3de   :  { %2457 = vmatpush.bf16.msra.mxu1 %v2341_v2  ;;  %2727 = vmatpush.bf16.msra.mxu3 %v2613_v61  ;;  %v22216_v61 = vld [vmem:[#allocation59_spill] sm:$0xff] }
 0x3df   :  { %10884 = vmatmul.msk.bf16.gmra.mxu3 %vm833_vm0, %v15324_v1  ;;  %10948 = vmatmul.msk.bf16.gmra.mxu2 %vm833_vm0, %v15370_v37  ;;  %v16239_v52 = vpack.c.b16 %v2886_v53, %v2885_v30  ;;  %v16241_v55 = vpack.c.b16 %v3184_v44, %v3183_v58  ;;  %v22217_v53 = vld [vmem:[#allocation62_spill] sm:$0xff]  ;;  %v14174_v44 = vld [vmem:[%s22025_s5 + $0xa0] sm:$0xf] }
 0x3e1   :  { %10998 = vmatmul.msk.bf16.gmra.mxu0 %vm833_vm0, %v15498_v39 }
 0x3e2   :  { %v1253_v21 = vpop.f32.mrf.mxu3  ;;  %v16245_v9 = vpop.f32.mrf.mxu2  ;;  %2458 = vmatpush.bf16.msra.mxu1 %v16096_v6  ;;  %2728 = vmatpush.bf16.msra.mxu3 %v16098_v42  ;;  %v14171_v6 = vld [vmem:[%s22025_s5 + $0x88] sm:$0xf] }
 0x3e3   :  { %v1934_v31 = vpack.c.bf16 %v1253_v21, %v22209_v54  ;;  %v11047_v21 = vld [vmem:[%s22025_s5 + $0xa8] sm:$0xf0] }
 0x3e5   :  { %v2887_v34 = vunpack.c.l.b16 %v1934_v31  ;;  %v3185_v42 = vunpack.c.h.b16 %v1934_v31 }
 0x3e6   :  { %2655 = vmatpush.bf16.msrb.mxu1 %v15876_v18  ;;  %v11035_v18 = vld [vmem:[%s22025_s5 + $0x90] sm:$0xf0] }
 0x3e7   :  { %v11038_v27 = vor.u32 %v14171_v6, %v11035_v18  ;;  %v22218_v18 = vld [vmem:[#allocation57_spill] sm:$0xff] }
 0x3e9   :  { %2431 = vmatmul.bf16.gmra.mxu1 %v11038_v27 }
 0x3ea   :  { %2656 = vmatpush.bf16.msrb.mxu1 %v15862_v60  ;;  %v1255_v23 = vpop.f32.mrf.mxu3  ;;  %v16252_v4 = vpop.f32.mrf.mxu2 }
 0x3eb   :  { %v1939_v13 = vpack.c.bf16 %v1255_v23, %v15705_v59 }
 0x3ed   :  { %v2888_v60 = vunpack.c.l.b16 %v1939_v13  ;;  %v3186_v48 = vunpack.c.h.b16 %v1939_v13  ;;  %v11050_v13 = vor.u32 %v14174_v44, %v11047_v21 }
 0x3ee   :  { %2657 = vmatpush.bf16.msrb.mxu1 %v15844_v32 }
 0x3ef   :  { %10885 = vmatmul.msk.bf16.gmra.mxu3 %vm833_vm0, %v15370_v37  ;;  %10949 = vmatmul.msk.bf16.gmra.mxu2 %vm833_vm0, %v15392_v63  ;;  %v16266_v59 = vpack.c.b16 %v2888_v60, %v2887_v34  ;;  %v16268_v32 = vpack.c.b16 %v3186_v48, %v3185_v42  ;;  %v22220_v48 = vld [vmem:[#allocation63_spill] sm:$0xff] }
 0x3f1   :  { %10999 = vmatmul.msk.bf16.gmra.mxu0 %vm833_vm0, %v15524_v25 }
 0x3f2   :  { %2658 = vmatpush.bf16.msrb.mxu1 %v22210_v8  ;;  %v1258_v49 = vpop.f32.mrf.mxu3  ;;  %v16273_v45 = vpop.f32.mrf.mxu2 }
 0x3f3   :  { %22211 = vst [vmem:[#allocation45_spill] sm:$0xff] %v16273_v45  ;;  %v1944_v22 = vpack.c.bf16 %v1258_v49, %v22213_v47 }
 0x3f5   :  { %v2889_v58 = vunpack.c.l.b16 %v1944_v22  ;;  %v3187_v54 = vunpack.c.h.b16 %v1944_v22 }
 0x3f6   :  { %2659 = vmatpush.bf16.msrb.mxu1 %v22212_v46  ;;  %v22222_v46 = vld [vmem:[#allocation64_spill] sm:$0xff] }
 0x3f9   :  { %2436 = vmatmul.bf16.gmra.mxu1 %v11050_v13 }
 0x3fa   :  { %2660 = vmatpush.bf16.msrb.mxu1 %v22214_v20  ;;  %v1260_v10 = vpop.f32.mrf.mxu3  ;;  %v16278_v2 = vpop.f32.mrf.mxu2  ;;  %v14177_v20 = vld [vmem:[%s22025_s5 + $0xb8] sm:$0xf] }
 0x3fb   :  { %22215 = vst [vmem:[#allocation44_spill] sm:$0xff] %v16278_v2  ;;  %v1949_v30 = vpack.c.bf16 %v1260_v10, %v22216_v61  ;;  %v11059_v10 = vld [vmem:[%s22025_s5 + $0xc0] sm:$0xf0] }
 0x3fd   :  { %v2890_v31 = vunpack.c.l.b16 %v1949_v30  ;;  %v3188_v23 = vunpack.c.h.b16 %v1949_v30 }
 0x3fe   :  { %2661 = vmatpush.bf16.msrb.mxu1 %v22217_v53  ;;  %v11062_v53 = vor.u32 %v14177_v20, %v11059_v10  ;;  %v16338_v10 = vpop.f32.mrf.mxu1 }
 0x3ff   :  { %10886 = vmatmul.msk.bf16.gmra.mxu3 %vm833_vm0, %v15392_v63  ;;  %10950 = vmatmul.msk.bf16.gmra.mxu2 %vm833_vm0, %v15402_v19  ;;  %v16292_v34 = vpack.c.b16 %v2890_v31, %v2889_v58  ;;  %v16294_v6 = vpack.c.b16 %v3188_v23, %v3187_v54  ;;  %v22224_v23 = vld [vmem:[#allocation68_spill] sm:$0xff] }
 0x401   :  { %11000 = vmatmul.msk.bf16.gmra.mxu0 %vm833_vm0, %v15538_v0 }
 0x402   :  { %2662 = vmatpush.bf16.msrb.mxu1 %v22218_v18  ;;  %v1263_v42 = vpop.f32.mrf.mxu3  ;;  %v16299_v60 = vpop.f32.mrf.mxu2 }
 0x403   :  { %22219 = vst [vmem:[#allocation41_spill] sm:$0xff] %v16299_v60  ;;  %v1954_v27 = vpack.c.bf16 %v1263_v42, %v22220_v48  ;;  %v22226_v48 = vld [vmem:[#allocation69_spill] sm:$0xff] }
 0x405   :  { %v2891_v22 = vunpack.c.l.b16 %v1954_v27  ;;  %v3189_v61 = vunpack.c.h.b16 %v1954_v27 }
 0x409   :  { %2441 = vmatmul.bf16.gmra.mxu1 %v11062_v53  ;;  %v16345_v53 = vpop.f32.mrf.mxu1 }
 0x40a   :  { %v1265_v8 = vpop.f32.mrf.mxu3  ;;  %v16302_v49 = vpop.f32.mrf.mxu2  ;;  %22229 = vst [vmem:[#allocation51_spill] sm:$0xff] %v16345_v53 }
 0x40b   :  { %22221 = vst [vmem:[#allocation40_spill] sm:$0xff] %v16302_v49  ;;  %v1959_v47 = vpack.c.bf16 %v1265_v8, %v22222_v46  ;;  %v2213_v8 = vunpack.c.h.b16 %v16173_v41  ;;  %v22228_v41 = vld [vmem:[#allocation73_spill] sm:$0xff] }
 0x40d   :  { %v2892_v30 = vunpack.c.l.b16 %v1959_v47  ;;  %v3190_v58 = vunpack.c.h.b16 %v1959_v47 }
 0x40f   :  { %10887 = vmatmul.msk.bf16.gmra.mxu3 %vm833_vm0, %v15402_v19  ;;  %10951 = vmatmul.msk.bf16.gmra.mxu2 %vm833_vm0, %v15416_v36  ;;  %v16315_v44 = vpack.c.b16 %v2892_v30, %v2891_v22  ;;  %v16317_v21 = vpack.c.b16 %v3190_v58, %v3189_v61  ;;  %v2228_v22 = vpack.c.b16 %v2213_v8, %v2213_v8  ;;  %v11029_v8 = vld [vmem:[%s22025_s5 + $0x74] sm:$0xf] }
 0x412   :  { %v1268_v54 = vpop.f32.mrf.mxu3  ;;  %v16319_v31 = vpop.f32.mrf.mxu2 }
 0x413   :  { %22223 = vst [vmem:[#allocation37_spill] sm:$0xff] %v16319_v31  ;;  %v16322_v13 = vpack.c.bf16 %v1268_v54, %v22224_v23 }
 0x415   :  { %v3191_v46 = vunpack.c.h.b16 %v16322_v13 }
 0x419   :  { %2446 = vmatmul.bf16.gmra.mxu1 %v2228_v22 }
 0x41a   :  { %v1270_v18 = vpop.f32.mrf.mxu3  ;;  %v16324_v42 = vpop.f32.mrf.mxu2 }
 0x41b   :  { %22225 = vst [vmem:[#allocation36_spill] sm:$0xff] %v16324_v42  ;;  %v16327_v27 = vpack.c.bf16 %v1270_v18, %v22226_v48  ;;  %v22231_v18 = vld [vmem:[#allocation74_spill] sm:$0xff] }
 0x41d   :  { %v3192_v47 = vunpack.c.h.b16 %v16327_v27 }
 0x41f   :  { %10888 = vmatmul.msk.bf16.gmra.mxu3 %vm833_vm0, %v15416_v36  ;;  %10952 = vmatmul.msk.bf16.gmra.mxu2 %vm833_vm0, %v15430_v56  ;;  %v16336_v20 = vpack.c.b16 %v3192_v47, %v3191_v46  ;;  %v14170_v46 = vld [vmem:[%s22025_s5 + $0x7c] sm:$0xf0] }
 0x422   :  { %v1273_v61 = vpop.f32.mrf.mxu3  ;;  %v16340_v30 = vpop.f32.mrf.mxu2 }
 0x423   :  { %22227 = vst [vmem:[#allocation49_spill] sm:$0xff] %v16340_v30  ;;  %v16343_v58 = vpack.c.bf16 %v1273_v61, %v22228_v41  ;;  %v11030_v61 = vor.u32 %v14170_v46, %v11029_v8 }
 0x425   :  { %v3193_v47 = vunpack.c.h.b16 %v16343_v58 }
 0x429   :  { %11067 = vmatmul.msk.bf16.vlgmr.msra.gmra.mxu1 %vm2365_vm2, %v11030_v61 }
 0x42a   :  { %v1275_v54 = vpop.f32.mrf.mxu3  ;;  %v16347_v23 = vpop.f32.mrf.mxu2 }
 0x42b   :  { %22230 = vst [vmem:[#allocation54_spill] sm:$0xff] %v16347_v23  ;;  %v1979_v48 = vpack.c.bf16 %v1275_v54, %v22231_v18  ;;  %v16364_v54 = vpop.f32.mrf.mxu1  ;;  %v22233_v23 = vld [vmem:[#allocation78_spill] sm:$0xff] }
 0x42d   :  { %v3194_v22 = vunpack.c.h.b16 %v1979_v48 }
 0x42f   :  { %10889 = vmatmul.msk.bf16.gmra.mxu3 %vm833_vm0, %v15430_v56  ;;  %10953 = vmatmul.msk.bf16.gmra.mxu2 %vm833_vm0, %v15444_v12  ;;  %v16361_v41 = vpack.c.b16 %v3194_v22, %v3193_v47  ;;  %v22236_v56 = vld [vmem:[#allocation79_spill] sm:$0xff]  ;;  %v11041_v47 = vld [vmem:[%s22025_s5 + $0x8c] sm:$0xf] }
 0x430   :  { %v14173_v22 = vld [vmem:[%s22025_s5 + $0x94] sm:$0xf0] }
 0x432   :  { %v1278_v18 = vpop.f32.mrf.mxu3  ;;  %v16366_v53 = vpop.f32.mrf.mxu2 }
 0x433   :  { %22232 = vst [vmem:[#allocation77_spill] sm:$0xff] %v16366_v53  ;;  %v1984_v30 = vpack.c.bf16 %v1278_v18, %v22233_v23  ;;  %v16369_v42 = vpop.f32.mrf.mxu1  ;;  %v11042_v53 = vor.u32 %v14173_v22, %v11041_v47 }
 0x434   :  { %22234 = vst [vmem:[#allocation72_spill] sm:$0xff] %v16369_v42  ;;  %v22238_v42 = vld [vmem:[#allocation82_spill] sm:$0xff] }
 0x435   :  { %v3195_v61 = vunpack.c.h.b16 %v1984_v30 }
 0x439   :  { %11068 = vmatmul.msk.bf16.gmra.mxu1 %vm2365_vm2, %v11042_v53  ;;  %v14176_v53 = vld [vmem:[%s22025_s5 + $0xac] sm:$0xf0] }
 0x43a   :  { %v1280_v8 = vpop.f32.mrf.mxu3  ;;  %v16371_v46 = vpop.f32.mrf.mxu2 }
 0x43b   :  { %22235 = vst [vmem:[#allocation58_spill] sm:$0xff] %v16371_v46  ;;  %v1989_v31 = vpack.c.bf16 %v1280_v8, %v22236_v56  ;;  %v16387_v56 = vpop.f32.mrf.mxu1 }
 0x43d   :  { %v3196_v36 = vunpack.c.h.b16 %v1989_v31 }
 0x43f   :  { %10890 = vmatmul.msk.bf16.gmra.mxu3 %vm833_vm0, %v15444_v12  ;;  %10954 = vmatmul.msk.bf16.gmra.mxu2 %vm833_vm0, %v15458_v35  ;;  %v16384_v23 = vpack.c.b16 %v3196_v36, %v3195_v61  ;;  %v22241_v12 = vld [vmem:[#allocation83_spill] sm:$0xff]  ;;  %v11053_v36 = vld [vmem:[%s22025_s5 + $0xa4] sm:$0xf] }
 0x442   :  { %v1283_v18 = vpop.f32.mrf.mxu3  ;;  %v16389_v8 = vpop.f32.mrf.mxu2 }
 0x443   :  { %22237 = vst [vmem:[#allocation67_spill] sm:$0xff] %v16389_v8  ;;  %v1994_v46 = vpack.c.bf16 %v1283_v18, %v22238_v42  ;;  %v16392_v49 = vpop.f32.mrf.mxu1  ;;  %v11054_v42 = vor.u32 %v14176_v53, %v11053_v36  ;;  %v2898_v18 = vunpack.c.l.b16 %v1989_v31  ;;  %v22242_v36 = vld [vmem:[#allocation86_spill] sm:$0xff] }
 0x444   :  { %22239 = vst [vmem:[#allocation59_spill] sm:$0xff] %v16392_v49 }
 0x445   :  { %v2899_v61 = vunpack.c.l.b16 %v1994_v46  ;;  %v3197_v19 = vunpack.c.h.b16 %v1994_v46 }
 0x449   :  { %11069 = vmatmul.msk.bf16.gmra.mxu1 %vm2365_vm2, %v11054_v42 }
 0x44a   :  { %v1285_v47 = vpop.f32.mrf.mxu3  ;;  %v16394_v22 = vpop.f32.mrf.mxu2 }
 0x44b   :  { %22240 = vst [vmem:[#allocation62_spill] sm:$0xff] %v16394_v22  ;;  %v1999_v60 = vpack.c.bf16 %v1285_v47, %v22241_v12  ;;  %v2897_v12 = vunpack.c.l.b16 %v1984_v30  ;;  %v16409_v47 = vpop.f32.mrf.mxu1 }
 0x44d   :  { %v2900_v8 = vunpack.c.l.b16 %v1999_v60  ;;  %v3198_v2 = vunpack.c.h.b16 %v1999_v60  ;;  %v2896_v60 = vunpack.c.l.b16 %v1979_v48  ;;  %v2933_v31 = vpack.c.b16 %v2898_v18, %v2897_v12 }
 0x44f   :  { %v2934_v49 = vpack.c.b16 %v2900_v8, %v2899_v61  ;;  %v16403_v45 = vpack.c.b16 %v3198_v2, %v3197_v19  ;;  %10891 = vmatmul.msk.bf16.gmra.mxu3 %vm833_vm0, %v15458_v35  ;;  %10955 = vmatmul.msk.bf16.gmra.mxu2 %vm833_vm0, %v15472_v62  ;;  %v2895_v19 = vunpack.c.l.b16 %v16343_v58  ;;  %v2894_v2 = vunpack.c.l.b16 %v16327_v27  ;;  %v11065_v58 = vld [vmem:[%s22025_s5 + $0xbc] sm:$0xf]  ;;  %v14179_v27 = vld [vmem:[%s22025_s5 + $0xc4] sm:$0xf0] }
 0x450   :  { %v2893_v8 = vunpack.c.l.b16 %v16322_v13 }
 0x451   :  { %2986 = vmatpush.bf16.msra.mxu1 %v2934_v49  ;;  %v2932_v46 = vpack.c.b16 %v2896_v60, %v2895_v19  ;;  %v11066_v60 = vor.u32 %v14179_v27, %v11065_v58 }
 0x452   :  { %v1288_v22 = vpop.f32.mrf.mxu3  ;;  %v16411_v63 = vpop.f32.mrf.mxu2  ;;  %v2931_v48 = vpack.c.b16 %v2894_v2, %v2893_v8 }
 0x453   :  { %v2004_v30 = vpack.c.bf16 %v1288_v22, %v22242_v36  ;;  %v16418_v49 = vpop.f32.mrf.mxu1 }
 0x454   :  { %22243 = vst [vmem:[#allocation57_spill] sm:$0xff] %v16418_v49 }
 0x455   :  { %2987 = vmatpush.bf16.msra.mxu1 %v2933_v31  ;;  %v2901_v13 = vunpack.c.l.b16 %v2004_v30  ;;  %v3199_v18 = vunpack.c.h.b16 %v2004_v30 }
 0x459   :  { %2988 = vmatpush.bf16.msra.mxu1 %v2932_v46 }
 0x45a   :  { %v1290_v53 = vpop.f32.mrf.mxu3  ;;  %v16420_v61 = vpop.f32.mrf.mxu2  ;;  %11070 = vmatmul.msk.bf16.gmra.mxu1 %vm2365_vm2, %v11066_v60 }
 0x45b   :  { %22244 = vst [vmem:[#allocation63_spill] sm:$0xff] %v16420_v61  ;;  %v2009_v42 = vpack.c.bf16 %v1290_v53, %v15869_v17  ;;  %v16438_v19 = vpop.f32.mrf.mxu1  ;;  %v22274_v61 = vld [vmem:[#allocation97_spill] sm:$0xff] }
 0x45d   :  { %v2902_v22 = vunpack.c.l.b16 %v2009_v42  ;;  %v3200_v12 = vunpack.c.h.b16 %v2009_v42  ;;  %2989 = vmatpush.bf16.msra.mxu1 %v2931_v48 }
 0x45f   :  { %10892 = vmatmul.msk.bf16.gmra.mxu3 %vm833_vm0, %v15472_v62  ;;  %10956 = vmatmul.msk.bf16.gmra.mxu2 %vm833_vm0, %v15498_v39  ;;  %v16433_v17 = vpack.c.b16 %v2902_v22, %v2901_v13  ;;  %v16435_v31 = vpack.c.b16 %v3200_v12, %v3199_v18 }
 0x461   :  { %2990 = vmatpush.bf16.msra.mxu1 %v16315_v44  ;;  %v11018_v44 = vld [vmem:[%s22025_s5 + $0xd4] sm:$0x7] }
 0x462   :  { %v1293_v2 = vpop.f32.mrf.mxu3  ;;  %v16440_v46 = vpop.f32.mrf.mxu2  ;;  %v2214_v48 = vunpack.c.l.b16 %v11018_v44  ;;  %v14157_v44 = vld [vmem:[%s22025_s5 + $0x8] sm:$0xf0] }
 0x463   :  { %22245 = vst [vmem:[#allocation64_spill] sm:$0xff] %v16440_v46  ;;  %v2014_v8 = vpack.c.bf16 %v1293_v2, %v15884_v28  ;;  %v2416_v36 = vpop.f32.mrf.mxu1 }
 0x464   :  { %v2229_v28 = vpack.c.b16 %v2214_v48, %v2214_v48 }
 0x465   :  { %2991 = vmatpush.bf16.msra.mxu1 %v16292_v34  ;;  %v2903_v58 = vunpack.c.l.b16 %v2014_v8  ;;  %v3201_v27 = vunpack.c.h.b16 %v2014_v8 }
 0x469   :  { %2992 = vmatpush.bf16.msra.mxu1 %v16266_v59 }
 0x46a   :  { %v1295_v30 = vpop.f32.mrf.mxu3  ;;  %v16446_v53 = vpop.f32.mrf.mxu2  ;;  %11071 = vmatmul.msk.bf16.gmra.mxu1 %vm2365_vm2, %v2229_v28 }
 0x46b   :  { %22246 = vst [vmem:[#allocation68_spill] sm:$0xff] %v16446_v53  ;;  %v2019_v42 = vpack.c.bf16 %v1295_v30, %v15891_v7  ;;  %v16461_v22 = vpop.f32.mrf.mxu1  ;;  %v11074_v30 = vld [vmem:[%s22025_s5] sm:$0xf] }
 0x46d   :  { %v2904_v13 = vunpack.c.l.b16 %v2019_v42  ;;  %v3202_v18 = vunpack.c.h.b16 %v2019_v42  ;;  %2993 = vmatpush.bf16.msra.mxu1 %v16239_v52 }
 0x46f   :  { %10893 = vmatmul.msk.bf16.gmra.mxu3 %vm833_vm0, %v15498_v39  ;;  %10957 = vmatmul.msk.bf16.gmra.mxu2 %vm833_vm0, %v15524_v25  ;;  %v16457_v59 = vpack.c.b16 %v2904_v13, %v2903_v58  ;;  %v16459_v34 = vpack.c.b16 %v3202_v18, %v3201_v27 }
 0x472   :  { %v1298_v7 = vpop.f32.mrf.mxu3  ;;  %v16463_v12 = vpop.f32.mrf.mxu2 }
 0x473   :  { %22247 = vst [vmem:[#allocation69_spill] sm:$0xff] %v16463_v12  ;;  %v2024_v52 = vpack.c.bf16 %v1298_v7, %v15909_v57  ;;  %v16467_v60 = vpop.f32.mrf.mxu1  ;;  %v11075_v57 = vor.u32 %v14157_v44, %v11074_v30  ;;  %v22253_v44 = vld [vmem:[#allocation93_spill] sm:$0xff] }
 0x474   :  { %22248 = vst [vmem:[#allocation73_spill] sm:$0xff] %v16467_v60 }
 0x475   :  { %v2905_v42 = vunpack.c.l.b16 %v2024_v52  ;;  %v3203_v48 = vunpack.c.h.b16 %v2024_v52 }
 0x47a   :  { %v1300_v2 = vpop.f32.mrf.mxu3  ;;  %v16469_v8 = vpop.f32.mrf.mxu2  ;;  %2663 = vmatmul.bf16.vlgmr.msrb.gmra.mxu1 %v11075_v57 }
 0x47b   :  { %22249 = vst [vmem:[#allocation74_spill] sm:$0xff] %v16469_v8  ;;  %v2029_v36 = vpack.c.bf16 %v1300_v2, %v15926_v11  ;;  %v16486_v18 = vpop.f32.mrf.mxu1 }
 0x47d   :  { %v2906_v58 = vunpack.c.l.b16 %v2029_v36  ;;  %v3204_v27 = vunpack.c.h.b16 %v2029_v36 }
 0x47f   :  { %10894 = vmatmul.msk.bf16.gmra.mxu3 %vm833_vm0, %v15524_v25  ;;  %10958 = vmatmul.msk.bf16.gmra.mxu2 %vm833_vm0, %v15538_v0  ;;  %v16482_v11 = vpack.c.b16 %v2906_v58, %v2905_v42  ;;  %v16484_v13 = vpack.c.b16 %v3204_v27, %v3203_v48  ;;  %v11086_v42 = vld [vmem:[%s22025_s5 + $0x18] sm:$0xf]  ;;  %v14160_v48 = vld [vmem:[%s22025_s5 + $0x20] sm:$0xf0] }
 0x482   :  { %v1303_v28 = vpop.f32.mrf.mxu3  ;;  %v16488_v7 = vpop.f32.mrf.mxu2 }
 0x483   :  { %22250 = vst [vmem:[#allocation78_spill] sm:$0xff] %v16488_v7  ;;  %v2034_v52 = vpack.c.bf16 %v1303_v28, %v15944_v50  ;;  %v16491_v2 = vpop.f32.mrf.mxu1  ;;  %v14156_v50 = vld [vmem:[%s22025_s5 + $0x4] sm:$0xf]  ;;  %v11076_v28 = vld [vmem:[%s22025_s5 + $0xc] sm:$0xf0] }
 0x484   :  { %22251 = vst [vmem:[#allocation79_spill] sm:$0xff] %v16491_v2 }
 0x485   :  { %v2907_v58 = vunpack.c.l.b16 %v2034_v52  ;;  %v3205_v27 = vunpack.c.h.b16 %v2034_v52 }
 0x48a   :  { %v1305_v36 = vpop.f32.mrf.mxu3  ;;  %v16493_v30 = vpop.f32.mrf.mxu2 }
 0x48b   :  { %22252 = vst [vmem:[#allocation82_spill] sm:$0xff] %v16493_v30  ;;  %v2039_v49 = vpack.c.bf16 %v1305_v36, %v22253_v44  ;;  %v11087_v36 = vor.u32 %v14160_v48, %v11086_v42  ;;  %v11079_v44 = vor.u32 %v14156_v50, %v11076_v28  ;;  %v16514_v52 = vpop.f32.mrf.mxu1  ;;  %v11098_v48 = vld [vmem:[%s22025_s5 + $0x30] sm:$0xf]  ;;  %v22257_v28 = vld [vmem:[#allocation5_spill] sm:$0xff] }
 0x48d   :  { %v2908_v57 = vunpack.c.l.b16 %v2039_v49  ;;  %v3206_v60 = vunpack.c.h.b16 %v2039_v49  ;;  %2668 = vmatmul.bf16.gmra.mxu1 %v11087_v36 }
 0x48f   :  { %10895 = vmatmul.msk.bf16.gmra.mxu3 %vm833_vm0, %v15538_v0  ;;  %v16510_v2 = vpack.c.b16 %v2908_v57, %v2907_v58  ;;  %v16512_v7 = vpack.c.b16 %v3206_v60, %v3205_v27  ;;  %2696 = vmatmul.bf16.vlgmr.msrb.gmra.mxu2 %v11079_v44  ;;  %v14163_v60 = vld [vmem:[%s22025_s5 + $0x38] sm:$0xf0]  ;;  %v11088_v27 = vld [vmem:[%s22025_s5 + $0x24] sm:$0xf0] }
 0x490   :  { %v14159_v58 = vld [vmem:[%s22025_s5 + $0x1c] sm:$0xf]  ;;  %v11099_v57 = vor.u32 %v14163_v60, %v11098_v48 }
 0x491   :  { %v11091_v50 = vor.u32 %v14159_v58, %v11088_v27  ;;  %v14166_v58 = vld [vmem:[%s22025_s5 + $0x50] sm:$0xf0] }
 0x492   :  { %v16516_v49 = vpop.f32.mrf.mxu3  ;;  %v16518_v30 = vpop.f32.mrf.mxu2 }
 0x493   :  { %22254 = vst [vmem:[#allocation83_spill] sm:$0xff] %v16518_v30  ;;  %v16520_v8 = vpop.f32.mrf.mxu1 }
 0x494   :  { %22255 = vst [vmem:[#allocation86_spill] sm:$0xff] %v16520_v8 }
 0x49a   :  { %v16522_v12 = vpop.f32.mrf.mxu3  ;;  %v16524_v42 = vpop.f32.mrf.mxu2 }
 0x49b   :  { %22256 = vst [vmem:[#allocation93_spill] sm:$0xff] %v16524_v42  ;;  %v16541_v36 = vpop.f32.mrf.mxu1 }
 0x49d   :  { %2673 = vmatmul.bf16.gmra.mxu1 %v11099_v57 }
 0x49f   :  { %10959 = vmatmul.msk.bf16.vlgmr.msrb.gmra.mxu3 %vm833_vm0, %v22257_v28  ;;  %2701 = vmatmul.bf16.gmra.mxu2 %v11091_v50  ;;  %v22261_v50 = vld [vmem:[#allocation6_spill] sm:$0xff] }
 0x4a0   :  { %3284 = vmatpush.bf16.msrb.mxu3 %v16403_v45  ;;  %v11110_v45 = vld [vmem:[%s22025_s5 + $0x48] sm:$0xf] }
 0x4a1   :  { %v11111_v27 = vor.u32 %v14166_v58, %v11110_v45  ;;  %v2149_v58 = vld [vmem:[%s22025_s5 + $0x60] sm:$0x77] }
 0x4a2   :  { %v16543_v44 = vpop.f32.mrf.mxu3  ;;  %v16545_v8 = vpop.f32.mrf.mxu2 }
 0x4a3   :  { %22258 = vst [vmem:[#allocation5_spill] sm:$0xff] %v16545_v8  ;;  %v16549_v30 = vpop.f32.mrf.mxu1 }
 0x4a4   :  { %3285 = vmatpush.bf16.msrb.mxu3 %v16384_v23  ;;  %22259 = vst [vmem:[#allocation119_spill] sm:$0xff] %v16549_v30  ;;  %v14162_v23 = vld [vmem:[%s22025_s5 + $0x34] sm:$0xf] }
 0x4a8   :  { %3286 = vmatpush.bf16.msrb.mxu3 %v16361_v41  ;;  %v11100_v41 = vld [vmem:[%s22025_s5 + $0x3c] sm:$0xf0] }
 0x4a9   :  { %v11103_v57 = vor.u32 %v14162_v23, %v11100_v41  ;;  %v14165_v23 = vld [vmem:[%s22025_s5 + $0x4c] sm:$0xf] }
 0x4aa   :  { %v1315_v48 = vpop.f32.mrf.mxu3  ;;  %v16551_v60 = vpop.f32.mrf.mxu2 }
 0x4ab   :  { %22260 = vst [vmem:[#allocation120_spill] sm:$0xff] %v16551_v60  ;;  %v22266_v60 = vld [vmem:[#allocation108_spill] sm:$0xff] }
 0x4ac   :  { %3287 = vmatpush.bf16.msrb.mxu3 %v16336_v20  ;;  %v16569_v20 = vpop.f32.mrf.mxu1 }
 0x4ad   :  { %2678 = vmatmul.bf16.gmra.mxu1 %v11111_v27  ;;  %v22264_v27 = vld [vmem:[#allocation7_spill] sm:$0xff] }
 0x4af   :  { %10960 = vmatmul.msk.bf16.gmra.mxu3 %vm833_vm0, %v22261_v50  ;;  %2706 = vmatmul.bf16.gmra.mxu2 %v11103_v57 }
 0x4b0   :  { %3288 = vmatpush.bf16.msrb.mxu3 %v16317_v21  ;;  %v2526_v21 = vunpack.c.l.b16 %v2149_v58 }
 0x4b2   :  { %v1318_v28 = vpop.f32.mrf.mxu3  ;;  %v16571_v30 = vpop.f32.mrf.mxu2 }
 0x4b3   :  { %22262 = vst [vmem:[#allocation6_spill] sm:$0xff] %v16571_v30 }
 0x4b4   :  { %3289 = vmatpush.bf16.msrb.mxu3 %v16294_v6  ;;  %v2449_v42 = vpop.f32.mrf.mxu1  ;;  %v11112_v6 = vld [vmem:[%s22025_s5 + $0x54] sm:$0xf0] }
 0x4b5   :  { %v2541_v42 = vpack.c.b16 %v2526_v21, %v2526_v21  ;;  %v11115_v41 = vor.u32 %v14165_v23, %v11112_v6  ;;  %v22270_v21 = vld [vmem:[#allocation111_spill] sm:$0xff]  ;;  %v22271_v6 = vld [vmem:[#allocation104_spill] sm:$0xff] }
 0x4b8   :  { %3290 = vmatpush.bf16.msrb.mxu3 %v16268_v32  ;;  %v2428_v32 = vadd.f32 %v16461_v22, %v16338_v10  ;;  %v22269_v10 = vld [vmem:[#allocation107_spill] sm:$0xff] }
 0x4ba   :  { %v1320_v8 = vpop.f32.mrf.mxu3  ;;  %v16575_v45 = vpop.f32.mrf.mxu2 }
 0x4bb   :  { %22263 = vst [vmem:[#allocation121_spill] sm:$0xff] %v16575_v45  ;;  %v2069_v22 = vpack.c.bf16 %v1320_v8, %v22269_v10  ;;  %v22272_v8 = vld [vmem:[#allocation103_spill] sm:$0xff] }
 0x4bc   :  { %3291 = vmatpush.bf16.msrb.mxu3 %v16241_v55  ;;  %v2460_v57 = vpop.f32.mrf.mxu1  ;;  %v2059_v10 = vpack.c.bf16 %v1315_v48, %v22272_v8 }
 0x4bd   :  { %2683 = vmatmul.bf16.gmra.mxu1 %v2541_v42  ;;  %v16593_v45 = vadd.f32 %v2460_v57, %v2428_v32  ;;  %v14181_v32 = vld [vmem:[%s22025_s5 + $0xe0] sm:$0xf0] }
 0x4bf   :  { %10961 = vmatmul.msk.bf16.gmra.mxu3 %vm833_vm0, %v22264_v27  ;;  %2711 = vmatmul.bf16.gmra.mxu2 %v11115_v41  ;;  %v2064_v41 = vpack.c.bf16 %v1318_v28, %v22271_v6  ;;  %v11145_v27 = vld [vmem:[%s22025_s5 + $0xd8] sm:$0xf]  ;;  %v3212_v28 = vunpack.c.h.b16 %v2069_v22 }
 0x4c1   :  { %v2913_v39 = vunpack.c.l.b16 %v2064_v41 }
 0x4c2   :  { %v1323_v50 = vpop.f32.mrf.mxu3  ;;  %v16591_v55 = vpop.f32.mrf.mxu2 }
 0x4c3   :  { %22265 = vst [vmem:[#allocation7_spill] sm:$0xff] %v16591_v55  ;;  %v2074_v30 = vpack.c.bf16 %v1323_v50, %v22266_v60  ;;  %v22273_v55 = vld [vmem:[#allocation100_spill] sm:$0xff] }
 0x4c4   :  { %v16596_v0 = vpop.f32.mrf.mxu1  ;;  %v2054_v46 = vpack.c.bf16 %v16543_v44, %v22273_v55  ;;  %v22275_v44 = vld [vmem:[#allocation96_spill] sm:$0xff] }
 0x4c5   :  { %22267 = vst [vmem:[#allocation108_spill] sm:$0xff] %v16596_v0  ;;  %v2915_v60 = vunpack.c.l.b16 %v2074_v30  ;;  %v3213_v42 = vunpack.c.h.b16 %v2074_v30  ;;  %v2433_v0 = vadd.f32 %v16486_v18, %v16364_v54  ;;  %v3211_v30 = vunpack.c.h.b16 %v2064_v41 }
 0x4c6   :  { %v2049_v54 = vpack.c.bf16 %v16522_v12, %v22274_v61  ;;  %v2044_v55 = vpack.c.bf16 %v16516_v49, %v22275_v44  ;;  %v2911_v41 = vunpack.c.l.b16 %v2054_v46 }
 0x4c8   :  { %v2910_v61 = vunpack.c.l.b16 %v2049_v54  ;;  %v3208_v12 = vunpack.c.h.b16 %v2049_v54 }
 0x4ca   :  { %v1325_v25 = vpop.f32.mrf.mxu3  ;;  %v16598_v53 = vpop.f32.mrf.mxu2 }
 0x4cb   :  { %22268 = vst [vmem:[#allocation122_spill] sm:$0xff] %v16598_v53  ;;  %v2079_v23 = vpack.c.bf16 %v1325_v25, %v22270_v21  ;;  %v11146_v25 = vor.u32 %v14181_v32, %v11145_v27  ;;  %v2914_v21 = vunpack.c.l.b16 %v2069_v22  ;;  %v2912_v27 = vunpack.c.l.b16 %v2059_v10 }
 0x4cc   :  { %v3210_v32 = vunpack.c.h.b16 %v2059_v10 }
 0x4cd   :  { %v2916_v57 = vunpack.c.l.b16 %v2079_v23  ;;  %v3214_v50 = vunpack.c.h.b16 %v2079_v23  ;;  %v2465_v23 = vpop.f32.mrf.mxu1  ;;  %2994 = vmatmul.bf16.vlgmr.msra.gmra.mxu1 %v11146_v25  ;;  %v3207_v25 = vunpack.c.h.b16 %v2044_v55 }
 0x4ce   :  { %v16620_v22 = vadd.f32 %v2465_v23, %v2433_v0  ;;  %v2909_v0 = vunpack.c.l.b16 %v2044_v55 }
 0x4cf   :  { %v2942_v6 = vpack.c.b16 %v2916_v57, %v2915_v60  ;;  %v3240_v53 = vpack.c.b16 %v3214_v50, %v3213_v42  ;;  %10962 = vmatmul.msk.bf16.gmra.mxu3 %vm833_vm0, %v15212_v15  ;;  %v2941_v15 = vpack.c.b16 %v2914_v21, %v2913_v39  ;;  %v3239_v60 = vpack.c.b16 %v3212_v28, %v3211_v30 }
 0x4d0   :  { %v2527_v42 = vunpack.c.h.b16 %v2149_v58  ;;  %v2940_v50 = vpack.c.b16 %v2912_v27, %v2911_v41  ;;  %v2939_v28 = vpack.c.b16 %v2910_v61, %v2909_v0  ;;  %v3237_v30 = vpack.c.b16 %v3208_v12, %v3207_v25 }
 0x4d1   :  { %3019 = vmatpush.bf16.msrb.mxu0 %v2942_v6  ;;  %3317 = vmatpush.bf16.msrb.mxu1 %v3240_v53  ;;  %v3209_v53 = vunpack.c.h.b16 %v2054_v46  ;;  %v22276_v6 = vld [vmem:[#allocation112_spill] sm:$0xff]  ;;  %v22277_v46 = vld [vmem:[#allocation114_spill] sm:$0xff] }
 0x4d2   :  { %v1328_v18 = vpop.f32.mrf.mxu3  ;;  %v16618_v48 = vpop.f32.mrf.mxu2  ;;  %v2542_v57 = vpack.c.b16 %v2527_v42, %v2527_v42 }
 0x4d3   :  { %v3238_v8 = vpack.c.b16 %v3210_v32, %v3209_v53  ;;  %v2084_v10 = vpack.c.bf16 %v1328_v18, %v22276_v6  ;;  %v2438_v18 = vadd.f32 %v16514_v52, %v16387_v56  ;;  %v22280_v53 = vld [vmem:[#allocation94_spill] sm:$0xff] }
 0x4d4   :  { %2716 = vmatmul.bf16.gmra.mxu2 %v2542_v57 }
 0x4d5   :  { %3020 = vmatpush.bf16.msrb.mxu0 %v2941_v15  ;;  %3318 = vmatpush.bf16.msrb.mxu1 %v3239_v60  ;;  %v16625_v39 = vpop.f32.mrf.mxu1  ;;  %v2917_v23 = vunpack.c.l.b16 %v2084_v10  ;;  %v3215_v54 = vunpack.c.h.b16 %v2084_v10  ;;  %v16684_v10 = vpop.f32.mrf.mxu0 }
 0x4d6   :  { %22285 = vst [vmem:[#allocation104_spill] sm:$0xff] %v16684_v10  ;;  %v22354_v10 = vld [vmem:[#allocation58_spill] sm:$0xff] }
 0x4d9   :  { %3021 = vmatpush.bf16.msrb.mxu0 %v2940_v50  ;;  %3319 = vmatpush.bf16.msrb.mxu1 %v3238_v8 }
 0x4da   :  { %v1330_v58 = vpop.f32.mrf.mxu3  ;;  %v16627_v49 = vpop.f32.mrf.mxu2 }
 0x4db   :  { %v2089_v21 = vpack.c.bf16 %v1330_v58, %v22277_v46 }
 0x4dd   :  { %v2918_v27 = vunpack.c.l.b16 %v2089_v21  ;;  %v3216_v32 = vunpack.c.h.b16 %v2089_v21  ;;  %3022 = vmatpush.bf16.msrb.mxu0 %v2939_v28  ;;  %3320 = vmatpush.bf16.msrb.mxu1 %v3237_v30  ;;  %v2470_v42 = vpop.f32.mrf.mxu1 }
 0x4de   :  { %v16644_v41 = vadd.f32 %v2470_v42, %v2438_v18 }
 0x4df   :  { %10963 = vmatmul.msk.bf16.gmra.mxu3 %vm833_vm0, %v15230_v33  ;;  %v16634_v15 = vpack.c.b16 %v2918_v27, %v2917_v23  ;;  %v16636_v60 = vpack.c.b16 %v3216_v32, %v3215_v54  ;;  %v16697_v54 = vpop.f32.mrf.mxu0 }
 0x4e0   :  { %22286 = vst [vmem:[#allocation103_spill] sm:$0xff] %v16697_v54 }
 0x4e1   :  { %3023 = vmatpush.bf16.msrb.mxu0 %v16510_v2  ;;  %3321 = vmatpush.bf16.msrb.mxu1 %v16512_v7  ;;  %v22279_v2 = vld [vmem:[#allocation98_spill] sm:$0xff] }
 0x4e2   :  { %v16640_v44 = vpop.f32.mrf.mxu3  ;;  %v16642_v55 = vpop.f32.mrf.mxu2  ;;  %v3622_v52 = vsel %vm2381_vm1, %v22279_v2, 0 }
 0x4e5   :  { %3024 = vmatpush.bf16.msrb.mxu0 %v16482_v11  ;;  %3322 = vmatpush.bf16.msrb.mxu1 %v16484_v13  ;;  %v16650_v33 = vpop.f32.mrf.mxu1  ;;  %v2443_v11 = vadd.f32 %v16541_v36, %v16409_v47  ;;  %v22283_v47 = vld [vmem:[#allocation89_spill] sm:$0xff]  ;;  %v22284_v36 = vld [vmem:[#allocation87_spill] sm:$0xff] }
 0x4e6   :  { %22278 = vst [vmem:[#allocation107_spill] sm:$0xff] %v16650_v33  ;;  %v22383_v33 = vld [vmem:[#allocation93_spill] sm:$0xff] }
 0x4e9   :  { %3025 = vmatpush.bf16.msrb.mxu0 %v16457_v59  ;;  %3323 = vmatpush.bf16.msrb.mxu1 %v16459_v34 }
 0x4ea   :  { %v16652_v56 = vpop.f32.mrf.mxu3  ;;  %v16654_v7 = vpop.f32.mrf.mxu2 }
 0x4ed   :  { %3026 = vmatpush.bf16.msrb.mxu0 %v16433_v17  ;;  %3324 = vmatpush.bf16.msrb.mxu1 %v16435_v31  ;;  %v2475_v59 = vpop.f32.mrf.mxu1  ;;  %v22281_v17 = vld [vmem:[#allocation91_spill] sm:$0xff] }
 0x4ee   :  { %v16667_v57 = vadd.f32 %v2475_v59, %v2443_v11 }
 0x4ef   :  { %10964 = vmatmul.msk.bf16.gmra.mxu3 %vm833_vm0, %v15248_v51  ;;  %v2448_v51 = vadd.f32 %v16569_v20, %v16438_v19  ;;  %v11147_v20 = vld [vmem:[%s22025_s5 + $0xe4] sm:$0xf0] }
 0x4f1   :  { %3693 = vmatpush.bf16.msra.mxu1 %v3622_v52 }
 0x4f2   :  { %v1338_v34 = vpop.f32.mrf.mxu3  ;;  %v16664_v13 = vpop.f32.mrf.mxu2 }
 0x4f5   :  { %3694 = vmatpush.bf16.msra.mxu1 %v22280_v53  ;;  %v16670_v31 = vpop.f32.mrf.mxu1 }
 0x4f6   :  { %22282 = vst [vmem:[#allocation111_spill] sm:$0xff] %v16670_v31 }
 0x4f9   :  { %3695 = vmatpush.bf16.msra.mxu1 %v22281_v17 }
 0x4fa   :  { %v1340_v61 = vpop.f32.mrf.mxu3  ;;  %v16672_v12 = vpop.f32.mrf.mxu2 }
 0x4fd   :  { %3696 = vmatpush.bf16.msra.mxu1 %v22283_v47  ;;  %v2480_v50 = vpop.f32.mrf.mxu1 }
 0x4fe   :  { %v16682_v25 = vadd.f32 %v2480_v50, %v2448_v51  ;;  %v2109_v51 = vpack.c.bf16 %v1340_v61, %v16124_v40 }
 0x4ff   :  { %10965 = vmatmul.msk.bf16.gmra.mxu3 %vm833_vm0, %v15266_v5  ;;  %v14180_v5 = vld [vmem:[%s22025_s5 + $0xdc] sm:$0xf] }
 0x500   :  { %v11150_v30 = vor.u32 %v14180_v5, %v11147_v20  ;;  %v2922_v61 = vunpack.c.l.b16 %v2109_v51 }
 0x501   :  { %3697 = vmatpush.bf16.msra.mxu1 %v22284_v36 }
 0x502   :  { %v1343_v8 = vpop.f32.mrf.mxu3  ;;  %v16680_v0 = vpop.f32.mrf.mxu2  ;;  %3027 = vmatmul.bf16.vlgmr.msrb.gmra.mxu0 %v11150_v30 }
 0x503   :  { %v2114_v17 = vpack.c.bf16 %v1343_v8, %v16144_v38  ;;  %v22287_v38 = vld [vmem:[#allocation21_spill] sm:$0xff] }
 0x504   :  { %v2099_v8 = vpack.c.bf16 %v16652_v56, %v22287_v38 }
 0x505   :  { %v2482_v6 = vpop.f32.mrf.mxu1  ;;  %v3221_v5 = vunpack.c.h.b16 %v2114_v17 }
 0x50a   :  { %v1345_v58 = vpop.f32.mrf.mxu3  ;;  %v16686_v46 = vpop.f32.mrf.mxu2 }
 0x50b   :  { %v2119_v52 = vpack.c.bf16 %v1345_v58, %v16150_v16  ;;  %v2104_v58 = vpack.c.bf16 %v1338_v34, %v16112_v3 }
 0x50d   :  { %v2664_v19 = vpop.f32.mrf.mxu1  ;;  %v2924_v36 = vunpack.c.l.b16 %v2119_v52  ;;  %v3222_v50 = vunpack.c.h.b16 %v2119_v52  ;;  %v2921_v34 = vunpack.c.l.b16 %v2104_v58  ;;  %v3218_v52 = vunpack.c.h.b16 %v2099_v8 }
 0x50e   :  { %v2665_v28 = vadd.f32 %v2664_v19, %v16593_v45  ;;  %v2923_v19 = vunpack.c.l.b16 %v2114_v17 }
 0x50f   :  { %10966 = vmatmul.msk.bf16.gmra.mxu3 %vm833_vm0, %v15284_v24  ;;  %v3244_v30 = vpack.c.b16 %v3222_v50, %v3221_v5  ;;  %v14182_v5 = vld [vmem:[%s22025_s5 + $0xe8] sm:$0xf0] }
 0x512   :  { %v1348_v21 = vpop.f32.mrf.mxu3  ;;  %v2697_v23 = vpop.f32.mrf.mxu2 }
 0x513   :  { %v16699_v27 = vadd.f32 %v2697_v23, %v2665_v28  ;;  %v2124_v24 = vpack.c.bf16 %v1348_v21, %v16178_v29  ;;  %v3220_v21 = vunpack.c.h.b16 %v2109_v51  ;;  %v2946_v28 = vpack.c.b16 %v2924_v36, %v2923_v19  ;;  %v11153_v19 = vld [vmem:[%s22025_s5 + $0xe0] sm:$0xf] }
 0x515   :  { %v16702_v32 = vpop.f32.mrf.mxu1  ;;  %v2925_v11 = vunpack.c.l.b16 %v2124_v24  ;;  %v3223_v45 = vunpack.c.h.b16 %v2124_v24  ;;  %v22289_v24 = vld [vmem:[#allocation25_spill] sm:$0xff] }
 0x516   :  { %v2094_v3 = vpack.c.bf16 %v16640_v44, %v22289_v24  ;;  %v22298_v24 = vld [vmem:[#allocation42_spill] sm:$0xff] }
 0x518   :  { %v3217_v17 = vunpack.c.h.b16 %v2094_v3 }
 0x51a   :  { %v1350_v18 = vpop.f32.mrf.mxu3  ;;  %v16705_v2 = vpop.f32.mrf.mxu2  ;;  %v3242_v50 = vpack.c.b16 %v3218_v52, %v3217_v17  ;;  %v22303_v52 = vld [vmem:[#allocation39_spill] sm:$0xff] }
 0x51b   :  { %v2129_v42 = vpack.c.bf16 %v1350_v18, %v16184_v14  ;;  %v3219_v18 = vunpack.c.h.b16 %v2104_v58 }
 0x51d   :  { %v2926_v59 = vunpack.c.l.b16 %v2129_v42  ;;  %v3224_v53 = vunpack.c.h.b16 %v2129_v42  ;;  %v2669_v16 = vpop.f32.mrf.mxu1  ;;  %v2920_v42 = vunpack.c.l.b16 %v2099_v8  ;;  %v11154_v8 = vor.u32 %v14182_v5, %v11153_v19  ;;  %v22309_v19 = vld [vmem:[#allocation31_spill] sm:$0xff] }
 0x51f   :  { %10967 = vmatmul.msk.bf16.gmra.mxu3 %vm833_vm0, %v15302_v43  ;;  %v2947_v47 = vpack.c.b16 %v2926_v59, %v2925_v11  ;;  %v3245_v29 = vpack.c.b16 %v3224_v53, %v3223_v45  ;;  %v2670_v43 = vadd.f32 %v2669_v16, %v16620_v22  ;;  %v2945_v22 = vpack.c.b16 %v2922_v61, %v2921_v34  ;;  %v22290_v45 = vld [vmem:[#allocation116_spill] sm:$0xff]  ;;  %v22300_v34 = vld [vmem:[#allocation50_spill] sm:$0xff] }
 0x520   :  { %v3243_v11 = vpack.c.b16 %v3220_v21, %v3219_v18  ;;  %v2919_v53 = vunpack.c.l.b16 %v2094_v3  ;;  %v22295_v21 = vld [vmem:[#allocation46_spill] sm:$0xff]  ;;  %v22299_v3 = vld [vmem:[#allocation43_spill] sm:$0xff] }
 0x521   :  { %v2984_v14 = vsel %vm2381_vm1, %v2947_v47, 0  ;;  %v3282_v6 = vsel %vm2381_vm1, %v3245_v29, 0  ;;  %v22292_v29 = vld [vmem:[#allocation118_spill] sm:$0xff] }
 0x522   :  { %v1704_v20 = vpop.f32.mrf.mxu3  ;;  %3055 = vmatpush.bf16.msra.mxu2 %v2984_v14  ;;  %3353 = vmatpush.bf16.msra.mxu0 %v3282_v6  ;;  %v2702_v40 = vpop.f32.mrf.mxu2  ;;  %v2944_v36 = vpack.c.b16 %v2920_v42, %v2919_v53  ;;  %v22302_v42 = vld [vmem:[#allocation38_spill] sm:$0xff] }
 0x523   :  { %v16718_v23 = vadd.f32 %v2702_v40, %v2670_v43  ;;  %v1926_v56 = vpack.c.bf16 %v1704_v20, %v22290_v45  ;;  %v11157_v45 = vld [vmem:[%s22025_s5 + $0xf0] sm:$0xf] }
 0x525   :  { %22288 = vst [vmem:[#allocation100_spill] sm:$0xff] %v16718_v23  ;;  %v16723_v59 = vpop.f32.mrf.mxu1  ;;  %v4161_v14 = vunpack.c.l.b16 %v1926_v56  ;;  %v4459_v6 = vunpack.c.h.b16 %v1926_v56  ;;  %v14184_v56 = vld [vmem:[%s22025_s5 + $0xf8] sm:$0xf0] }
 0x526   :  { %3056 = vmatpush.bf16.msra.mxu2 %v2946_v28  ;;  %3354 = vmatpush.bf16.msra.mxu0 %v3244_v30  ;;  %22291 = vst [vmem:[#allocation97_spill] sm:$0xff] %v16723_v59  ;;  %v22296_v28 = vld [vmem:[#allocation47_spill] sm:$0xff] }
 0x52a   :  { %v1706_v47 = vpop.f32.mrf.mxu3  ;;  %3057 = vmatpush.bf16.msra.mxu2 %v2945_v22  ;;  %3355 = vmatpush.bf16.msra.mxu0 %v3243_v11  ;;  %v16726_v44 = vpop.f32.mrf.mxu2 }
 0x52b   :  { %v1931_v51 = vpack.c.bf16 %v1706_v47, %v22292_v29  ;;  %22293 = vst [vmem:[#allocation96_spill] sm:$0xff] %v16726_v44  ;;  %v11158_v29 = vor.u32 %v14184_v56, %v11157_v45  ;;  %v22319_v45 = vld [vmem:[#allocation19_spill] sm:$0xff]  ;;  %v22320_v56 = vld [vmem:[#allocation85_spill] sm:$0xff] }
 0x52d   :  { %v4162_v16 = vunpack.c.l.b16 %v1931_v51  ;;  %v4460_v58 = vunpack.c.h.b16 %v1931_v51  ;;  %v2674_v38 = vpop.f32.mrf.mxu1  ;;  %2999 = vmatmul.bf16.gmra.mxu1 %v11158_v29 }
 0x52e   :  { %3058 = vmatpush.bf16.msra.mxu2 %v2944_v36  ;;  %3356 = vmatpush.bf16.msra.mxu0 %v3242_v50  ;;  %v2675_v61 = vadd.f32 %v2674_v38, %v16644_v41  ;;  %v22307_v50 = vld [vmem:[#allocation35_spill] sm:$0xff] }
 0x52f   :  { %10968 = vmatmul.msk.bf16.gmra.mxu3 %vm833_vm0, %v15324_v1  ;;  %v16736_v20 = vpack.c.b16 %v4162_v16, %v4161_v14  ;;  %v16738_v43 = vpack.c.b16 %v4460_v58, %v4459_v6  ;;  %v22308_v58 = vld [vmem:[#allocation30_spill] sm:$0xff] }
 0x531   :  { %22294 = vst [vmem:[#allocation112_spill] sm:$0xff] %v16738_v43 }
 0x532   :  { %v1709_v40 = vpop.f32.mrf.mxu3  ;;  %3059 = vmatpush.bf16.msra.mxu2 %v16634_v15  ;;  %3357 = vmatpush.bf16.msra.mxu0 %v16636_v60  ;;  %v2707_v30 = vpop.f32.mrf.mxu2 }
 0x533   :  { %v16746_v1 = vadd.f32 %v2707_v30, %v2675_v61  ;;  %v1936_v18 = vpack.c.bf16 %v1709_v40, %v22300_v34  ;;  %v22312_v40 = vld [vmem:[#allocation27_spill] sm:$0xff] }
 0x535   :  { %11191 = vmatmul.msk.bf16.vlgmr.msra.gmra.mxu2 %vm2365_vm2, %v11154_v8  ;;  %22297 = vst [vmem:[#allocation114_spill] sm:$0xff] %v16746_v1  ;;  %v16751_v15 = vpop.f32.mrf.mxu1  ;;  %v4163_v11 = vunpack.c.l.b16 %v1936_v18  ;;  %v4461_v53 = vunpack.c.h.b16 %v1936_v18 }
 0x536   :  { %3624 = vmatpush.bf16.msrb.mxu2 %v22295_v21  ;;  %3922 = vmatpush.bf16.msrb.mxu0 %v22296_v28  ;;  %22301 = vst [vmem:[#allocation98_spill] sm:$0xff] %v16751_v15  ;;  %v22313_v28 = vld [vmem:[#allocation22_spill] sm:$0xff]  ;;  %v14229_v15 = vld [vmem:[%s22025_s5 + $0x290] sm:$0xf0] }
 0x53a   :  { %3625 = vmatpush.bf16.msrb.mxu2 %v22298_v24  ;;  %3923 = vmatpush.bf16.msrb.mxu0 %v22299_v3  ;;  %v1711_v60 = vpop.f32.mrf.mxu3  ;;  %v16756_v22 = vpop.f32.mrf.mxu2  ;;  %v11169_v24 = vld [vmem:[%s22025_s5 + $0x108] sm:$0xf]  ;;  %v14187_v3 = vld [vmem:[%s22025_s5 + $0x110] sm:$0xf0] }
 0x53b   :  { %v1941_v41 = vpack.c.bf16 %v1711_v60, %v16232_v26  ;;  %22304 = vst [vmem:[#allocation94_spill] sm:$0xff] %v16756_v22  ;;  %v22305_v26 = vld [vmem:[#allocation34_spill] sm:$0xff] }
 0x53d   :  { %v4164_v17 = vunpack.c.l.b16 %v1941_v41  ;;  %v4462_v47 = vunpack.c.h.b16 %v1941_v41  ;;  %v2679_v14 = vpop.f32.mrf.mxu1  ;;  %v11170_v41 = vor.u32 %v14187_v3, %v11169_v24 }
 0x53e   :  { %3626 = vmatpush.bf16.msrb.mxu2 %v22302_v42  ;;  %3924 = vmatpush.bf16.msrb.mxu0 %v22303_v52  ;;  %v2680_v16 = vadd.f32 %v2679_v14, %v16667_v57  ;;  %v22314_v57 = vld [vmem:[#allocation23_spill] sm:$0xff]  ;;  %v22317_v42 = vld [vmem:[#allocation18_spill] sm:$0xff] }
 0x53f   :  { %10969 = vmatmul.msk.bf16.gmra.mxu3 %vm833_vm0, %v15370_v37  ;;  %v16767_v51 = vpack.c.b16 %v4164_v17, %v4163_v11  ;;  %v16769_v36 = vpack.c.b16 %v4462_v47, %v4461_v53  ;;  %v22311_v37 = vld [vmem:[#allocation26_spill] sm:$0xff]  ;;  %3004 = vmatmul.bf16.gmra.mxu1 %v11170_v41  ;;  %v22322_v47 = vld [vmem:[#allocation80_spill] sm:$0xff]  ;;  %v22331_v41 = vld [vmem:[#allocation65_spill] sm:$0xff] }
 0x541   :  { %22306 = vst [vmem:[#allocation91_spill] sm:$0xff] %v16769_v36  ;;  %v11236_v36 = vld [vmem:[%s22025_s5 + $0x164] sm:$0xf] }
 0x542   :  { %3627 = vmatpush.bf16.msrb.mxu2 %v22305_v26  ;;  %3925 = vmatpush.bf16.msrb.mxu0 %v22307_v50  ;;  %v1714_v6 = vpop.f32.mrf.mxu3  ;;  %v2712_v5 = vpop.f32.mrf.mxu2  ;;  %v22323_v50 = vld [vmem:[#allocation45_spill] sm:$0xff] }
 0x543   :  { %v16775_v38 = vadd.f32 %v2712_v5, %v2680_v16  ;;  %v1946_v8 = vpack.c.bf16 %v1714_v6, %v16245_v9  ;;  %v22324_v6 = vld [vmem:[#allocation75_spill] sm:$0xff] }
 0x545   :  { %22310 = vst [vmem:[#allocation89_spill] sm:$0xff] %v16775_v38  ;;  %v4165_v30 = vunpack.c.l.b16 %v1946_v8  ;;  %v4463_v34 = vunpack.c.h.b16 %v1946_v8  ;;  %v16789_v60 = vpop.f32.mrf.mxu1 }
 0x546   :  { %3628 = vmatpush.bf16.msrb.mxu2 %v22308_v58  ;;  %3926 = vmatpush.bf16.msrb.mxu0 %v22309_v19  ;;  %22315 = vst [vmem:[#allocation87_spill] sm:$0xff] %v16789_v60  ;;  %v22325_v58 = vld [vmem:[#allocation44_spill] sm:$0xff]  ;;  %v14197_v60 = vld [vmem:[%s22025_s5 + $0x16c] sm:$0xf0] }
 0x54a   :  { %3629 = vmatpush.bf16.msrb.mxu2 %v22311_v37  ;;  %3927 = vmatpush.bf16.msrb.mxu0 %v22312_v40  ;;  %v1716_v61 = vpop.f32.mrf.mxu3  ;;  %v16800_v17 = vpop.f32.mrf.mxu2  ;;  %v22327_v40 = vld [vmem:[#allocation70_spill] sm:$0xff] }
 0x54b   :  { %v1951_v21 = vpack.c.bf16 %v1716_v61, %v16252_v4  ;;  %v22316_v4 = vld [vmem:[#allocation8_spill] sm:$0xff]  ;;  %22321 = vst [vmem:[#allocation25_spill] sm:$0xff] %v16800_v17  ;;  %v16807_v37 = vpop.f32.mrf.mxu0 }
 0x54c   :  { %22326 = vst [vmem:[#allocation116_spill] sm:$0xff] %v16807_v37  ;;  %v22377_v17 = vld [vmem:[#allocation56_spill] sm:$0xff] }
 0x54d   :  { %v4166_v9 = vunpack.c.l.b16 %v1951_v21  ;;  %v4464_v18 = vunpack.c.h.b16 %v1951_v21  ;;  %v2684_v29 = vpop.f32.mrf.mxu1  ;;  %v11181_v21 = vld [vmem:[%s22025_s5 + $0x120] sm:$0xf] }
 0x54e   :  { %3630 = vmatpush.bf16.msrb.mxu2 %v22313_v28  ;;  %3928 = vmatpush.bf16.msrb.mxu0 %v22314_v57  ;;  %v2685_v26 = vadd.f32 %v2684_v29, %v16682_v25  ;;  %v14190_v25 = vld [vmem:[%s22025_s5 + $0x128] sm:$0xf0] }
 0x54f   :  { %10970 = vmatmul.msk.bf16.gmra.mxu3 %vm833_vm0, %v22316_v4  ;;  %v16794_v52 = vpack.c.b16 %v4166_v9, %v4165_v30  ;;  %v16796_v11 = vpack.c.b16 %v4464_v18, %v4463_v34  ;;  %v11182_v24 = vor.u32 %v14190_v25, %v11181_v21  ;;  %v22329_v34 = vld [vmem:[#allocation9_spill] sm:$0xff] }
 0x551   :  { %22318 = vst [vmem:[#allocation21_spill] sm:$0xff] %v16796_v11  ;;  %3009 = vmatmul.bf16.gmra.mxu1 %v11182_v24  ;;  %v11237_v11 = vor.u32 %v14197_v60, %v11236_v36  ;;  %v11118_v36 = vld [vmem:[%s22025_s5 + $0x50] sm:$0xf]  ;;  %v14167_v60 = vld [vmem:[%s22025_s5 + $0x58] sm:$0xf0] }
 0x552   :  { %3631 = vmatpush.bf16.msrb.mxu2 %v22317_v42  ;;  %3929 = vmatpush.bf16.msrb.mxu0 %v22319_v45  ;;  %v1719_v53 = vpop.f32.mrf.mxu3  ;;  %v22332_v45 = vld [vmem:[#allocation60_spill] sm:$0xff] }
 0x553   :  { %v1956_v14 = vpack.c.bf16 %v1719_v53, %v22323_v50  ;;  %v22334_v53 = vld [vmem:[#allocation55_spill] sm:$0xff] }
 0x554   :  { %v16835_v50 = vld [vmem:[%s22025_s5 + $0x138] sm:$0x77] }
 0x555   :  { %v4167_v8 = vunpack.c.l.b16 %v1956_v14  ;;  %v4465_v28 = vunpack.c.h.b16 %v1956_v14  ;;  %v2686_v3 = vpop.f32.mrf.mxu1  ;;  %v22336_v14 = vld [vmem:[#allocation40_spill] sm:$0xff] }
 0x556   :  { %3955 = vmatpush.bf16.msra.mxu2 %v22320_v56  ;;  %v16826_v56 = vpop.f32.mrf.mxu0 }
 0x557   :  { %v2717_v5 = vpop.f32.mrf.mxu2  ;;  %22333 = vst [vmem:[#allocation47_spill] sm:$0xff] %v16826_v56 }
 0x558   :  { %v16810_v61 = vadd.f32 %v2717_v5, %v2685_v26 }
 0x55a   :  { %3956 = vmatpush.bf16.msra.mxu2 %v22322_v47  ;;  %v1721_v16 = vpop.f32.mrf.mxu3  ;;  %22328 = vst [vmem:[#allocation118_spill] sm:$0xff] %v16810_v61  ;;  %v22335_v47 = vld [vmem:[#allocation41_spill] sm:$0xff] }
 0x55b   :  { %v1961_v19 = vpack.c.bf16 %v1721_v16, %v22325_v58  ;;  %v2815_v16 = vunpack.c.l.b16 %v16835_v50  ;;  %v22337_v58 = vld [vmem:[#allocation52_spill] sm:$0xff] }
 0x55d   :  { %v4168_v30 = vunpack.c.l.b16 %v1961_v19  ;;  %v4466_v57 = vunpack.c.h.b16 %v1961_v19 }
 0x55e   :  { %3957 = vmatpush.bf16.msra.mxu2 %v22324_v6  ;;  %v16848_v25 = vpop.f32.mrf.mxu0 }
 0x55f   :  { %10971 = vmatmul.msk.bf16.gmra.mxu3 %vm833_vm0, %v22329_v34  ;;  %v16820_v9 = vpack.c.b16 %v4168_v30, %v4167_v8  ;;  %v16822_v18 = vpack.c.b16 %v4466_v57, %v4465_v28  ;;  %v2719_v42 = vpop.f32.mrf.mxu2  ;;  %v2830_v8 = vpack.c.b16 %v2815_v16, %v2815_v16  ;;  %22340 = vst [vmem:[#allocation43_spill] sm:$0xff] %v16848_v25  ;;  %v22341_v30 = vld [vmem:[#allocation37_spill] sm:$0xff]  ;;  %v22343_v34 = vld [vmem:[#allocation36_spill] sm:$0xff] }
 0x560   :  { %v11218_v42 = vld [vmem:[%s22025_s5 + $0x150] sm:$0xf0] }
 0x561   :  { %22330 = vst [vmem:[#allocation46_spill] sm:$0xff] %v16822_v18  ;;  %3014 = vmatmul.bf16.gmra.mxu1 %v2830_v8 }
 0x562   :  { %3958 = vmatpush.bf16.msra.mxu2 %v22327_v40  ;;  %v1724_v4 = vpop.f32.mrf.mxu3  ;;  %v22338_v40 = vld [vmem:[#allocation10_spill] sm:$0xff] }
 0x563   :  { %v16830_v29 = vpack.c.bf16 %v1724_v4, %v22335_v47  ;;  %v14192_v4 = vld [vmem:[%s22025_s5 + $0x148] sm:$0xf] }
 0x564   :  { %v11221_v47 = vor.u32 %v14192_v4, %v11218_v42 }
 0x565   :  { %v4467_v19 = vunpack.c.h.b16 %v16830_v29 }
 0x566   :  { %3959 = vmatpush.bf16.msra.mxu2 %v22331_v41  ;;  %v16851_v24 = vpop.f32.mrf.mxu0 }
 0x567   :  { %22342 = vst [vmem:[#allocation50_spill] sm:$0xff] %v16851_v24 }
 0x56a   :  { %3960 = vmatpush.bf16.msra.mxu2 %v22332_v45  ;;  %v1726_v26 = vpop.f32.mrf.mxu3 }
 0x56b   :  { %v16838_v6 = vpack.c.bf16 %v1726_v26, %v22336_v14  ;;  %v22344_v26 = vld [vmem:[#allocation11_spill] sm:$0xff] }
 0x56d   :  { %v4468_v5 = vunpack.c.h.b16 %v16838_v6 }
 0x56e   :  { %3961 = vmatpush.bf16.msra.mxu2 %v22334_v53 }
 0x56f   :  { %10972 = vmatmul.msk.bf16.gmra.mxu3 %vm833_vm0, %v22338_v40  ;;  %v16846_v21 = vpack.c.b16 %v4468_v5, %v4467_v19  ;;  %v22347_v19 = vld [vmem:[#allocation49_spill] sm:$0xff]  ;;  %v22348_v40 = vld [vmem:[#allocation54_spill] sm:$0xff] }
 0x571   :  { %22339 = vst [vmem:[#allocation42_spill] sm:$0xff] %v16846_v21  ;;  %3325 = vmatmul.bf16.vlgmr.msrb.gmra.mxu1 %v11221_v47  ;;  %v22382_v21 = vld [vmem:[#allocation5_spill] sm:$0xff] }
 0x572   :  { %3962 = vmatpush.bf16.msra.mxu2 %v22337_v58  ;;  %v1729_v28 = vpop.f32.mrf.mxu3  ;;  %v16864_v58 = vpop.f32.mrf.mxu0 }
 0x573   :  { %v1976_v57 = vpack.c.bf16 %v1729_v28, %v22341_v30  ;;  %22346 = vst [vmem:[#allocation39_spill] sm:$0xff] %v16864_v58  ;;  %v14195_v30 = vld [vmem:[%s22025_s5 + $0x160] sm:$0xf] }
 0x575   :  { %v4469_v45 = vunpack.c.h.b16 %v1976_v57 }
 0x57a   :  { %v1731_v3 = vpop.f32.mrf.mxu3 }
 0x57b   :  { %v1981_v41 = vpack.c.bf16 %v1731_v3, %v22343_v34  ;;  %v11230_v3 = vld [vmem:[%s22025_s5 + $0x168] sm:$0xf0] }
 0x57c   :  { %v11233_v42 = vor.u32 %v14195_v30, %v11230_v3  ;;  %v14198_v30 = vld [vmem:[%s22025_s5 + $0x178] sm:$0xf]  ;;  %v11242_v3 = vld [vmem:[%s22025_s5 + $0x180] sm:$0xf0] }
 0x57d   :  { %v4470_v53 = vunpack.c.h.b16 %v1981_v41  ;;  %v11245_v37 = vor.u32 %v14198_v30, %v11242_v3  ;;  %v22357_v30 = vld [vmem:[#allocation67_spill] sm:$0xff] }
 0x57f   :  { %10973 = vmatmul.msk.bf16.gmra.mxu3 %vm833_vm0, %v22344_v26  ;;  %v16862_v14 = vpack.c.b16 %v4470_v53, %v4469_v45  ;;  %v16874_v45 = vpop.f32.mrf.mxu0  ;;  %v22350_v53 = vld [vmem:[#allocation12_spill] sm:$0xff] }
 0x580   :  { %22349 = vst [vmem:[#allocation34_spill] sm:$0xff] %v16874_v45  ;;  %v4171_v45 = vunpack.c.l.b16 %v1976_v57 }
 0x581   :  { %22345 = vst [vmem:[#allocation38_spill] sm:$0xff] %v16862_v14  ;;  %3330 = vmatmul.bf16.gmra.mxu1 %v11233_v42  ;;  %v11429_v14 = vld [vmem:[%s22025_s5 + $0x288] sm:$0xf] }
 0x582   :  { %v1734_v16 = vpop.f32.mrf.mxu3 }
 0x583   :  { %v1986_v5 = vpack.c.bf16 %v1734_v16, %v22347_v19  ;;  %v22353_v19 = vld [vmem:[#allocation77_spill] sm:$0xff] }
 0x585   :  { %v4471_v34 = vunpack.c.h.b16 %v1986_v5 }
 0x587   :  { %v16880_v16 = vpop.f32.mrf.mxu0 }
 0x588   :  { %22352 = vst [vmem:[#allocation30_spill] sm:$0xff] %v16880_v16 }
 0x58a   :  { %v1736_v8 = vpop.f32.mrf.mxu3 }
 0x58b   :  { %v1991_v28 = vpack.c.bf16 %v1736_v8, %v22348_v40 }
 0x58d   :  { %v4472_v4 = vunpack.c.h.b16 %v1991_v28  ;;  %v4174_v56 = vunpack.c.l.b16 %v1991_v28  ;;  %v4169_v28 = vunpack.c.l.b16 %v16830_v29 }
 0x58f   :  { %10974 = vmatmul.msk.bf16.gmra.mxu3 %vm833_vm0, %v22350_v53  ;;  %v16878_v47 = vpack.c.b16 %v4472_v4, %v4471_v34 }
 0x591   :  { %22351 = vst [vmem:[#allocation35_spill] sm:$0xff] %v16878_v47  ;;  %3335 = vmatmul.bf16.gmra.mxu1 %v11245_v37  ;;  %v14201_v37 = vld [vmem:[%s22025_s5 + $0x190] sm:$0xf] }
 0x592   :  { %v1739_v26 = vpop.f32.mrf.mxu3 }
 0x593   :  { %v1996_v8 = vpack.c.bf16 %v1739_v26, %v22353_v19  ;;  %v16894_v26 = vpop.f32.mrf.mxu0 }
 0x594   :  { %22356 = vst [vmem:[#allocation26_spill] sm:$0xff] %v16894_v26 }
 0x595   :  { %v4175_v53 = vunpack.c.l.b16 %v1996_v8  ;;  %v4473_v34 = vunpack.c.h.b16 %v1996_v8 }
 0x59a   :  { %v1741_v40 = vpop.f32.mrf.mxu3 }
 0x59b   :  { %v2001_v54 = vpack.c.bf16 %v1741_v40, %v22354_v10  ;;  %v4173_v10 = vunpack.c.l.b16 %v1986_v5  ;;  %v4172_v40 = vunpack.c.l.b16 %v1981_v41 }
 0x59d   :  { %v4176_v4 = vunpack.c.l.b16 %v2001_v54  ;;  %v4474_v42 = vunpack.c.h.b16 %v2001_v54  ;;  %v4209_v58 = vpack.c.b16 %v4174_v56, %v4173_v10  ;;  %v4170_v54 = vunpack.c.l.b16 %v16838_v6  ;;  %v11254_v56 = vld [vmem:[%s22025_s5 + $0x198] sm:$0xf0] }
 0x59e   :  { %v4208_v8 = vpack.c.b16 %v4172_v40, %v4171_v45 }
 0x59f   :  { %v4210_v25 = vpack.c.b16 %v4176_v4, %v4175_v53  ;;  %v16890_v24 = vpack.c.b16 %v4474_v42, %v4473_v34  ;;  %10975 = vmatmul.msk.bf16.gmra.mxu3 %vm833_vm0, %v15458_v35  ;;  %v22358_v35 = vld [vmem:[#allocation62_spill] sm:$0xff]  ;;  %v16900_v34 = vpop.f32.mrf.mxu0 }
 0x5a0   :  { %22359 = vst [vmem:[#allocation27_spill] sm:$0xff] %v16900_v34 }
 0x5a1   :  { %22355 = vst [vmem:[#allocation31_spill] sm:$0xff] %v16890_v24  ;;  %4262 = vmatpush.bf16.msrb.mxu1 %v4210_v25  ;;  %v4207_v25 = vpack.c.b16 %v4170_v54, %v4169_v28  ;;  %v22361_v54 = vld [vmem:[#allocation63_spill] sm:$0xff] }
 0x5a2   :  { %v1744_v19 = vpop.f32.mrf.mxu3 }
 0x5a3   :  { %v2006_v3 = vpack.c.bf16 %v1744_v19, %v22357_v30 }
 0x5a5   :  { %4263 = vmatpush.bf16.msrb.mxu1 %v4209_v58  ;;  %v4177_v6 = vunpack.c.l.b16 %v2006_v3  ;;  %v4475_v57 = vunpack.c.h.b16 %v2006_v3  ;;  %v11257_v58 = vor.u32 %v14201_v37, %v11254_v56 }
 0x5a7   :  { %3340 = vmatmul.bf16.gmra.mxu1 %v11257_v58  ;;  %v16916_v10 = vpop.f32.mrf.mxu0  ;;  %v22366_v58 = vld [vmem:[#allocation68_spill] sm:$0xff] }
 0x5a8   :  { %22360 = vst [vmem:[#allocation22_spill] sm:$0xff] %v16916_v10  ;;  %v22375_v10 = vld [vmem:[#allocation66_spill] sm:$0xff] }
 0x5a9   :  { %4264 = vmatpush.bf16.msrb.mxu1 %v4208_v8 }
 0x5aa   :  { %v1746_v53 = vpop.f32.mrf.mxu3 }
 0x5ab   :  { %v2011_v5 = vpack.c.bf16 %v1746_v53, %v22358_v35  ;;  %v11159_v35 = vld [vmem:[%s22025_s5 + $0xfc] sm:$0xf0] }
 0x5ad   :  { %v4178_v29 = vunpack.c.l.b16 %v2011_v5  ;;  %v4476_v41 = vunpack.c.h.b16 %v2011_v5  ;;  %4265 = vmatpush.bf16.msrb.mxu1 %v4207_v25 }
 0x5af   :  { %10976 = vmatmul.msk.bf16.gmra.mxu3 %vm833_vm0, %v15472_v62  ;;  %v16910_v45 = vpack.c.b16 %v4178_v29, %v4177_v6  ;;  %v16912_v4 = vpack.c.b16 %v4476_v41, %v4475_v57  ;;  %v16923_v62 = vld [vmem:[%s22025_s5 + $0x1a4] sm:$0x77]  ;;  %v16940_v37 = vpop.f32.mrf.mxu0  ;;  %v22364_v6 = vld [vmem:[#allocation64_spill] sm:$0xff] }
 0x5b0   :  { %22363 = vst [vmem:[#allocation23_spill] sm:$0xff] %v16940_v37 }
 0x5b1   :  { %4266 = vmatpush.bf16.msrb.mxu1 %v16820_v9  ;;  %v3156_v9 = vunpack.c.h.b16 %v16923_v62 }
 0x5b2   :  { %v1749_v42 = vpop.f32.mrf.mxu3 }
 0x5b3   :  { %v2016_v19 = vpack.c.bf16 %v1749_v42, %v16411_v63  ;;  %v3171_v53 = vpack.c.b16 %v3156_v9, %v3156_v9  ;;  %v22362_v63 = vld [vmem:[#allocation13_spill] sm:$0xff] }
 0x5b5   :  { %4267 = vmatpush.bf16.msrb.mxu1 %v16794_v52  ;;  %v4179_v28 = vunpack.c.l.b16 %v2016_v19  ;;  %v4477_v30 = vunpack.c.h.b16 %v2016_v19  ;;  %v11295_v19 = vld [vmem:[%s22025_s5 + $0x1b8] sm:$0xf] }
 0x5b7   :  { %3345 = vmatmul.bf16.gmra.mxu1 %v3171_v53  ;;  %v16943_v29 = vpop.f32.mrf.mxu0  ;;  %v11171_v53 = vld [vmem:[%s22025_s5 + $0x114] sm:$0xf0] }
 0x5b8   :  { %22365 = vst [vmem:[#allocation8_spill] sm:$0xff] %v16943_v29  ;;  %v22376_v29 = vld [vmem:[#allocation61_spill] sm:$0xff] }
 0x5b9   :  { %4268 = vmatpush.bf16.msrb.mxu1 %v16767_v51  ;;  %v14183_v51 = vld [vmem:[%s22025_s5 + $0xf4] sm:$0xf] }
 0x5ba   :  { %v1751_v40 = vpop.f32.mrf.mxu3  ;;  %v11162_v56 = vor.u32 %v14183_v51, %v11159_v35 }
 0x5bb   :  { %v2021_v8 = vpack.c.bf16 %v1751_v40, %v22361_v54  ;;  %v14206_v40 = vld [vmem:[%s22025_s5 + $0x1c0] sm:$0xf0] }
 0x5bc   :  { %3032 = vmatmul.bf16.gmra.mxu0 %v11162_v56  ;;  %v11165_v56 = vld [vmem:[%s22025_s5 + $0xf8] sm:$0xf] }
 0x5bd   :  { %v4180_v3 = vunpack.c.l.b16 %v2021_v8  ;;  %v4478_v52 = vunpack.c.h.b16 %v2021_v8  ;;  %4269 = vmatpush.bf16.msrb.mxu1 %v16736_v20 }
 0x5bf   :  { %10977 = vmatmul.msk.bf16.gmra.mxu3 %vm833_vm0, %v22362_v63  ;;  %v16936_v5 = vpack.c.b16 %v4180_v3, %v4179_v28  ;;  %v16938_v25 = vpack.c.b16 %v4478_v52, %v4477_v30  ;;  %v11296_v30 = vor.u32 %v14206_v40, %v11295_v19  ;;  %v22367_v3 = vld [vmem:[#allocation14_spill] sm:$0xff] }
 0x5c0   :  { %v14186_v52 = vld [vmem:[%s22025_s5 + $0x10c] sm:$0xf] }
 0x5c1   :  { %v11174_v35 = vor.u32 %v14186_v52, %v11171_v53  ;;  %v22369_v40 = vld [vmem:[#allocation74_spill] sm:$0xff] }
 0x5c2   :  { %v1754_v20 = vpop.f32.mrf.mxu3 }
 0x5c3   :  { %v2026_v57 = vpack.c.bf16 %v1754_v20, %v22364_v6  ;;  %v14185_v20 = vld [vmem:[%s22025_s5 + $0x100] sm:$0xf0] }
 0x5c5   :  { %v4181_v54 = vunpack.c.l.b16 %v2026_v57  ;;  %v4479_v8 = vunpack.c.h.b16 %v2026_v57  ;;  %v11166_v57 = vor.u32 %v14185_v20, %v11165_v56  ;;  %v22370_v56 = vld [vmem:[#allocation15_spill] sm:$0xff]  ;;  %v14189_v20 = vld [vmem:[%s22025_s5 + $0x124] sm:$0xf] }
 0x5c7   :  { %11333 = vmatmul.msk.bf16.vlgmr.msra.gmra.mxu1 %vm2365_vm2, %v11296_v30  ;;  %11192 = vmatmul.msk.bf16.gmra.mxu2 %vm2365_vm2, %v11166_v57 }
 0x5ca   :  { %v1756_v41 = vpop.f32.mrf.mxu3 }
 0x5cb   :  { %v2031_v42 = vpack.c.bf16 %v1756_v41, %v22366_v58  ;;  %v16971_v41 = vpop.f32.mrf.mxu0  ;;  %v22368_v58 = vld [vmem:[#allocation69_spill] sm:$0xff] }
 0x5cc   :  { %3037 = vmatmul.bf16.gmra.mxu0 %v11174_v35 }
 0x5cd   :  { %v4182_v9 = vunpack.c.l.b16 %v2031_v42  ;;  %v4480_v28 = vunpack.c.h.b16 %v2031_v42 }
 0x5cf   :  { %10978 = vmatmul.msk.bf16.gmra.mxu3 %vm833_vm0, %v22367_v3  ;;  %v16960_v63 = vpack.c.b16 %v4182_v9, %v4181_v54  ;;  %v16962_v51 = vpack.c.b16 %v4480_v28, %v4479_v8  ;;  %v11307_v8 = vld [vmem:[%s22025_s5 + $0x1d0] sm:$0xf]  ;;  %v14209_v9 = vld [vmem:[%s22025_s5 + $0x1d8] sm:$0xf0] }
 0x5d0   :  { %v11308_v35 = vor.u32 %v14209_v9, %v11307_v8  ;;  %v17006_v9 = vpop.f32.mrf.mxu1 }
 0x5d2   :  { %v1759_v6 = vpop.f32.mrf.mxu3 }
 0x5d3   :  { %v2036_v42 = vpack.c.bf16 %v1759_v6, %v22368_v58  ;;  %v16982_v53 = vpop.f32.mrf.mxu0  ;;  %v11183_v6 = vld [vmem:[%s22025_s5 + $0x12c] sm:$0xf0] }
 0x5d5   :  { %v4183_v28 = vunpack.c.l.b16 %v2036_v42  ;;  %v4481_v30 = vunpack.c.h.b16 %v2036_v42  ;;  %v11186_v42 = vor.u32 %v14189_v20, %v11183_v6  ;;  %v14212_v20 = vld [vmem:[%s22025_s5 + $0x1f0] sm:$0xf0] }
 0x5d7   :  { %11334 = vmatmul.msk.bf16.gmra.mxu1 %vm2365_vm2, %v11308_v35  ;;  %v11319_v35 = vld [vmem:[%s22025_s5 + $0x1e8] sm:$0xf] }
 0x5d8   :  { %v17024_v6 = vpop.f32.mrf.mxu1 }
 0x5da   :  { %v1761_v19 = vpop.f32.mrf.mxu3 }
 0x5db   :  { %v2041_v54 = vpack.c.bf16 %v1761_v19, %v22369_v40  ;;  %v11177_v19 = vld [vmem:[%s22025_s5 + $0x110] sm:$0xf]  ;;  %v14188_v40 = vld [vmem:[%s22025_s5 + $0x118] sm:$0xf0] }
 0x5dc   :  { %3042 = vmatmul.bf16.gmra.mxu0 %v11186_v42  ;;  %v11178_v8 = vor.u32 %v14188_v40, %v11177_v19  ;;  %v11320_v42 = vor.u32 %v14212_v20, %v11319_v35  ;;  %v2816_v19 = vunpack.c.h.b16 %v16835_v50  ;;  %v22371_v40 = vld [vmem:[#allocation84_spill] sm:$0xff] }
 0x5dd   :  { %v4184_v3 = vunpack.c.l.b16 %v2041_v54  ;;  %v4482_v52 = vunpack.c.h.b16 %v2041_v54  ;;  %v22373_v20 = vld [vmem:[#allocation76_spill] sm:$0xff] }
 0x5de   :  { %11193 = vmatmul.msk.bf16.gmra.mxu2 %vm2365_vm2, %v11178_v8  ;;  %v2831_v8 = vpack.c.b16 %v2816_v19, %v2816_v19  ;;  %v11094_v19 = vld [vmem:[%s22025_s5 + $0x20] sm:$0xf] }
 0x5df   :  { %10979 = vmatmul.msk.bf16.gmra.mxu3 %vm833_vm0, %v22370_v56  ;;  %v16992_v57 = vpack.c.b16 %v4184_v3, %v4183_v28  ;;  %v16994_v58 = vpack.c.b16 %v4482_v52, %v4481_v30  ;;  %v17008_v28 = vpop.f32.mrf.mxu0  ;;  %v11082_v30 = vld [vmem:[%s22025_s5 + $0x8] sm:$0xf]  ;;  %v14158_v3 = vld [vmem:[%s22025_s5 + $0x10] sm:$0xf0] }
 0x5e0   :  { %v11083_v56 = vor.u32 %v14158_v3, %v11082_v30  ;;  %v11189_v30 = vld [vmem:[%s22025_s5 + $0x128] sm:$0xf]  ;;  %v14191_v3 = vld [vmem:[%s22025_s5 + $0x130] sm:$0xf0]  ;;  %v17042_v35 = vpop.f32.mrf.mxu1 }
 0x5e1   :  { %v11190_v50 = vor.u32 %v14191_v3, %v11189_v30  ;;  %v22374_v30 = vld [vmem:[#allocation71_spill] sm:$0xff]  ;;  %v11331_v3 = vld [vmem:[%s22025_s5 + $0x200] sm:$0xf] }
 0x5e2   :  { %v17002_v54 = vpop.f32.mrf.mxu3 }
 0x5e7   :  { %v17035_v16 = vpop.f32.mrf.mxu0  ;;  %11335 = vmatmul.msk.bf16.gmra.mxu1 %vm2365_vm2, %v11320_v42 }
 0x5ea   :  { %v17016_v52 = vpop.f32.mrf.mxu3 }
 0x5ec   :  { %3047 = vmatmul.bf16.gmra.mxu0 %v2831_v8 }
 0x5ee   :  { %11194 = vmatmul.msk.bf16.gmra.mxu2 %vm2365_vm2, %v11190_v50  ;;  %v14215_v50 = vld [vmem:[%s22025_s5 + $0x208] sm:$0xf0] }
 0x5ef   :  { %11120 = vmatmul.msk.bf16.vlgmr.msra.gmra.mxu3 %vm2365_vm2, %v11083_v56  ;;  %v22372_v56 = vld [vmem:[#allocation81_spill] sm:$0xff]  ;;  %v17051_v8 = vpop.f32.mrf.mxu0 }
 0x5f0   :  { %3657 = vmatpush.bf16.msra.mxu3 %v22371_v40  ;;  %v14161_v40 = vld [vmem:[%s22025_s5 + $0x28] sm:$0xf0] }
 0x5f1   :  { %v11095_v42 = vor.u32 %v14161_v40, %v11094_v19  ;;  %v11224_v19 = vld [vmem:[%s22025_s5 + $0x14c] sm:$0xf]  ;;  %v14194_v40 = vld [vmem:[%s22025_s5 + $0x154] sm:$0xf0] }
 0x5f2   :  { %v17037_v26 = vpop.f32.mrf.mxu3  ;;  %v11225_v37 = vor.u32 %v14194_v40, %v11224_v19 }
 0x5f4   :  { %3658 = vmatpush.bf16.msra.mxu3 %v22372_v56  ;;  %v11332_v56 = vor.u32 %v14215_v50, %v11331_v3 }
 0x5f7   :  { %v17077_v61 = vpop.f32.mrf.mxu0 }
 0x5f8   :  { %3659 = vmatpush.bf16.msra.mxu3 %v22373_v20  ;;  %v17061_v20 = vpop.f32.mrf.mxu1  ;;  %11336 = vmatmul.msk.bf16.gmra.mxu1 %vm2365_vm2, %v11332_v56  ;;  %v14164_v56 = vld [vmem:[%s22025_s5 + $0x40] sm:$0xf0] }
 0x5fa   :  { %v1771_v34 = vpop.f32.mrf.mxu3 }
 0x5fb   :  { %v2061_v24 = vpack.c.bf16 %v1771_v34, %v22383_v33  ;;  %v14208_v34 = vld [vmem:[%s22025_s5 + $0x1d0] sm:$0xf0] }
 0x5fc   :  { %3660 = vmatpush.bf16.msra.mxu3 %v22374_v30  ;;  %v11142_v30 = vld [vmem:[%s22025_s5 + $0x140] sm:$0x7]  ;;  %11262 = vmatmul.msk.bf16.vlgmr.msra.gmra.mxu0 %vm2365_vm2, %v11225_v37 }
 0x5fd   :  { %v2817_v3 = vunpack.c.l.b16 %v11142_v30  ;;  %v22378_v30 = vld [vmem:[#allocation53_spill] sm:$0xff] }
 0x5ff   :  { %11121 = vmatmul.msk.bf16.gmra.mxu3 %vm2365_vm2, %v11095_v42  ;;  %v2832_v42 = vpack.c.b16 %v2817_v3, %v2817_v3 }
 0x600   :  { %3661 = vmatpush.bf16.msra.mxu3 %v22375_v10  ;;  %v17079_v43 = vpop.f32.mrf.mxu1  ;;  %v11106_v10 = vld [vmem:[%s22025_s5 + $0x38] sm:$0xf] }
 0x601   :  { %11195 = vmatmul.msk.bf16.gmra.mxu2 %vm2365_vm2, %v2832_v42  ;;  %v11107_v19 = vor.u32 %v14164_v56, %v11106_v10  ;;  %v17095_v42 = vpop.f32.mrf.mxu0  ;;  %v11287_v10 = vld [vmem:[%s22025_s5 + $0x1b0] sm:$0xf]  ;;  %v14205_v56 = vld [vmem:[%s22025_s5 + $0x1b8] sm:$0xf0] }
 0x602   :  { %v1774_v50 = vpop.f32.mrf.mxu3 }
 0x603   :  { %v2066_v22 = vpack.c.bf16 %v1774_v50, %v22382_v21  ;;  %v11248_v50 = vld [vmem:[%s22025_s5 + $0x17c] sm:$0xf] }
 0x604   :  { %3662 = vmatpush.bf16.msra.mxu3 %v22376_v29  ;;  %v11284_v29 = vld [vmem:[%s22025_s5 + $0x218] sm:$0x7] }
 0x605   :  { %v3455_v40 = vunpack.c.l.b16 %v11284_v29 }
 0x607   :  { %v3470_v3 = vpack.c.b16 %v3455_v40, %v3455_v40 }
 0x608   :  { %3663 = vmatpush.bf16.msra.mxu3 %v22377_v17  ;;  %v17093_v17 = vpop.f32.mrf.mxu1 }
 0x609   :  { %11337 = vmatmul.msk.bf16.gmra.mxu1 %vm2365_vm2, %v3470_v3  ;;  %v17120_v31 = vpop.f32.mrf.mxu0  ;;  %v22380_v3 = vld [vmem:[#allocation120_spill] sm:$0xff] }
 0x60a   :  { %v1776_v37 = vpop.f32.mrf.mxu3 }
 0x60c   :  { %3664 = vmatpush.bf16.msra.mxu3 %v22378_v30  ;;  %11263 = vmatmul.msk.bf16.gmra.mxu0 %vm2365_vm2, %v11237_v11  ;;  %v22379_v30 = vld [vmem:[#allocation6_spill] sm:$0xff] }
 0x60f   :  { %11122 = vmatmul.msk.bf16.gmra.mxu3 %vm2365_vm2, %v11107_v19  ;;  %v11288_v19 = vor.u32 %v14205_v56, %v11287_v10  ;;  %v2071_v10 = vpack.c.bf16 %v1776_v37, %v22380_v3  ;;  %v22381_v56 = vld [vmem:[#allocation121_spill] sm:$0xff]  ;;  %v11430_v37 = vor.u32 %v14229_v15, %v11429_v14  ;;  %v4189_v15 = vunpack.c.l.b16 %v2066_v22 }
 0x610   :  { %v17111_v40 = vpop.f32.mrf.mxu1  ;;  %v4487_v14 = vunpack.c.h.b16 %v2066_v22 }
 0x611   :  { %3632 = vmatmul.bf16.vlgmr.msrb.gmra.mxu2 %v11288_v19  ;;  %v11119_v19 = vor.u32 %v14167_v60, %v11118_v36  ;;  %v4190_v3 = vunpack.c.l.b16 %v2071_v10 }
 0x612   :  { %v1779_v29 = vpop.f32.mrf.mxu3 }
 0x613   :  { %v2076_v38 = vpack.c.bf16 %v1779_v29, %v22379_v30  ;;  %v4217_v22 = vpack.c.b16 %v4190_v3, %v4189_v15 }
 0x615   :  { %v4191_v47 = vunpack.c.l.b16 %v2076_v38  ;;  %v4489_v29 = vunpack.c.h.b16 %v2076_v38  ;;  %v14200_v38 = vld [vmem:[%s22025_s5 + $0x184] sm:$0xf0] }
 0x618   :  { %v17133_v21 = vpop.f32.mrf.mxu1 }
 0x619   :  { %22384 = vst [vmem:[#allocation18_spill] sm:$0xff] %v17133_v21  ;;  %4270 = vmatmul.bf16.vlgmr.msrb.gmra.mxu1 %v11430_v37 }
 0x61a   :  { %v1781_v18 = vpop.f32.mrf.mxu3 }
 0x61b   :  { %v2081_v11 = vpack.c.bf16 %v1781_v18, %v22381_v56  ;;  %v4488_v18 = vunpack.c.h.b16 %v2071_v10  ;;  %v22385_v56 = vld [vmem:[#allocation83_spill] sm:$0xff]  ;;  %v22386_v10 = vld [vmem:[#allocation82_spill] sm:$0xff] }
 0x61c   :  { %v2056_v33 = vpack.c.bf16 %v17037_v26, %v22385_v56  ;;  %v4188_v26 = vunpack.c.l.b16 %v2061_v24 }
 0x61d   :  { %v4192_v30 = vunpack.c.l.b16 %v2081_v11  ;;  %v4490_v1 = vunpack.c.h.b16 %v2081_v11  ;;  %v2051_v11 = vpack.c.bf16 %v17016_v52, %v22386_v10 }
 0x61e   :  { %v4187_v44 = vunpack.c.l.b16 %v2056_v33  ;;  %v4485_v52 = vunpack.c.h.b16 %v2056_v33 }
 0x61f   :  { %v4218_v36 = vpack.c.b16 %v4192_v30, %v4191_v47  ;;  %v4516_v60 = vpack.c.b16 %v4490_v1, %v4489_v29  ;;  %11123 = vmatmul.msk.bf16.gmra.mxu3 %vm2365_vm2, %v11119_v19  ;;  %v11249_v1 = vor.u32 %v14200_v38, %v11248_v50  ;;  %v11299_v47 = vld [vmem:[%s22025_s5 + $0x1c8] sm:$0xf]  ;;  %v4486_v30 = vunpack.c.h.b16 %v2061_v24 }
 0x620   :  { %v11300_v29 = vor.u32 %v14208_v34, %v11299_v47  ;;  %v2150_v50 = vld [vmem:[%s22025_s5 + $0x68] sm:$0x7]  ;;  %v4186_v37 = vunpack.c.l.b16 %v2051_v11  ;;  %v4484_v47 = vunpack.c.h.b16 %v2051_v11  ;;  %v4216_v24 = vpack.c.b16 %v4188_v26, %v4187_v44  ;;  %v11260_v26 = vld [vmem:[%s22025_s5 + $0x194] sm:$0xf] }
 0x621   :  { %4295 = vmatpush.bf16.msra.mxu0 %v4218_v36  ;;  %4593 = vmatpush.bf16.msra.mxu1 %v4516_v60  ;;  %v4515_v36 = vpack.c.b16 %v4488_v18, %v4487_v14  ;;  %v1918_v60 = vpop.f32.mrf.mxu0  ;;  %v22387_v38 = vld [vmem:[#allocation78_spill] sm:$0xff]  ;;  %v4514_v3 = vpack.c.b16 %v4486_v30, %v4485_v52  ;;  %v2528_v18 = vunpack.c.l.b16 %v2150_v50  ;;  %v14203_v30 = vld [vmem:[%s22025_s5 + $0x19c] sm:$0xf0] }
 0x622   :  { %v1784_v19 = vpop.f32.mrf.mxu3  ;;  %11264 = vmatmul.msk.bf16.gmra.mxu0 %vm2365_vm2, %v11249_v1  ;;  %3637 = vmatmul.bf16.gmra.mxu2 %v11300_v29  ;;  %v2046_v56 = vpack.c.bf16 %v17002_v54, %v22387_v38  ;;  %v22388_v1 = vld [vmem:[#allocation7_spill] sm:$0xff]  ;;  %v22389_v29 = vld [vmem:[#allocation122_spill] sm:$0xff] }
 0x623   :  { %v2086_v34 = vpack.c.bf16 %v1784_v19, %v22388_v1  ;;  %v2543_v38 = vpack.c.b16 %v2528_v18, %v2528_v18  ;;  %v22390_v1 = vld [vmem:[#allocation99_spill] sm:$0xff] }
 0x624   :  { %v4185_v15 = vunpack.c.l.b16 %v2046_v56  ;;  %v4483_v14 = vunpack.c.h.b16 %v2046_v56 }
 0x625   :  { %4296 = vmatpush.bf16.msra.mxu0 %v4217_v22  ;;  %4594 = vmatpush.bf16.msra.mxu1 %v4515_v36  ;;  %v4193_v33 = vunpack.c.l.b16 %v2086_v34  ;;  %v4491_v22 = vunpack.c.h.b16 %v2086_v34 }
 0x626   :  { %v4215_v59 = vpack.c.b16 %v4186_v37, %v4185_v15  ;;  %v4513_v54 = vpack.c.b16 %v4484_v47, %v4483_v14  ;;  %v2127_v37 = vpack.c.bf16 %v1918_v60, %v1918_v60  ;;  %v14193_v60 = vld [vmem:[%s22025_s5 + $0x14c] sm:$0xf0] }
 0x629   :  { %4297 = vmatpush.bf16.msra.mxu0 %v4216_v24  ;;  %4595 = vmatpush.bf16.msra.mxu1 %v4514_v3  ;;  %v1920_v44 = vpop.f32.mrf.mxu0  ;;  %v11216_v24 = vld [vmem:[%s22025_s5 + $0x144] sm:$0xf] }
 0x62a   :  { %v1786_v10 = vpop.f32.mrf.mxu3  ;;  %v2132_v50 = vpack.c.bf16 %v1920_v44, %v1920_v44  ;;  %v11217_v18 = vor.u32 %v14193_v60, %v11216_v24  ;;  %v3061_v60 = vpop.f32.mrf.mxu2 }
 0x62b   :  { %v2091_v21 = vpack.c.bf16 %v1786_v10, %v22389_v29 }
 0x62c   :  { %v4840_v47 = vunpack.c.l.b16 %v2132_v50  ;;  %v2087_v50 = vpack.c.bf16 %v16971_v41, %v16971_v41 }
 0x62d   :  { %v4194_v36 = vunpack.c.l.b16 %v2091_v21  ;;  %v4492_v23 = vunpack.c.h.b16 %v2091_v21  ;;  %4298 = vmatpush.bf16.msra.mxu0 %v4215_v59  ;;  %4596 = vmatpush.bf16.msra.mxu1 %v4513_v54  ;;  %v11261_v59 = vor.u32 %v14203_v30, %v11260_v26  ;;  %v11311_v21 = vld [vmem:[%s22025_s5 + $0x1e0] sm:$0xf]  ;;  %v14214_v54 = vld [vmem:[%s22025_s5 + $0x200] sm:$0xf0]  ;;  %v22391_v26 = vld [vmem:[#allocation95_spill] sm:$0xff] }
 0x62f   :  { %11124 = vmatmul.msk.bf16.gmra.mxu3 %vm2365_vm2, %v2543_v38  ;;  %v17160_v11 = vpack.c.b16 %v4194_v36, %v4193_v33  ;;  %v17162_v19 = vpack.c.b16 %v4492_v23, %v4491_v22  ;;  %v14211_v23 = vld [vmem:[%s22025_s5 + $0x1e8] sm:$0xf0]  ;;  %v2097_v38 = vpack.c.bf16 %v17008_v28, %v17008_v28  ;;  %v2092_v36 = vpack.c.bf16 %v16982_v53, %v16982_v53  ;;  %v14196_v53 = vld [vmem:[%s22025_s5 + $0x164] sm:$0xf0] }
 0x630   :  { %v11312_v52 = vor.u32 %v14211_v23, %v11311_v21  ;;  %v22392_v21 = vld [vmem:[#allocation92_spill] sm:$0xff] }
 0x631   :  { %4299 = vmatpush.bf16.msra.mxu0 %v16992_v57  ;;  %4597 = vmatpush.bf16.msra.mxu1 %v16994_v58  ;;  %v4839_v57 = vunpack.c.l.b16 %v2127_v37  ;;  %v2122_v58 = vpack.c.bf16 %v17120_v31, %v17120_v31  ;;  %v2112_v31 = vpack.c.bf16 %v17077_v61, %v17077_v61  ;;  %v3920_v61 = vsel %vm2381_vm1, %v22390_v1, 0  ;;  %v3028_v24 = vpop.f32.mrf.mxu0 }
 0x632   :  { %v17178_v56 = vpop.f32.mrf.mxu3  ;;  %11265 = vmatmul.msk.bf16.gmra.mxu0 %vm2365_vm2, %v11261_v59  ;;  %3642 = vmatmul.bf16.gmra.mxu2 %v11312_v52  ;;  %v4833_v59 = vunpack.c.l.b16 %v2097_v38  ;;  %v4832_v28 = vunpack.c.l.b16 %v2092_v36  ;;  %v11228_v52 = vld [vmem:[%s22025_s5 + $0x15c] sm:$0xf]  ;;  %v4831_v37 = vunpack.c.l.b16 %v2087_v50  ;;  %v11360_v36 = vld [vmem:[%s22025_s5 + $0x228] sm:$0xf0] }
 0x633   :  { %v4861_v3 = vpack.c.b16 %v4840_v47, %v4839_v57  ;;  %v4838_v15 = vunpack.c.l.b16 %v2122_v58  ;;  %v11229_v57 = vor.u32 %v14196_v53, %v11228_v52  ;;  %v22393_v58 = vld [vmem:[#allocation90_spill] sm:$0xff] }
 0x634   :  { %v4857_v41 = vpack.c.b16 %v4832_v28, %v4831_v37  ;;  %v14202_v28 = vld [vmem:[%s22025_s5 + $0x194] sm:$0xf0] }
 0x635   :  { %4300 = vmatpush.bf16.msra.mxu0 %v16960_v63  ;;  %4598 = vmatpush.bf16.msra.mxu1 %v16962_v51  ;;  %v2117_v63 = vpack.c.bf16 %v17095_v42, %v17095_v42  ;;  %v4898_v14 = vsel %vm2381_vm1, %v4861_v3, 0  ;;  %v11213_v42 = vld [vmem:[%s22025_s5 + $0x1ac] sm:$0x7]  ;;  %v3029_v3 = vadd.f32 %v3028_v24, %v17006_v9 }
 0x636   :  { %v3157_v34 = vunpack.c.l.b16 %v11213_v42 }
 0x638   :  { %v3172_v29 = vpack.c.b16 %v3157_v34, %v3157_v34 }
 0x639   :  { %4301 = vmatpush.bf16.msra.mxu0 %v16936_v5  ;;  %4599 = vmatpush.bf16.msra.mxu1 %v16938_v25  ;;  %v2107_v5 = vpack.c.bf16 %v17051_v8, %v17051_v8  ;;  %v4837_v25 = vunpack.c.l.b16 %v2117_v63  ;;  %v11323_v8 = vld [vmem:[%s22025_s5 + $0x1f8] sm:$0xf]  ;;  %v17239_v63 = vld [vmem:[%s22025_s5 + $0x210] sm:$0x77]  ;;  %v3030_v1 = vpop.f32.mrf.mxu0 }
 0x63a   :  { %v17195_v51 = vpop.f32.mrf.mxu3  ;;  %v3453_v9 = vunpack.c.l.b16 %v17239_v63  ;;  %v3031_v34 = vadd.f32 %v3030_v1, %v17024_v6  ;;  %v14216_v6 = vld [vmem:[%s22025_s5 + $0x220] sm:$0xf] }
 0x63b   :  { %v4860_v10 = vpack.c.b16 %v4838_v15, %v4837_v25  ;;  %v4835_v33 = vunpack.c.l.b16 %v2107_v5  ;;  %v11358_v15 = vld [vmem:[%s22025_s5 + $0x21c] sm:$0xf] }
 0x63c   :  { %v3468_v42 = vpack.c.b16 %v3453_v9, %v3453_v9 }
 0x63d   :  { %4302 = vmatpush.bf16.msra.mxu0 %v16910_v45  ;;  %4600 = vmatpush.bf16.msra.mxu1 %v16912_v4  ;;  %v2102_v45 = vpack.c.bf16 %v17035_v16, %v17035_v16  ;;  %v4836_v4 = vunpack.c.l.b16 %v2112_v31  ;;  %v11324_v16 = vor.u32 %v14214_v54, %v11323_v8  ;;  %v17242_v31 = vadd.f32 %v3061_v60, %v3029_v3 }
 0x63f   :  { %3292 = vmatmul.bf16.vlgmr.msrb.gmra.mxu3 %v11217_v18  ;;  %v4834_v44 = vunpack.c.l.b16 %v2102_v45  ;;  %v4859_v30 = vpack.c.b16 %v4836_v4, %v4835_v33  ;;  %v22394_v18 = vld [vmem:[#allocation88_spill] sm:$0xff]  ;;  %v11240_v45 = vld [vmem:[%s22025_s5 + $0x174] sm:$0xf] }
 0x640   :  { %3991 = vmatpush.bf16.msrb.mxu3 %v3920_v61  ;;  %v3063_v61 = vpop.f32.mrf.mxu2  ;;  %v14199_v4 = vld [vmem:[%s22025_s5 + $0x17c] sm:$0xf0] }
 0x641   :  { %4969 = vmatpush.bf16.msrb.mxu1 %v4898_v14  ;;  %v4858_v23 = vpack.c.b16 %v4834_v44, %v4833_v59  ;;  %v14217_v14 = vld [vmem:[%s22025_s5 + $0x224] sm:$0xf0]  ;;  %v11241_v8 = vor.u32 %v14199_v4, %v11240_v45  ;;  %v3033_v54 = vpop.f32.mrf.mxu0 }
 0x642   :  { %v17219_v22 = vpop.f32.mrf.mxu3  ;;  %11266 = vmatmul.msk.bf16.gmra.mxu0 %vm2365_vm2, %v3172_v29  ;;  %3647 = vmatmul.bf16.gmra.mxu2 %v11324_v16  ;;  %v11359_v5 = vor.u32 %v14217_v14, %v11358_v15  ;;  %v3034_v33 = vadd.f32 %v3033_v54, %v17042_v35  ;;  %v11252_v35 = vld [vmem:[%s22025_s5 + $0x18c] sm:$0xf] }
 0x643   :  { %v11253_v37 = vor.u32 %v14202_v28, %v11252_v35 }
 0x644   :  { %3992 = vmatpush.bf16.msrb.mxu3 %v22391_v26  ;;  %v11363_v26 = vor.u32 %v14216_v6, %v11360_v36 }
 0x645   :  { %4970 = vmatpush.bf16.msrb.mxu1 %v4860_v10  ;;  %v17258_v10 = vadd.f32 %v3063_v61, %v3031_v34 }
 0x648   :  { %3993 = vmatpush.bf16.msrb.mxu3 %v22392_v21 }
 0x649   :  { %4971 = vmatpush.bf16.msrb.mxu1 %v4859_v30  ;;  %v3035_v30 = vpop.f32.mrf.mxu0 }
 0x64a   :  { %v1796_v47 = vpop.f32.mrf.mxu3  ;;  %v3066_v38 = vpop.f32.mrf.mxu2  ;;  %v3036_v59 = vadd.f32 %v3035_v30, %v17061_v20 }
 0x64b   :  { %v17261_v16 = vadd.f32 %v3066_v38, %v3034_v33 }
 0x64c   :  { %3994 = vmatpush.bf16.msrb.mxu3 %v22393_v58  ;;  %v22396_v58 = vld [vmem:[#allocation73_spill] sm:$0xff] }
 0x64d   :  { %4972 = vmatpush.bf16.msrb.mxu1 %v4858_v23 }
 0x64f   :  { %3297 = vmatmul.bf16.gmra.mxu3 %v11229_v57  ;;  %v22395_v57 = vld [vmem:[#allocation51_spill] sm:$0xff] }
 0x650   :  { %3995 = vmatpush.bf16.msrb.mxu3 %v22394_v18 }
 0x651   :  { %4973 = vmatpush.bf16.msrb.mxu1 %v4857_v41  ;;  %v2430_v41 = vadd.f32 %v22396_v58, %v22395_v57  ;;  %v3038_v15 = vpop.f32.mrf.mxu0 }
 0x652   :  { %v1799_v25 = vpop.f32.mrf.mxu3  ;;  %3930 = vmatmul.bf16.vlgmr.msrb.gmra.mxu0 %v11359_v5  ;;  %3652 = vmatmul.bf16.gmra.mxu2 %v3468_v42  ;;  %v3068_v50 = vpop.f32.mrf.mxu2  ;;  %v3039_v5 = vadd.f32 %v3038_v15, %v17079_v43 }
 0x653   :  { %v17276_v21 = vadd.f32 %v3068_v50, %v3036_v59  ;;  %v2116_v9 = vpack.c.bf16 %v1799_v25, %v16664_v13  ;;  %v2106_v13 = vpack.c.bf16 %v17219_v22, %v16642_v55 }
 0x655   :  { %v4199_v25 = vunpack.c.l.b16 %v2116_v9  ;;  %v4497_v43 = vunpack.c.h.b16 %v2116_v9  ;;  %v4197_v30 = vunpack.c.l.b16 %v2106_v13  ;;  %v4495_v50 = vunpack.c.h.b16 %v2106_v13 }
 0x659   :  { %v3040_v55 = vpop.f32.mrf.mxu0 }
 0x65a   :  { %v1801_v29 = vpop.f32.mrf.mxu3 }
 0x65b   :  { %v2121_v20 = vpack.c.bf16 %v1801_v29, %v16672_v12  ;;  %v22397_v12 = vld [vmem:[#allocation108_spill] sm:$0xff] }
 0x65c   :  { %v2463_v45 = vadd.f32 %v22397_v12, %v2430_v41  ;;  %v22399_v41 = vld [vmem:[#allocation79_spill] sm:$0xff]  ;;  %v22404_v12 = vld [vmem:[#allocation97_spill] sm:$0xff] }
 0x65d   :  { %v4200_v1 = vunpack.c.l.b16 %v2121_v20  ;;  %v4498_v61 = vunpack.c.h.b16 %v2121_v20 }
 0x65e   :  { %v2667_v36 = vadd.f32 %v16702_v32, %v2463_v45 }
 0x65f   :  { %3302 = vmatmul.bf16.gmra.mxu3 %v11241_v8  ;;  %v4222_v33 = vpack.c.b16 %v4200_v1, %v4199_v25  ;;  %v4520_v6 = vpack.c.b16 %v4498_v61, %v4497_v43  ;;  %v22401_v1 = vld [vmem:[#allocation115_spill] sm:$0xff]  ;;  %v22406_v43 = vld [vmem:[#allocation32_spill] sm:$0xff] }
 0x661   :  { %v3071_v14 = vpop.f32.mrf.mxu2 }
 0x662   :  { %v1804_v44 = vpop.f32.mrf.mxu3  ;;  %3963 = vmatmul.bf16.vlgmr.msra.gmra.mxu2 %v11363_v26  ;;  %v17286_v34 = vadd.f32 %v3071_v14, %v3039_v5  ;;  %v2096_v26 = vpack.c.bf16 %v17178_v56, %v16618_v48  ;;  %v14219_v48 = vld [vmem:[%s22025_s5 + $0x238] sm:$0xf]  ;;  %v11372_v56 = vld [vmem:[%s22025_s5 + $0x240] sm:$0xf0]  ;;  %v14220_v14 = vld [vmem:[%s22025_s5 + $0x23c] sm:$0xf0] }
 0x663   :  { %v2126_v23 = vpack.c.bf16 %v1804_v44, %v16680_v0 }
 0x665   :  { %v4201_v24 = vunpack.c.l.b16 %v2126_v23  ;;  %v4499_v60 = vunpack.c.h.b16 %v2126_v23  ;;  %v4195_v23 = vunpack.c.l.b16 %v2096_v26 }
 0x669   :  { %v3073_v22 = vpop.f32.mrf.mxu2 }
 0x66a   :  { %v1806_v52 = vpop.f32.mrf.mxu3 }
 0x66b   :  { %v2131_v53 = vpack.c.bf16 %v1806_v52, %v16686_v46  ;;  %v2111_v46 = vpack.c.bf16 %v1796_v47, %v16654_v7  ;;  %v2101_v7 = vpack.c.bf16 %v17195_v51, %v16627_v49  ;;  %v3041_v49 = vadd.f32 %v3040_v55, %v17093_v17 }
 0x66c   :  { %v3155_v51 = vunpack.c.l.b16 %v16923_v62  ;;  %v4493_v17 = vunpack.c.h.b16 %v2096_v26  ;;  %v11375_v62 = vor.u32 %v14219_v48, %v11372_v56  ;;  %v22411_v26 = vld [vmem:[#allocation20_spill] sm:$0xff] }
 0x66d   :  { %v4202_v3 = vunpack.c.l.b16 %v2131_v53  ;;  %v4500_v18 = vunpack.c.h.b16 %v2131_v53  ;;  %v4198_v54 = vunpack.c.l.b16 %v2111_v46  ;;  %v4496_v38 = vunpack.c.h.b16 %v2111_v46 }
 0x66e   :  { %v4494_v59 = vunpack.c.h.b16 %v2101_v7  ;;  %v17304_v28 = vadd.f32 %v3073_v22, %v3041_v49  ;;  %v22410_v22 = vld [vmem:[#allocation17_spill] sm:$0xff]  ;;  %v22413_v49 = vld [vmem:[#allocation59_spill] sm:$0xff] }
 0x66f   :  { %3307 = vmatmul.bf16.gmra.mxu3 %v11253_v37  ;;  %v4223_v0 = vpack.c.b16 %v4202_v3, %v4201_v24  ;;  %v4521_v42 = vpack.c.b16 %v4500_v18, %v4499_v60  ;;  %v4221_v35 = vpack.c.b16 %v4198_v54, %v4197_v30  ;;  %v4519_v32 = vpack.c.b16 %v4496_v38, %v4495_v50  ;;  %v3043_v60 = vpop.f32.mrf.mxu0  ;;  %v11370_v18 = vld [vmem:[%s22025_s5 + $0x234] sm:$0xf]  ;;  %v14222_v38 = vld [vmem:[%s22025_s5 + $0x250] sm:$0xf] }
 0x670   :  { %v3170_v37 = vpack.c.b16 %v3155_v51, %v3155_v51  ;;  %v4518_v58 = vpack.c.b16 %v4494_v59, %v4493_v17  ;;  %v3044_v15 = vadd.f32 %v3043_v60, %v17111_v40  ;;  %v11371_v9 = vor.u32 %v14220_v14, %v11370_v18  ;;  %v22402_v40 = vld [vmem:[#allocation33_spill] sm:$0xff]  ;;  %v22415_v17 = vld [vmem:[#allocation24_spill] sm:$0xff]  ;;  %v22425_v14 = vld [vmem:[#allocation98_spill] sm:$0xff] }
 0x671   :  { %v4260_v4 = vsel %vm2381_vm1, %v4223_v0, 0  ;;  %v4558_v29 = vsel %vm2381_vm1, %v4521_v42, 0  ;;  %v3076_v3 = vpop.f32.mrf.mxu2  ;;  %v22400_v42 = vld [vmem:[#allocation100_spill] sm:$0xff]  ;;  %v22403_v61 = vpack.c.b16 %v22401_v1, %v22402_v40  ;;  %v22412_v30 = vpack.c.b16 %v22410_v22, %v22411_v26  ;;  %v22426_v1 = vld [vmem:[#allocation110_spill] sm:$0xff]  ;;  %v22427_v40 = vld [vmem:[#allocation109_spill] sm:$0xff] }
 0x672   :  { %v2730_v8 = vpop.f32.mrf.mxu3  ;;  %4331 = vmatpush.bf16.msrb.mxu2 %v4260_v4  ;;  %4629 = vmatpush.bf16.msrb.mxu0 %v4558_v29  ;;  %v17325_v5 = vadd.f32 %v3076_v3, %v3044_v15  ;;  %v22421_v60 = vld [vmem:[#allocation28_spill] sm:$0xff]  ;;  %v22422_v3 = vld [vmem:[#allocation113_spill] sm:$0xff]  ;;  %v22424_v15 = vld [vmem:[#allocation35_spill] sm:$0xff] }
 0x673   :  { %v2731_v47 = vadd.f32 %v2730_v8, %v16699_v27  ;;  %v4196_v27 = vunpack.c.l.b16 %v2101_v7  ;;  %3968 = vmatmul.bf16.gmra.mxu2 %v11375_v62  ;;  %3935 = vmatmul.bf16.gmra.mxu0 %v11371_v9  ;;  %v22407_v8 = vld [vmem:[#allocation16_spill] sm:$0xff]  ;;  %v22423_v18 = vpack.c.b16 %v22421_v60, %v22422_v3  ;;  %v14210_v60 = vld [vmem:[%s22025_s5 + $0x1e4] sm:$0xf]  ;;  %v11313_v3 = vld [vmem:[%s22025_s5 + $0x1ec] sm:$0xf0] }
 0x674   :  { %v11289_v7 = vld [vmem:[%s22025_s5 + $0x1bc] sm:$0xf0] }
 0x675   :  { %v17298_v44 = vadd.f32 %v17242_v31, %v2731_v47  ;;  %v2700_v31 = vadd.f32 %v16705_v2, %v2667_v36  ;;  %v4220_v57 = vpack.c.b16 %v4196_v27, %v4195_v23  ;;  %v22398_v2 = vld [vmem:[#allocation72_spill] sm:$0xff]  ;;  %v22414_v27 = vld [vmem:[#allocation86_spill] sm:$0xff] }
 0x676   :  { %4332 = vmatpush.bf16.msrb.mxu2 %v4222_v33  ;;  %4630 = vmatpush.bf16.msrb.mxu0 %v4520_v6  ;;  %v2435_v20 = vadd.f32 %v22399_v41, %v22398_v2  ;;  %v11384_v33 = vld [vmem:[%s22025_s5 + $0x258] sm:$0xf0]  ;;  %v2440_v51 = vadd.f32 %v22414_v27, %v22413_v49  ;;  %v14223_v23 = vld [vmem:[%s22025_s5 + $0x254] sm:$0xf0]  ;;  %v22420_v41 = vld [vmem:[#allocation114_spill] sm:$0xff] }
 0x677   :  { %v3045_v29 = vpop.f32.mrf.mxu0  ;;  %v11387_v36 = vor.u32 %v14222_v38, %v11384_v33  ;;  %v22434_v38 = vld [vmem:[#allocation42_spill] sm:$0xff]  ;;  %v22435_v33 = vld [vmem:[#allocation57_spill] sm:$0xff] }
 0x679   :  { %v3078_v13 = vpop.f32.mrf.mxu2 }
 0x67a   :  { %v2732_v52 = vpop.f32.mrf.mxu3  ;;  %4333 = vmatpush.bf16.msrb.mxu2 %v4221_v35  ;;  %4631 = vmatpush.bf16.msrb.mxu0 %v4519_v32  ;;  %v3015_v35 = vpop.f32.mrf.mxu1 }
 0x67b   :  { %v2733_v53 = vadd.f32 %v2732_v52, %v2700_v31  ;;  %v11382_v31 = vld [vmem:[%s22025_s5 + $0x24c] sm:$0xf]  ;;  %v22416_v52 = vld [vmem:[#allocation29_spill] sm:$0xff] }
 0x67c   :  { %v22417_v62 = vpack.c.b16 %v22415_v17, %v22416_v52  ;;  %v22443_v52 = vld [vmem:[#allocation21_spill] sm:$0xff] }
 0x67d   :  { %v17316_v24 = vadd.f32 %v17258_v10, %v2733_v53  ;;  %v2468_v10 = vadd.f32 %v16625_v39, %v2435_v20  ;;  %v22405_v39 = vld [vmem:[#allocation18_spill] sm:$0xff]  ;;  %v11383_v53 = vor.u32 %v14223_v23, %v11382_v31  ;;  %v22441_v31 = vld [vmem:[#allocation111_spill] sm:$0xff]  ;;  %v22442_v23 = vld [vmem:[#allocation89_spill] sm:$0xff] }
 0x67e   :  { %4334 = vmatpush.bf16.msrb.mxu2 %v4220_v57  ;;  %4632 = vmatpush.bf16.msrb.mxu0 %v4518_v58  ;;  %v3046_v25 = vadd.f32 %v3045_v29, %v22405_v39  ;;  %v22419_v57 = vld [vmem:[#allocation107_spill] sm:$0xff]  ;;  %v14225_v39 = vld [vmem:[%s22025_s5 + $0x268] sm:$0xf] }
 0x67f   :  { %3312 = vmatmul.bf16.gmra.mxu3 %v3170_v37  ;;  %v2672_v45 = vadd.f32 %v22404_v12, %v2468_v10  ;;  %v3048_v32 = vpop.f32.mrf.mxu0  ;;  %v2473_v58 = vadd.f32 %v22419_v57, %v2440_v51  ;;  %v22429_v12 = vld [vmem:[#allocation38_spill] sm:$0xff]  ;;  %v11301_v29 = vld [vmem:[%s22025_s5 + $0x1d4] sm:$0xf0] }
 0x680   :  { %v17348_v47 = vadd.f32 %v3078_v13, %v3046_v25  ;;  %v3049_v48 = vadd.f32 %v3048_v32, %v3015_v35  ;;  %v22430_v13 = vld [vmem:[#allocation94_spill] sm:$0xff]  ;;  %v11396_v25 = vld [vmem:[%s22025_s5 + $0x270] sm:$0xf0]  ;;  %v22438_v35 = vld [vmem:[#allocation101_spill] sm:$0xff] }
 0x681   :  { %v2677_v9 = vadd.f32 %v22425_v14, %v2473_v58  ;;  %v22437_v51 = vld [vmem:[#allocation102_spill] sm:$0xff] }
 0x682   :  { %v2735_v0 = vpop.f32.mrf.mxu3  ;;  %4335 = vmatpush.bf16.msrb.mxu2 %v17160_v11  ;;  %4633 = vmatpush.bf16.msrb.mxu0 %v17162_v19  ;;  %v22408_v11 = vpack.c.b16 %v22406_v43, %v22407_v8  ;;  %v14204_v19 = vld [vmem:[%s22025_s5 + $0x1b4] sm:$0xf]  ;;  %v11399_v8 = vor.u32 %v14225_v39, %v11396_v25  ;;  %v22439_v32 = vpack.c.b16 %v22437_v51, %v22438_v35 }
 0x683   :  { %v2736_v46 = vadd.f32 %v2735_v0, %v22400_v42  ;;  %v11292_v50 = vor.u32 %v14204_v19, %v11289_v7  ;;  %3973 = vmatmul.bf16.gmra.mxu2 %v11387_v36  ;;  %3940 = vmatmul.bf16.gmra.mxu0 %v11383_v53  ;;  %v3017_v0 = vpop.f32.mrf.mxu1  ;;  %v22431_v19 = vld [vmem:[#allocation106_spill] sm:$0xff]  ;;  %v22432_v7 = vld [vmem:[#allocation105_spill] sm:$0xff] }
 0x684   :  { %v3081_v56 = vpop.f32.mrf.mxu2 }
 0x685   :  { %v17336_v4 = vadd.f32 %v17261_v16, %v2736_v46  ;;  %v22409_v16 = vld [vmem:[#allocation96_spill] sm:$0xff]  ;;  %v17375_v37 = vadd.f32 %v3081_v56, %v3049_v48 }
 0x686   :  { %4900 = vmatpush.bf16.msra.mxu2 %v22403_v61  ;;  %v2705_v54 = vadd.f32 %v22409_v16, %v2672_v45  ;;  %v22428_v61 = vpack.c.b16 %v22426_v1, %v22427_v40  ;;  %v14207_v45 = vld [vmem:[%s22025_s5 + $0x1cc] sm:$0xf]  ;;  %v22433_v16 = vpack.c.b16 %v22431_v19, %v22432_v7  ;;  %v11325_v19 = vld [vmem:[%s22025_s5 + $0x204] sm:$0xf0]  ;;  %v11437_v7 = vld [vmem:[%s22025_s5 + $0x290] sm:$0xf] }
 0x687   :  { %v3050_v42 = vpop.f32.mrf.mxu0 }
 0x688   :  { %v11316_v42 = vor.u32 %v14210_v60, %v11313_v3  ;;  %v14232_v60 = vld [vmem:[%s22025_s5 + $0x2a8] sm:$0xf0] }
 0x68a   :  { %4901 = vmatpush.bf16.msra.mxu2 %v22408_v11  ;;  %v2737_v6 = vpop.f32.mrf.mxu3 }
 0x68b   :  { %v2738_v55 = vadd.f32 %v2737_v6, %v2705_v54  ;;  %v11304_v54 = vor.u32 %v14207_v45, %v11301_v29  ;;  %v22436_v6 = vld [vmem:[#allocation119_spill] sm:$0xff]  ;;  %v3326_v22 = vpop.f32.mrf.mxu1 }
 0x68c   :  { %v3083_v46 = vpop.f32.mrf.mxu2  ;;  %v2445_v36 = vadd.f32 %v22436_v6, %v22435_v33 }
 0x68d   :  { %v17363_v59 = vadd.f32 %v17276_v21, %v2738_v55  ;;  %v22418_v21 = vld [vmem:[#allocation31_spill] sm:$0xff]  ;;  %v22447_v46 = vld [vmem:[#allocation112_spill] sm:$0xff] }
 0x68e   :  { %4902 = vmatpush.bf16.msra.mxu2 %v22412_v30  ;;  %v11394_v30 = vld [vmem:[%s22025_s5 + $0x264] sm:$0xf]  ;;  %v2478_v48 = vadd.f32 %v22441_v31, %v2445_v36  ;;  %v14228_v36 = vld [vmem:[%s22025_s5 + $0x28c] sm:$0xf] }
 0x68f   :  { %3665 = vmatmul.bf16.vlgmr.msra.gmra.mxu3 %v11292_v50  ;;  %v3359_v26 = vpop.f32.mrf.mxu0  ;;  %v14226_v50 = vld [vmem:[%s22025_s5 + $0x26c] sm:$0xf0] }
 0x690   :  { %4560 = vmatpush.bf16.msra.mxu3 %v22418_v21  ;;  %v11395_v27 = vor.u32 %v14226_v50, %v11394_v30  ;;  %v11431_v30 = vld [vmem:[%s22025_s5 + $0x294] sm:$0xf0] }
 0x692   :  { %4903 = vmatpush.bf16.msra.mxu2 %v22417_v62  ;;  %v2740_v2 = vpop.f32.mrf.mxu3  ;;  %v22444_v62 = vld [vmem:[#allocation87_spill] sm:$0xff] }
 0x693   :  { %v2741_v20 = vadd.f32 %v2740_v2, %v22420_v41  ;;  %3978 = vmatmul.bf16.gmra.mxu2 %v11399_v8  ;;  %3945 = vmatmul.bf16.gmra.mxu0 %v11395_v27  ;;  %v2682_v53 = vadd.f32 %v22444_v62, %v2478_v48  ;;  %v3328_v57 = vpop.f32.mrf.mxu1  ;;  %v11354_v41 = vld [vmem:[%s22025_s5 + $0x27c] sm:$0x77]  ;;  %v11434_v27 = vor.u32 %v14228_v36, %v11431_v30  ;;  %v22452_v30 = vld [vmem:[#allocation27_spill] sm:$0xff] }
 0x694   :  { %4561 = vmatpush.bf16.msra.mxu3 %v22424_v15  ;;  %v17419_v49 = vpop.f32.mrf.mxu2  ;;  %v3793_v1 = vunpack.c.l.b16 %v11354_v41 }
 0x695   :  { %v17385_v10 = vadd.f32 %v17286_v34, %v2741_v20  ;;  %v2710_v34 = vadd.f32 %v22430_v13, %v2677_v9  ;;  %v22445_v20 = vld [vmem:[#allocation91_spill] sm:$0xff] }
 0x696   :  { %4904 = vmatpush.bf16.msra.mxu2 %v22423_v18  ;;  %v22446_v18 = vld [vmem:[#allocation25_spill] sm:$0xff]  ;;  %v3808_v45 = vpack.c.b16 %v3793_v1, %v3793_v1  ;;  %v22449_v1 = vld [vmem:[#allocation8_spill] sm:$0xff] }
 0x697   :  { %v3361_v58 = vpop.f32.mrf.mxu0  ;;  %v2715_v15 = vadd.f32 %v22446_v18, %v2682_v53 }
 0x698   :  { %4562 = vmatpush.bf16.msra.mxu3 %v22429_v12 }
 0x69a   :  { %4905 = vmatpush.bf16.msra.mxu2 %v22428_v61  ;;  %v2742_v43 = vpop.f32.mrf.mxu3 }
 0x69b   :  { %v2743_v11 = vadd.f32 %v2742_v43, %v2710_v34  ;;  %v3331_v61 = vpop.f32.mrf.mxu1  ;;  %v22448_v34 = vld [vmem:[#allocation118_spill] sm:$0xff] }
 0x69c   :  { %4563 = vmatpush.bf16.msra.mxu3 %v22434_v38  ;;  %v17432_v2 = vpop.f32.mrf.mxu2 }
 0x69d   :  { %v17411_v55 = vadd.f32 %v17304_v28, %v2743_v11  ;;  %v22440_v28 = vld [vmem:[#allocation46_spill] sm:$0xff] }
 0x69e   :  { %4906 = vmatpush.bf16.msra.mxu2 %v22433_v16 }
 0x69f   :  { %3670 = vmatmul.bf16.gmra.mxu3 %v11304_v54  ;;  %v3364_v12 = vpop.f32.mrf.mxu0 }
 0x6a0   :  { %4564 = vmatpush.bf16.msra.mxu3 %v22440_v28 }
 0x6a2   :  { %4907 = vmatpush.bf16.msra.mxu2 %v22439_v32  ;;  %v2745_v56 = vpop.f32.mrf.mxu3 }
 0x6a3   :  { %v2746_v17 = vadd.f32 %v2745_v56, %v22442_v23  ;;  %3950 = vmatmul.bf16.gmra.mxu0 %v3808_v45  ;;  %v17455_v43 = vpop.f32.mrf.mxu1  ;;  %v3454_v56 = vunpack.c.h.b16 %v17239_v63  ;;  %v2082_v45 = vpack.c.bf16 %v22449_v1, %v22449_v1 }
 0x6a4   :  { %4565 = vmatpush.bf16.msra.mxu3 %v22443_v52 }
 0x6a5   :  { %v17430_v21 = vadd.f32 %v17325_v5, %v2746_v17  ;;  %v3794_v5 = vunpack.c.h.b16 %v11354_v41  ;;  %v17449_v29 = vpop.f32.mrf.mxu2  ;;  %v11449_v17 = vld [vmem:[%s22025_s5 + $0x2a8] sm:$0xf]  ;;  %v3469_v53 = vpack.c.b16 %v3454_v56, %v3454_v56 }
 0x6a7   :  { %v3809_v9 = vpack.c.b16 %v3794_v5, %v3794_v5  ;;  %v17457_v8 = vpop.f32.mrf.mxu0 }
 0x6a8   :  { %4566 = vmatpush.bf16.msra.mxu3 %v22445_v20  ;;  %v11441_v20 = vld [vmem:[%s22025_s5 + $0x2a0] sm:$0xf] }
 0x6a9   :  { %3983 = vmatmul.bf16.gmra.mxu2 %v3809_v9  ;;  %v11442_v18 = vor.u32 %v14232_v60, %v11441_v20 }
 0x6aa   :  { %v2747_v14 = vpop.f32.mrf.mxu3 }
 0x6ab   :  { %v2748_v0 = vadd.f32 %v2747_v14, %v2715_v15  ;;  %v17474_v33 = vpop.f32.mrf.mxu1  ;;  %4275 = vmatmul.bf16.gmra.mxu1 %v11442_v18 }
 0x6ac   :  { %4567 = vmatpush.bf16.msra.mxu3 %v22447_v46 }
 0x6ad   :  { %v17447_v40 = vadd.f32 %v17348_v47, %v2748_v0  ;;  %v17459_v11 = vpop.f32.mrf.mxu2  ;;  %v14213_v47 = vld [vmem:[%s22025_s5 + $0x1fc] sm:$0xf] }
 0x6ae   :  { %v11328_v38 = vor.u32 %v14213_v47, %v11325_v19  ;;  %v11461_v47 = vld [vmem:[%s22025_s5 + $0x2c0] sm:$0xf]  ;;  %v22451_v19 = vld [vmem:[#allocation22_spill] sm:$0xff] }
 0x6af   :  { %3675 = vmatmul.bf16.gmra.mxu3 %v11316_v42  ;;  %v17476_v6 = vpop.f32.mrf.mxu0 }
 0x6b2   :  { %v2750_v13 = vpop.f32.mrf.mxu3 }
 0x6b3   :  { %v2751_v39 = vadd.f32 %v2750_v13, %v22448_v34  ;;  %4303 = vmatmul.bf16.vlgmr.msra.gmra.mxu0 %v11434_v27  ;;  %v17486_v28 = vpop.f32.mrf.mxu1  ;;  %v22450_v34 = vld [vmem:[#allocation23_spill] sm:$0xff]  ;;  %v2067_v27 = vpack.c.bf16 %v22452_v30, %v22452_v30 }
 0x6b5   :  { %v17453_v25 = vadd.f32 %v17375_v37, %v2751_v39  ;;  %v14230_v37 = vld [vmem:[%s22025_s5 + $0x298] sm:$0xf0]  ;;  %v17484_v50 = vpop.f32.mrf.mxu2  ;;  %v2077_v39 = vpack.c.bf16 %v22450_v34, %v22450_v34  ;;  %v22456_v34 = vld [vmem:[#allocation39_spill] sm:$0xff] }
 0x6b6   :  { %v11438_v54 = vor.u32 %v14230_v37, %v11437_v7  ;;  %v2072_v7 = vpack.c.bf16 %v22451_v19, %v22451_v19  ;;  %v4830_v37 = vunpack.c.l.b16 %v2082_v45  ;;  %v22457_v19 = vld [vmem:[#allocation50_spill] sm:$0xff] }
 0x6b7   :  { %v17488_v31 = vpop.f32.mrf.mxu0 }
 0x6b9   :  { %11475 = vmatmul.msk.bf16.vlgmr.msrb.gmra.mxu2 %vm2365_vm2, %v11438_v54 }
 0x6ba   :  { %v2752_v16 = vpop.f32.mrf.mxu3 }
 0x6bb   :  { %v17503_v41 = vpop.f32.mrf.mxu1 }
 0x6bd   :  { %v17494_v23 = vpop.f32.mrf.mxu2 }
 0x6bf   :  { %3680 = vmatmul.bf16.gmra.mxu3 %v11328_v38  ;;  %v17505_v63 = vpop.f32.mrf.mxu0 }
 0x6c2   :  { %v3293_v51 = vpop.f32.mrf.mxu3 }
 0x6c3   :  { %v3327_v35 = vadd.f32 %v3326_v22, %v3293_v51  ;;  %v14233_v22 = vld [vmem:[%s22025_s5 + $0x2b0] sm:$0xf0]  ;;  %v17524_v42 = vpop.f32.mrf.mxu1  ;;  %v4829_v51 = vunpack.c.l.b16 %v2077_v39  ;;  %v2047_v39 = vpack.c.bf16 %v22456_v34, %v22456_v34  ;;  %v11467_v34 = vld [vmem:[%s22025_s5 + $0x2dc] sm:$0xf0] }
 0x6c4   :  { %v11450_v52 = vor.u32 %v14233_v22, %v11449_v17  ;;  %v11453_v17 = vld [vmem:[%s22025_s5 + $0x2b8] sm:$0xf]  ;;  %v22453_v22 = vld [vmem:[#allocation26_spill] sm:$0xff] }
 0x6c5   :  { %v3360_v32 = vadd.f32 %v3359_v26, %v3327_v35  ;;  %v17522_v5 = vpop.f32.mrf.mxu2  ;;  %v4823_v30 = vunpack.c.l.b16 %v2047_v39 }
 0x6c7   :  { %v17491_v48 = vadd.f32 %v3360_v32, %v17298_v44  ;;  %v17526_v46 = vpop.f32.mrf.mxu0 }
 0x6c9   :  { %11476 = vmatmul.msk.bf16.gmra.mxu2 %vm2365_vm2, %v11450_v52  ;;  %v4856_v52 = vpack.c.b16 %v4830_v37, %v4829_v51  ;;  %v11473_v51 = vld [vmem:[%s22025_s5 + $0x2d8] sm:$0xf] }
 0x6ca   :  { %v3295_v26 = vpop.f32.mrf.mxu3 }
 0x6cb   :  { %v3329_v62 = vadd.f32 %v3328_v57, %v3295_v26  ;;  %v14231_v57 = vld [vmem:[%s22025_s5 + $0x2a4] sm:$0xf]  ;;  %v17556_v32 = vpop.f32.mrf.mxu1  ;;  %v4828_v26 = vunpack.c.l.b16 %v2072_v7  ;;  %v2042_v7 = vpack.c.bf16 %v22457_v19, %v22457_v19 }
 0x6cd   :  { %v3362_v44 = vadd.f32 %v3361_v58, %v3329_v62  ;;  %v11443_v58 = vld [vmem:[%s22025_s5 + $0x2ac] sm:$0xf0]  ;;  %v17533_v13 = vpop.f32.mrf.mxu2  ;;  %v14235_v62 = vld [vmem:[%s22025_s5 + $0x2c0] sm:$0xf0] }
 0x6ce   :  { %v11446_v15 = vor.u32 %v14231_v57, %v11443_v58  ;;  %v11454_v60 = vor.u32 %v14235_v62, %v11453_v17  ;;  %v22454_v58 = vld [vmem:[#allocation30_spill] sm:$0xff] }
 0x6cf   :  { %v17520_v3 = vadd.f32 %v3362_v44, %v17316_v24  ;;  %3685 = vmatmul.bf16.gmra.mxu3 %v3469_v53  ;;  %v17558_v56 = vpop.f32.mrf.mxu0  ;;  %v11455_v53 = vld [vmem:[%s22025_s5 + $0x2c4] sm:$0xf0]  ;;  %v2057_v18 = vpack.c.bf16 %v22454_v58, %v22454_v58 }
 0x6d0   :  { %4308 = vmatmul.bf16.gmra.mxu0 %v11446_v15  ;;  %v4827_v15 = vunpack.c.l.b16 %v2067_v27  ;;  %4280 = vmatmul.bf16.gmra.mxu1 %v11454_v60  ;;  %v14221_v27 = vld [vmem:[%s22025_s5 + $0x244] sm:$0xf0] }
 0x6d2   :  { %v3298_v14 = vpop.f32.mrf.mxu3 }
 0x6d3   :  { %v3332_v9 = vadd.f32 %v3331_v61, %v3298_v14  ;;  %v11366_v61 = vld [vmem:[%s22025_s5 + $0x224] sm:$0xf]  ;;  %v22455_v14 = vld [vmem:[#allocation34_spill] sm:$0xff] }
 0x6d5   :  { %v3365_v0 = vadd.f32 %v3364_v12, %v3332_v9  ;;  %v14218_v12 = vld [vmem:[%s22025_s5 + $0x22c] sm:$0xf0]  ;;  %v17578_v20 = vpop.f32.mrf.mxu2  ;;  %v2052_v9 = vpack.c.bf16 %v22455_v14, %v22455_v14 }
 0x6d6   :  { %v11367_v36 = vor.u32 %v14218_v12, %v11366_v61  ;;  %v4825_v61 = vunpack.c.l.b16 %v2057_v18  ;;  %v11465_v14 = vld [vmem:[%s22025_s5 + $0x2d0] sm:$0xf] }
 0x6d7   :  { %v17531_v24 = vadd.f32 %v3365_v0, %v17336_v4  ;;  %v14236_v4 = vld [vmem:[%s22025_s5 + $0x2c8] sm:$0xf0]  ;;  %v4824_v37 = vunpack.c.l.b16 %v2052_v9  ;;  %v14237_v9 = vld [vmem:[%s22025_s5 + $0x2d4] sm:$0xf] }
 0x6d8   :  { %v11462_v54 = vor.u32 %v14236_v4, %v11461_v47  ;;  %v3348_v47 = vpop.f32.mrf.mxu1  ;;  %v3381_v4 = vpop.f32.mrf.mxu0 }
 0x6d9   :  { %v22462_v47 = vld [vmem:[#allocation104_spill] sm:$0xff] }
 0x6da   :  { %v3300_v16 = vpop.f32.mrf.mxu3  ;;  %11477 = vmatmul.msk.bf16.gmra.mxu2 %vm2365_vm2, %v11462_v54  ;;  %v2017_v4 = vpack.c.bf16 %v22462_v47, %v22462_v47 }
 0x6db   :  { %v3334_v38 = vadd.f32 %v17455_v43, %v3300_v16  ;;  %v2062_v43 = vpack.c.bf16 %v22453_v22, %v22453_v22  ;;  %v4822_v22 = vunpack.c.l.b16 %v2042_v7 }
 0x6dd   :  { %v3367_v35 = vadd.f32 %v17457_v8, %v3334_v38  ;;  %v14234_v8 = vld [vmem:[%s22025_s5 + $0x2bc] sm:$0xf]  ;;  %v4826_v0 = vunpack.c.l.b16 %v2062_v43  ;;  %v3655_v38 = vpop.f32.mrf.mxu2 }
 0x6de   :  { %v11458_v57 = vor.u32 %v14234_v8, %v11455_v53  ;;  %v22460_v53 = vld [vmem:[#allocation116_spill] sm:$0xff] }
 0x6df   :  { %v17575_v44 = vadd.f32 %v3367_v35, %v17363_v59  ;;  %11404 = vmatmul.msk.bf16.vlgmr.msrb.gmra.mxu3 %vm2365_vm2, %v11367_v36  ;;  %v4855_v59 = vpack.c.b16 %v4828_v26, %v4827_v15  ;;  %v4854_v16 = vpack.c.b16 %v4826_v0, %v4825_v61  ;;  %v22458_v36 = vld [vmem:[#allocation43_spill] sm:$0xff]  ;;  %v4853_v26 = vpack.c.b16 %v4824_v37, %v4823_v30 }
 0x6e0   :  { %4933 = vmatpush.bf16.msrb.mxu3 %v4856_v52  ;;  %4313 = vmatmul.bf16.gmra.mxu0 %v11458_v57  ;;  %v22459_v35 = vld [vmem:[#allocation47_spill] sm:$0xff]  ;;  %v2027_v60 = vpack.c.bf16 %v22460_v53, %v22460_v53  ;;  %v17614_v18 = vpop.f32.mrf.mxu1  ;;  %v3931_v15 = vpop.f32.mrf.mxu0 }
 0x6e1   :  { %v2032_v17 = vpack.c.bf16 %v22459_v35, %v22459_v35  ;;  %v22461_v0 = vld [vmem:[#allocation103_spill] sm:$0xff] }
 0x6e2   :  { %v3303_v1 = vpop.f32.mrf.mxu3  ;;  %v4819_v19 = vunpack.c.l.b16 %v2027_v60  ;;  %v11390_v35 = vld [vmem:[%s22025_s5 + $0x254] sm:$0xf]  ;;  %v11426_v60 = vld [vmem:[%s22025_s5 + $0x2f0] sm:$0x7] }
 0x6e3   :  { %v3337_v45 = vadd.f32 %v17474_v33, %v3303_v1  ;;  %v2037_v33 = vpack.c.bf16 %v22458_v36, %v22458_v36  ;;  %v2022_v1 = vpack.c.bf16 %v22461_v0, %v22461_v0 }
 0x6e4   :  { %4934 = vmatpush.bf16.msrb.mxu3 %v4855_v59  ;;  %v4820_v59 = vunpack.c.l.b16 %v2032_v17 }
 0x6e5   :  { %v3370_v12 = vadd.f32 %v17476_v6, %v3337_v45  ;;  %v11378_v6 = vld [vmem:[%s22025_s5 + $0x23c] sm:$0xf]  ;;  %v4821_v57 = vunpack.c.l.b16 %v2037_v33  ;;  %v3964_v61 = vpop.f32.mrf.mxu2  ;;  %v4818_v37 = vunpack.c.l.b16 %v2022_v1 }
 0x6e6   :  { %v11379_v8 = vor.u32 %v14221_v27, %v11378_v6  ;;  %v17636_v7 = vadd.f32 %v3964_v61, %v3931_v15  ;;  %v4851_v38 = vpack.c.b16 %v4820_v59, %v4819_v19  ;;  %v14240_v19 = vld [vmem:[%s22025_s5 + $0x2f8] sm:$0xf] }
 0x6e7   :  { %v17591_v54 = vadd.f32 %v3370_v12, %v17385_v10  ;;  %v14239_v10 = vld [vmem:[%s22025_s5 + $0x2e0] sm:$0xf0]  ;;  %v11470_v12 = vor.u32 %v14237_v9, %v11467_v34 }
 0x6e8   :  { %4935 = vmatpush.bf16.msrb.mxu3 %v4854_v16  ;;  %v11474_v52 = vor.u32 %v14239_v10, %v11473_v51  ;;  %v17640_v30 = vpop.f32.mrf.mxu1  ;;  %v17642_v6 = vpop.f32.mrf.mxu0 }
 0x6ea   :  { %v3305_v43 = vpop.f32.mrf.mxu3  ;;  %11478 = vmatmul.msk.bf16.gmra.mxu2 %vm2365_vm2, %v11474_v52 }
 0x6eb   :  { %v3339_v62 = vadd.f32 %v17486_v28, %v3305_v43  ;;  %v14238_v28 = vld [vmem:[%s22025_s5 + $0x2d8] sm:$0xf0] }
 0x6ec   :  { %4936 = vmatpush.bf16.msrb.mxu3 %v4853_v26  ;;  %v11466_v45 = vor.u32 %v14238_v28, %v11465_v14  ;;  %v22463_v43 = vld [vmem:[#allocation48_spill] sm:$0xff]  ;;  %v22464_v26 = vld [vmem:[#allocation117_spill] sm:$0xff] }
 0x6ed   :  { %v3372_v58 = vadd.f32 %v17488_v31, %v3339_v62  ;;  %v4852_v31 = vpack.c.b16 %v4822_v22, %v4821_v57  ;;  %v17647_v10 = vpop.f32.mrf.mxu2  ;;  %v22465_v52 = vpack.c.b16 %v22463_v43, %v22464_v26 }
 0x6ee   :  { %4285 = vmatmul.bf16.gmra.mxu1 %v11466_v45 }
 0x6ef   :  { %v17631_v39 = vadd.f32 %v3372_v58, %v17411_v55  ;;  %11405 = vmatmul.msk.bf16.gmra.mxu3 %vm2365_vm2, %v11379_v8  ;;  %v4817_v55 = vunpack.c.l.b16 %v2017_v4  ;;  %v4093_v58 = vunpack.c.l.b16 %v11426_v60 }
 0x6f0   :  { %4937 = vmatpush.bf16.msrb.mxu3 %v4852_v31  ;;  %4318 = vmatmul.bf16.gmra.mxu0 %v11470_v12  ;;  %v17663_v53 = vpop.f32.mrf.mxu1  ;;  %v3936_v57 = vpop.f32.mrf.mxu0  ;;  %v11402_v12 = vld [vmem:[%s22025_s5 + $0x26c] sm:$0xf] }
 0x6f1   :  { %v4850_v27 = vpack.c.b16 %v4818_v37, %v4817_v55  ;;  %v4108_v9 = vpack.c.b16 %v4093_v58, %v4093_v58  ;;  %v11502_v37 = vld [vmem:[%s22025_s5 + $0x300] sm:$0xf0] }
 0x6f2   :  { %v3308_v16 = vpop.f32.mrf.mxu3 }
 0x6f3   :  { %v3342_v36 = vadd.f32 %v17503_v41, %v3308_v16  ;;  %v14224_v41 = vld [vmem:[%s22025_s5 + $0x25c] sm:$0xf0] }
 0x6f4   :  { %4938 = vmatpush.bf16.msrb.mxu3 %v4851_v38  ;;  %v11391_v22 = vor.u32 %v14224_v41, %v11390_v35  ;;  %v11505_v38 = vor.u32 %v14240_v19, %v11502_v37 }
 0x6f5   :  { %v3375_v33 = vadd.f32 %v17505_v63, %v3342_v36 }
 0x6f6   :  { %v3969_v14 = vpop.f32.mrf.mxu2 }
 0x6f7   :  { %v17645_v51 = vadd.f32 %v3375_v33, %v17430_v21  ;;  %v11425_v21 = vld [vmem:[%s22025_s5 + $0x2e8] sm:$0x77]  ;;  %v17672_v28 = vadd.f32 %v3969_v14, %v3936_v57  ;;  %v14243_v57 = vld [vmem:[%s22025_s5 + $0x310] sm:$0xf] }
 0x6f8   :  { %4939 = vmatpush.bf16.msrb.mxu3 %v4850_v27  ;;  %v4091_v62 = vunpack.c.l.b16 %v11425_v21  ;;  %v4092_v0 = vunpack.c.h.b16 %v11425_v21  ;;  %v3706_v45 = vpop.f32.mrf.mxu1  ;;  %v17677_v34 = vpop.f32.mrf.mxu0  ;;  %v11355_v27 = vld [vmem:[%s22025_s5 + $0x284] sm:$0x7] }
 0x6fa   :  { %v3310_v63 = vpop.f32.mrf.mxu3  ;;  %11479 = vmatmul.msk.bf16.gmra.mxu2 %vm2365_vm2, %v4108_v9  ;;  %v4107_v59 = vpack.c.b16 %v4092_v0, %v4092_v0 }
 0x6fb   :  { %v3344_v17 = vadd.f32 %v17524_v42, %v3310_v63  ;;  %v4106_v42 = vpack.c.b16 %v4091_v62, %v4091_v62  ;;  %v11508_v63 = vld [vmem:[%s22025_s5 + $0x2fc] sm:$0xf] }
 0x6fc   :  { %4940 = vmatpush.bf16.msrb.mxu3 %v22465_v52 }
 0x6fd   :  { %v3377_v8 = vadd.f32 %v17526_v46, %v3344_v17  ;;  %v14242_v17 = vld [vmem:[%s22025_s5 + $0x304] sm:$0xf0] }
 0x6fe   :  { %4290 = vmatmul.bf16.gmra.mxu1 %v4106_v42  ;;  %v17682_v61 = vpop.f32.mrf.mxu2  ;;  %v11509_v21 = vor.u32 %v14242_v17, %v11508_v63 }
 0x6ff   :  { %v17669_v15 = vadd.f32 %v3377_v8, %v17447_v40  ;;  %11406 = vmatmul.msk.bf16.gmra.mxu3 %vm2365_vm2, %v11391_v22 }
 0x700   :  { %4323 = vmatmul.bf16.gmra.mxu0 %v4107_v59  ;;  %v11520_v59 = vld [vmem:[%s22025_s5 + $0x314] sm:$0xf] }
 0x702   :  { %v3313_v46 = vpop.f32.mrf.mxu3 }
 0x703   :  { %v3347_v1 = vadd.f32 %v17556_v32, %v3313_v46  ;;  %v14227_v32 = vld [vmem:[%s22025_s5 + $0x274] sm:$0xf0] }
 0x704   :  { %v11403_v4 = vor.u32 %v14227_v32, %v11402_v12 }
 0x705   :  { %v3380_v31 = vadd.f32 %v17558_v56, %v3347_v1  ;;  %v17690_v56 = vpop.f32.mrf.mxu1 }
 0x706   :  { %v3974_v16 = vpop.f32.mrf.mxu2 }
 0x707   :  { %v17680_v40 = vadd.f32 %v3380_v31, %v17453_v25  ;;  %v3941_v25 = vpop.f32.mrf.mxu0  ;;  %v14245_v31 = vld [vmem:[%s22025_s5 + $0x31c] sm:$0xf0] }
 0x708   :  { %v17699_v36 = vadd.f32 %v3974_v16, %v3941_v25  ;;  %v11521_v12 = vor.u32 %v14245_v31, %v11520_v59 }
 0x70a   :  { %v3315_v47 = vpop.f32.mrf.mxu3 }
 0x70d   :  { %v17706_v41 = vpop.f32.mrf.mxu1 }
 0x70e   :  { %4601 = vmatmul.bf16.vlgmr.msra.gmra.mxu1 %v11505_v38  ;;  %v17716_v43 = vpop.f32.mrf.mxu2 }
 0x70f   :  { %11407 = vmatmul.msk.bf16.gmra.mxu3 %vm2365_vm2, %v11403_v4  ;;  %v17714_v22 = vpop.f32.mrf.mxu0 }
 0x710   :  { %11546 = vmatmul.msk.bf16.vlgmr.msrb.gmra.mxu0 %vm2365_vm2, %v11509_v21 }
 0x712   :  { %v3666_v55 = vpop.f32.mrf.mxu3 }
 0x713   :  { %v3667_v33 = vadd.f32 %v3666_v55, %v17419_v49  ;;  %v3795_v49 = vunpack.c.l.b16 %v11355_v27  ;;  %v11526_v55 = vld [vmem:[%s22025_s5 + $0x330] sm:$0xf0] }
 0x715   :  { %v3700_v35 = vadd.f32 %v17614_v18, %v3667_v33  ;;  %v3810_v62 = vpack.c.b16 %v3795_v49, %v3795_v49  ;;  %v17724_v60 = vpop.f32.mrf.mxu1  ;;  %v11532_v49 = vld [vmem:[%s22025_s5 + $0x32c] sm:$0xf] }
 0x716   :  { %v3979_v58 = vpop.f32.mrf.mxu2 }
 0x717   :  { %v17719_v26 = vadd.f32 %v3700_v35, %v17491_v48  ;;  %v3946_v42 = vpop.f32.mrf.mxu0  ;;  %v11514_v48 = vld [vmem:[%s22025_s5 + $0x318] sm:$0xf0] }
 0x718   :  { %v11517_v14 = vor.u32 %v14243_v57, %v11514_v48  ;;  %v17736_v9 = vadd.f32 %v3979_v58, %v3946_v42 }
 0x71a   :  { %v3668_v18 = vpop.f32.mrf.mxu3 }
 0x71b   :  { %v3669_v52 = vadd.f32 %v3668_v18, %v17432_v2  ;;  %v14248_v18 = vld [vmem:[%s22025_s5 + $0x334] sm:$0xf0] }
 0x71d   :  { %v3702_v8 = vadd.f32 %v17640_v30, %v3669_v52  ;;  %v17740_v1 = vpop.f32.mrf.mxu1 }
 0x71e   :  { %4606 = vmatmul.bf16.gmra.mxu1 %v11517_v14  ;;  %v17750_v32 = vpop.f32.mrf.mxu2 }
 0x71f   :  { %11408 = vmatmul.msk.bf16.gmra.mxu3 %vm2365_vm2, %v3810_v62  ;;  %v17734_v2 = vadd.f32 %v3702_v8, %v17520_v3  ;;  %v17748_v3 = vpop.f32.mrf.mxu0 }
 0x720   :  { %11547 = vmatmul.msk.bf16.gmra.mxu0 %vm2365_vm2, %v11521_v12 }
 0x722   :  { %v3671_v30 = vpop.f32.mrf.mxu3 }
 0x723   :  { %v3672_v46 = vadd.f32 %v3671_v30, %v17449_v29  ;;  %v11500_v29 = vld [vmem:[%s22025_s5 + $0x2f4] sm:$0xf]  ;;  %v11538_v30 = vld [vmem:[%s22025_s5 + $0x348] sm:$0xf0] }
 0x725   :  { %v3705_v0 = vadd.f32 %v17663_v53, %v3672_v46  ;;  %v14241_v53 = vld [vmem:[%s22025_s5 + $0x2fc] sm:$0xf0]  ;;  %v17763_v16 = vpop.f32.mrf.mxu1 }
 0x726   :  { %v11501_v25 = vor.u32 %v14241_v53, %v11500_v29 }
 0x727   :  { %v17753_v47 = vadd.f32 %v3705_v0, %v17531_v24  ;;  %v14246_v24 = vld [vmem:[%s22025_s5 + $0x328] sm:$0xf]  ;;  %v3951_v38 = vpop.f32.mrf.mxu0 }
 0x728   :  { %v11529_v27 = vor.u32 %v14246_v24, %v11526_v55 }
 0x72a   :  { %v3673_v4 = vpop.f32.mrf.mxu3 }
 0x72b   :  { %v3674_v19 = vadd.f32 %v3673_v4, %v17459_v11 }
 0x72c   :  { %v3984_v33 = vpop.f32.mrf.mxu2 }
 0x72d   :  { %v3707_v37 = vadd.f32 %v3706_v45, %v3674_v19  ;;  %v17774_v11 = vadd.f32 %v3984_v33, %v3951_v38  ;;  %v3721_v21 = vpop.f32.mrf.mxu1  ;;  %v11544_v19 = vld [vmem:[%s22025_s5 + $0x344] sm:$0xf] }
 0x72e   :  { %4611 = vmatmul.bf16.gmra.mxu1 %v11529_v27 }
 0x72f   :  { %4568 = vmatmul.bf16.vlgmr.msra.gmra.mxu3 %v11501_v25  ;;  %v17772_v35 = vadd.f32 %v3707_v37, %v17575_v44  ;;  %v3953_v52 = vpop.f32.mrf.mxu0  ;;  %v11533_v44 = vor.u32 %v14248_v18, %v11532_v49  ;;  %v14251_v25 = vld [vmem:[%s22025_s5 + $0x34c] sm:$0xf0] }
 0x730   :  { %v11545_v37 = vor.u32 %v14251_v25, %v11544_v19 }
 0x731   :  { %11548 = vmatmul.msk.bf16.gmra.mxu0 %vm2365_vm2, %v11533_v44 }
 0x732   :  { %v3676_v45 = vpop.f32.mrf.mxu3 }
 0x733   :  { %v3677_v63 = vadd.f32 %v3676_v45, %v17484_v50  ;;  %v11512_v50 = vld [vmem:[%s22025_s5 + $0x30c] sm:$0xf]  ;;  %v11496_v45 = vld [vmem:[%s22025_s5 + $0x354] sm:$0x77] }
 0x734   :  { %v3986_v62 = vpop.f32.mrf.mxu2 }
 0x735   :  { %v3710_v17 = vadd.f32 %v17690_v56, %v3677_v63  ;;  %v14244_v56 = vld [vmem:[%s22025_s5 + $0x314] sm:$0xf0]  ;;  %v4271_v14 = vpop.f32.mrf.mxu1 }
 0x736   :  { %v11513_v48 = vor.u32 %v14244_v56, %v11512_v50  ;;  %v11497_v56 = vld [vmem:[%s22025_s5 + $0x35c] sm:$0x7] }
 0x737   :  { %v17785_v8 = vadd.f32 %v3710_v17, %v17591_v54  ;;  %v14249_v54 = vld [vmem:[%s22025_s5 + $0x340] sm:$0xf]  ;;  %v4304_v46 = vpop.f32.mrf.mxu0 }
 0x738   :  { %v11541_v0 = vor.u32 %v14249_v54, %v11538_v30  ;;  %v4305_v59 = vadd.f32 %v4304_v46, %v4271_v14  ;;  %v14250_v46 = vld [vmem:[%s22025_s5 + $0x344] sm:$0xf0] }
 0x73a   :  { %v3678_v57 = vpop.f32.mrf.mxu3 }
 0x73b   :  { %v3679_v42 = vadd.f32 %v3678_v57, %v17494_v23 }
 0x73c   :  { %v4337_v31 = vpop.f32.mrf.mxu2 }
 0x73d   :  { %v3712_v58 = vadd.f32 %v17706_v41, %v3679_v42  ;;  %v17805_v23 = vadd.f32 %v4337_v31, %v4305_v59  ;;  %v17809_v4 = vpop.f32.mrf.mxu1  ;;  %v11571_v42 = vld [vmem:[%s22025_s5 + $0x360] sm:$0xf]  ;;  %v11579_v31 = vld [vmem:[%s22025_s5 + $0x368] sm:$0xf] }
 0x73e   :  { %4616 = vmatmul.bf16.gmra.mxu1 %v11541_v0 }
 0x73f   :  { %4573 = vmatmul.bf16.gmra.mxu3 %v11513_v48  ;;  %v17803_v12 = vadd.f32 %v3712_v58, %v17631_v39  ;;  %v17817_v39 = vpop.f32.mrf.mxu0 }
 0x741   :  { %11549 = vmatmul.msk.bf16.gmra.mxu0 %vm2365_vm2, %v11545_v37 }
 0x742   :  { %v3681_v41 = vpop.f32.mrf.mxu3 }
 0x743   :  { %v3682_v29 = vadd.f32 %v3681_v41, %v17522_v5  ;;  %v11524_v5 = vld [vmem:[%s22025_s5 + $0x324] sm:$0xf] }
 0x744   :  { %v17819_v24 = vpop.f32.mrf.mxu2 }
 0x745   :  { %v3715_v53 = vadd.f32 %v17724_v60, %v3682_v29  ;;  %v14247_v60 = vld [vmem:[%s22025_s5 + $0x32c] sm:$0xf0]  ;;  %v4276_v17 = vpop.f32.mrf.mxu1  ;;  %v14254_v29 = vld [vmem:[%s22025_s5 + $0x370] sm:$0xf0] }
 0x746   :  { %v11525_v27 = vor.u32 %v14247_v60, %v11524_v5  ;;  %v11580_v25 = vor.u32 %v14254_v29, %v11579_v31  ;;  %v3972_v31 = vadd.f32 %v17682_v61, %v17677_v34  ;;  %v14260_v34 = vld [vmem:[%s22025_s5 + $0x3a0] sm:$0xf0] }
 0x747   :  { %v17822_v38 = vadd.f32 %v3715_v53, %v17645_v51  ;;  %v4432_v51 = vunpack.c.h.b16 %v11496_v45 }
 0x749   :  { %v4447_v49 = vpack.c.b16 %v4432_v51, %v4432_v51 }
 0x74a   :  { %v3683_v55 = vpop.f32.mrf.mxu3 }
 0x74b   :  { %v3684_v33 = vadd.f32 %v3683_v55, %v17533_v13 }
 0x74c   :  { %v4342_v52 = vpop.f32.mrf.mxu2 }
 0x74d   :  { %v3717_v63 = vadd.f32 %v17740_v1, %v3684_v33  ;;  %v4309_v21 = vpop.f32.mrf.mxu0  ;;  %v4433_v1 = vunpack.c.l.b16 %v11497_v56  ;;  %v17852_v48 = vpop.f32.mrf.mxu1  ;;  %v11583_v33 = vld [vmem:[%s22025_s5 + $0x378] sm:$0xf] }
 0x74e   :  { %v4310_v18 = vadd.f32 %v4309_v21, %v4276_v17  ;;  %4621 = vmatmul.bf16.gmra.mxu1 %v4447_v49  ;;  %v4431_v21 = vunpack.c.l.b16 %v11496_v45  ;;  %v11591_v45 = vld [vmem:[%s22025_s5 + $0x380] sm:$0xf] }
 0x74f   :  { %4578 = vmatmul.bf16.gmra.mxu3 %v11525_v27  ;;  %v17837_v44 = vadd.f32 %v3717_v63, %v17669_v15  ;;  %v14253_v15 = vld [vmem:[%s22025_s5 + $0x368] sm:$0xf0]  ;;  %v14256_v27 = vld [vmem:[%s22025_s5 + $0x380] sm:$0xf0] }
 0x750   :  { %v17839_v62 = vadd.f32 %v4342_v52, %v4310_v18  ;;  %v11572_v14 = vor.u32 %v14253_v15, %v11571_v42  ;;  %v11584_v17 = vor.u32 %v14256_v27, %v11583_v33  ;;  %v4307_v18 = vadd.f32 %v17817_v39, %v17809_v4 }
 0x752   :  { %v3686_v13 = vpop.f32.mrf.mxu3  ;;  %4908 = vmatmul.bf16.vlgmr.msra.gmra.mxu2 %v11572_v14  ;;  %v4340_v56 = vadd.f32 %v17819_v24, %v4307_v18  ;;  %v11595_v14 = vld [vmem:[%s22025_s5 + $0x390] sm:$0xf] }
 0x753   :  { %v3687_v50 = vadd.f32 %v3686_v13, %v17578_v20  ;;  %v4448_v20 = vpack.c.b16 %v4433_v1, %v4433_v1 }
 0x754   :  { %v17856_v54 = vpop.f32.mrf.mxu2 }
 0x755   :  { %v3720_v57 = vadd.f32 %v17763_v16, %v3687_v50  ;;  %v17854_v58 = vpop.f32.mrf.mxu0  ;;  %v11536_v16 = vld [vmem:[%s22025_s5 + $0x33c] sm:$0xf]  ;;  %11550 = vmatmul.msk.bf16.gmra.mxu0 %vm2365_vm2, %v4448_v20  ;;  %v4281_v41 = vpop.f32.mrf.mxu1  ;;  %v4446_v50 = vpack.c.b16 %v4431_v21, %v4431_v21  ;;  %v11607_v21 = vld [vmem:[%s22025_s5 + $0x3a8] sm:$0xf] }
 0x756   :  { %v11537_v59 = vor.u32 %v14250_v46, %v11536_v16  ;;  %v14259_v16 = vld [vmem:[%s22025_s5 + $0x398] sm:$0xf0] }
 0x757   :  { %v17859_v30 = vadd.f32 %v3720_v57, %v17680_v40 }
 0x75a   :  { %v3688_v0 = vpop.f32.mrf.mxu3 }
 0x75b   :  { %v11596_v0 = vor.u32 %v14259_v16, %v11595_v14  ;;  %v14258_v16 = vld [vmem:[%s22025_s5 + $0x394] sm:$0xf] }
 0x75d   :  { %v4314_v40 = vpop.f32.mrf.mxu0  ;;  %v4347_v19 = vpop.f32.mrf.mxu2 }
 0x75e   :  { %v4315_v53 = vadd.f32 %v4314_v40, %v4281_v41  ;;  %11617 = vmatmul.msk.bf16.vlgmr.msrb.gmra.mxu1 %vm2365_vm2, %v11580_v25  ;;  %v17885_v51 = vpop.f32.mrf.mxu1  ;;  %v4312_v41 = vadd.f32 %v17854_v58, %v17852_v48 }
 0x75f   :  { %4583 = vmatmul.bf16.gmra.mxu3 %v11537_v59 }
 0x760   :  { %v17874_v37 = vadd.f32 %v4347_v19, %v4315_v53  ;;  %v4345_v19 = vadd.f32 %v17856_v54, %v4312_v41 }
 0x762   :  { %v3997_v5 = vpop.f32.mrf.mxu3  ;;  %4913 = vmatmul.bf16.gmra.mxu2 %v11584_v17 }
 0x763   :  { %v3998_v60 = vadd.f32 %v3997_v5, %v17636_v7 }
 0x765   :  { %v4021_v55 = vadd.f32 %v3998_v60, %v17719_v26  ;;  %v17887_v63 = vpop.f32.mrf.mxu0  ;;  %v17889_v49 = vpop.f32.mrf.mxu2  ;;  %v3967_v26 = vadd.f32 %v17647_v10, %v17642_v6  ;;  %v14257_v6 = vld [vmem:[%s22025_s5 + $0x388] sm:$0xf0]  ;;  %v11603_v60 = vld [vmem:[%s22025_s5 + $0x398] sm:$0xf] }
 0x766   :  { %v11592_v4 = vor.u32 %v14257_v6, %v11591_v45  ;;  %v11604_v61 = vor.u32 %v14260_v34, %v11603_v60 }
 0x767   :  { %v17892_v7 = vadd.f32 %v17805_v23, %v4021_v55 }
 0x76a   :  { %v3999_v52 = vpop.f32.mrf.mxu3 }
 0x76b   :  { %v4000_v13 = vadd.f32 %v3999_v52, %v3967_v26  ;;  %v4286_v23 = vpop.f32.mrf.mxu1  ;;  %v14262_v26 = vld [vmem:[%s22025_s5 + $0x3b0] sm:$0xf0] }
 0x76d   :  { %v4022_v1 = vadd.f32 %v4000_v13, %v17734_v2  ;;  %v4319_v57 = vpop.f32.mrf.mxu0  ;;  %v4352_v42 = vpop.f32.mrf.mxu2  ;;  %v11608_v13 = vor.u32 %v14262_v26, %v11607_v21 }
 0x76e   :  { %v4320_v10 = vadd.f32 %v4319_v57, %v4286_v23  ;;  %11618 = vmatmul.msk.bf16.gmra.mxu1 %vm2365_vm2, %v11592_v4 }
 0x76f   :  { %4588 = vmatmul.bf16.gmra.mxu3 %v4446_v50  ;;  %v17906_v39 = vadd.f32 %v4340_v56, %v4022_v1  ;;  %v3977_v56 = vadd.f32 %v17716_v43, %v17714_v22 }
 0x770   :  { %v4353_v15 = vadd.f32 %v4352_v42, %v4320_v10  ;;  %v14263_v10 = vld [vmem:[%s22025_s5 + $0x3b8] sm:$0xf0] }
 0x772   :  { %v4002_v2 = vpop.f32.mrf.mxu3  ;;  %4918 = vmatmul.bf16.gmra.mxu2 %v11596_v0  ;;  %v11597_v0 = vld [vmem:[%s22025_s5 + $0x39c] sm:$0xf0] }
 0x773   :  { %v4003_v24 = vadd.f32 %v4002_v2, %v17672_v28  ;;  %v17917_v46 = vpop.f32.mrf.mxu1  ;;  %v14252_v28 = vld [vmem:[%s22025_s5 + $0x364] sm:$0xf] }
 0x775   :  { %v4023_v20 = vadd.f32 %v4003_v24, %v17753_v47  ;;  %v11573_v47 = vld [vmem:[%s22025_s5 + $0x36c] sm:$0xf0]  ;;  %v17936_v5 = vpop.f32.mrf.mxu2 }
 0x776   :  { %v11576_v53 = vor.u32 %v14252_v28, %v11573_v47  ;;  %v11600_v47 = vor.u32 %v14258_v16, %v11597_v0  ;;  %v11876_v0 = vld [vmem:[%s22026_s6 + $0x1f8] sm:$0xf] }
 0x777   :  { %v17920_v59 = vadd.f32 %v17839_v62, %v4023_v20  ;;  %v17932_v62 = vpop.f32.mrf.mxu0 }
 0x77a   :  { %v4004_v40 = vpop.f32.mrf.mxu3 }
 0x77b   :  { %v4005_v29 = vadd.f32 %v4004_v40, %v3972_v31  ;;  %v4291_v55 = vpop.f32.mrf.mxu1 }
 0x77d   :  { %v4024_v25 = vadd.f32 %v4005_v29, %v17772_v35  ;;  %v4357_v17 = vpop.f32.mrf.mxu2 }
 0x77e   :  { %11619 = vmatmul.msk.bf16.gmra.mxu1 %vm2365_vm2, %v11604_v61 }
 0x77f   :  { %4941 = vmatmul.bf16.vlgmr.msrb.gmra.mxu3 %v11576_v53  ;;  %v17944_v48 = vadd.f32 %v4345_v19, %v4024_v25  ;;  %v4324_v54 = vpop.f32.mrf.mxu0  ;;  %v11568_v53 = vld [vmem:[%s22025_s5 + $0x3c8] sm:$0x7] }
 0x780   :  { %v4325_v33 = vadd.f32 %v4324_v54, %v4291_v55  ;;  %v4731_v19 = vunpack.c.l.b16 %v11568_v53 }
 0x782   :  { %v4007_v58 = vpop.f32.mrf.mxu3  ;;  %v4358_v52 = vadd.f32 %v4357_v17, %v4325_v33  ;;  %4923 = vmatmul.bf16.gmra.mxu2 %v11608_v13  ;;  %v4746_v34 = vpack.c.b16 %v4731_v19, %v4731_v19  ;;  %v11886_v19 = vld [vmem:[%s22026_s6 + $0x224] sm:$0xf0] }
 0x783   :  { %v4008_v35 = vadd.f32 %v4007_v58, %v17699_v36  ;;  %v4293_v18 = vpop.f32.mrf.mxu1  ;;  %v14255_v36 = vld [vmem:[%s22025_s5 + $0x37c] sm:$0xf]  ;;  %v14261_v58 = vld [vmem:[%s22025_s5 + $0x3ac] sm:$0xf] }
 0x785   :  { %v4025_v27 = vadd.f32 %v4008_v35, %v17785_v8  ;;  %v11585_v8 = vld [vmem:[%s22025_s5 + $0x384] sm:$0xf0]  ;;  %v4359_v4 = vpop.f32.mrf.mxu2 }
 0x786   :  { %v11588_v23 = vor.u32 %v14255_v36, %v11585_v8 }
 0x787   :  { %v17956_v50 = vadd.f32 %v17874_v37, %v4025_v27  ;;  %v4326_v57 = vpop.f32.mrf.mxu0  ;;  %v11615_v37 = vld [vmem:[%s22025_s5 + $0x3b0] sm:$0xf] }
 0x788   :  { %v11616_v2 = vor.u32 %v14263_v10, %v11615_v37 }
 0x78a   :  { %v4009_v1 = vpop.f32.mrf.mxu3 }
 0x78b   :  { %v4010_v45 = vadd.f32 %v4009_v1, %v3977_v56  ;;  %v4602_v42 = vpop.f32.mrf.mxu1 }
 0x78d   :  { %v17967_v6 = vadd.f32 %v4010_v45, %v17803_v12 }
 0x78e   :  { %11620 = vmatmul.msk.bf16.gmra.mxu1 %vm2365_vm2, %v11616_v2 }
 0x78f   :  { %4946 = vmatmul.bf16.gmra.mxu3 %v11588_v23  ;;  %v4635_v24 = vpop.f32.mrf.mxu0 }
 0x792   :  { %v4012_v22 = vpop.f32.mrf.mxu3 }
 0x793   :  { %v4013_v43 = vadd.f32 %v4012_v22, %v17736_v9  ;;  %v17978_v20 = vpop.f32.mrf.mxu1  ;;  %v11567_v9 = vld [vmem:[%s22025_s5 + $0x3c0] sm:$0x77] }
 0x794   :  { %v4730_v13 = vunpack.c.h.b16 %v11567_v9 }
 0x795   :  { %v4027_v12 = vadd.f32 %v4013_v43, %v17822_v38  ;;  %v4729_v38 = vunpack.c.l.b16 %v11567_v9 }
 0x796   :  { %v4745_v8 = vpack.c.b16 %v4730_v13, %v4730_v13  ;;  %v14319_v13 = vld [vmem:[%s22026_s6 + $0x1bc] sm:$0xf] }
 0x797   :  { %v17980_v14 = vadd.f32 %v4353_v15, %v4027_v12  ;;  %v17993_v31 = vpop.f32.mrf.mxu0  ;;  %v4744_v41 = vpack.c.b16 %v4729_v38, %v4729_v38 }
 0x799   :  { %4928 = vmatmul.bf16.gmra.mxu2 %v4744_v41  ;;  %v11884_v41 = vld [vmem:[%s22026_s6 + $0x200] sm:$0xf] }
 0x79a   :  { %v17988_v28 = vpop.f32.mrf.mxu3 }
 0x79b   :  { %v4607_v15 = vpop.f32.mrf.mxu1 }
 0x79e   :  { %11621 = vmatmul.msk.bf16.gmra.mxu1 %vm2365_vm2, %v4746_v34  ;;  %v11840_v34 = vld [vmem:[%s22026_s6 + $0x1b0] sm:$0xf] }
 0x79f   :  { %4951 = vmatmul.bf16.gmra.mxu3 %v11600_v47  ;;  %v4640_v60 = vpop.f32.mrf.mxu0  ;;  %v14327_v47 = vld [vmem:[%s22026_s6 + $0x1fc] sm:$0xf] }
 0x7a2   :  { %v4017_v40 = vpop.f32.mrf.mxu3 }
 0x7a3   :  { %v4018_v29 = vadd.f32 %v4017_v40, %v17774_v11  ;;  %v18000_v55 = vpop.f32.mrf.mxu1  ;;  %v11609_v11 = vld [vmem:[%s22025_s5 + $0x3b4] sm:$0xf0]  ;;  %v14332_v40 = vld [vmem:[%s22026_s6 + $0x220] sm:$0xf0] }
 0x7a4   :  { %v11612_v54 = vor.u32 %v14261_v58, %v11609_v11  ;;  %v11885_v53 = vor.u32 %v14332_v40, %v11884_v41  ;;  %v14322_v58 = vld [vmem:[%s22026_s6 + $0x1d0] sm:$0xf0]  ;;  %v11814_v40 = vld [vmem:[%s22026_s6 + $0x194] sm:$0xf0] }
 0x7a5   :  { %v4029_v25 = vadd.f32 %v4018_v29, %v17859_v30  ;;  %v14318_v11 = vld [vmem:[%s22026_s6 + $0x1b4] sm:$0xf] }
 0x7a6   :  { %5549 = vmatpush.bf16.msra.mxu3 %v11885_v53 }
 0x7a7   :  { %v18002_v61 = vadd.f32 %v4358_v52, %v4029_v25  ;;  %v18011_v33 = vpop.f32.mrf.mxu0 }
 0x7aa   :  { %v4019_v35 = vpop.f32.mrf.mxu3 }
 0x7ab   :  { %v4612_v30 = vpop.f32.mrf.mxu1 }
 0x7af   :  { %4956 = vmatmul.bf16.gmra.mxu3 %v11612_v54  ;;  %v4645_v26 = vpop.f32.mrf.mxu0  ;;  %v11841_v54 = vor.u32 %v14322_v58, %v11840_v34 }
 0x7b2   :  { %v4569_v27 = vpop.f32.mrf.mxu3 }
 0x7b3   :  { %v4603_v17 = vadd.f32 %v4602_v42, %v4569_v27  ;;  %v18013_v18 = vpop.f32.mrf.mxu1  ;;  %v11848_v27 = vld [vmem:[%s22026_s6 + $0x1b8] sm:$0xf] }
 0x7b5   :  { %v4636_v21 = vadd.f32 %v4635_v24, %v4603_v17  ;;  %v14323_v17 = vld [vmem:[%s22026_s6 + $0x1d8] sm:$0xf0] }
 0x7b7   :  { %v18016_v52 = vadd.f32 %v4636_v21, %v17892_v7  ;;  %v18020_v56 = vpop.f32.mrf.mxu0 }
 0x7ba   :  { %v18018_v36 = vpop.f32.mrf.mxu3 }
 0x7bb   :  { %v18022_v1 = vpop.f32.mrf.mxu1 }
 0x7bf   :  { %4961 = vmatmul.bf16.gmra.mxu3 %v4745_v8  ;;  %v18024_v37 = vpop.f32.mrf.mxu0  ;;  %v11850_v8 = vld [vmem:[%s22026_s6 + $0x1dc] sm:$0xf0] }
 0x7c2   :  { %v4574_v45 = vpop.f32.mrf.mxu3 }
 0x7c3   :  { %v4608_v23 = vadd.f32 %v4607_v15, %v4574_v45  ;;  %v18026_v10 = vpop.f32.mrf.mxu1  ;;  %v11878_v15 = vld [vmem:[%s22026_s6 + $0x21c] sm:$0xf0]  ;;  %v11804_v45 = vld [vmem:[%s22026_s6 + $0x168] sm:$0xf] }
 0x7c4   :  { %v11881_v29 = vor.u32 %v14327_v47, %v11878_v15  ;;  %v11812_v47 = vld [vmem:[%s22026_s6 + $0x170] sm:$0xf]  ;;  %v14310_v15 = vld [vmem:[%s22026_s6 + $0x174] sm:$0xf] }
 0x7c5   :  { %v4641_v57 = vadd.f32 %v4640_v60, %v4608_v23  ;;  %v11853_v23 = vor.u32 %v14319_v13, %v11850_v8 }
 0x7c6   :  { %5516 = vmatpush.bf16.msrb.mxu2 %v11881_v29  ;;  %v11817_v29 = vor.u32 %v14310_v15, %v11814_v40 }
 0x7c7   :  { %v18029_v4 = vadd.f32 %v4641_v57, %v17920_v59  ;;  %v18033_v42 = vpop.f32.mrf.mxu0  ;;  %v14331_v59 = vld [vmem:[%s22026_s6 + $0x218] sm:$0xf0]  ;;  %v14313_v57 = vld [vmem:[%s22026_s6 + $0x188] sm:$0xf0] }
 0x7c8   :  { %v11877_v38 = vor.u32 %v14331_v59, %v11876_v0  ;;  %v11805_v0 = vor.u32 %v14313_v57, %v11804_v45  ;;  %v14295_v57 = vld [vmem:[%s22026_s6 + $0xf8] sm:$0xf0] }
 0x7ca   :  { %v18031_v7 = vpop.f32.mrf.mxu3  ;;  %5483 = vmatpush.bf16.msra.mxu0 %v11877_v38  ;;  %v14314_v38 = vld [vmem:[%s22026_s6 + $0x190] sm:$0xf0] }
 0x7cb   :  { %v18035_v2 = vpop.f32.mrf.mxu1  ;;  %v11813_v41 = vor.u32 %v14314_v38, %v11812_v47  ;;  %v14296_v47 = vld [vmem:[%s22026_s6 + $0x100] sm:$0xf0]  ;;  %v11742_v38 = vld [vmem:[%s22026_s6 + $0x104] sm:$0xf0] }
 0x7ce   :  { %5484 = vmatpush.bf16.msra.mxu0 %v11841_v54  ;;  %v11770_v54 = vld [vmem:[%s22026_s6 + $0x144] sm:$0xf0] }
 0x7d2   :  { %v4579_v22 = vpop.f32.mrf.mxu3  ;;  %v18037_v24 = vpop.f32.mrf.mxu0  ;;  %5485 = vmatpush.bf16.msra.mxu0 %v11805_v0  ;;  %v11740_v0 = vld [vmem:[%s22026_s6 + $0xe0] sm:$0xf] }
 0x7d3   :  { %v4613_v43 = vadd.f32 %v4612_v30, %v4579_v22  ;;  %v4624_v16 = vpop.f32.mrf.mxu1  ;;  %v11842_v30 = vld [vmem:[%s22026_s6 + $0x1d4] sm:$0xf0]  ;;  %v14309_v22 = vld [vmem:[%s22026_s6 + $0x16c] sm:$0xf]  ;;  %v11741_v15 = vor.u32 %v14296_v47, %v11740_v0  ;;  %v14274_v47 = vld [vmem:[%s22026_s6 + $0x54] sm:$0xf] }
 0x7d4   :  { %v11845_v21 = vor.u32 %v14318_v11, %v11842_v30  ;;  %v11776_v30 = vld [vmem:[%s22026_s6 + $0x128] sm:$0xf] }
 0x7d5   :  { %v4646_v12 = vadd.f32 %v4645_v26, %v4613_v43  ;;  %v18077_v35 = vpop.f32.mrf.mxu2  ;;  %v11849_v26 = vor.u32 %v14323_v17, %v11848_v27  ;;  %v11806_v43 = vld [vmem:[%s22026_s6 + $0x18c] sm:$0xf0]  ;;  %v14305_v27 = vld [vmem:[%s22026_s6 + $0x148] sm:$0xf0] }
 0x7d6   :  { %5517 = vmatpush.bf16.msrb.mxu2 %v11845_v21  ;;  %v11809_v59 = vor.u32 %v14309_v22, %v11806_v43  ;;  %v11777_v21 = vor.u32 %v14305_v27, %v11776_v30  ;;  %v14291_v22 = vld [vmem:[%s22026_s6 + $0xdc] sm:$0xf] }
 0x7d7   :  { %v18049_v9 = vadd.f32 %v4646_v12, %v17956_v50  ;;  %v14328_v50 = vld [vmem:[%s22026_s6 + $0x204] sm:$0xf]  ;;  %5550 = vmatpush.bf16.msra.mxu3 %v11849_v26  ;;  %v11778_v26 = vld [vmem:[%s22026_s6 + $0x14c] sm:$0xf0] }
 0x7d8   :  { %v11889_v25 = vor.u32 %v14328_v50, %v11886_v19  ;;  %v11768_v50 = vld [vmem:[%s22026_s6 + $0x120] sm:$0xf]  ;;  %v14304_v19 = vld [vmem:[%s22026_s6 + $0x140] sm:$0xf0] }
 0x7d9   :  { %v11769_v11 = vor.u32 %v14304_v19, %v11768_v50  ;;  %v14282_v50 = vld [vmem:[%s22026_s6 + $0x94] sm:$0xf] }
 0x7da   :  { %v18066_v60 = vpop.f32.mrf.mxu3  ;;  %5582 = vmatpush.bf16.msra.mxu1 %v11889_v25  ;;  %v4657_v12 = vpop.f32.mrf.mxu0  ;;  %5518 = vmatpush.bf16.msrb.mxu2 %v11809_v59  ;;  %v14300_v25 = vld [vmem:[%s22026_s6 + $0x124] sm:$0xf] }
 0x7db   :  { %v18106_v16 = vpop.f32.mrf.mxu1  ;;  %5551 = vmatpush.bf16.msra.mxu3 %v11813_v41  ;;  %v11773_v17 = vor.u32 %v14300_v25, %v11770_v54  ;;  %5486 = vmatpush.bf16.msra.mxu0 %v11769_v11  ;;  %v11734_v12 = vld [vmem:[%s22026_s6 + $0xfc] sm:$0xf0]  ;;  %v11704_v11 = vld [vmem:[%s22026_s6 + $0x98] sm:$0xf]  ;;  %v14287_v54 = vld [vmem:[%s22026_s6 + $0xb8] sm:$0xf0] }
 0x7dc   :  { %v11737_v59 = vor.u32 %v14291_v22, %v11734_v12  ;;  %v11705_v27 = vor.u32 %v14287_v54, %v11704_v11  ;;  %v11662_v22 = vld [vmem:[%s22026_s6 + $0x6c] sm:$0xf0]  ;;  %v14278_v12 = vld [vmem:[%s22026_s6 + $0x70] sm:$0xf0]  ;;  %v11626_v11 = vld [vmem:[%s22026_s6 + $0x24] sm:$0xf0] }
 0x7dd   :  { %v18130_v58 = vpop.f32.mrf.mxu2  ;;  %v11632_v54 = vld [vmem:[%s22026_s6 + $0x8] sm:$0xf] }
 0x7de   :  { %5583 = vmatpush.bf16.msra.mxu1 %v11853_v23  ;;  %5519 = vmatpush.bf16.msrb.mxu2 %v11773_v17  ;;  %v11732_v23 = vld [vmem:[%s22026_s6 + $0xd8] sm:$0xf]  ;;  %v14283_v17 = vld [vmem:[%s22026_s6 + $0x9c] sm:$0xf] }
 0x7df   :  { %5552 = vmatpush.bf16.msra.mxu3 %v11777_v21  ;;  %v11733_v43 = vor.u32 %v14295_v57, %v11732_v23  ;;  %v11706_v21 = vld [vmem:[%s22026_s6 + $0xbc] sm:$0xf0]  ;;  %v14273_v23 = vld [vmem:[%s22026_s6 + $0x4c] sm:$0xf] }
 0x7e0   :  { %v11665_v0 = vor.u32 %v14273_v23, %v11662_v22 }
 0x7e1   :  { %5487 = vmatpush.bf16.msra.mxu0 %v11733_v43  ;;  %v11668_v43 = vld [vmem:[%s22026_s6 + $0x50] sm:$0xf] }
 0x7e2   :  { %v4584_v53 = vpop.f32.mrf.mxu3  ;;  %5584 = vmatpush.bf16.msra.mxu1 %v11817_v29  ;;  %5520 = vmatpush.bf16.msrb.mxu2 %v11737_v59  ;;  %v11696_v29 = vld [vmem:[%s22026_s6 + $0x90] sm:$0xf]  ;;  %v11669_v59 = vor.u32 %v14278_v12, %v11668_v43 }
 0x7e3   :  { %v4618_v34 = vadd.f32 %v18022_v1, %v4584_v53  ;;  %v14301_v1 = vld [vmem:[%s22026_s6 + $0x12c] sm:$0xf]  ;;  %v18148_v45 = vpop.f32.mrf.mxu1  ;;  %v14286_v53 = vld [vmem:[%s22026_s6 + $0xb0] sm:$0xf0]  ;;  %5553 = vmatpush.bf16.msra.mxu3 %v11741_v15 }
 0x7e4   :  { %v11781_v8 = vor.u32 %v14301_v1, %v11778_v26  ;;  %v11697_v25 = vor.u32 %v14286_v53, %v11696_v29  ;;  %v11709_v1 = vor.u32 %v14283_v17, %v11706_v21  ;;  %v14268_v29 = vld [vmem:[%s22026_s6 + $0x20] sm:$0xf0]  ;;  %v11634_v21 = vld [vmem:[%s22026_s6 + $0x2c] sm:$0xf0] }
 0x7e5   :  { %v4651_v13 = vadd.f32 %v18024_v37, %v4618_v34  ;;  %v18188_v19 = vpop.f32.mrf.mxu2  ;;  %v11698_v34 = vld [vmem:[%s22026_s6 + $0xb4] sm:$0xf0]  ;;  %v14264_v53 = vld [vmem:[%s22026_s6 + $0x4] sm:$0xf] }
 0x7e6   :  { %5585 = vmatpush.bf16.msra.mxu1 %v11781_v8  ;;  %v11701_v30 = vor.u32 %v14282_v50, %v11698_v34  ;;  %5488 = vmatpush.bf16.msra.mxu0 %v11697_v25  ;;  %v14277_v8 = vld [vmem:[%s22026_s6 + $0x68] sm:$0xf0] }
 0x7e7   :  { %v18160_v37 = vadd.f32 %v4651_v13, %v17980_v14  ;;  %v14292_v14 = vld [vmem:[%s22026_s6 + $0xe4] sm:$0xf]  ;;  %v11660_v13 = vld [vmem:[%s22026_s6 + $0x48] sm:$0xf]  ;;  %5554 = vmatpush.bf16.msra.mxu3 %v11705_v27  ;;  %v11629_v27 = vor.u32 %v14264_v53, %v11626_v11 }
 0x7e8   :  { %v11745_v41 = vor.u32 %v14292_v14, %v11742_v38  ;;  %5521 = vmatpush.bf16.msrb.mxu2 %v11701_v30  ;;  %v11661_v57 = vor.u32 %v14277_v8, %v11660_v13  ;;  %v11670_v14 = vld [vmem:[%s22026_s6 + $0x74] sm:$0xf0]  ;;  %v14269_v30 = vld [vmem:[%s22026_s6 + $0x28] sm:$0xf0] }
 0x7e9   :  { %v11673_v38 = vor.u32 %v14274_v47, %v11670_v14  ;;  %v11633_v17 = vor.u32 %v14269_v30, %v11632_v54 }
 0x7ea   :  { %v18177_v40 = vpop.f32.mrf.mxu3  ;;  %5586 = vmatpush.bf16.msra.mxu1 %v11745_v41  ;;  %5489 = vmatpush.bf16.msra.mxu0 %v11661_v57  ;;  %v11624_v41 = vld [vmem:[%s22026_s6] sm:$0xf] }
 0x7eb   :  { %v18205_v26 = vpop.f32.mrf.mxu1  ;;  %5555 = vmatpush.bf16.msra.mxu3 %v11669_v59  ;;  %v11625_v34 = vor.u32 %v14268_v29, %v11624_v41  ;;  %v4605_v59 = vadd.f32 %v17978_v20, %v18018_v36  ;;  %v18273_v41 = vld [vmem:[%s22024_s4] ss:$0 sm:$0xff] }
 0x7ec   :  { %5522 = vmatpush.bf16.msrb.mxu2 %v11665_v0 }
 0x7ed   :  { %v4916_v25 = vpop.f32.mrf.mxu2  ;;  %v4638_v14 = vadd.f32 %v17993_v31, %v4605_v59 }
 0x7ee   :  { %5587 = vmatpush.bf16.msra.mxu1 %v11709_v1  ;;  %5490 = vmatpush.bf16.msra.mxu0 %v11625_v34 }
 0x7ef   :  { %5556 = vmatpush.bf16.msra.mxu3 %v11633_v17  ;;  %v4660_v20 = vadd.f32 %v4638_v14, %v17906_v39  ;;  %v11892_v14 = vld [vmem:[%s22026_s6 + $0x208] sm:$0xf] }
 0x7f0   :  { %5523 = vmatpush.bf16.msrb.mxu2 %v11629_v27 }
 0x7f2   :  { %v4589_v15 = vpop.f32.mrf.mxu3  ;;  %5588 = vmatpush.bf16.msra.mxu1 %v11673_v38 }
 0x7f3   :  { %v4623_v50 = vadd.f32 %v18035_v2, %v4589_v15  ;;  %v14265_v2 = vld [vmem:[%s22026_s6 + $0xc] sm:$0xf]  ;;  %v4982_v8 = vpop.f32.mrf.mxu1 }
 0x7f4   :  { %v11637_v13 = vor.u32 %v14265_v2, %v11634_v21 }
 0x7f5   :  { %v4656_v1 = vadd.f32 %v18037_v24, %v4623_v50  ;;  %v4919_v22 = vpop.f32.mrf.mxu2 }
 0x7f6   :  { %5589 = vmatpush.bf16.msra.mxu1 %v11637_v13 }
 0x7f7   :  { %v18258_v23 = vadd.f32 %v4656_v1, %v18002_v61 }
 0x7fa   :  { %v4591_v57 = vpop.f32.mrf.mxu3 }
 0x7fb   :  { %v4985_v43 = vpop.f32.mrf.mxu1 }
 0x7fd   :  { %v18264_v47 = vpop.f32.mrf.mxu2 }
 0x802   :  { %v4942_v12 = vpop.f32.mrf.mxu3 }
 0x803   :  { %v4943_v0 = vadd.f32 %v4942_v12, %v18077_v35  ;;  %v18267_v38 = vpop.f32.mrf.mxu1 }
 0x805   :  { %v4976_v24 = vadd.f32 %v18106_v16, %v4943_v0  ;;  %v18280_v53 = vpop.f32.mrf.mxu2 }
 0x807   :  { %v4999_v15 = vadd.f32 %v4976_v24, %v18016_v52 }
 0x809   :  { %v5012_v16 = vadd.f32 %v18273_v41, %v4999_v15 }
 0x80a   :  { %v4944_v61 = vpop.f32.mrf.mxu3 }
 0x80b   :  { %v4945_v35 = vadd.f32 %v4944_v61, %v18130_v58  ;;  %v5021_v52 = vmax.f32 %v5012_v16, 0.0  ;;  %v18283_v54 = vpop.f32.mrf.mxu1  ;;  %v4610_v58 = vadd.f32 %v18000_v55, %v18031_v7 }
 0x80d   :  { %v4978_v36 = vadd.f32 %v18148_v45, %v4945_v35  ;;  %v4643_v30 = vadd.f32 %v18011_v33, %v4610_v58  ;;  %v18296_v2 = vpop.f32.mrf.mxu2  ;;  %v14330_v35 = vld [vmem:[%s22026_s6 + $0x214] sm:$0xf] }
 0x80f   :  { %v5000_v29 = vadd.f32 %v4978_v36, %v4660_v20  ;;  %v4662_v55 = vadd.f32 %v4643_v30, %v17944_v48  ;;  %v4615_v48 = vadd.f32 %v18013_v18, %v18066_v60  ;;  %v11894_v18 = vld [vmem:[%s22026_s6 + $0x22c] sm:$0xf0]  ;;  %v11902_v20 = vld [vmem:[%s22026_s6 + $0x234] sm:$0xf0]  ;;  %v11864_v30 = vld [vmem:[%s22026_s6 + $0x1c8] sm:$0xf] }
 0x810   :  { %v11900_v60 = vld [vmem:[%s22026_s6 + $0x210] sm:$0xf] }
 0x811   :  { %v5013_v31 = vadd.f32 %v18273_v41, %v5000_v29  ;;  %v4648_v16 = vadd.f32 %v18020_v56, %v4615_v48  ;;  %v11905_v29 = vor.u32 %v14330_v35, %v11902_v20  ;;  %v14316_v48 = vld [vmem:[%s22026_s6 + $0x1a0] sm:$0xf0]  ;;  %v11786_v35 = vld [vmem:[%s22026_s6 + $0x154] sm:$0xf0] }
 0x812   :  { %v4947_v50 = vpop.f32.mrf.mxu3 }
 0x813   :  { %v5022_v34 = vmax.f32 %v5013_v31, 0.0  ;;  %v4948_v11 = vadd.f32 %v4947_v50, %v18188_v19  ;;  %5714 = vmatpush.bf16.msrb.mxu1 %v11905_v29 }
 0x815   :  { %v18287_v39 = vpack.c.bf16 %v5022_v34, %v5021_v52  ;;  %v4981_v45 = vadd.f32 %v18205_v26, %v4948_v11  ;;  %v18299_v26 = vpop.f32.mrf.mxu1  ;;  %v11856_v52 = vld [vmem:[%s22026_s6 + $0x1c0] sm:$0xf]  ;;  %v14324_v34 = vld [vmem:[%s22026_s6 + $0x1e0] sm:$0xf0] }
 0x816   :  { %v11857_v58 = vor.u32 %v14324_v34, %v11856_v52  ;;  %v11794_v52 = vld [vmem:[%s22026_s6 + $0x15c] sm:$0xf0] }
 0x817   :  { %5491 = vmatmul.bf16.vlgmr.msra.gmra.mxu0 %v18287_v39  ;;  %5524 = vmatmul.bf16.vlgmr.msrb.gmra.mxu2 %v18287_v39  ;;  %v5001_v27 = vadd.f32 %v4981_v45, %v18029_v4  ;;  %v4317_v4 = vadd.f32 %v17887_v63, %v17885_v51  ;;  %v14329_v51 = vld [vmem:[%s22026_s6 + $0x20c] sm:$0xf]  ;;  %v11858_v45 = vld [vmem:[%s22026_s6 + $0x1e4] sm:$0xf0] }
 0x818   :  { %5557 = vmatmul.bf16.vlgmr.msra.gmra.mxu3 %v18287_v39  ;;  %5590 = vmatmul.bf16.vlgmr.msra.gmra.mxu1 %v18287_v39  ;;  %v11897_v61 = vor.u32 %v14329_v51, %v11894_v18  ;;  %v14312_v51 = vld [vmem:[%s22026_s6 + $0x184] sm:$0xf]  ;;  %v11784_v18 = vld [vmem:[%s22026_s6 + $0x130] sm:$0xf] }
 0x819   :  { %v5014_v21 = vadd.f32 %v18273_v41, %v5001_v27  ;;  %v4350_v36 = vadd.f32 %v17889_v49, %v4317_v4  ;;  %v14320_v49 = vld [vmem:[%s22026_s6 + $0x1c4] sm:$0xf]  ;;  %v14325_v27 = vld [vmem:[%s22026_s6 + $0x1e8] sm:$0xf0]  ;;  %v11828_v4 = vld [vmem:[%s22026_s6 + $0x180] sm:$0xf] }
 0x81a   :  { %v4949_v19 = vpop.f32.mrf.mxu3  ;;  %5648 = vmatpush.bf16.msra.mxu2 %v11897_v61  ;;  %v14306_v61 = vld [vmem:[%s22026_s6 + $0x150] sm:$0xf0] }
 0x81b   :  { %v4950_v17 = vadd.f32 %v4949_v19, %v4916_v25  ;;  %v5023_v12 = vmax.f32 %v5014_v21, 0.0  ;;  %v4366_v56 = vadd.f32 %v4350_v36, %v17967_v6  ;;  %v11861_v19 = vor.u32 %v14320_v49, %v11858_v45  ;;  %v14321_v6 = vld [vmem:[%s22026_s6 + $0x1cc] sm:$0xf] }
 0x81c   :  { %v18303_v59 = vpop.f32.mrf.mxu2  ;;  %v11865_v21 = vor.u32 %v14325_v27, %v11864_v30  ;;  %v11785_v36 = vor.u32 %v14306_v61, %v11784_v18  ;;  %v14298_v27 = vld [vmem:[%s22026_s6 + $0x110] sm:$0xf0]  ;;  %v14279_v18 = vld [vmem:[%s22026_s6 + $0x78] sm:$0xf0] }
 0x81d   :  { %v4983_v7 = vadd.f32 %v4982_v8, %v4950_v17  ;;  %v18311_v8 = vpop.f32.mrf.mxu1  ;;  %v4664_v17 = vadd.f32 %v4648_v16, %v4366_v56 }
 0x81e   :  { %5649 = vmatpush.bf16.msra.mxu2 %v11861_v19  ;;  %v14297_v19 = vld [vmem:[%s22026_s6 + $0x108] sm:$0xf0] }
 0x81f   :  { %v5002_v1 = vadd.f32 %v4983_v7, %v4662_v55 }
 0x821   :  { %v5015_v13 = vadd.f32 %v18273_v41, %v5002_v1 }
 0x822   :  { %v4952_v57 = vpop.f32.mrf.mxu3 }
 0x823   :  { %v5024_v0 = vmax.f32 %v5015_v13, 0.0  ;;  %v4953_v33 = vadd.f32 %v4952_v57, %v4919_v22  ;;  %v14333_v22 = vld [vmem:[%s22026_s6 + $0x228] sm:$0xf0]  ;;  %v11820_v13 = vld [vmem:[%s22026_s6 + $0x178] sm:$0xf] }
 0x824   :  { %v11893_v63 = vor.u32 %v14333_v22, %v11892_v14  ;;  %v14315_v57 = vld [vmem:[%s22026_s6 + $0x198] sm:$0xf0]  ;;  %v11829_v22 = vor.u32 %v14316_v48, %v11828_v4  ;;  %v14289_v4 = vld [vmem:[%s22026_s6 + $0xc8] sm:$0xf0] }
 0x825   :  { %v18309_v25 = vpack.c.bf16 %v5024_v0, %v5023_v12  ;;  %v4986_v24 = vadd.f32 %v4985_v43, %v4953_v33  ;;  %v14334_v43 = vld [vmem:[%s22026_s6 + $0x230] sm:$0xf0]  ;;  %v4997_v7 = vpop.f32.mrf.mxu1  ;;  %v14311_v12 = vld [vmem:[%s22026_s6 + $0x17c] sm:$0xf]  ;;  %v11822_v33 = vld [vmem:[%s22026_s6 + $0x19c] sm:$0xf0] }
 0x826   :  { %v11901_v15 = vor.u32 %v14334_v43, %v11900_v60  ;;  %5615 = vmatpush.bf16.msrb.mxu0 %v11893_v63  ;;  %v11825_v14 = vor.u32 %v14311_v12, %v11822_v33  ;;  %v11830_v63 = vld [vmem:[%s22026_s6 + $0x1a4] sm:$0xf0]  ;;  %v3982_v60 = vadd.f32 %v17750_v32, %v17748_v3  ;;  %v11792_v3 = vld [vmem:[%s22026_s6 + $0x138] sm:$0xf]  ;;  %v11712_v7 = vld [vmem:[%s22026_s6 + $0xa0] sm:$0xf] }
 0x827   :  { %5496 = vmatmul.bf16.gmra.mxu0 %v18309_v25  ;;  %5529 = vmatmul.bf16.gmra.mxu2 %v18309_v25  ;;  %v5003_v31 = vadd.f32 %v4986_v24, %v18049_v9  ;;  %v4931_v9 = vpop.f32.mrf.mxu2  ;;  %v11833_v43 = vor.u32 %v14312_v51, %v11830_v63  ;;  %v11720_v33 = vld [vmem:[%s22026_s6 + $0xa8] sm:$0xf]  ;;  %v14285_v48 = vld [vmem:[%s22026_s6 + $0xac] sm:$0xf]  ;;  %v11676_v51 = vld [vmem:[%s22026_s6 + $0x58] sm:$0xf] }
 0x828   :  { %5562 = vmatmul.bf16.gmra.mxu3 %v18309_v25  ;;  %5595 = vmatmul.bf16.gmra.mxu1 %v18309_v25  ;;  %v4015_v32 = vadd.f32 %v17988_v28, %v3982_v60  ;;  %v4322_v28 = vadd.f32 %v17932_v62, %v17917_v46  ;;  %v14293_v46 = vld [vmem:[%s22026_s6 + $0xec] sm:$0xf]  ;;  %v14275_v60 = vld [vmem:[%s22026_s6 + $0x5c] sm:$0xf] }
 0x829   :  { %5681 = vmatpush.bf16.msrb.mxu3 %v11901_v15  ;;  %v5016_v0 = vadd.f32 %v18273_v41, %v5003_v31  ;;  %v14302_v15 = vld [vmem:[%s22026_s6 + $0x134] sm:$0xf]  ;;  %5650 = vmatpush.bf16.msra.mxu2 %v11825_v14  ;;  %v14307_v31 = vld [vmem:[%s22026_s6 + $0x158] sm:$0xf0] }
 0x82a   :  { %v4954_v50 = vpop.f32.mrf.mxu3  ;;  %5616 = vmatpush.bf16.msrb.mxu0 %v11857_v58  ;;  %v11789_v29 = vor.u32 %v14302_v15, %v11786_v35  ;;  %v11793_v58 = vor.u32 %v14307_v31, %v11792_v3  ;;  %v4028_v30 = vadd.f32 %v4015_v32, %v17837_v44  ;;  %v11684_v15 = vld [vmem:[%s22026_s6 + $0x60] sm:$0xf]  ;;  %v14280_v35 = vld [vmem:[%s22026_s6 + $0x80] sm:$0xf0]  ;;  %v11686_v3 = vld [vmem:[%s22026_s6 + $0x84] sm:$0xf0] }
 0x82b   :  { %v4955_v11 = vadd.f32 %v4954_v50, %v18264_v47  ;;  %v11866_v47 = vld [vmem:[%s22026_s6 + $0x1ec] sm:$0xf0]  ;;  %v14303_v50 = vld [vmem:[%s22026_s6 + $0x13c] sm:$0xf]  ;;  %v5025_v34 = vmax.f32 %v5016_v0, 0.0 }
 0x82c   :  { %v11869_v1 = vor.u32 %v14321_v6, %v11866_v47  ;;  %v11797_v45 = vor.u32 %v14303_v50, %v11794_v52  ;;  %v4355_v6 = vadd.f32 %v17936_v5, %v4322_v28  ;;  %v11640_v32 = vld [vmem:[%s22026_s6 + $0x10] sm:$0xf]  ;;  %v14270_v31 = vld [vmem:[%s22026_s6 + $0x30] sm:$0xf0]  ;;  %v11642_v52 = vld [vmem:[%s22026_s6 + $0x34] sm:$0xf0] }
 0x82d   :  { %v4988_v55 = vadd.f32 %v18267_v38, %v4955_v11  ;;  %v11821_v38 = vor.u32 %v14315_v57, %v11820_v13  ;;  %5682 = vmatpush.bf16.msrb.mxu3 %v11865_v21  ;;  %v4620_v11 = vadd.f32 %v18026_v10, %v18177_v40  ;;  %5651 = vmatpush.bf16.msra.mxu2 %v11789_v29  ;;  %v11750_v10 = vld [vmem:[%s22026_s6 + $0x10c] sm:$0xf0]  ;;  %v14288_v21 = vld [vmem:[%s22026_s6 + $0xc0] sm:$0xf0]  ;;  %v11714_v13 = vld [vmem:[%s22026_s6 + $0xc4] sm:$0xf0] }
 0x82e   :  { %5715 = vmatpush.bf16.msrb.mxu1 %v11869_v1  ;;  %v11756_v40 = vld [vmem:[%s22026_s6 + $0xf0] sm:$0xf]  ;;  %v11753_v47 = vor.u32 %v14293_v46, %v11750_v10  ;;  %v14284_v1 = vld [vmem:[%s22026_s6 + $0xa4] sm:$0xf]  ;;  %v4368_v57 = vadd.f32 %v4355_v6, %v4028_v30  ;;  %v11713_v0 = vor.u32 %v14288_v21, %v11712_v7  ;;  %v14266_v50 = vld [vmem:[%s22026_s6 + $0x14] sm:$0xf] }
 0x82f   :  { %v5004_v24 = vadd.f32 %v4988_v55, %v4664_v17  ;;  %5617 = vmatpush.bf16.msrb.mxu0 %v11821_v38  ;;  %v14294_v17 = vld [vmem:[%s22026_s6 + $0xf4] sm:$0xf]  ;;  %v11758_v55 = vld [vmem:[%s22026_s6 + $0x114] sm:$0xf0]  ;;  %v11757_v5 = vor.u32 %v14298_v27, %v11756_v40  ;;  %v11717_v38 = vor.u32 %v14284_v1, %v11714_v13  ;;  %v11645_v30 = vor.u32 %v14266_v50, %v11642_v52  ;;  %v11872_v7 = vld [vmem:[%s22026_s6 + $0x1d0] sm:$0xf] }
 0x830   :  { %v11648_v28 = vld [vmem:[%s22026_s6 + $0x18] sm:$0xf]  ;;  %v11836_v21 = vld [vmem:[%s22026_s6 + $0x188] sm:$0xf]  ;;  %v14317_v1 = vld [vmem:[%s22026_s6 + $0x1a8] sm:$0xf0] }
 0x831   :  { %v5017_v20 = vadd.f32 %v18273_v41, %v5004_v24  ;;  %5683 = vmatpush.bf16.msrb.mxu3 %v11829_v22  ;;  %5652 = vmatpush.bf16.msra.mxu2 %v11753_v47  ;;  %v11722_v22 = vld [vmem:[%s22026_s6 + $0xcc] sm:$0xf0]  ;;  %v11837_v13 = vor.u32 %v14317_v1, %v11836_v21 }
 0x832   :  { %v4957_v16 = vpop.f32.mrf.mxu3  ;;  %5716 = vmatpush.bf16.msrb.mxu1 %v11833_v43  ;;  %v11721_v43 = vor.u32 %v14289_v4, %v11720_v33  ;;  %v11725_v61 = vor.u32 %v14285_v48, %v11722_v22  ;;  %v14299_v33 = vld [vmem:[%s22026_s6 + $0x118] sm:$0xf0]  ;;  %v11728_v48 = vld [vmem:[%s22026_s6 + $0xb0] sm:$0xf]  ;;  %v11692_v22 = vld [vmem:[%s22026_s6 + $0x68] sm:$0xf] }
 0x833   :  { %v5026_v49 = vmax.f32 %v5017_v20, 0.0  ;;  %v4958_v56 = vadd.f32 %v4957_v16, %v18280_v53  ;;  %5618 = vmatpush.bf16.msrb.mxu0 %v11785_v36  ;;  %v11748_v53 = vld [vmem:[%s22026_s6 + $0xe8] sm:$0xf]  ;;  %v11677_v20 = vor.u32 %v14279_v18, %v11676_v51  ;;  %v14281_v51 = vld [vmem:[%s22026_s6 + $0x88] sm:$0xf0] }
 0x834   :  { %v11749_v44 = vor.u32 %v14297_v19, %v11748_v53  ;;  %v14267_v53 = vld [vmem:[%s22026_s6 + $0x1c] sm:$0xf]  ;;  %v11650_v19 = vld [vmem:[%s22026_s6 + $0x3c] sm:$0xf0] }
 0x835   :  { %v18429_v9 = vpack.c.bf16 %v5026_v49, %v5025_v34  ;;  %v4991_v62 = vadd.f32 %v18283_v54, %v4958_v56  ;;  %v4653_v54 = vadd.f32 %v18033_v42, %v4620_v11  ;;  %5684 = vmatpush.bf16.msrb.mxu3 %v11793_v58  ;;  %v11761_v42 = vor.u32 %v14294_v17, %v11758_v55  ;;  %v14271_v11 = vld [vmem:[%s22026_s6 + $0x38] sm:$0xf0]  ;;  %v11656_v18 = vld [vmem:[%s22026_s6 + $0x20] sm:$0xf] }
 0x836   :  { %5717 = vmatpush.bf16.msrb.mxu1 %v11797_v45  ;;  %5653 = vmatpush.bf16.msra.mxu2 %v11717_v38  ;;  %v11685_v49 = vor.u32 %v14280_v35, %v11684_v15  ;;  %v11641_v45 = vor.u32 %v14270_v31, %v11640_v32  ;;  %v11649_v10 = vor.u32 %v14271_v11, %v11648_v28  ;;  %v11764_v38 = vld [vmem:[%s22026_s6 + $0xf8] sm:$0xf] }
 0x837   :  { %5501 = vmatmul.bf16.gmra.mxu0 %v18429_v9  ;;  %5534 = vmatmul.bf16.gmra.mxu2 %v18429_v9  ;;  %v5005_v24 = vadd.f32 %v4991_v62, %v18160_v37  ;;  %v4666_v63 = vadd.f32 %v4653_v54, %v4368_v57  ;;  %v11678_v37 = vld [vmem:[%s22026_s6 + $0x7c] sm:$0xf0]  ;;  %v11653_v6 = vor.u32 %v14267_v53, %v11650_v19 }
 0x838   :  { %5567 = vmatmul.bf16.gmra.mxu3 %v18429_v9  ;;  %5600 = vmatmul.bf16.gmra.mxu1 %v18429_v9  ;;  %v11681_v36 = vor.u32 %v14275_v60, %v11678_v37  ;;  %v11800_v57 = vld [vmem:[%s22026_s6 + $0x140] sm:$0xf]  ;;  %v11765_v4 = vor.u32 %v14299_v33, %v11764_v38  ;;  %v14272_v60 = vld [vmem:[%s22026_s6 + $0x40] sm:$0xf0] }
 0x839   :  { %5619 = vmatpush.bf16.msrb.mxu0 %v11749_v44  ;;  %5685 = vmatpush.bf16.msrb.mxu3 %v11757_v5  ;;  %v5018_v16 = vadd.f32 %v18273_v41, %v5005_v24  ;;  %v14326_v5 = vld [vmem:[%s22026_s6 + $0x1f0] sm:$0xf0]  ;;  %v11657_v37 = vor.u32 %v14272_v60, %v11656_v18 }
 0x83a   :  { %v4959_v12 = vpop.f32.mrf.mxu3  ;;  %5718 = vmatpush.bf16.msrb.mxu1 %v11761_v42  ;;  %5654 = vmatpush.bf16.msra.mxu2 %v11681_v36  ;;  %v11873_v42 = vor.u32 %v14326_v5, %v11872_v7  ;;  %v14290_v24 = vld [vmem:[%s22026_s6 + $0xd0] sm:$0xf0] }
 0x83b   :  { %v4960_v14 = vadd.f32 %v4959_v12, %v18296_v2  ;;  %v5027_v46 = vmax.f32 %v5018_v16, 0.0  ;;  %v14308_v12 = vld [vmem:[%s22026_s6 + $0x160] sm:$0xf0] }
 0x83d   :  { %v4993_v2 = vadd.f32 %v18299_v26, %v4960_v14  ;;  %5620 = vmatpush.bf16.msrb.mxu0 %v11713_v0  ;;  %v14276_v26 = vld [vmem:[%s22026_s6 + $0x64] sm:$0xf]  ;;  %5686 = vmatpush.bf16.msrb.mxu3 %v11721_v43  ;;  %v11801_v0 = vor.u32 %v14308_v12, %v11800_v57  ;;  %v11729_v14 = vor.u32 %v14290_v24, %v11728_v48 }
 0x83e   :  { %5719 = vmatpush.bf16.msrb.mxu1 %v11725_v61  ;;  %v11689_v56 = vor.u32 %v14276_v26, %v11686_v3  ;;  %5655 = vmatpush.bf16.msra.mxu2 %v11645_v30 }
 0x83f   :  { %v5006_v29 = vadd.f32 %v4993_v2, %v4666_v63  ;;  %v11693_v63 = vor.u32 %v14281_v51, %v11692_v22 }
 0x841   :  { %v5019_v34 = vadd.f32 %v18273_v41, %v5006_v29  ;;  %5621 = vmatpush.bf16.msrb.mxu0 %v11677_v20  ;;  %5687 = vmatpush.bf16.msrb.mxu3 %v11685_v49 }
 0x842   :  { %v4962_v58 = vpop.f32.mrf.mxu3  ;;  %5720 = vmatpush.bf16.msrb.mxu1 %v11689_v56 }
 0x843   :  { %v5028_v62 = vmax.f32 %v5019_v34, 0.0  ;;  %v4963_v44 = vadd.f32 %v4962_v58, %v18303_v59 }
 0x845   :  { %v18541_v40 = vpack.c.bf16 %v5028_v62, %v5027_v46  ;;  %v4996_v27 = vadd.f32 %v18311_v8, %v4963_v44  ;;  %5622 = vmatpush.bf16.msrb.mxu0 %v11641_v45  ;;  %5688 = vmatpush.bf16.msrb.mxu3 %v11649_v10 }
 0x846   :  { %5721 = vmatpush.bf16.msrb.mxu1 %v11653_v6 }
 0x847   :  { %v5007_v54 = vadd.f32 %v4996_v27, %v18258_v23  ;;  %5506 = vmatmul.bf16.gmra.mxu0 %v18541_v40  ;;  %5539 = vmatmul.bf16.gmra.mxu2 %v18541_v40  ;;  %v11908_v23 = vld [vmem:[%s22026_s6 + $0x218] sm:$0xf] }
 0x848   :  { %5572 = vmatmul.bf16.gmra.mxu3 %v18541_v40  ;;  %5605 = vmatmul.bf16.gmra.mxu1 %v18541_v40 }
 0x849   :  { %v5020_v59 = vadd.f32 %v18273_v41, %v5007_v54  ;;  %v14335_v41 = vld [vmem:[%s22026_s6 + $0x238] sm:$0xf0] }
 0x84a   :  { %v4964_v8 = vpop.f32.mrf.mxu3  ;;  %v11909_v55 = vor.u32 %v14335_v41, %v11908_v23 }
 0x84b   :  { %v5029_v47 = vmax.f32 %v5020_v59, 0.0 }
 0x84c   :  { %5747 = vmatpush.bf16.msra.mxu0 %v11909_v55 }
 0x84d   :  { %v18550_v17 = vpack.c.bf16 %v5029_v47, %v5029_v47 }
 0x850   :  { %5748 = vmatpush.bf16.msra.mxu0 %v11873_v42 }
 0x854   :  { %5749 = vmatpush.bf16.msra.mxu0 %v11837_v13 }
 0x857   :  { %5511 = vmatmul.bf16.gmra.mxu0 %v18550_v17  ;;  %5544 = vmatmul.bf16.gmra.mxu2 %v18550_v17 }
 0x858   :  { %5577 = vmatmul.bf16.gmra.mxu3 %v18550_v17  ;;  %5610 = vmatmul.bf16.gmra.mxu1 %v18550_v17 }
 0x859   :  { %5750 = vmatpush.bf16.msra.mxu0 %v11801_v0 }
 0x85d   :  { %5751 = vmatpush.bf16.msra.mxu0 %v11765_v4 }
 0x861   :  { %5752 = vmatpush.bf16.msra.mxu0 %v11729_v14 }
 0x865   :  { %5753 = vmatpush.bf16.msra.mxu0 %v11693_v63 }
 0x867   :  { %5623 = vmatmul.bf16.vlgmr.msrb.gmra.mxu0 %v18287_v39  ;;  %5656 = vmatmul.bf16.vlgmr.msra.gmra.mxu2 %v18287_v39 }
 0x868   :  { %5689 = vmatmul.bf16.vlgmr.msrb.gmra.mxu3 %v18287_v39  ;;  %5722 = vmatmul.bf16.vlgmr.msrb.gmra.mxu1 %v18287_v39 }
 0x869   :  { %5754 = vmatpush.bf16.msra.mxu0 %v11657_v37 }
 0x877   :  { %5628 = vmatmul.bf16.gmra.mxu0 %v18309_v25  ;;  %5661 = vmatmul.bf16.gmra.mxu2 %v18309_v25 }
 0x878   :  { %5694 = vmatmul.bf16.gmra.mxu3 %v18309_v25  ;;  %5727 = vmatmul.bf16.gmra.mxu1 %v18309_v25 }
 0x887   :  { %5633 = vmatmul.bf16.gmra.mxu0 %v18429_v9  ;;  %5666 = vmatmul.bf16.gmra.mxu2 %v18429_v9 }
 0x888   :  { %5699 = vmatmul.bf16.gmra.mxu3 %v18429_v9  ;;  %5732 = vmatmul.bf16.gmra.mxu1 %v18429_v9 }
 0x894   :  { %v5492_v2 = vpop.f32.mrf.mxu0 }
 0x895   :  { %v5591_v43 = vpop.f32.mrf.mxu1 }
 0x897   :  { %5638 = vmatmul.bf16.gmra.mxu0 %v18541_v40  ;;  %5671 = vmatmul.bf16.gmra.mxu2 %v18541_v40 }
 0x898   :  { %5704 = vmatmul.bf16.gmra.mxu3 %v18541_v40  ;;  %5737 = vmatmul.bf16.gmra.mxu1 %v18541_v40 }
 0x89a   :  { %v5525_v61 = vpop.f32.mrf.mxu2 }
 0x89b   :  { %v5780_v15 = vpack.c.bf16 %v5525_v61, %v5492_v2  ;;  %v5558_v35 = vpop.f32.mrf.mxu3 }
 0x89c   :  { %v18620_v20 = vpack.c.bf16 %v5591_v43, %v5558_v35  ;;  %v5494_v36 = vpop.f32.mrf.mxu0 }
 0x89d   :  { %v18622_v26 = vpop.f32.mrf.mxu1  ;;  %v5853_v31 = vunpack.c.h.b16 %v5780_v15  ;;  %v5911_v50 = vunpack.c.l.b16 %v5780_v15 }
 0x8a2   :  { %v5527_v3 = vpop.f32.mrf.mxu2 }
 0x8a3   :  { %v5785_v32 = vpack.c.bf16 %v5527_v3, %v5494_v36  ;;  %v18624_v16 = vpop.f32.mrf.mxu3 }
 0x8a4   :  { %v18626_v29 = vpop.f32.mrf.mxu0 }
 0x8a5   :  { %v5854_v52 = vunpack.c.h.b16 %v5785_v32  ;;  %v5912_v34 = vunpack.c.l.b16 %v5785_v32  ;;  %v18628_v49 = vpop.f32.mrf.mxu1 }
 0x8a7   :  { %5643 = vmatmul.bf16.gmra.mxu0 %v18550_v17  ;;  %5676 = vmatmul.bf16.gmra.mxu2 %v18550_v17  ;;  %v18632_v56 = vpack.c.b16 %v5854_v52, %v5853_v31  ;;  %v18634_v28 = vpack.c.b16 %v5912_v34, %v5911_v50 }
 0x8a8   :  { %5709 = vmatmul.bf16.gmra.mxu3 %v18550_v17  ;;  %5742 = vmatmul.bf16.gmra.mxu1 %v18550_v17 }
 0x8aa   :  { %v18638_v11 = vpop.f32.mrf.mxu2 }
 0x8ab   :  { %v18640_v58 = vpop.f32.mrf.mxu3 }
 0x8ac   :  { %v5499_v45 = vpop.f32.mrf.mxu0 }
 0x8ad   :  { %v5598_v30 = vpop.f32.mrf.mxu1 }
 0x8b2   :  { %v5532_v53 = vpop.f32.mrf.mxu2 }
 0x8b3   :  { %v5565_v19 = vpop.f32.mrf.mxu3  ;;  %v18645_v12 = vpack.c.bf16 %v5532_v53, %v5499_v45 }
 0x8b4   :  { %v5502_v46 = vpop.f32.mrf.mxu0 }
 0x8b5   :  { %v5601_v62 = vpop.f32.mrf.mxu1 }
 0x8b7   :  { %5755 = vmatmul.bf16.vlgmr.msra.gmra.mxu0 %v18287_v39 }
 0x8ba   :  { %v5535_v44 = vpop.f32.mrf.mxu2 }
 0x8bb   :  { %v5568_v10 = vpop.f32.mrf.mxu3  ;;  %v18647_v0 = vpack.c.bf16 %v5535_v44, %v5502_v46  ;;  %v5796_v46 = vpack.c.bf16 %v5598_v30, %v5565_v19 }
 0x8bc   :  { %v5504_v27 = vpop.f32.mrf.mxu0  ;;  %v5801_v44 = vpack.c.bf16 %v5601_v62, %v5568_v10  ;;  %v5786_v62 = vpack.c.bf16 %v18622_v26, %v18624_v16  ;;  %v5791_v10 = vpack.c.bf16 %v18628_v49, %v18640_v58 }
 0x8bd   :  { %v5603_v6 = vpop.f32.mrf.mxu1  ;;  %v5857_v30 = vunpack.c.h.b16 %v18647_v0  ;;  %v5915_v19 = vunpack.c.l.b16 %v18647_v0 }
 0x8be   :  { %v5983_v49 = vunpack.c.l.b16 %v5791_v10  ;;  %v6048_v58 = vunpack.c.h.b16 %v5791_v10 }
 0x8c2   :  { %v5537_v54 = vpop.f32.mrf.mxu2 }
 0x8c3   :  { %v5570_v59 = vpop.f32.mrf.mxu3  ;;  %v5805_v22 = vpack.c.bf16 %v5537_v54, %v5504_v27 }
 0x8c4   :  { %v5507_v8 = vpop.f32.mrf.mxu0 }
 0x8c5   :  { %v5606_v47 = vpop.f32.mrf.mxu1 }
 0x8c7   :  { %5760 = vmatmul.bf16.gmra.mxu0 %v18309_v25 }
 0x8ca   :  { %v5540_v23 = vpop.f32.mrf.mxu2 }
 0x8cb   :  { %v5573_v41 = vpop.f32.mrf.mxu3  ;;  %v5810_v51 = vpack.c.bf16 %v5540_v23, %v5507_v8  ;;  %v5916_v8 = vunpack.c.l.b16 %v5805_v22 }
 0x8cc   :  { %v5509_v55 = vpop.f32.mrf.mxu0  ;;  %v5811_v60 = vpack.c.bf16 %v5606_v47, %v5573_v41 }
 0x8cd   :  { %v5608_v7 = vpop.f32.mrf.mxu1  ;;  %v5859_v50 = vunpack.c.h.b16 %v5810_v51  ;;  %v5917_v52 = vunpack.c.l.b16 %v5810_v51  ;;  %v5922_v0 = vpack.c.b16 %v5916_v8, %v5915_v19  ;;  %v11930_v19 = vld [vmem:[%s22028_s8 + $0x8] sm:$0xf] }
 0x8ce   :  { %v5987_v27 = vunpack.c.l.b16 %v5811_v60 }
 0x8d2   :  { %v5542_v5 = vpop.f32.mrf.mxu2 }
 0x8d3   :  { %v5575_v42 = vpop.f32.mrf.mxu3  ;;  %v5815_v38 = vpack.c.bf16 %v5542_v5, %v5509_v55 }
 0x8d4   :  { %v5512_v21 = vpop.f32.mrf.mxu0  ;;  %v5816_v4 = vpack.c.bf16 %v5608_v7, %v5575_v42 }
 0x8d5   :  { %v5611_v1 = vpop.f32.mrf.mxu1  ;;  %v5860_v43 = vunpack.c.h.b16 %v5815_v38  ;;  %v5918_v61 = vunpack.c.l.b16 %v5815_v38  ;;  %v5984_v38 = vunpack.c.l.b16 %v5796_v46 }
 0x8d6   :  { %v5988_v36 = vunpack.c.l.b16 %v5816_v4  ;;  %v6053_v3 = vunpack.c.h.b16 %v5816_v4 }
 0x8d7   :  { %5765 = vmatmul.bf16.gmra.mxu0 %v18429_v9  ;;  %v5806_v9 = vpack.c.bf16 %v5603_v6, %v5570_v59  ;;  %v6052_v6 = vunpack.c.h.b16 %v5811_v60  ;;  %v5858_v59 = vunpack.c.h.b16 %v5805_v22  ;;  %v5865_v23 = vpack.c.b16 %v5860_v43, %v5859_v50 }
 0x8d8   :  { %v5923_v41 = vpack.c.b16 %v5918_v61, %v5917_v52  ;;  %v5993_v42 = vpack.c.b16 %v5988_v36, %v5987_v27  ;;  %v5991_v60 = vpack.c.b16 %v5984_v38, %v5983_v49  ;;  %v6046_v43 = vunpack.c.h.b16 %v18620_v20 }
 0x8d9   :  { %v5986_v55 = vunpack.c.l.b16 %v5806_v9  ;;  %v6051_v7 = vunpack.c.h.b16 %v5806_v9 }
 0x8da   :  { %v5545_v39 = vpop.f32.mrf.mxu2 }
 0x8db   :  { %v5820_v13 = vpack.c.bf16 %v5545_v39, %v5512_v21  ;;  %v5578_v57 = vpop.f32.mrf.mxu3  ;;  %v6058_v21 = vpack.c.b16 %v6053_v3, %v6052_v6  ;;  %v5985_v39 = vunpack.c.l.b16 %v5801_v44  ;;  %v14336_v6 = vld [vmem:[%s22028_s8] sm:$0xff] }
 0x8dc   :  { %v5821_v33 = vpack.c.bf16 %v5611_v1, %v5578_v57  ;;  %v5514_v25 = vpop.f32.mrf.mxu0  ;;  %v5790_v1 = vpack.c.bf16 %v18638_v11, %v18626_v29  ;;  %v5856_v57 = vunpack.c.h.b16 %v18645_v12  ;;  %v5914_v29 = vunpack.c.l.b16 %v18645_v12 }
 0x8dd   :  { %v5861_v48 = vunpack.c.h.b16 %v5820_v13  ;;  %v5919_v24 = vunpack.c.l.b16 %v5820_v13  ;;  %v5613_v14 = vpop.f32.mrf.mxu1  ;;  %v6050_v13 = vunpack.c.h.b16 %v5801_v44  ;;  %v5864_v11 = vpack.c.b16 %v5858_v59, %v5857_v30 }
 0x8de   :  { %v5989_v63 = vunpack.c.l.b16 %v5821_v33  ;;  %v6054_v18 = vunpack.c.h.b16 %v5821_v33  ;;  %v6049_v33 = vunpack.c.h.b16 %v5796_v46  ;;  %v5992_v25 = vpack.c.b16 %v5986_v55, %v5985_v39 }
 0x8df   :  { %v5866_v37 = vpack.c.b16 %v5861_v48, %v5861_v48  ;;  %v5924_v2 = vpack.c.b16 %v5919_v24, %v5919_v24  ;;  %v6057_v4 = vpack.c.b16 %v6051_v7, %v6050_v13  ;;  %v5855_v26 = vunpack.c.h.b16 %v5790_v1 }
 0x8e0   :  { %v5994_v15 = vpack.c.b16 %v5989_v63, %v5989_v63  ;;  %v6059_v35 = vpack.c.b16 %v6054_v18, %v6054_v18  ;;  %v5913_v16 = vunpack.c.l.b16 %v5790_v1  ;;  %v5982_v63 = vunpack.c.l.b16 %v5786_v62 }
 0x8e1   :  { %v5880_v32 = vsel %vm5878_vm3, %v5866_v37, 0  ;;  %v5936_v31 = vsel %vm5878_vm3, %v5924_v2, 0  ;;  %v5863_v22 = vpack.c.b16 %v5856_v57, %v5855_v26  ;;  %v6047_v18 = vunpack.c.h.b16 %v5786_v62  ;;  %v14337_v62 = vld [vmem:[%s22028_s8 + $0x8] sm:$0x70] }
 0x8e2   :  { %v5547_v34 = vpop.f32.mrf.mxu2  ;;  %5885 = vmatpush.bf16.msrb.mxu2 %v5880_v32  ;;  %5941 = vmatpush.bf16.msra.mxu3 %v5936_v31  ;;  %v6006_v45 = vsel %vm5878_vm3, %v5994_v15, 0  ;;  %v6071_v53 = vsel %vm5878_vm3, %v6059_v35, 0  ;;  %v5921_v51 = vpack.c.b16 %v5914_v29, %v5913_v16  ;;  %v6056_v37 = vpack.c.b16 %v6049_v33, %v6048_v58  ;;  %v11958_v33 = vld [vmem:[%s22028_s8 + $0x38] sm:$0xf] }
 0x8e3   :  { %v5580_v54 = vpop.f32.mrf.mxu3  ;;  %6011 = vmatpush.bf16.msra.mxu1 %v6006_v45  ;;  %6076 = vmatpush.bf16.msrb.mxu0 %v6071_v53  ;;  %v5981_v2 = vunpack.c.l.b16 %v18620_v20  ;;  %v6055_v15 = vpack.c.b16 %v6047_v18, %v6046_v43  ;;  %v11931_v10 = vor.u32 %v14337_v62, %v11930_v19 }
 0x8e4   :  { %v5624_v47 = vpop.f32.mrf.mxu0 }
 0x8e5   :  { %v5723_v5 = vpop.f32.mrf.mxu1  ;;  %v5990_v61 = vpack.c.b16 %v5982_v63, %v5981_v2 }
 0x8e6   :  { %5886 = vmatpush.bf16.msrb.mxu2 %v5865_v23  ;;  %5942 = vmatpush.bf16.msra.mxu3 %v5923_v41  ;;  %v14340_v23 = vld [vmem:[%s22028_s8 + $0x20] sm:$0xff]  ;;  %v14342_v41 = vld [vmem:[%s22028_s8 + $0x30] sm:$0xff] }
 0x8e7   :  { %6012 = vmatpush.bf16.msra.mxu1 %v5993_v42  ;;  %6077 = vmatpush.bf16.msrb.mxu0 %v6058_v21  ;;  %v14339_v42 = vld [vmem:[%s22028_s8 + $0x18] sm:$0x70] }
 0x8e8   :  { %5770 = vmatmul.bf16.gmra.mxu0 %v18541_v40 }
 0x8ea   :  { %v5657_v48 = vpop.f32.mrf.mxu2  ;;  %5887 = vmatpush.bf16.msrb.mxu2 %v5864_v11  ;;  %5943 = vmatpush.bf16.msra.mxu3 %v5922_v0  ;;  %v11944_v11 = vld [vmem:[%s22028_s8 + $0x28] sm:$0xf]  ;;  %v14341_v0 = vld [vmem:[%s22028_s8 + $0x28] sm:$0x70] }
 0x8eb   :  { %v18664_v24 = vpack.c.bf16 %v5657_v48, %v5624_v47  ;;  %v5690_v14 = vpop.f32.mrf.mxu3  ;;  %6013 = vmatpush.bf16.msra.mxu1 %v5992_v25  ;;  %6078 = vmatpush.bf16.msrb.mxu0 %v6057_v4  ;;  %v11945_v38 = vor.u32 %v14341_v0, %v11944_v11  ;;  %v14343_v25 = vld [vmem:[%s22028_s8 + $0x38] sm:$0x70] }
 0x8ec   :  { %v18666_v12 = vpack.c.bf16 %v5723_v5, %v5690_v14  ;;  %v18668_v40 = vpop.f32.mrf.mxu0  ;;  %v11920_v5 = vld [vmem:[%s22028_s8 + $0x18] sm:$0xf]  ;;  %v11959_v4 = vor.u32 %v14343_v25, %v11958_v33 }
 0x8ed   :  { %v18670_v9 = vpop.f32.mrf.mxu1  ;;  %v11921_v1 = vor.u32 %v14339_v42, %v11920_v5 }
 0x8ee   :  { %5888 = vmatpush.bf16.msrb.mxu2 %v5863_v22  ;;  %5944 = vmatpush.bf16.msra.mxu3 %v5921_v51 }
 0x8ef   :  { %6014 = vmatpush.bf16.msra.mxu1 %v5991_v60  ;;  %6079 = vmatpush.bf16.msrb.mxu0 %v6056_v37 }
 0x8f2   :  { %v18674_v35 = vpop.f32.mrf.mxu2  ;;  %5889 = vmatpush.bf16.msrb.mxu2 %v18632_v56  ;;  %5945 = vmatpush.bf16.msra.mxu3 %v18634_v28 }
 0x8f3   :  { %v18678_v36 = vpop.f32.mrf.mxu3  ;;  %6015 = vmatpush.bf16.msra.mxu1 %v5990_v61  ;;  %6080 = vmatpush.bf16.msrb.mxu0 %v6055_v15 }
 0x8f4   :  { %v18680_v3 = vpop.f32.mrf.mxu0  ;;  %v5788_v33 = vpack.c.bf16 %v18670_v9, %v18678_v36 }
 0x8f5   :  { %v18682_v32 = vpop.f32.mrf.mxu1  ;;  %11932 = vmatmul.msk.bf16.vlgmr.msra.gmra.mxu3 %vm5871_vm4, %v14336_v6 }
 0x8f6   :  { %11946 = vmatmul.msk.bf16.vlgmr.msra.gmra.mxu1 %vm5871_vm4, %v14340_v23 }
 0x8f8   :  { %5775 = vmatmul.bf16.gmra.mxu0 %v18550_v17  ;;  %v14338_v17 = vld [vmem:[%s22028_s8 + $0x10] sm:$0xff] }
 0x8f9   :  { %11922 = vmatmul.msk.bf16.vlgmr.msrb.gmra.mxu2 %vm5871_vm4, %v14338_v17 }
 0x8fa   :  { %v18685_v20 = vpop.f32.mrf.mxu2 }
 0x8fb   :  { %v18687_v31 = vpop.f32.mrf.mxu3 }
 0x8fc   :  { %v5631_v50 = vpop.f32.mrf.mxu0  ;;  %v5793_v25 = vpack.c.bf16 %v18682_v32, %v18687_v31 }
 0x8fd   :  { %v18689_v52 = vpop.f32.mrf.mxu1 }
 0x8fe   :  { %v6261_v9 = vunpack.c.l.b16 %v5793_v25  ;;  %v6326_v36 = vunpack.c.h.b16 %v5793_v25 }
 0x902   :  { %v5664_v56 = vpop.f32.mrf.mxu2 }
 0x903   :  { %v18691_v34 = vpop.f32.mrf.mxu3  ;;  %v18741_v49 = vpack.c.bf16 %v5664_v56, %v5631_v50 }
 0x904   :  { %v5634_v28 = vpop.f32.mrf.mxu0 }
 0x905   :  { %v18693_v45 = vpop.f32.mrf.mxu1  ;;  %11933 = vmatmul.msk.bf16.gmra.mxu3 %vm5871_vm4, %v11931_v10 }
 0x906   :  { %11947 = vmatmul.msk.bf16.gmra.mxu1 %vm5871_vm4, %v11945_v38 }
 0x908   :  { %11960 = vmatmul.msk.bf16.vlgmr.msrb.gmra.mxu0 %vm5871_vm4, %v14342_v41 }
 0x909   :  { %11923 = vmatmul.msk.bf16.gmra.mxu2 %vm5871_vm4, %v11921_v1 }
 0x90a   :  { %v5667_v53 = vpop.f32.mrf.mxu2 }
 0x90b   :  { %v18695_v46 = vpop.f32.mrf.mxu3  ;;  %v5802_v51 = vpack.c.bf16 %v5667_v53, %v5634_v28 }
 0x90c   :  { %v5636_v44 = vpop.f32.mrf.mxu0 }
 0x90d   :  { %v5735_v27 = vpop.f32.mrf.mxu1 }
 0x912   :  { %v5669_v54 = vpop.f32.mrf.mxu2 }
 0x913   :  { %v5702_v59 = vpop.f32.mrf.mxu3  ;;  %v5807_v2 = vpack.c.bf16 %v5669_v54, %v5636_v44 }
 0x914   :  { %v5639_v8 = vpop.f32.mrf.mxu0  ;;  %v5808_v17 = vpack.c.bf16 %v5735_v27, %v5702_v59  ;;  %v5798_v59 = vpack.c.bf16 %v18689_v52, %v18691_v34  ;;  %v5787_v52 = vpack.c.bf16 %v18674_v35, %v18668_v40  ;;  %v5792_v34 = vpack.c.bf16 %v18685_v20, %v18680_v3 }
 0x915   :  { %v5738_v47 = vpop.f32.mrf.mxu1  ;;  %v6125_v62 = vunpack.c.l.b16 %v5807_v2  ;;  %v6190_v10 = vunpack.c.h.b16 %v5807_v2  ;;  %v6188_v40 = vunpack.c.h.b16 %v18741_v49 }
 0x916   :  { %v6329_v11 = vunpack.c.h.b16 %v5808_v17  ;;  %v6262_v20 = vunpack.c.l.b16 %v5798_v59  ;;  %v6121_v32 = vunpack.c.l.b16 %v5787_v52  ;;  %v6186_v31 = vunpack.c.h.b16 %v5787_v52 }
 0x918   :  { %11961 = vmatmul.msk.bf16.gmra.mxu0 %vm5871_vm4, %v11959_v4  ;;  %v6269_v2 = vpack.c.b16 %v6262_v20, %v6261_v9 }
 0x91a   :  { %v5672_v55 = vpop.f32.mrf.mxu2 }
 0x91b   :  { %v5705_v7 = vpop.f32.mrf.mxu3  ;;  %v5812_v43 = vpack.c.bf16 %v5672_v55, %v5639_v8  ;;  %v5803_v8 = vpack.c.bf16 %v18693_v45, %v18695_v46  ;;  %v6124_v45 = vunpack.c.l.b16 %v5802_v51  ;;  %v6189_v46 = vunpack.c.h.b16 %v5802_v51 }
 0x91c   :  { %v5641_v21 = vpop.f32.mrf.mxu0  ;;  %v5813_v6 = vpack.c.bf16 %v5738_v47, %v5705_v7  ;;  %v6187_v51 = vunpack.c.h.b16 %v5792_v34 }
 0x91d   :  { %v5740_v30 = vpop.f32.mrf.mxu1  ;;  %v6191_v19 = vunpack.c.h.b16 %v5812_v43  ;;  %v6263_v4 = vunpack.c.l.b16 %v5803_v8  ;;  %v6131_v35 = vpack.c.b16 %v6125_v62, %v6124_v45  ;;  %v6196_v3 = vpack.c.b16 %v6190_v10, %v6189_v46 }
 0x91e   :  { %v6265_v47 = vunpack.c.l.b16 %v5813_v6  ;;  %v6330_v55 = vunpack.c.h.b16 %v5813_v6  ;;  %v6324_v6 = vunpack.c.h.b16 %v18666_v12 }
 0x922   :  { %v5674_v39 = vpop.f32.mrf.mxu2 }
 0x923   :  { %v5707_v13 = vpop.f32.mrf.mxu3  ;;  %v5817_v58 = vpack.c.bf16 %v5674_v39, %v5641_v21 }
 0x924   :  { %v5644_v57 = vpop.f32.mrf.mxu0  ;;  %v5818_v63 = vpack.c.bf16 %v5740_v30, %v5707_v13  ;;  %v6126_v30 = vunpack.c.l.b16 %v5812_v43 }
 0x925   :  { %v5743_v29 = vpop.f32.mrf.mxu1  ;;  %v6127_v5 = vunpack.c.l.b16 %v5817_v58  ;;  %v6192_v42 = vunpack.c.h.b16 %v5817_v58 }
 0x926   :  { %v6266_v21 = vunpack.c.l.b16 %v5818_v63  ;;  %v6331_v1 = vunpack.c.h.b16 %v5818_v63 }
 0x927   :  { %v6132_v13 = vpack.c.b16 %v6127_v5, %v6126_v30  ;;  %v11986_v30 = vld [vmem:[%s22028_s8 + $0x58] sm:$0xf] }
 0x928   :  { %v6271_v0 = vpack.c.b16 %v6266_v21, %v6265_v47  ;;  %v6336_v38 = vpack.c.b16 %v6331_v1, %v6330_v55 }
 0x92a   :  { %v5677_v26 = vpop.f32.mrf.mxu2 }
 0x92b   :  { %v5822_v16 = vpack.c.bf16 %v5677_v26, %v5644_v57  ;;  %v5710_v48 = vpop.f32.mrf.mxu3  ;;  %v6197_v57 = vpack.c.b16 %v6192_v42, %v6191_v19  ;;  %v6328_v26 = vunpack.c.h.b16 %v5803_v8  ;;  %v14347_v19 = vld [vmem:[%s22028_s8 + $0x58] sm:$0x70] }
 0x92c   :  { %v5823_v14 = vpack.c.bf16 %v5743_v29, %v5710_v48  ;;  %v5646_v22 = vpop.f32.mrf.mxu0  ;;  %v6264_v29 = vunpack.c.l.b16 %v5808_v17  ;;  %v6327_v48 = vunpack.c.h.b16 %v5798_v59  ;;  %v6259_v17 = vunpack.c.l.b16 %v18666_v12  ;;  %v14348_v12 = vld [vmem:[%s22028_s8 + $0x60] sm:$0xff]  ;;  %v14351_v59 = vld [vmem:[%s22028_s8 + $0x78] sm:$0x70] }
 0x92d   :  { %v6128_v18 = vunpack.c.l.b16 %v5822_v16  ;;  %v6193_v60 = vunpack.c.h.b16 %v5822_v16  ;;  %v5745_v37 = vpop.f32.mrf.mxu1  ;;  %v6123_v16 = vunpack.c.l.b16 %v18741_v49  ;;  %v6122_v22 = vunpack.c.l.b16 %v5792_v34 }
 0x92e   :  { %v6267_v61 = vunpack.c.l.b16 %v5823_v14  ;;  %v6332_v15 = vunpack.c.h.b16 %v5823_v14  ;;  %v6270_v58 = vpack.c.b16 %v6264_v29, %v6263_v4  ;;  %v6335_v14 = vpack.c.b16 %v6329_v11, %v6328_v26 }
 0x92f   :  { %v6133_v23 = vpack.c.b16 %v6128_v18, %v6128_v18  ;;  %v6198_v41 = vpack.c.b16 %v6193_v60, %v6193_v60  ;;  %v6130_v18 = vpack.c.b16 %v6123_v16, %v6122_v22  ;;  %v6195_v49 = vpack.c.b16 %v6188_v40, %v6187_v51 }
 0x930   :  { %v6272_v50 = vpack.c.b16 %v6267_v61, %v6267_v61  ;;  %v6337_v56 = vpack.c.b16 %v6332_v15, %v6332_v15  ;;  %v6260_v60 = vunpack.c.l.b16 %v5788_v33  ;;  %v6325_v37 = vunpack.c.h.b16 %v5788_v33 }
 0x931   :  { %v6145_v28 = vsel %vm5878_vm3, %v6133_v23, 0  ;;  %v6210_v53 = vsel %vm5878_vm3, %v6198_v41, 0  ;;  %v6334_v43 = vpack.c.b16 %v6327_v48, %v6326_v36  ;;  %v6120_v61 = vunpack.c.l.b16 %v18664_v24 }
 0x932   :  { %v5679_v44 = vpop.f32.mrf.mxu2  ;;  %6150 = vmatpush.bf16.msra.mxu2 %v6145_v28  ;;  %6215 = vmatpush.bf16.msrb.mxu3 %v6210_v53  ;;  %v6284_v27 = vsel %vm5878_vm3, %v6272_v50, 0  ;;  %v6349_v54 = vsel %vm5878_vm3, %v6337_v56, 0  ;;  %v6185_v15 = vunpack.c.h.b16 %v18664_v24  ;;  %v6268_v5 = vpack.c.b16 %v6260_v60, %v6259_v17  ;;  %v14344_v50 = vld [vmem:[%s22028_s8 + $0x40] sm:$0xff]  ;;  %v14346_v24 = vld [vmem:[%s22028_s8 + $0x50] sm:$0xff]  ;;  %v11972_v28 = vld [vmem:[%s22028_s8 + $0x48] sm:$0xf] }
 0x933   :  { %v5712_v7 = vpop.f32.mrf.mxu3  ;;  %6289 = vmatpush.bf16.msrb.mxu1 %v6284_v27  ;;  %6354 = vmatpush.bf16.msra.mxu0 %v6349_v54  ;;  %v6129_v23 = vpack.c.b16 %v6121_v32, %v6120_v61  ;;  %v6333_v42 = vpack.c.b16 %v6325_v37, %v6324_v6  ;;  %v14350_v56 = vld [vmem:[%s22028_s8 + $0x70] sm:$0xff]  ;;  %v14345_v53 = vld [vmem:[%s22028_s8 + $0x48] sm:$0x70]  ;;  %v12000_v44 = vld [vmem:[%s22028_s8 + $0x68] sm:$0xf]  ;;  %v11987_v47 = vor.u32 %v14347_v19, %v11986_v30 }
 0x934   :  { %v18751_v39 = vpop.f32.mrf.mxu0  ;;  %v6194_v41 = vpack.c.b16 %v6186_v31, %v6185_v15  ;;  %v14349_v27 = vld [vmem:[%s22028_s8 + $0x68] sm:$0x70]  ;;  %v12014_v54 = vld [vmem:[%s22028_s8 + $0x78] sm:$0xf]  ;;  %v11973_v8 = vor.u32 %v14345_v53, %v11972_v28  ;;  %v12146_v60 = vld [vmem:[%s22029_s9 + $0xe0] sm:$0xf] }
 0x935   :  { %v12001_v55 = vor.u32 %v14349_v27, %v12000_v44  ;;  %v12015_v7 = vor.u32 %v14351_v59, %v12014_v54  ;;  %v5784_v22 = vpack.c.bf16 %v18751_v39, %v18751_v39  ;;  %v14353_v39 = vld [vmem:[%s22028_s8 + $0x88] sm:$0x70]  ;;  %v14384_v37 = vld [vmem:[%s22029_s9 + $0xec] sm:$0xf0]  ;;  %v12402_v15 = vld [vmem:[%s22029_s9 + $0x2e0] sm:$0xf] }
 0x936   :  { %6151 = vmatpush.bf16.msra.mxu2 %v6132_v13  ;;  %6216 = vmatpush.bf16.msrb.mxu3 %v6197_v57  ;;  %v14416_v61 = vld [vmem:[%s22029_s9 + $0x1ec] sm:$0xf0]  ;;  %v12514_v30 = vld [vmem:[%s22029_s9 + $0x3c0] sm:$0xf] }
 0x937   :  { %6290 = vmatpush.bf16.msrb.mxu1 %v6271_v0  ;;  %6355 = vmatpush.bf16.msra.mxu0 %v6336_v38  ;;  %v6398_v32 = vunpack.c.l.b16 %v5784_v22  ;;  %v14448_v6 = vld [vmem:[%s22029_s9 + $0x2ec] sm:$0xf0]  ;;  %v12114_v54 = vld [vmem:[%s22029_s9 + $0xa0] sm:$0xf] }
 0x938   :  { %v14444_v53 = vld [vmem:[%s22029_s9 + $0x2cc] sm:$0xf0]  ;;  %v12338_v22 = vld [vmem:[%s22029_s9 + $0x260] sm:$0xf] }
 0x939   :  { %v14476_v19 = vld [vmem:[%s22029_s9 + $0x3cc] sm:$0xf0] }
 0x93a   :  { %6152 = vmatpush.bf16.msra.mxu2 %v6131_v35  ;;  %6217 = vmatpush.bf16.msrb.mxu3 %v6196_v3  ;;  %v12515_v27 = vor.u32 %v14476_v19, %v12514_v30  ;;  %v14376_v59 = vld [vmem:[%s22029_s9 + $0xac] sm:$0xf0]  ;;  %v12658_v19 = vld [vmem:[%s22029_s9 + $0x4e0] sm:$0xf] }
 0x93b   :  { %6291 = vmatpush.bf16.msrb.mxu1 %v6270_v58  ;;  %6356 = vmatpush.bf16.msra.mxu0 %v6335_v14  ;;  %v14356_v30 = vld [vmem:[%s22029_s9 + $0xc] sm:$0xf0] }
 0x93c   :  { %v18763_v63 = vpop.f32.mrf.mxu0 }
 0x93d   :  { %v5789_v48 = vpack.c.bf16 %v18763_v63, %v18763_v63  ;;  %v12028_v63 = vld [vmem:[%s22028_s8 + $0x88] sm:$0xf] }
 0x93e   :  { %6153 = vmatpush.bf16.msra.mxu2 %v6130_v18  ;;  %6218 = vmatpush.bf16.msrb.mxu3 %v6195_v49  ;;  %v14352_v18 = vld [vmem:[%s22028_s8 + $0x80] sm:$0xff]  ;;  %v12029_v49 = vor.u32 %v14353_v39, %v12028_v63  ;;  %v14364_v39 = vld [vmem:[%s22029_s9 + $0x4c] sm:$0xf0]  ;;  %s14900_s8 = smov [#allocation2]  }
 0x93f   :  { %6292 = vmatpush.bf16.msrb.mxu1 %v6269_v2  ;;  %6357 = vmatpush.bf16.msra.mxu0 %v6334_v43  ;;  %v6399_v9 = vunpack.c.l.b16 %v5789_v48  ;;  %v12147_v2 = vor.u32 %v14384_v37, %v12146_v60  ;;  %v12274_v43 = vld [vmem:[%s22029_s9 + $0x1e0] sm:$0xf]  ;;  %v14396_v60 = vld [vmem:[%s22029_s9 + $0x14c] sm:$0xf0]  ;;  %s10497_s14 = sshll.u32 %s14900_s8, 4  ;;  %s10498_s14 = int_to_ptr.vmem [resolvable:$true] %s10497_s14 }
 0x940   :  { %v12275_v17 = vor.u32 %v14416_v61, %v12274_v43  ;;  %v12210_v48 = vld [vmem:[%s22029_s9 + $0x160] sm:$0xf]  ;;  %v14428_v43 = vld [vmem:[%s22029_s9 + $0x24c] sm:$0xf0] }
 0x941   :  { %v6407_v31 = vpack.c.b16 %v6399_v9, %v6398_v32  ;;  %v12466_v32 = vld [vmem:[%s22029_s9 + $0x360] sm:$0xf] }
 0x942   :  { %6154 = vmatpush.bf16.msra.mxu2 %v6129_v23  ;;  %6219 = vmatpush.bf16.msrb.mxu3 %v6194_v41  ;;  %v12530_v23 = vld [vmem:[%s22029_s9 + $0x3e0] sm:$0xf]  ;;  %v14480_v41 = vld [vmem:[%s22029_s9 + $0x3ec] sm:$0xf0] }
 0x943   :  { %6293 = vmatpush.bf16.msrb.mxu1 %v6268_v5  ;;  %6358 = vmatpush.bf16.msra.mxu0 %v6333_v42  ;;  %v12403_v5 = vor.u32 %v14448_v6, %v12402_v15  ;;  %v12531_v42 = vor.u32 %v14480_v41, %v12530_v23  ;;  %v12450_v61 = vld [vmem:[%s22029_s9 + $0x340] sm:$0xf]  ;;  %v14360_v23 = vld [vmem:[%s22029_s9 + $0x2c] sm:$0xf0] }
 0x944   :  { %v5761_v21 = vpop.f32.mrf.mxu0  ;;  %v12050_v6 = vld [vmem:[%s22029_s9 + $0x20] sm:$0xf] }
 0x945   :  { %11974 = vmatmul.msk.bf16.vlgmr.msra.gmra.mxu2 %vm5871_vm4, %v14344_v50  ;;  %11988 = vmatmul.msk.bf16.vlgmr.msrb.gmra.mxu3 %vm5871_vm4, %v14346_v24  ;;  %v5794_v3 = vpack.c.bf16 %v5761_v21, %v5761_v21  ;;  %v12130_v50 = vld [vmem:[%s22029_s9 + $0xc0] sm:$0xf]  ;;  %v14380_v24 = vld [vmem:[%s22029_s9 + $0xcc] sm:$0xf0] }
 0x946   :  { %12002 = vmatmul.msk.bf16.vlgmr.msrb.gmra.mxu1 %vm5871_vm4, %v14348_v12  ;;  %12016 = vmatmul.msk.bf16.vlgmr.msra.gmra.mxu0 %vm5871_vm4, %v14350_v56  ;;  %v12131_v12 = vor.u32 %v14380_v24, %v12130_v50  ;;  %v12258_v56 = vld [vmem:[%s22029_s9 + $0x1c0] sm:$0xf]  ;;  %v14412_v21 = vld [vmem:[%s22029_s9 + $0x1cc] sm:$0xf0] }
 0x947   :  { %v6400_v51 = vunpack.c.l.b16 %v5794_v3  ;;  %9391 = vmatpush.bf16.msra.mxu3 %v12147_v2  ;;  %9404 = vmatpush.bf16.msra.mxu1 %v12275_v17  ;;  %v12259_v28 = vor.u32 %v14412_v21, %v12258_v56  ;;  %v12082_v3 = vld [vmem:[%s22029_s9 + $0x60] sm:$0xf]  ;;  %v14460_v17 = vld [vmem:[%s22029_s9 + $0x34c] sm:$0xf0]  ;;  %v12051_v56 = vor.u32 %v14360_v23, %v12050_v6 }
 0x948   :  { %9417 = vmatpush.bf16.msrb.mxu0 %v12403_v5  ;;  %v12322_v2 = vld [vmem:[%s22029_s9 + $0x240] sm:$0xf]  ;;  %v14392_v24 = vld [vmem:[%s22029_s9 + $0x12c] sm:$0xf0] }
 0x949   :  { %v12323_v5 = vor.u32 %v14428_v43, %v12322_v2  ;;  %v12178_v50 = vld [vmem:[%s22029_s9 + $0x120] sm:$0xf]  ;;  %v14424_v21 = vld [vmem:[%s22029_s9 + $0x22c] sm:$0xf0] }
 0x94a   :  { %v12882_v2 = vld [vmem:[%s22029_s9 + $0x6a0] sm:$0xf]  ;;  %v14568_v43 = vld [vmem:[%s22029_s9 + $0x6ac] sm:$0xf0] }
 0x94b   :  { %9392 = vmatpush.bf16.msra.mxu3 %v12131_v12  ;;  %9405 = vmatpush.bf16.msra.mxu1 %v12259_v28  ;;  %v12306_v12 = vld [vmem:[%s22029_s9 + $0x220] sm:$0xf]  ;;  %v14456_v28 = vld [vmem:[%s22029_s9 + $0x32c] sm:$0xf0] }
 0x94c   :  { %v5763_v1 = vpop.f32.mrf.mxu0  ;;  %v14500_v6 = vld [vmem:[%s22029_s9 + $0x48c] sm:$0xf0] }
 0x94d   :  { %v5799_v16 = vpack.c.bf16 %v5763_v1, %v5763_v1  ;;  %v12386_v1 = vld [vmem:[%s22029_s9 + $0x2c0] sm:$0xf] }
 0x94e   :  { %v12387_v44 = vor.u32 %v14444_v53, %v12386_v1  ;;  %v12434_v1 = vld [vmem:[%s22029_s9 + $0x320] sm:$0xf] }
 0x94f   :  { %v6401_v58 = vunpack.c.l.b16 %v5799_v16  ;;  %v14468_v16 = vld [vmem:[%s22029_s9 + $0x38c] sm:$0xf0]  ;;  %v12034_v53 = vld [vmem:[%s22029_s9] sm:$0xf] }
 0x950   :  { %9418 = vmatpush.bf16.msrb.mxu0 %v12387_v44  ;;  %v12179_v44 = vor.u32 %v14392_v24, %v12178_v50  ;;  %v12738_v50 = vld [vmem:[%s22029_s9 + $0x580] sm:$0xf]  ;;  %v14532_v24 = vld [vmem:[%s22029_s9 + $0x58c] sm:$0xf0] }
 0x951   :  { %v6408_v36 = vpack.c.b16 %v6401_v58, %v6400_v51  ;;  %v14432_v51 = vld [vmem:[%s22029_s9 + $0x26c] sm:$0xf0] }
 0x954   :  { %v5766_v62 = vpop.f32.mrf.mxu0 }
 0x955   :  { %11975 = vmatmul.msk.bf16.gmra.mxu2 %vm5871_vm4, %v11973_v8  ;;  %11989 = vmatmul.msk.bf16.gmra.mxu3 %vm5871_vm4, %v11987_v47  ;;  %v5804_v25 = vpack.c.bf16 %v5766_v62, %v5766_v62  ;;  %v12115_v8 = vor.u32 %v14376_v59, %v12114_v54  ;;  %v12242_v47 = vld [vmem:[%s22029_s9 + $0x1a0] sm:$0xf]  ;;  %v14388_v59 = vld [vmem:[%s22029_s9 + $0x10c] sm:$0xf0] }
 0x956   :  { %12003 = vmatmul.msk.bf16.gmra.mxu1 %vm5871_vm4, %v12001_v55  ;;  %12017 = vmatmul.msk.bf16.gmra.mxu0 %vm5871_vm4, %v12015_v7  ;;  %v14408_v55 = vld [vmem:[%s22029_s9 + $0x1ac] sm:$0xf0]  ;;  %v12370_v7 = vld [vmem:[%s22029_s9 + $0x2a0] sm:$0xf] }
 0x957   :  { %v6402_v20 = vunpack.c.l.b16 %v5804_v25  ;;  %9393 = vmatpush.bf16.msra.mxu3 %v12115_v8  ;;  %v12243_v62 = vor.u32 %v14408_v55, %v12242_v47  ;;  %v12162_v54 = vld [vmem:[%s22029_s9 + $0x100] sm:$0xf]  ;;  %v12307_v8 = vor.u32 %v14424_v21, %v12306_v12  ;;  %v12435_v47 = vor.u32 %v14456_v28, %v12434_v1  ;;  %v14564_v1 = vld [vmem:[%s22029_s9 + $0x68c] sm:$0xf0] }
 0x958   :  { %v12290_v55 = vld [vmem:[%s22029_s9 + $0x200] sm:$0xf] }
 0x959   :  { %9406 = vmatpush.bf16.msra.mxu1 %v12243_v62  ;;  %v12418_v62 = vld [vmem:[%s22029_s9 + $0x300] sm:$0xf] }
 0x95a   :  { %v12866_v21 = vld [vmem:[%s22029_s9 + $0x680] sm:$0xf] }
 0x95b   :  { %v12994_v28 = vld [vmem:[%s22029_s9 + $0x780] sm:$0xf] }
 0x95c   :  { %v5768_v10 = vpop.f32.mrf.mxu0 }
 0x95d   :  { %v5809_v45 = vpack.c.bf16 %v5768_v10, %v5768_v10  ;;  %v14440_v10 = vld [vmem:[%s22029_s9 + $0x2ac] sm:$0xf0] }
 0x95f   :  { %v6403_v40 = vunpack.c.l.b16 %v5809_v45  ;;  %v12226_v45 = vld [vmem:[%s22029_s9 + $0x180] sm:$0xf] }
 0x961   :  { %v6409_v14 = vpack.c.b16 %v6403_v40, %v6402_v20  ;;  %v14368_v20 = vld [vmem:[%s22029_s9 + $0x6c] sm:$0xf0] }
 0x962   :  { %v12083_v58 = vor.u32 %v14368_v20, %v12082_v3  ;;  %v14540_v3 = vld [vmem:[%s22029_s9 + $0x5cc] sm:$0xf0] }
 0x965   :  { %v5771_v13 = vpop.f32.mrf.mxu0 }
 0x966   :  { %v5814_v52 = vpack.c.bf16 %v5771_v13, %v5771_v13  ;;  %v12498_v13 = vld [vmem:[%s22029_s9 + $0x3a0] sm:$0xf] }
 0x968   :  { %v6404_v4 = vunpack.c.l.b16 %v5814_v52  ;;  %v14372_v52 = vld [vmem:[%s22029_s9 + $0x8c] sm:$0xf0] }
 0x96d   :  { %v5773_v57 = vpop.f32.mrf.mxu0 }
 0x96e   :  { %v5819_v0 = vpack.c.bf16 %v5773_v57, %v5773_v57  ;;  %v14472_v57 = vld [vmem:[%s22029_s9 + $0x3ac] sm:$0xf0] }
 0x970   :  { %v6405_v46 = vunpack.c.l.b16 %v5819_v0  ;;  %v12499_v0 = vor.u32 %v14472_v57, %v12498_v13  ;;  %v14452_v13 = vld [vmem:[%s22029_s9 + $0x30c] sm:$0xf0]  ;;  %v12786_v57 = vld [vmem:[%s22029_s9 + $0x5e0] sm:$0xf] }
 0x972   :  { %v6410_v35 = vpack.c.b16 %v6405_v46, %v6404_v4  ;;  %v14404_v46 = vld [vmem:[%s22029_s9 + $0x18c] sm:$0xf0] }
 0x973   :  { %v12227_v25 = vor.u32 %v14404_v46, %v12226_v45  ;;  %v14436_v4 = vld [vmem:[%s22029_s9 + $0x28c] sm:$0xf0]  ;;  %v12163_v45 = vor.u32 %v14388_v59, %v12162_v54  ;;  %v19107_v23 = vpop.f32.mrf.mxu1  ;;  %v12739_v54 = vor.u32 %v14532_v24, %v12738_v50  ;;  %v12867_v59 = vor.u32 %v14564_v1, %v12866_v21  ;;  %v12802_v1 = vld [vmem:[%s22029_s9 + $0x600] sm:$0xf] }
 0x974   :  { %v14608_v46 = vld [vmem:[%s22029_s9 + $0x7ec] sm:$0xf0] }
 0x975   :  { %v5776_v29 = vpop.f32.mrf.mxu0  ;;  %9407 = vmatpush.bf16.msra.mxu1 %v12227_v25  ;;  %v14508_v25 = vld [vmem:[%s22029_s9 + $0x4cc] sm:$0xf0] }
 0x976   :  { %v5824_v11 = vpack.c.bf16 %v5776_v29, %v5776_v29  ;;  %v14516_v21 = vld [vmem:[%s22029_s9 + $0x50c] sm:$0xf0] }
 0x978   :  { %v6406_v38 = vunpack.c.l.b16 %v5824_v11  ;;  %v12371_v11 = vor.u32 %v14440_v10, %v12370_v7  ;;  %v14420_v7 = vld [vmem:[%s22029_s9 + $0x20c] sm:$0xf0]  ;;  %v12035_v10 = vor.u32 %v14356_v30, %v12034_v53  ;;  %v12594_v30 = vld [vmem:[%s22029_s9 + $0x460] sm:$0xf] }
 0x979   :  { %v14596_v53 = vld [vmem:[%s22029_s9 + $0x78c] sm:$0xf0] }
 0x97a   :  { %v6411_v34 = vpack.c.b16 %v6406_v38, %v6406_v38  ;;  %v12098_v38 = vld [vmem:[%s22029_s9 + $0x80] sm:$0xf]  ;;  %9419 = vmatpush.bf16.msrb.mxu0 %v12371_v11  ;;  %v14544_v11 = vld [vmem:[%s22029_s9 + $0x5ec] sm:$0xf0] }
 0x97c   :  { %v6423_v33 = vsel %vm5878_vm3, %v6411_v34, 0  ;;  %v18901_v29 = vpop.f32.mrf.mxu2  ;;  %v12099_v34 = vor.u32 %v14372_v52, %v12098_v38  ;;  %v12914_v38 = vld [vmem:[%s22029_s9 + $0x6e0] sm:$0xf]  ;;  %v14576_v52 = vld [vmem:[%s22029_s9 + $0x6ec] sm:$0xf0] }
 0x97d   :  { %v5778_v26 = vpop.f32.mrf.mxu0  ;;  %6428 = vmatpush.bf16.msrb.mxu2 %v6423_v33  ;;  %v12354_v33 = vld [vmem:[%s22029_s9 + $0x280] sm:$0xf] }
 0x97e   :  { %9394 = vmatpush.bf16.msra.mxu3 %v12099_v34  ;;  %v12482_v26 = vld [vmem:[%s22029_s9 + $0x380] sm:$0xf]  ;;  %v12355_v40 = vor.u32 %v14436_v4, %v12354_v33  ;;  %v12291_v4 = vor.u32 %v14420_v7, %v12290_v55  ;;  %v14528_v7 = vld [vmem:[%s22029_s9 + $0x56c] sm:$0xf0] }
 0x97f   :  { %v13042_v34 = vld [vmem:[%s22029_s9 + $0x7e0] sm:$0xf] }
 0x980   :  { %9420 = vmatpush.bf16.msrb.mxu0 %v12355_v40  ;;  %v12642_v33 = vld [vmem:[%s22029_s9 + $0x4c0] sm:$0xf]  ;;  %v12915_v40 = vor.u32 %v14576_v52, %v12914_v38 }
 0x981   :  { %6429 = vmatpush.bf16.msrb.mxu2 %v6410_v35  ;;  %v12483_v35 = vor.u32 %v14468_v16, %v12482_v26  ;;  %v12419_v26 = vor.u32 %v14452_v13, %v12418_v62  ;;  %v12787_v16 = vor.u32 %v14544_v11, %v12786_v57  ;;  %v12850_v62 = vld [vmem:[%s22029_s9 + $0x660] sm:$0xf]  ;;  %v14592_v11 = vld [vmem:[%s22029_s9 + $0x76c] sm:$0xf0] }
 0x982   :  { %9395 = vmatpush.bf16.msra.mxu3 %v12083_v58  ;;  %v12643_v58 = vor.u32 %v14508_v25, %v12642_v33  ;;  %v12978_v57 = vld [vmem:[%s22029_s9 + $0x760] sm:$0xf] }
 0x983   :  { %v12979_v52 = vor.u32 %v14592_v11, %v12978_v57  ;;  %v12578_v25 = vld [vmem:[%s22029_s9 + $0x440] sm:$0xf] }
 0x984   :  { %v18981_v41 = vpop.f32.mrf.mxu2 }
 0x985   :  { %6430 = vmatpush.bf16.msrb.mxu2 %v6409_v14  ;;  %v14400_v14 = vld [vmem:[%s22029_s9 + $0x16c] sm:$0xf0] }
 0x986   :  { %v12211_v9 = vor.u32 %v14400_v14, %v12210_v48  ;;  %v13043_v48 = vor.u32 %v14608_v46, %v13042_v34  ;;  %v12898_v14 = vld [vmem:[%s22029_s9 + $0x6c0] sm:$0xf]  ;;  %v19157_v34 = vpop.f32.mrf.mxu1 }
 0x988   :  { %9408 = vmatpush.bf16.msra.mxu1 %v12211_v9  ;;  %v14604_v9 = vld [vmem:[%s22029_s9 + $0x7cc] sm:$0xf0] }
 0x989   :  { %6431 = vmatpush.bf16.msrb.mxu2 %v6408_v36  ;;  %v12339_v36 = vor.u32 %v14432_v51, %v12338_v22  ;;  %v14572_v22 = vld [vmem:[%s22029_s9 + $0x6cc] sm:$0xf0]  ;;  %v13026_v51 = vld [vmem:[%s22029_s9 + $0x7c0] sm:$0xf] }
 0x98b   :  { %9421 = vmatpush.bf16.msrb.mxu0 %v12339_v36  ;;  %v12626_v36 = vld [vmem:[%s22029_s9 + $0x4a0] sm:$0xf] }
 0x98c   :  { %v19061_v20 = vpop.f32.mrf.mxu2 }
 0x98d   :  { %6432 = vmatpush.bf16.msrb.mxu2 %v6407_v31  ;;  %v14464_v31 = vld [vmem:[%s22029_s9 + $0x36c] sm:$0xf0] }
 0x98e   :  { %v12467_v63 = vor.u32 %v14464_v31, %v12466_v32  ;;  %v14504_v32 = vld [vmem:[%s22029_s9 + $0x4ac] sm:$0xf0]  ;;  %v19081_v31 = vpop.f32.mrf.mxu3 }
 0x98f   :  { %9422 = vmatpush.bf16.msrb.mxu0 %v12323_v5  ;;  %v5948_v24 = vadd.f32 %v19081_v31, %v18901_v29  ;;  %v14548_v29 = vld [vmem:[%s22029_s9 + $0x60c] sm:$0xf0]  ;;  %v12930_v31 = vld [vmem:[%s22029_s9 + $0x700] sm:$0xf] }
 0x990   :  { %12030 = vmatmul.msk.bf16.vlgmr.msrb.gmra.mxu2 %vm5871_vm4, %v14352_v18  ;;  %v12066_v18 = vld [vmem:[%s22029_s9 + $0x40] sm:$0xf] }
 0x991   :  { %9430 = vmatpush.bf16.msra.mxu2 %v12531_v42  ;;  %v12067_v37 = vor.u32 %v14364_v39, %v12066_v18  ;;  %v12451_v42 = vor.u32 %v14460_v17, %v12450_v61  ;;  %v12754_v39 = vld [vmem:[%s22029_s9 + $0x5a0] sm:$0xf] }
 0x992   :  { %v13010_v61 = vld [vmem:[%s22029_s9 + $0x7a0] sm:$0xf] }
 0x993   :  { %9396 = vmatpush.bf16.msra.mxu3 %v12067_v37  ;;  %9423 = vmatpush.bf16.msrb.mxu0 %v12307_v8  ;;  %v12627_v37 = vor.u32 %v14504_v32, %v12626_v36  ;;  %v12610_v17 = vld [vmem:[%s22029_s9 + $0x480] sm:$0xf]  ;;  %v14488_v32 = vld [vmem:[%s22029_s9 + $0x42c] sm:$0xf0] }
 0x994   :  { %v12722_v8 = vld [vmem:[%s22029_s9 + $0x560] sm:$0xf] }
 0x995   :  { %9431 = vmatpush.bf16.msra.mxu2 %v12515_v27  ;;  %v14512_v27 = vld [vmem:[%s22029_s9 + $0x4ec] sm:$0xf0]  ;;  %v12562_v36 = vld [vmem:[%s22029_s9 + $0x420] sm:$0xf] }
 0x996   :  { %v19149_v13 = vpop.f32.mrf.mxu3 }
 0x997   :  { %9397 = vmatpush.bf16.msra.mxu3 %v12051_v56  ;;  %9424 = vmatpush.bf16.msrb.mxu0 %v12291_v4  ;;  %v12611_v56 = vor.u32 %v14500_v6, %v12610_v17  ;;  %v14492_v4 = vld [vmem:[%s22029_s9 + $0x44c] sm:$0xf0] }
 0x999   :  { %9432 = vmatpush.bf16.msra.mxu2 %v12499_v0  ;;  %v12659_v0 = vor.u32 %v14512_v27, %v12658_v19  ;;  %v14496_v19 = vld [vmem:[%s22029_s9 + $0x46c] sm:$0xf0]  ;;  %v19135_v27 = vpop.f32.mrf.mxu0 }
 0x99a   :  { %v12595_v55 = vor.u32 %v14496_v19, %v12594_v30  ;;  %v12803_v30 = vor.u32 %v14548_v29, %v12802_v1  ;;  %v13282_v1 = vld [vmem:[%s22029_s9 + $0x9c0] sm:$0xf] }
 0x99b   :  { %9398 = vmatpush.bf16.msra.mxu3 %v12035_v10  ;;  %9469 = vmatpush.bf16.msra.mxu0 %v12915_v40  ;;  %v14560_v10 = vld [vmem:[%s22029_s9 + $0x66c] sm:$0xf0] }
 0x99c   :  { %v12851_v38 = vor.u32 %v14560_v10, %v12850_v62  ;;  %v14524_v40 = vld [vmem:[%s22029_s9 + $0x54c] sm:$0xf0] }
 0x99d   :  { %9433 = vmatpush.bf16.msra.mxu2 %v12483_v35  ;;  %v12770_v35 = vld [vmem:[%s22029_s9 + $0x5c0] sm:$0xf] }
 0x99e   :  { %v12771_v18 = vor.u32 %v14540_v3, %v12770_v35  ;;  %v19163_v33 = vpop.f32.mrf.mxu3  ;;  %v12834_v35 = vld [vmem:[%s22029_s9 + $0x640] sm:$0xf] }
 0x99f   :  { %9443 = vmatpush.bf16.msrb.mxu3 %v12659_v0  ;;  %v12723_v0 = vor.u32 %v14528_v7, %v12722_v8  ;;  %v5950_v8 = vadd.f32 %v19149_v13, %v18981_v41 }
 0x9a0   :  { %12031 = vmatmul.msk.bf16.gmra.mxu2 %vm5871_vm4, %v12029_v49  ;;  %v12194_v49 = vld [vmem:[%s22029_s9 + $0x140] sm:$0xf] }
 0x9a1   :  { %v12195_v15 = vor.u32 %v14396_v60, %v12194_v49  ;;  %9434 = vmatpush.bf16.msra.mxu2 %v12467_v63  ;;  %v12899_v63 = vor.u32 %v14572_v22, %v12898_v14  ;;  %v14536_v49 = vld [vmem:[%s22029_s9 + $0x5ac] sm:$0xf0]  ;;  %v13027_v60 = vor.u32 %v14604_v9, %v13026_v51  ;;  %v19161_v46 = vpop.f32.mrf.mxu0  ;;  %v19189_v22 = vpop.f32.mrf.mxu1  ;;  %v6028_v10 = vadd.f32 %v19157_v34, %v5950_v8 }
 0x9a2   :  { %v12755_v5 = vor.u32 %v14536_v49, %v12754_v39  ;;  %v14588_v14 = vld [vmem:[%s22029_s9 + $0x74c] sm:$0xf0]  ;;  %v12818_v49 = vld [vmem:[%s22029_s9 + $0x620] sm:$0xf]  ;;  %v5953_v34 = vadd.f32 %v19163_v33, %v19061_v20 }
 0x9a3   :  { %9409 = vmatpush.bf16.msra.mxu1 %v12195_v15  ;;  %9444 = vmatpush.bf16.msrb.mxu3 %v12643_v58  ;;  %v14600_v15 = vld [vmem:[%s22029_s9 + $0x7ac] sm:$0xf0]  ;;  %v12962_v58 = vld [vmem:[%s22029_s9 + $0x740] sm:$0xf]  ;;  %v6093_v11 = vadd.f32 %v19161_v46, %v6028_v10 }
 0x9a4   :  { %9470 = vmatpush.bf16.msra.mxu0 %v12899_v63  ;;  %v13011_v12 = vor.u32 %v14600_v15, %v13010_v61  ;;  %v12963_v9 = vor.u32 %v14588_v14, %v12962_v58  ;;  %v12690_v63 = vld [vmem:[%s22029_s9 + $0x520] sm:$0xf]  ;;  %v14520_v39 = vld [vmem:[%s22029_s9 + $0x52c] sm:$0xf0]  ;;  %v6029_v20 = vadd.f32 %v19189_v22, %v5953_v34 }
 0x9a5   :  { %9435 = vmatpush.bf16.msra.mxu2 %v12451_v42  ;;  %v12883_v42 = vor.u32 %v14568_v43, %v12882_v2  ;;  %v14552_v2 = vld [vmem:[%s22029_s9 + $0x62c] sm:$0xf0]  ;;  %v12946_v43 = vld [vmem:[%s22029_s9 + $0x720] sm:$0xf] }
 0x9a6   :  { %v14584_v61 = vld [vmem:[%s22029_s9 + $0x72c] sm:$0xf0]  ;;  %v12819_v17 = vor.u32 %v14552_v2, %v12818_v49  ;;  %v13298_v14 = vld [vmem:[%s22029_s9 + $0x9e0] sm:$0xf] }
 0x9a7   :  { %9410 = vmatpush.bf16.msra.mxu1 %v12179_v44  ;;  %9445 = vmatpush.bf16.msrb.mxu3 %v12627_v37  ;;  %v19133_v44 = vpop.f32.mrf.mxu2  ;;  %v12691_v37 = vor.u32 %v14520_v39, %v12690_v63  ;;  %v12947_v6 = vor.u32 %v14584_v61, %v12946_v43  ;;  %v14640_v58 = vld [vmem:[%s22029_s9 + $0x8ec] sm:$0xf0]  ;;  %v13154_v39 = vld [vmem:[%s22029_s9 + $0x8c0] sm:$0xf] }
 0x9a8   :  { %9471 = vmatpush.bf16.msra.mxu0 %v12883_v42  ;;  %v14484_v42 = vld [vmem:[%s22029_s9 + $0x40c] sm:$0xf0] }
 0x9a9   :  { %9436 = vmatpush.bf16.msra.mxu2 %v12435_v47  ;;  %v12995_v47 = vor.u32 %v14596_v53, %v12994_v28  ;;  %v19215_v15 = vpop.f32.mrf.mxu0  ;;  %v14580_v53 = vld [vmem:[%s22029_s9 + $0x70c] sm:$0xf0] }
 0x9aa   :  { %v12931_v19 = vor.u32 %v14580_v53, %v12930_v31  ;;  %v14672_v33 = vld [vmem:[%s22029_s9 + $0x9ec] sm:$0xf0]  ;;  %v6094_v61 = vadd.f32 %v19215_v15, %v6029_v20  ;;  %v13538_v53 = vld [vmem:[%s22029_s9 + $0xbc0] sm:$0xf] }
 0x9ab   :  { %9411 = vmatpush.bf16.msra.mxu1 %v12163_v45  ;;  %9446 = vmatpush.bf16.msrb.mxu3 %v12611_v56  ;;  %v12674_v56 = vld [vmem:[%s22029_s9 + $0x500] sm:$0xf]  ;;  %v14736_v22 = vld [vmem:[%s22029_s9 + $0xbec] sm:$0xf0] }
 0x9ac   :  { %9472 = vmatpush.bf16.msra.mxu0 %v12867_v59  ;;  %v12675_v28 = vor.u32 %v14516_v21, %v12674_v56  ;;  %v19246_v59 = vpop.f32.mrf.mxu1  ;;  %v14636_v43 = vld [vmem:[%s22029_s9 + $0x8cc] sm:$0xf0]  ;;  %v13506_v20 = vld [vmem:[%s22029_s9 + $0xb80] sm:$0xf] }
 0x9ad   :  { %9437 = vmatpush.bf16.msra.mxu2 %v12419_v26  ;;  %v12579_v26 = vor.u32 %v14492_v4, %v12578_v25  ;;  %v14668_v15 = vld [vmem:[%s22029_s9 + $0x9cc] sm:$0xf0]  ;;  %v13155_v29 = vor.u32 %v14636_v43, %v13154_v39 }
 0x9ae   :  { %v14700_v31 = vld [vmem:[%s22029_s9 + $0xacc] sm:$0xf0] }
 0x9af   :  { %9456 = vmatpush.bf16.msrb.mxu1 %v12787_v16  ;;  %9447 = vmatpush.bf16.msrb.mxu3 %v12595_v55  ;;  %v12706_v16 = vld [vmem:[%s22029_s9 + $0x540] sm:$0xf] }
 0x9b0   :  { %9473 = vmatpush.bf16.msra.mxu0 %v12851_v38  ;;  %v12707_v3 = vor.u32 %v14524_v40, %v12706_v16  ;;  %v19263_v16 = vld [vmem:[%s22027_s7] ss:$0 sm:$0xff] }
 0x9b1   :  { %9482 = vmatpush.bf16.msrb.mxu2 %v13043_v48  ;;  %v14556_v48 = vld [vmem:[%s22029_s9 + $0x64c] sm:$0xf0]  ;;  %v19253_v7 = vpop.f32.mrf.mxu0 }
 0x9b2   :  { %v12835_v51 = vor.u32 %v14556_v48, %v12834_v35  ;;  %v13170_v48 = vld [vmem:[%s22029_s9 + $0x8e0] sm:$0xf] }
 0x9b3   :  { %9457 = vmatpush.bf16.msrb.mxu1 %v12771_v18  ;;  %9448 = vmatpush.bf16.msrb.mxu3 %v12579_v26  ;;  %v12563_v18 = vor.u32 %v14488_v32, %v12562_v36  ;;  %v13554_v32 = vld [vmem:[%s22029_s9 + $0xbe0] sm:$0xf]  ;;  %v13171_v63 = vor.u32 %v14640_v58, %v13170_v48 }
 0x9b4   :  { %9474 = vmatpush.bf16.msra.mxu0 %v12835_v51  ;;  %v13426_v51 = vld [vmem:[%s22029_s9 + $0xae0] sm:$0xf] }
 0x9b5   :  { %9483 = vmatpush.bf16.msrb.mxu2 %v13027_v60  ;;  %v13378_v48 = vld [vmem:[%s22029_s9 + $0xa80] sm:$0xf] }
 0x9b7   :  { %9458 = vmatpush.bf16.msrb.mxu1 %v12755_v5  ;;  %9449 = vmatpush.bf16.msrb.mxu3 %v12563_v18  ;;  %v12546_v5 = vld [vmem:[%s22029_s9 + $0x400] sm:$0xf] }
 0x9b8   :  { %v12547_v50 = vor.u32 %v14484_v42, %v12546_v5  ;;  %9475 = vmatpush.bf16.msra.mxu0 %v12819_v17  ;;  %v13555_v42 = vor.u32 %v14736_v22, %v13554_v32  ;;  %v13106_v32 = vld [vmem:[%s22029_s9 + $0x860] sm:$0xf]  ;;  %v14624_v22 = vld [vmem:[%s22029_s9 + $0x86c] sm:$0xf0] }
 0x9b9   :  { %9484 = vmatpush.bf16.msrb.mxu2 %v13011_v12  ;;  %v19225_v12 = vpop.f32.mrf.mxu3 }
 0x9bb   :  { %9459 = vmatpush.bf16.msrb.mxu1 %v12739_v54  ;;  %9450 = vmatpush.bf16.msrb.mxu3 %v12547_v50  ;;  %v6027_v54 = vadd.f32 %v19107_v23, %v5948_v24 }
 0x9bc   :  { %9476 = vmatpush.bf16.msra.mxu0 %v12803_v30  ;;  %v14732_v30 = vld [vmem:[%s22029_s9 + $0xbcc] sm:$0xf0] }
 0x9bd   :  { %9485 = vmatpush.bf16.msrb.mxu2 %v12995_v47  ;;  %v6092_v55 = vadd.f32 %v19135_v27, %v6027_v54  ;;  %v14632_v54 = vld [vmem:[%s22029_s9 + $0x8ac] sm:$0xf0] }
 0x9bf   :  { %9460 = vmatpush.bf16.msrb.mxu1 %v12723_v0 }
 0x9c1   :  { %9486 = vmatpush.bf16.msrb.mxu2 %v12979_v52 }
 0x9c3   :  { %9461 = vmatpush.bf16.msrb.mxu1 %v12707_v3  ;;  %v6295_v23 = vpop.f32.mrf.mxu1  ;;  %v6360_v52 = vpop.f32.mrf.mxu0 }
 0x9c5   :  { %9487 = vmatpush.bf16.msrb.mxu2 %v12963_v9  ;;  %v14704_v9 = vld [vmem:[%s22029_s9 + $0xaec] sm:$0xf0] }
 0x9c6   :  { %v13427_v5 = vor.u32 %v14704_v9, %v13426_v51 }
 0x9c7   :  { %9462 = vmatpush.bf16.msrb.mxu1 %v12691_v37 }
 0x9c8   :  { %v19159_v45 = vpop.f32.mrf.mxu2  ;;  %v6221_v62 = vpop.f32.mrf.mxu3 }
 0x9c9   :  { %9488 = vmatpush.bf16.msrb.mxu2 %v12947_v6  ;;  %v6166_v57 = vadd.f32 %v19159_v45, %v6092_v55  ;;  %v13299_v6 = vor.u32 %v14672_v33, %v13298_v14  ;;  %v13283_v55 = vor.u32 %v14668_v15, %v13282_v1  ;;  %v14692_v14 = vld [vmem:[%s22029_s9 + $0xa8c] sm:$0xf0]  ;;  %v5955_v15 = vadd.f32 %v19225_v12, %v19133_v44  ;;  %v13218_v44 = vld [vmem:[%s22029_s9 + $0x940] sm:$0xf] }
 0x9ca   :  { %v14724_v33 = vld [vmem:[%s22029_s9 + $0xb8c] sm:$0xf0] }
 0x9cb   :  { %9463 = vmatpush.bf16.msrb.mxu1 %v12675_v28  ;;  %v6231_v0 = vadd.f32 %v6221_v62, %v6166_v57  ;;  %v6297_v27 = vpop.f32.mrf.mxu1  ;;  %v6362_v35 = vpop.f32.mrf.mxu0  ;;  %v13410_v28 = vld [vmem:[%s22029_s9 + $0xac0] sm:$0xf]  ;;  %v13539_v57 = vor.u32 %v14732_v30, %v13538_v53  ;;  %v13507_v39 = vor.u32 %v14724_v33, %v13506_v20  ;;  %v14720_v1 = vld [vmem:[%s22029_s9 + $0xb6c] sm:$0xf0] }
 0x9cc   :  { %v13411_v10 = vor.u32 %v14700_v31, %v13410_v28  ;;  %v13090_v31 = vld [vmem:[%s22029_s9 + $0x840] sm:$0xf]  ;;  %v14620_v53 = vld [vmem:[%s22029_s9 + $0x84c] sm:$0xf0] }
 0x9cd   :  { %9489 = vmatpush.bf16.msrb.mxu2 %v12931_v19  ;;  %v6305_v41 = vadd.f32 %v6295_v23, %v6231_v0  ;;  %v13138_v19 = vld [vmem:[%s22029_s9 + $0x8a0] sm:$0xf]  ;;  %v14768_v20 = vld [vmem:[%s22029_s9 + $0xcec] sm:$0xf0] }
 0x9ce   :  { %v13266_v23 = vld [vmem:[%s22029_s9 + $0x9a0] sm:$0xf]  ;;  %v13139_v0 = vor.u32 %v14632_v54, %v13138_v19 }
 0x9cf   :  { %v6370_v26 = vadd.f32 %v6360_v52, %v6305_v41  ;;  %v14696_v52 = vld [vmem:[%s22029_s9 + $0xaac] sm:$0xf0]  ;;  %v13186_v33 = vld [vmem:[%s22029_s9 + $0x900] sm:$0xf] }
 0x9d0   :  { %v6158_v60 = vpop.f32.mrf.mxu2  ;;  %v6223_v13 = vpop.f32.mrf.mxu3  ;;  %v14728_v41 = vld [vmem:[%s22029_s9 + $0xbac] sm:$0xf0] }
 0x9d1   :  { %v6167_v25 = vadd.f32 %v6158_v60, %v6093_v11  ;;  %v14664_v11 = vld [vmem:[%s22029_s9 + $0x9ac] sm:$0xf0] }
 0x9d2   :  { %v13267_v34 = vor.u32 %v14664_v11, %v13266_v23  ;;  %v14684_v23 = vld [vmem:[%s22029_s9 + $0xa4c] sm:$0xf0]  ;;  %v13091_v11 = vor.u32 %v14620_v53, %v13090_v31 }
 0x9d3   :  { %v6232_v4 = vadd.f32 %v6223_v13, %v6167_v25  ;;  %v13522_v25 = vld [vmem:[%s22029_s9 + $0xba0] sm:$0xf]  ;;  %v6300_v51 = vpop.f32.mrf.mxu1  ;;  %v14764_v31 = vld [vmem:[%s22029_s9 + $0xccc] sm:$0xf0] }
 0x9d5   :  { %v6306_v40 = vadd.f32 %v6297_v27, %v6232_v4  ;;  %v13122_v4 = vld [vmem:[%s22029_s9 + $0x880] sm:$0xf] }
 0x9d7   :  { %v6371_v18 = vadd.f32 %v6362_v35, %v6306_v40  ;;  %v13523_v35 = vor.u32 %v14728_v41, %v13522_v25  ;;  %v14616_v25 = vld [vmem:[%s22029_s9 + $0x82c] sm:$0xf0]  ;;  %v6030_v41 = vadd.f32 %v19246_v59, %v5955_v15  ;;  %v13330_v59 = vld [vmem:[%s22029_s9 + $0xa20] sm:$0xf] }
 0x9d8   :  { %v19250_v47 = vpop.f32.mrf.mxu2  ;;  %v6226_v13 = vpop.f32.mrf.mxu3 }
 0x9d9   :  { %v6168_v8 = vadd.f32 %v19250_v47, %v6094_v61  ;;  %v13394_v47 = vld [vmem:[%s22029_s9 + $0xaa0] sm:$0xf] }
 0x9da   :  { %v13395_v40 = vor.u32 %v14696_v52, %v13394_v47  ;;  %v13362_v61 = vld [vmem:[%s22029_s9 + $0xa60] sm:$0xf] }
 0x9db   :  { %v6233_v27 = vadd.f32 %v6226_v13, %v6168_v8  ;;  %v13474_v47 = vld [vmem:[%s22029_s9 + $0xb40] sm:$0xf] }
 0x9dc   :  { %v13074_v52 = vld [vmem:[%s22029_s9 + $0x820] sm:$0xf] }
 0x9dd   :  { %v6307_v9 = vadd.f32 %v6300_v51, %v6233_v27  ;;  %v14648_v27 = vld [vmem:[%s22029_s9 + $0x92c] sm:$0xf0]  ;;  %v6095_v51 = vadd.f32 %v19253_v7, %v6030_v41  ;;  %v13442_v7 = vld [vmem:[%s22029_s9 + $0xb00] sm:$0xf] }
 0x9e0   :  { %v19258_v38 = vpop.f32.mrf.mxu2  ;;  %v6228_v53 = vpop.f32.mrf.mxu3 }
 0xa13   :  { %v6434_v45 = vpop.f32.mrf.mxu2 }
 0xa14   :  { %v6444_v46 = vadd.f32 %v6434_v45, %v6370_v26  ;;  %v14628_v26 = vld [vmem:[%s22029_s9 + $0x88c] sm:$0xf0]  ;;  %v13250_v45 = vld [vmem:[%s22029_s9 + $0x980] sm:$0xf] }
 0xa15   :  { %v13123_v58 = vor.u32 %v14628_v26, %v13122_v4  ;;  %v13202_v26 = vld [vmem:[%s22029_s9 + $0x920] sm:$0xf] }
 0xa16   :  { %v6452_v3 = vadd.f32 %v19263_v16, %v6444_v46 }
 0xa18   :  { %v6456_v36 = vmax.f32 %v6452_v3, 0.0  ;;  %v14660_v3 = vld [vmem:[%s22029_s9 + $0x98c] sm:$0xf0] }
 0xa1a   :  { %v6461_v49 = vrot.slane %v6456_v36, 2  ;;  %v6463_v60 = vrot.slane %v6456_v36, 4  ;;  %v6465_v37 = vrot.slane %v6456_v36, 6  ;;  %v19296_v2 = vpack.c.bf16 %v6456_v36, %v6456_v36 }
 0xa1b   :  { %v6436_v17 = vpop.f32.mrf.mxu2  ;;  %v13251_v36 = vor.u32 %v14660_v3, %v13250_v45  ;;  %v14712_v3 = vld [vmem:[%s22029_s9 + $0xb2c] sm:$0xf0] }
 0xa1c   :  { %v19302_v50 = vpack.c.bf16 %v6461_v49, %v6461_v49  ;;  %v19304_v24 = vpack.c.bf16 %v6463_v60, %v6463_v60  ;;  %v19306_v56 = vpack.c.bf16 %v6465_v37, %v6465_v37  ;;  %v6445_v21 = vadd.f32 %v6436_v17, %v6371_v18  ;;  %9399 = vmatmul.bf16.vlgmr.msra.gmra.mxu3 %v19296_v2  ;;  %v13234_v49 = vld [vmem:[%s22029_s9 + $0x960] sm:$0xf]  ;;  %v14656_v60 = vld [vmem:[%s22029_s9 + $0x96c] sm:$0xf0] }
 0xa1d   :  { %9495 = vmatpush.bf16.msra.mxu3 %v13171_v63  ;;  %v13379_v63 = vor.u32 %v14692_v14, %v13378_v48  ;;  %v14688_v17 = vld [vmem:[%s22029_s9 + $0xa6c] sm:$0xf0]  ;;  %v13235_v19 = vor.u32 %v14656_v60, %v13234_v49  ;;  %v13058_v48 = vld [vmem:[%s22029_s9 + $0x800] sm:$0xf] }
 0xa1e   :  { %9412 = vmatmul.bf16.vlgmr.msra.gmra.mxu1 %v19302_v50  ;;  %9425 = vmatmul.bf16.vlgmr.msrb.gmra.mxu0 %v19304_v24  ;;  %v6453_v62 = vadd.f32 %v19263_v16, %v6445_v21  ;;  %v13490_v21 = vld [vmem:[%s22029_s9 + $0xb60] sm:$0xf]  ;;  %v13363_v54 = vor.u32 %v14688_v17, %v13362_v61  ;;  %v14708_v49 = vld [vmem:[%s22029_s9 + $0xb0c] sm:$0xf0] }
 0xa1f   :  { %9438 = vmatmul.bf16.vlgmr.msra.gmra.mxu2 %v19306_v56  ;;  %9508 = vmatpush.bf16.msra.mxu1 %v13299_v6  ;;  %v6365_v6 = vpop.f32.mrf.mxu0  ;;  %v13682_v14 = vld [vmem:[%s22029_s9 + $0xce0] sm:$0xf] }
 0xa20   :  { %9521 = vmatpush.bf16.msrb.mxu0 %v13427_v5  ;;  %9534 = vmatpush.bf16.msra.mxu2 %v13555_v42  ;;  %v6457_v46 = vmax.f32 %v6453_v62, 0.0  ;;  %v13107_v42 = vor.u32 %v14624_v22, %v13106_v32  ;;  %v6372_v28 = vadd.f32 %v6365_v6, %v6307_v9  ;;  %v13491_v62 = vor.u32 %v14720_v1, %v13490_v21  ;;  %v14644_v32 = vld [vmem:[%s22029_s9 + $0x90c] sm:$0xf0]  ;;  %v13314_v22 = vld [vmem:[%s22029_s9 + $0xa00] sm:$0xf] }
 0xa21   :  { %9496 = vmatpush.bf16.msra.mxu3 %v13155_v29  ;;  %v13203_v9 = vor.u32 %v14648_v27, %v13202_v26  ;;  %v13938_v61 = vld [vmem:[%s22029_s9 + $0xee0] sm:$0xf]  ;;  %v13683_v17 = vor.u32 %v14768_v20, %v13682_v14  ;;  %v14832_v6 = vld [vmem:[%s22029_s9 + $0xeec] sm:$0xf0]  ;;  %v6169_v21 = vadd.f32 %v19258_v38, %v6095_v51  ;;  %v13187_v1 = vor.u32 %v14644_v32, %v13186_v33  ;;  %v14374_v20 = vld [vmem:[%s22029_s9 + $0xa4] sm:$0xf] }
 0xa22   :  { %v6468_v18 = vrot.slane %v6457_v46, 2  ;;  %v6470_v37 = vrot.slane %v6457_v46, 4  ;;  %v6472_v43 = vrot.slane %v6457_v46, 6  ;;  %v19406_v29 = vpack.c.bf16 %v6457_v46, %v6457_v46  ;;  %v14680_v46 = vld [vmem:[%s22029_s9 + $0xa2c] sm:$0xf0] }
 0xa23   :  { %9509 = vmatpush.bf16.msra.mxu1 %v13283_v55  ;;  %v6439_v5 = vpop.f32.mrf.mxu2  ;;  %v13794_v38 = vld [vmem:[%s22029_s9 + $0xdc0] sm:$0xf]  ;;  %v14824_v14 = vld [vmem:[%s22029_s9 + $0xeac] sm:$0xf0]  ;;  %v12116_v33 = vld [vmem:[%s22029_s9 + $0xb0] sm:$0xf0] }
 0xa24   :  { %9522 = vmatpush.bf16.msrb.mxu0 %v13411_v10  ;;  %9535 = vmatpush.bf16.msra.mxu2 %v13539_v57  ;;  %v19414_v30 = vpack.c.bf16 %v6468_v18, %v6468_v18  ;;  %v6446_v12 = vadd.f32 %v6439_v5, %v6372_v28  ;;  %v19420_v8 = vpack.c.bf16 %v6470_v37, %v6470_v37  ;;  %v14652_v10 = vld [vmem:[%s22029_s9 + $0x94c] sm:$0xf0]  ;;  %v13346_v57 = vld [vmem:[%s22029_s9 + $0xa40] sm:$0xf]  ;;  %v14382_v5 = vld [vmem:[%s22029_s9 + $0xe4] sm:$0xf] }
 0xa25   :  { %9497 = vmatpush.bf16.msra.mxu3 %v13139_v0  ;;  %v19422_v55 = vpack.c.bf16 %v6472_v43, %v6472_v43  ;;  %v14716_v0 = vld [vmem:[%s22029_s9 + $0xb4c] sm:$0xf0]  ;;  %v13219_v13 = vor.u32 %v14652_v10, %v13218_v44  ;;  %v13347_v4 = vor.u32 %v14684_v23, %v13346_v57  ;;  %v13810_v37 = vld [vmem:[%s22029_s9 + $0xde0] sm:$0xf]  ;;  %v13939_v10 = vor.u32 %v14832_v6, %v13938_v61  ;;  %v12100_v61 = vld [vmem:[%s22029_s9 + $0x90] sm:$0xf0] }
 0xa26   :  { %v13475_v45 = vor.u32 %v14716_v0, %v13474_v47  ;;  %v14676_v18 = vld [vmem:[%s22029_s9 + $0xa0c] sm:$0xf0]  ;;  %v13666_v28 = vld [vmem:[%s22029_s9 + $0xcc0] sm:$0xf]  ;;  %v14378_v0 = vld [vmem:[%s22029_s9 + $0xc4] sm:$0xf] }
 0xa27   :  { %9510 = vmatpush.bf16.msra.mxu1 %v13267_v34  ;;  %v6454_v34 = vadd.f32 %v19263_v16, %v6446_v12  ;;  %v14800_v43 = vld [vmem:[%s22029_s9 + $0xdec] sm:$0xf0]  ;;  %v13315_v15 = vor.u32 %v14676_v18, %v13314_v22  ;;  %v13922_v23 = vld [vmem:[%s22029_s9 + $0xec0] sm:$0xf]  ;;  %v13667_v41 = vor.u32 %v14764_v31, %v13666_v28 }
 0xa28   :  { %9523 = vmatpush.bf16.msrb.mxu0 %v13395_v40  ;;  %9536 = vmatpush.bf16.msra.mxu2 %v13523_v35  ;;  %v13458_v40 = vld [vmem:[%s22029_s9 + $0xb20] sm:$0xf]  ;;  %v13075_v35 = vor.u32 %v14616_v25, %v13074_v52  ;;  %v13811_v44 = vor.u32 %v14800_v43, %v13810_v37  ;;  %v14796_v12 = vld [vmem:[%s22029_s9 + $0xdcc] sm:$0xf0]  ;;  %v12132_v52 = vld [vmem:[%s22029_s9 + $0xd0] sm:$0xf0]  ;;  %v6234_v25 = vadd.f32 %v6228_v53, %v6169_v21 }
 0xa29   :  { %9498 = vmatpush.bf16.msra.mxu3 %v13123_v58  ;;  %v14612_v58 = vld [vmem:[%s22029_s9 + $0x80c] sm:$0xf0]  ;;  %v13795_v26 = vor.u32 %v14796_v12, %v13794_v38  ;;  %v13650_v27 = vld [vmem:[%s22029_s9 + $0xca0] sm:$0xf]  ;;  %v14370_v43 = vld [vmem:[%s22029_s9 + $0x84] sm:$0xf] }
 0xa2a   :  { %v13059_v60 = vor.u32 %v14612_v58, %v13058_v48  ;;  %v6302_v48 = vpop.f32.mrf.mxu1  ;;  %v14756_v32 = vld [vmem:[%s22029_s9 + $0xc8c] sm:$0xf0]  ;;  %v12103_v28 = vor.u32 %v14370_v43, %v12100_v61  ;;  %v13746_v31 = vld [vmem:[%s22029_s9 + $0xd60] sm:$0xf]  ;;  %v12084_v38 = vld [vmem:[%s22029_s9 + $0x70] sm:$0xf0] }
 0xa2b   :  { %9511 = vmatpush.bf16.msra.mxu1 %v13251_v36  ;;  %v13331_v36 = vor.u32 %v14680_v46, %v13330_v59  ;;  %v12135_v46 = vor.u32 %v14378_v0, %v12132_v52  ;;  %v6308_v22 = vadd.f32 %v6302_v48, %v6234_v25  ;;  %v14820_v37 = vld [vmem:[%s22029_s9 + $0xe8c] sm:$0xf0]  ;;  %v6441_v6 = vpop.f32.mrf.mxu2  ;;  %v13730_v0 = vld [vmem:[%s22029_s9 + $0xd40] sm:$0xf] }
 0xa2c   :  { %9524 = vmatpush.bf16.msrb.mxu0 %v13379_v63  ;;  %9537 = vmatpush.bf16.msra.mxu2 %v13507_v39  ;;  %v6458_v63 = vmax.f32 %v6454_v34, 0.0  ;;  %v13459_v39 = vor.u32 %v14712_v3, %v13458_v40  ;;  %v14760_v34 = vld [vmem:[%s22029_s9 + $0xcac] sm:$0xf0]  ;;  %v13778_v40 = vld [vmem:[%s22029_s9 + $0xda0] sm:$0xf] }
 0xa2d   :  { %9451 = vmatmul.bf16.vlgmr.msrb.gmra.mxu3 %v19406_v29  ;;  %v13906_v3 = vld [vmem:[%s22029_s9 + $0xea0] sm:$0xf]  ;;  %v13651_v51 = vor.u32 %v14760_v34, %v13650_v27  ;;  %v14752_v21 = vld [vmem:[%s22029_s9 + $0xc6c] sm:$0xf0]  ;;  %v12068_v27 = vld [vmem:[%s22029_s9 + $0x50] sm:$0xf0] }
 0xa2e   :  { %9499 = vmatpush.bf16.msra.mxu3 %v13107_v42  ;;  %9464 = vmatmul.bf16.vlgmr.msrb.gmra.mxu1 %v19414_v30  ;;  %v12148_v42 = vld [vmem:[%s22029_s9 + $0xf0] sm:$0xf0]  ;;  %v6479_v47 = vrot.slane %v6458_v63, 6  ;;  %v13907_v18 = vor.u32 %v14824_v14, %v13906_v3  ;;  %v14784_v53 = vld [vmem:[%s22029_s9 + $0xd6c] sm:$0xf0] }
 0xa2f   :  { %9477 = vmatmul.bf16.vlgmr.msra.gmra.mxu0 %v19420_v8  ;;  %9490 = vmatmul.bf16.vlgmr.msrb.gmra.mxu2 %v19422_v55  ;;  %v12151_v57 = vor.u32 %v14382_v5, %v12148_v42  ;;  %v13618_v42 = vld [vmem:[%s22029_s9 + $0xc60] sm:$0xf]  ;;  %v14780_v52 = vld [vmem:[%s22029_s9 + $0xd4c] sm:$0xf0] }
 0xa30   :  { %9512 = vmatpush.bf16.msra.mxu1 %v13235_v19  ;;  %9525 = vmatpush.bf16.msrb.mxu0 %v13363_v54  ;;  %v6475_v19 = vrot.slane %v6458_v63, 2  ;;  %v13443_v54 = vor.u32 %v14708_v49, %v13442_v7  ;;  %v19563_v58 = vpack.c.bf16 %v6479_v47, %v6479_v47  ;;  %v14788_v7 = vld [vmem:[%s22029_s9 + $0xd8c] sm:$0xf0]  ;;  %v13890_v49 = vld [vmem:[%s22029_s9 + $0xe80] sm:$0xf] }
 0xa31   :  { %9538 = vmatpush.bf16.msra.mxu2 %v13491_v62  ;;  %v6477_v62 = vrot.slane %v6458_v63, 4  ;;  %v13858_v25 = vld [vmem:[%s22029_s9 + $0xe40] sm:$0xf]  ;;  %v14776_v14 = vld [vmem:[%s22029_s9 + $0xd2c] sm:$0xf0] }
 0xa32   :  { %9500 = vmatpush.bf16.msra.mxu3 %v13091_v11  ;;  %v14828_v11 = vld [vmem:[%s22029_s9 + $0xecc] sm:$0xf0]  ;;  %v13826_v61 = vld [vmem:[%s22029_s9 + $0xe00] sm:$0xf] }
 0xa33   :  { %v13923_v59 = vor.u32 %v14828_v11, %v13922_v23  ;;  %v14748_v23 = vld [vmem:[%s22029_s9 + $0xc4c] sm:$0xf0] }
 0xa34   :  { %9513 = vmatpush.bf16.msra.mxu1 %v13219_v13  ;;  %9526 = vmatpush.bf16.msrb.mxu0 %v13347_v4  ;;  %v19542_v13 = vpack.c.bf16 %v6458_v63, %v6458_v63  ;;  %v19544_v4 = vpack.c.bf16 %v6475_v19, %v6475_v19  ;;  %v12119_v63 = vor.u32 %v14374_v20, %v12116_v33  ;;  %v13874_v19 = vld [vmem:[%s22029_s9 + $0xe60] sm:$0xf]  ;;  %v14808_v33 = vld [vmem:[%s22029_s9 + $0xe2c] sm:$0xf0] }
 0xa35   :  { %9539 = vmatpush.bf16.msra.mxu2 %v13475_v45  ;;  %v19552_v45 = vpack.c.bf16 %v6477_v62, %v6477_v62  ;;  %v13619_v62 = vor.u32 %v14752_v21, %v13618_v42  ;;  %v13842_v20 = vld [vmem:[%s22029_s9 + $0xe20] sm:$0xf]  ;;  %v14772_v43 = vld [vmem:[%s22029_s9 + $0xd0c] sm:$0xf0]  ;;  %v14446_v21 = vld [vmem:[%s22029_s9 + $0x2e4] sm:$0xf] }
 0xa36   :  { %9501 = vmatpush.bf16.msra.mxu3 %v13075_v35  ;;  %v14792_v35 = vld [vmem:[%s22029_s9 + $0xdac] sm:$0xf0] }
 0xa38   :  { %9514 = vmatpush.bf16.msra.mxu1 %v13203_v9  ;;  %9527 = vmatpush.bf16.msrb.mxu0 %v13331_v36  ;;  %v13779_v9 = vor.u32 %v14792_v35, %v13778_v40  ;;  %v13634_v36 = vld [vmem:[%s22029_s9 + $0xc80] sm:$0xf]  ;;  %v14744_v35 = vld [vmem:[%s22029_s9 + $0xc2c] sm:$0xf0] }
 0xa39   :  { %9540 = vmatpush.bf16.msra.mxu2 %v13459_v39  ;;  %v13762_v39 = vld [vmem:[%s22029_s9 + $0xd80] sm:$0xf] }
 0xa3a   :  { %9502 = vmatpush.bf16.msra.mxu3 %v13059_v60  ;;  %v6367_v60 = vpop.f32.mrf.mxu0  ;;  %v13763_v5 = vor.u32 %v14788_v7, %v13762_v39  ;;  %v13586_v40 = vld [vmem:[%s22029_s9 + $0xc20] sm:$0xf]  ;;  %v14414_v39 = vld [vmem:[%s22029_s9 + $0x1e4] sm:$0xf]  ;;  %v12276_v7 = vld [vmem:[%s22029_s9 + $0x1f0] sm:$0xf0] }
 0xa3c   :  { %9515 = vmatpush.bf16.msra.mxu1 %v13187_v1  ;;  %9528 = vmatpush.bf16.msrb.mxu0 %v13315_v15  ;;  %v6373_v1 = vadd.f32 %v6367_v60, %v6308_v22  ;;  %v13891_v15 = vor.u32 %v14820_v37, %v13890_v49  ;;  %v13570_v22 = vld [vmem:[%s22029_s9 + $0xc00] sm:$0xf]  ;;  %v13843_v49 = vor.u32 %v14808_v33, %v13842_v20  ;;  %v14438_v20 = vld [vmem:[%s22029_s9 + $0x2a4] sm:$0xf]  ;;  %v12372_v33 = vld [vmem:[%s22029_s9 + $0x2b0] sm:$0xf0] }
 0xa3d   :  { %9541 = vmatpush.bf16.msra.mxu2 %v13443_v54  ;;  %9503 = vmatmul.bf16.vlgmr.msra.gmra.mxu3 %v19542_v13  ;;  %v14816_v54 = vld [vmem:[%s22029_s9 + $0xe6c] sm:$0xf0]  ;;  %v13698_v37 = vld [vmem:[%s22029_s9 + $0xd00] sm:$0xf] }
 0xa3e   :  { %9547 = vmatpush.bf16.msrb.mxu3 %v13683_v17  ;;  %v13635_v17 = vor.u32 %v14756_v32, %v13634_v36  ;;  %v6447_v12 = vadd.f32 %v6441_v6, %v6373_v1  ;;  %v13875_v11 = vor.u32 %v14816_v54, %v13874_v19  ;;  %v13587_v32 = vor.u32 %v14744_v35, %v13586_v40  ;;  %v14354_v6 = vld [vmem:[%s22029_s9 + $0x4] sm:$0xf]  ;;  %v12404_v1 = vld [vmem:[%s22029_s9 + $0x2f0] sm:$0xf0] }
 0xa3f   :  { %9516 = vmatmul.bf16.vlgmr.msra.gmra.mxu1 %v19544_v4  ;;  %9529 = vmatmul.bf16.vlgmr.msrb.gmra.mxu0 %v19552_v45  ;;  %v14510_v19 = vld [vmem:[%s22029_s9 + $0x4e4] sm:$0xf]  ;;  %v12660_v54 = vld [vmem:[%s22029_s9 + $0x4f0] sm:$0xf0] }
 0xa40   :  { %9560 = vmatpush.bf16.msrb.mxu1 %v13811_v44  ;;  %9573 = vmatpush.bf16.msra.mxu0 %v13939_v10  ;;  %v14366_v44 = vld [vmem:[%s22029_s9 + $0x64] sm:$0xf]  ;;  %v13747_v10 = vor.u32 %v14784_v53, %v13746_v31  ;;  %v6455_v34 = vadd.f32 %v19263_v16, %v6447_v12  ;;  %v13714_v16 = vld [vmem:[%s22029_s9 + $0xd20] sm:$0xf]  ;;  %v13699_v31 = vor.u32 %v14772_v43, %v13698_v37  ;;  %v12532_v53 = vld [vmem:[%s22029_s9 + $0x3f0] sm:$0xf0] }
 0xa41   :  { %9586 = vmatpush.bf16.msrb.mxu2 %v12151_v57  ;;  %v13602_v57 = vld [vmem:[%s22029_s9 + $0xc40] sm:$0xf]  ;;  %v12087_v47 = vor.u32 %v14366_v44, %v12084_v38  ;;  %v12356_v37 = vld [vmem:[%s22029_s9 + $0x290] sm:$0xf0]  ;;  %v14466_v43 = vld [vmem:[%s22029_s9 + $0x384] sm:$0xf] }
 0xa42   :  { %9548 = vmatpush.bf16.msrb.mxu3 %v13667_v41  ;;  %9542 = vmatmul.bf16.vlgmr.msra.gmra.mxu2 %v19563_v58  ;;  %v14812_v41 = vld [vmem:[%s22029_s9 + $0xe4c] sm:$0xf0]  ;;  %v6459_v36 = vmax.f32 %v6455_v34, 0.0  ;;  %v12644_v34 = vld [vmem:[%s22029_s9 + $0x4d0] sm:$0xf0] }
 0xa43   :  { %v13859_v3 = vor.u32 %v14812_v41, %v13858_v25  ;;  %v14474_v25 = vld [vmem:[%s22029_s9 + $0x3c4] sm:$0xf] }
 0xa44   :  { %9561 = vmatpush.bf16.msrb.mxu1 %v13795_v26  ;;  %9574 = vmatpush.bf16.msra.mxu0 %v13923_v59  ;;  %v14362_v26 = vld [vmem:[%s22029_s9 + $0x44] sm:$0xf]  ;;  %v13603_v59 = vor.u32 %v14748_v23, %v13602_v57  ;;  %v6482_v12 = vrot.slane %v6459_v36, 2  ;;  %v12260_v23 = vld [vmem:[%s22029_s9 + $0x1d0] sm:$0xf0]  ;;  %v19738_v41 = vpack.c.bf16 %v6459_v36, %v6459_v36 }
 0xa45   :  { %9587 = vmatpush.bf16.msrb.mxu2 %v12135_v46  ;;  %v13731_v46 = vor.u32 %v14780_v52, %v13730_v0  ;;  %v12071_v48 = vor.u32 %v14362_v26, %v12068_v27  ;;  %v14410_v57 = vld [vmem:[%s22029_s9 + $0x1c4] sm:$0xf]  ;;  %v12388_v52 = vld [vmem:[%s22029_s9 + $0x2d0] sm:$0xf0] }
 0xa46   :  { %9549 = vmatpush.bf16.msrb.mxu3 %v13651_v51  ;;  %v14358_v51 = vld [vmem:[%s22029_s9 + $0x24] sm:$0xf]  ;;  %v12516_v26 = vld [vmem:[%s22029_s9 + $0x3d0] sm:$0xf0] }
 0xa47   :  { %v14442_v0 = vld [vmem:[%s22029_s9 + $0x2c4] sm:$0xf] }
 0xa48   :  { %9562 = vmatpush.bf16.msrb.mxu1 %v13779_v9  ;;  %9575 = vmatpush.bf16.msra.mxu0 %v13907_v18  ;;  %v12052_v9 = vld [vmem:[%s22029_s9 + $0x30] sm:$0xf0]  ;;  %v13715_v18 = vor.u32 %v14776_v14, %v13714_v16  ;;  %v14506_v27 = vld [vmem:[%s22029_s9 + $0x4c4] sm:$0xf]  ;;  %v12391_v35 = vor.u32 %v14442_v0, %v12388_v52  ;;  %v12519_v16 = vor.u32 %v14474_v25, %v12516_v26 }
 0xa49   :  { %9588 = vmatpush.bf16.msrb.mxu2 %v12119_v63  ;;  %v14740_v63 = vld [vmem:[%s22029_s9 + $0xc0c] sm:$0xf0]  ;;  %v12055_v60 = vor.u32 %v14358_v51, %v12052_v9  ;;  %v12647_v14 = vor.u32 %v14506_v27, %v12644_v34  ;;  %v14470_v51 = vld [vmem:[%s22029_s9 + $0x3a4] sm:$0xf]  ;;  %v12500_v9 = vld [vmem:[%s22029_s9 + $0x3b0] sm:$0xf0] }
 0xa4a   :  { %9550 = vmatpush.bf16.msrb.mxu3 %v13635_v17  ;;  %v14804_v17 = vld [vmem:[%s22029_s9 + $0xe0c] sm:$0xf0]  ;;  %v13571_v42 = vor.u32 %v14740_v63, %v13570_v22  ;;  %v14402_v63 = vld [vmem:[%s22029_s9 + $0x184] sm:$0xf]  ;;  %v12324_v0 = vld [vmem:[%s22029_s9 + $0x250] sm:$0xf0] }
 0xa4b   :  { %v13827_v44 = vor.u32 %v14804_v17, %v13826_v61  ;;  %v12484_v61 = vld [vmem:[%s22029_s9 + $0x390] sm:$0xf0]  ;;  %v14498_v17 = vld [vmem:[%s22029_s9 + $0x484] sm:$0xf] }
 0xa4c   :  { %9563 = vmatpush.bf16.msrb.mxu1 %v13763_v5  ;;  %9576 = vmatpush.bf16.msra.mxu0 %v13891_v15  ;;  %v12036_v5 = vld [vmem:[%s22029_s9 + $0x10] sm:$0xf0]  ;;  %v14478_v15 = vld [vmem:[%s22029_s9 + $0x3e4] sm:$0xf] }
 0xa4d   :  { %9589 = vmatpush.bf16.msrb.mxu2 %v12103_v28  ;;  %v12279_v28 = vor.u32 %v14414_v39, %v12276_v7  ;;  %v12039_v38 = vor.u32 %v14354_v6, %v12036_v5  ;;  %v12228_v39 = vld [vmem:[%s22029_s9 + $0x190] sm:$0xf0]  ;;  %v12503_v7 = vor.u32 %v14470_v51, %v12500_v9  ;;  %v14458_v52 = vld [vmem:[%s22029_s9 + $0x344] sm:$0xf] }
 0xa4e   :  { %9551 = vmatpush.bf16.msrb.mxu3 %v13619_v62  ;;  %v6484_v62 = vrot.slane %v6459_v36, 4  ;;  %v14502_v36 = vld [vmem:[%s22029_s9 + $0x4a4] sm:$0xf]  ;;  %v12612_v6 = vld [vmem:[%s22029_s9 + $0x490] sm:$0xf0]  ;;  %v12231_v5 = vor.u32 %v14402_v63, %v12228_v39 }
 0xa4f   :  { %v12452_v25 = vld [vmem:[%s22029_s9 + $0x350] sm:$0xf0]  ;;  %v14490_v26 = vld [vmem:[%s22029_s9 + $0x444] sm:$0xf] }
 0xa50   :  { %9564 = vmatpush.bf16.msrb.mxu1 %v13747_v10  ;;  %9577 = vmatpush.bf16.msra.mxu0 %v13875_v11  ;;  %v12407_v10 = vor.u32 %v14446_v21, %v12404_v1  ;;  %v12535_v11 = vor.u32 %v14478_v15, %v12532_v53  ;;  %v19751_v40 = vpack.c.bf16 %v6484_v62, %v6484_v62  ;;  %v14398_v21 = vld [vmem:[%s22029_s9 + $0x164] sm:$0xf]  ;;  %v12212_v1 = vld [vmem:[%s22029_s9 + $0x170] sm:$0xf0] }
 0xa51   :  { %9590 = vmatpush.bf16.msrb.mxu2 %v12087_v47  ;;  %v12663_v47 = vor.u32 %v14510_v19, %v12660_v54  ;;  %v12487_v15 = vor.u32 %v14466_v43, %v12484_v61  ;;  %v12340_v53 = vld [vmem:[%s22029_s9 + $0x270] sm:$0xf0]  ;;  %v14462_v19 = vld [vmem:[%s22029_s9 + $0x364] sm:$0xf] }
 0xa52   :  { %9552 = vmatpush.bf16.msrb.mxu3 %v13603_v59  ;;  %v12263_v59 = vor.u32 %v14410_v57, %v12260_v23  ;;  %v12468_v54 = vld [vmem:[%s22029_s9 + $0x370] sm:$0xf0]  ;;  %v14486_v9 = vld [vmem:[%s22029_s9 + $0x424] sm:$0xf] }
 0xa53   :  { %v12196_v57 = vld [vmem:[%s22029_s9 + $0x150] sm:$0xf0]  ;;  %v12471_v23 = vor.u32 %v14462_v19, %v12468_v54  ;;  %v14542_v39 = vld [vmem:[%s22029_s9 + $0x5e4] sm:$0xf] }
 0xa54   :  { %9565 = vmatpush.bf16.msrb.mxu1 %v13731_v46  ;;  %9578 = vmatpush.bf16.msra.mxu0 %v13859_v3  ;;  %v19749_v46 = vpack.c.bf16 %v6482_v12, %v6482_v12  ;;  %v14406_v3 = vld [vmem:[%s22029_s9 + $0x1a4] sm:$0xf]  ;;  %v12215_v12 = vor.u32 %v14398_v21, %v12212_v1  ;;  %v12580_v27 = vld [vmem:[%s22029_s9 + $0x450] sm:$0xf0] }
 0xa55   :  { %9591 = vmatpush.bf16.msrb.mxu2 %v12071_v48  ;;  %v12244_v48 = vld [vmem:[%s22029_s9 + $0x1b0] sm:$0xf0]  ;;  %v14450_v61 = vld [vmem:[%s22029_s9 + $0x304] sm:$0xf] }
 0xa56   :  { %9553 = vmatpush.bf16.msrb.mxu3 %v13587_v32  ;;  %v12628_v32 = vld [vmem:[%s22029_s9 + $0x4b0] sm:$0xf0]  ;;  %v12247_v22 = vor.u32 %v14406_v3, %v12244_v48  ;;  %v12455_v48 = vor.u32 %v14458_v52, %v12452_v25  ;;  %v14574_v21 = vld [vmem:[%s22029_s9 + $0x6e4] sm:$0xf] }
 0xa57   :  { %v12180_v3 = vld [vmem:[%s22029_s9 + $0x130] sm:$0xf0]  ;;  %v14638_v19 = vld [vmem:[%s22029_s9 + $0x8e4] sm:$0xf] }
 0xa58   :  { %9566 = vmatpush.bf16.msrb.mxu1 %v13715_v18  ;;  %9579 = vmatpush.bf16.msra.mxu0 %v13843_v49  ;;  %v12375_v18 = vor.u32 %v14438_v20, %v12372_v33  ;;  %v12631_v49 = vor.u32 %v14502_v36, %v12628_v32  ;;  %v12308_v20 = vld [vmem:[%s22029_s9 + $0x230] sm:$0xf0]  ;;  %v14454_v33 = vld [vmem:[%s22029_s9 + $0x324] sm:$0xf] }
 0xa59   :  { %9592 = vmatpush.bf16.msrb.mxu2 %v12055_v60  ;;  %v14434_v60 = vld [vmem:[%s22029_s9 + $0x284] sm:$0xf]  ;;  %v12436_v51 = vld [vmem:[%s22029_s9 + $0x330] sm:$0xf0] }
 0xa5a   :  { %9554 = vmatpush.bf16.msrb.mxu3 %v13571_v42  ;;  %v12359_v42 = vor.u32 %v14434_v60, %v12356_v37  ;;  %v12564_v36 = vld [vmem:[%s22029_s9 + $0x430] sm:$0xf0]  ;;  %v14418_v37 = vld [vmem:[%s22029_s9 + $0x204] sm:$0xf] }
 0xa5b   :  { %v12164_v63 = vld [vmem:[%s22029_s9 + $0x110] sm:$0xf0]  ;;  %v12567_v60 = vor.u32 %v14486_v9, %v12564_v36  ;;  %v14634_v25 = vld [vmem:[%s22029_s9 + $0x8c4] sm:$0xf] }
 0xa5c   :  { %9567 = vmatpush.bf16.msrb.mxu1 %v13699_v31  ;;  %9580 = vmatpush.bf16.msra.mxu0 %v13827_v44  ;;  %v14430_v31 = vld [vmem:[%s22029_s9 + $0x264] sm:$0xf]  ;;  %v12292_v43 = vld [vmem:[%s22029_s9 + $0x210] sm:$0xf0] }
 0xa5d   :  { %9593 = vmatpush.bf16.msrb.mxu2 %v12039_v38  ;;  %9555 = vmatmul.bf16.vlgmr.msrb.gmra.mxu3 %v19738_v41  ;;  %v14494_v44 = vld [vmem:[%s22029_s9 + $0x464] sm:$0xf]  ;;  %v12596_v38 = vld [vmem:[%s22029_s9 + $0x470] sm:$0xf0]  ;;  %v12343_v62 = vor.u32 %v14430_v31, %v12340_v53  ;;  %v12295_v31 = vor.u32 %v14418_v37, %v12292_v43 }
 0xa5e   :  { %9599 = vmatpush.bf16.msra.mxu3 %v12279_v28  ;;  %v12615_v28 = vor.u32 %v14498_v17, %v12612_v6  ;;  %v12420_v17 = vld [vmem:[%s22029_s9 + $0x310] sm:$0xf0]  ;;  %v14482_v6 = vld [vmem:[%s22029_s9 + $0x404] sm:$0xf] }
 0xa5f   :  { %9568 = vmatmul.bf16.vlgmr.msrb.gmra.mxu1 %v19749_v46  ;;  %9581 = vmatmul.bf16.vlgmr.msra.gmra.mxu0 %v19751_v40  ;;  %v12916_v1 = vld [vmem:[%s22029_s9 + $0x6f0] sm:$0xf0]  ;;  %v14626_v43 = vld [vmem:[%s22029_s9 + $0x884] sm:$0xf] }
 0xa60   :  { %9612 = vmatpush.bf16.msra.mxu1 %v12407_v10  ;;  %9625 = vmatpush.bf16.msrb.mxu0 %v12535_v11  ;;  %v14394_v10 = vld [vmem:[%s22029_s9 + $0x144] sm:$0xf]  ;;  %v12599_v11 = vor.u32 %v14494_v44, %v12596_v38  ;;  %v13044_v53 = vld [vmem:[%s22029_s9 + $0x7f0] sm:$0xf0]  ;;  %v12423_v44 = vor.u32 %v14450_v61, %v12420_v17 }
 0xa61   :  { %9638 = vmatpush.bf16.msra.mxu2 %v12663_v47  ;;  %v14426_v47 = vld [vmem:[%s22029_s9 + $0x244] sm:$0xf]  ;;  %v12199_v34 = vor.u32 %v14394_v10, %v12196_v57  ;;  %v13172_v54 = vld [vmem:[%s22029_s9 + $0x8f0] sm:$0xf0] }
 0xa62   :  { %9594 = vmatmul.bf16.vlgmr.msrb.gmra.mxu2 %v19296_v2  ;;  %9600 = vmatpush.bf16.msra.mxu3 %v12263_v59  ;;  %v12327_v59 = vor.u32 %v14426_v47, %v12324_v0  ;;  %v12772_v10 = vld [vmem:[%s22029_s9 + $0x5d0] sm:$0xf0]  ;;  %v14602_v0 = vld [vmem:[%s22029_s9 + $0x7c4] sm:$0xf] }
 0xa63   :  { %v12900_v47 = vld [vmem:[%s22029_s9 + $0x6d0] sm:$0xf0] }
 0xa64   :  { %9613 = vmatpush.bf16.msra.mxu1 %v12391_v35  ;;  %9626 = vmatpush.bf16.msrb.mxu0 %v12519_v16  ;;  %v14390_v35 = vld [vmem:[%s22029_s9 + $0x124] sm:$0xf]  ;;  %v12583_v16 = vor.u32 %v14490_v26, %v12580_v27  ;;  %v13028_v52 = vld [vmem:[%s22029_s9 + $0x7d0] sm:$0xf0] }
 0xa65   :  { %9639 = vmatpush.bf16.msra.mxu2 %v12647_v14  ;;  %v14422_v14 = vld [vmem:[%s22029_s9 + $0x224] sm:$0xf]  ;;  %v12183_v32 = vor.u32 %v14390_v35, %v12180_v3  ;;  %v13156_v26 = vld [vmem:[%s22029_s9 + $0x8d0] sm:$0xf0]  ;;  %v13031_v3 = vor.u32 %v14602_v0, %v13028_v52 }
 0xa66   :  { %9601 = vmatpush.bf16.msra.mxu3 %v12247_v22  ;;  %v14386_v22 = vld [vmem:[%s22029_s9 + $0x104] sm:$0xf]  ;;  %v12756_v35 = vld [vmem:[%s22029_s9 + $0x5b0] sm:$0xf0] }
 0xa67   :  { %v13140_v9 = vld [vmem:[%s22029_s9 + $0x8b0] sm:$0xf0]  ;;  %v14618_v52 = vld [vmem:[%s22029_s9 + $0x844] sm:$0xf] }
 0xa68   :  { %9614 = vmatpush.bf16.msra.mxu1 %v12375_v18  ;;  %9627 = vmatpush.bf16.msrb.mxu0 %v12503_v7  ;;  %v12311_v18 = vor.u32 %v14422_v14, %v12308_v20  ;;  %v12788_v7 = vld [vmem:[%s22029_s9 + $0x5f0] sm:$0xf0]  ;;  %v14598_v20 = vld [vmem:[%s22029_s9 + $0x7a4] sm:$0xf] }
 0xa69   :  { %9640 = vmatpush.bf16.msra.mxu2 %v12631_v49  ;;  %v12439_v49 = vor.u32 %v14454_v33, %v12436_v51  ;;  %v12884_v14 = vld [vmem:[%s22029_s9 + $0x6b0] sm:$0xf0]  ;;  %v14630_v51 = vld [vmem:[%s22029_s9 + $0x8a4] sm:$0xf] }
 0xa6a   :  { %9602 = vmatpush.bf16.msra.mxu3 %v12231_v5  ;;  %v12548_v5 = vld [vmem:[%s22029_s9 + $0x410] sm:$0xf0] }
 0xa6b   :  { %v12551_v38 = vor.u32 %v14482_v6, %v12548_v5  ;;  %v13012_v33 = vld [vmem:[%s22029_s9 + $0x7b0] sm:$0xf0]  ;;  %v14526_v5 = vld [vmem:[%s22029_s9 + $0x564] sm:$0xf] }
 0xa6c   :  { %9615 = vmatpush.bf16.msra.mxu1 %v12359_v42  ;;  %9628 = vmatpush.bf16.msrb.mxu0 %v12487_v15  ;;  %v12167_v42 = vor.u32 %v14386_v22, %v12164_v63  ;;  %v14606_v15 = vld [vmem:[%s22029_s9 + $0x7e4] sm:$0xf]  ;;  %v13015_v63 = vor.u32 %v14598_v20, %v13012_v33  ;;  %v12996_v37 = vld [vmem:[%s22029_s9 + $0x790] sm:$0xf0] }
 0xa6d   :  { %9641 = vmatpush.bf16.msra.mxu2 %v12615_v28  ;;  %v12791_v28 = vor.u32 %v14542_v39, %v12788_v7  ;;  %v13047_v57 = vor.u32 %v14606_v15, %v13044_v53  ;;  %v14530_v22 = vld [vmem:[%s22029_s9 + $0x584] sm:$0xf]  ;;  %v13143_v39 = vor.u32 %v14630_v51, %v13140_v9  ;;  %v13124_v61 = vld [vmem:[%s22029_s9 + $0x890] sm:$0xf0] }
 0xa6e   :  { %9603 = vmatpush.bf16.msra.mxu3 %v12215_v12  ;;  %v12919_v12 = vor.u32 %v14574_v21, %v12916_v1  ;;  %v14562_v7 = vld [vmem:[%s22029_s9 + $0x684] sm:$0xf]  ;;  %v13127_v1 = vor.u32 %v14626_v43, %v13124_v61  ;;  %v12980_v53 = vld [vmem:[%s22029_s9 + $0x770] sm:$0xf0] }
 0xa6f   :  { %v14558_v15 = vld [vmem:[%s22029_s9 + $0x664] sm:$0xf]  ;;  %v12964_v0 = vld [vmem:[%s22029_s9 + $0x750] sm:$0xf0] }
 0xa70   :  { %9616 = vmatpush.bf16.msra.mxu1 %v12343_v62  ;;  %9629 = vmatpush.bf16.msrb.mxu0 %v12471_v23  ;;  %v14538_v62 = vld [vmem:[%s22029_s9 + $0x5c4] sm:$0xf]  ;;  %v13175_v23 = vor.u32 %v14638_v19, %v13172_v54  ;;  %v13108_v54 = vld [vmem:[%s22029_s9 + $0x870] sm:$0xf0] }
 0xa71   :  { %9642 = vmatpush.bf16.msra.mxu2 %v12599_v11  ;;  %v14570_v11 = vld [vmem:[%s22029_s9 + $0x6c4] sm:$0xf]  ;;  %v12775_v27 = vor.u32 %v14538_v62, %v12772_v10  ;;  %v12708_v62 = vld [vmem:[%s22029_s9 + $0x550] sm:$0xf0] }
 0xa72   :  { %9604 = vmatpush.bf16.msra.mxu3 %v12199_v34  ;;  %v12903_v34 = vor.u32 %v14570_v11, %v12900_v47  ;;  %v14622_v19 = vld [vmem:[%s22029_s9 + $0x864] sm:$0xf]  ;;  %v12836_v11 = vld [vmem:[%s22029_s9 + $0x650] sm:$0xf0] }
 0xa73   :  { %v14586_v47 = vld [vmem:[%s22029_s9 + $0x744] sm:$0xf]  ;;  %v12948_v20 = vld [vmem:[%s22029_s9 + $0x730] sm:$0xf0] }
 0xa74   :  { %9617 = vmatpush.bf16.msra.mxu1 %v12327_v59  ;;  %9630 = vmatpush.bf16.msrb.mxu0 %v12455_v48  ;;  %v14534_v59 = vld [vmem:[%s22029_s9 + $0x5a4] sm:$0xf]  ;;  %v13159_v48 = vor.u32 %v14634_v25, %v13156_v26  ;;  %v13092_v25 = vld [vmem:[%s22029_s9 + $0x850] sm:$0xf0] }
 0xa75   :  { %9643 = vmatpush.bf16.msra.mxu2 %v12583_v16  ;;  %v14566_v16 = vld [vmem:[%s22029_s9 + $0x6a4] sm:$0xf]  ;;  %v12759_v36 = vor.u32 %v14534_v59, %v12756_v35  ;;  %v12692_v59 = vld [vmem:[%s22029_s9 + $0x530] sm:$0xf0]  ;;  %v12967_v35 = vor.u32 %v14586_v47, %v12964_v0 }
 0xa76   :  { %9605 = vmatpush.bf16.msra.mxu3 %v12183_v32  ;;  %v12887_v32 = vor.u32 %v14566_v16, %v12884_v14  ;;  %v12820_v16 = vld [vmem:[%s22029_s9 + $0x630] sm:$0xf0]  ;;  %v14582_v14 = vld [vmem:[%s22029_s9 + $0x724] sm:$0xf] }
 0xa77   :  { %v14614_v33 = vld [vmem:[%s22029_s9 + $0x824] sm:$0xf]  ;;  %v13076_v51 = vld [vmem:[%s22029_s9 + $0x830] sm:$0xf0] }
 0xa78   :  { %9618 = vmatpush.bf16.msra.mxu1 %v12311_v18  ;;  %9631 = vmatpush.bf16.msrb.mxu0 %v12439_v49  ;;  %v12740_v18 = vld [vmem:[%s22029_s9 + $0x590] sm:$0xf0]  ;;  %v14610_v61 = vld [vmem:[%s22029_s9 + $0x804] sm:$0xf] }
 0xa79   :  { %9644 = vmatpush.bf16.msra.mxu2 %v12567_v60  ;;  %v12868_v49 = vld [vmem:[%s22029_s9 + $0x690] sm:$0xf0]  ;;  %v14594_v60 = vld [vmem:[%s22029_s9 + $0x784] sm:$0xf]  ;;  %v12743_v17 = vor.u32 %v14530_v22, %v12740_v18 }
 0xa7a   :  { %9606 = vmatpush.bf16.msra.mxu3 %v12167_v42  ;;  %v12871_v6 = vor.u32 %v14562_v7, %v12868_v49  ;;  %v12724_v42 = vld [vmem:[%s22029_s9 + $0x570] sm:$0xf0]  ;;  %v12999_v21 = vor.u32 %v14594_v60, %v12996_v37  ;;  %v14670_v18 = vld [vmem:[%s22029_s9 + $0x9e4] sm:$0xf]  ;;  %v13079_v7 = vor.u32 %v14614_v33, %v13076_v51  ;;  %v20175_v51 = vld [vmem:[%s22030_s10] sm:$0xf] }
 0xa7b   :  { %v12676_v22 = vld [vmem:[%s22029_s9 + $0x510] sm:$0xf0]  ;;  %v14546_v49 = vld [vmem:[%s22029_s9 + $0x604] sm:$0xf] }
 0xa7c   :  { %9619 = vmatpush.bf16.msra.mxu1 %v12295_v31  ;;  %9632 = vmatpush.bf16.msrb.mxu0 %v12423_v44  ;;  %v14590_v31 = vld [vmem:[%s22029_s9 + $0x764] sm:$0xf]  ;;  %v12727_v44 = vor.u32 %v14526_v5, %v12724_v42  ;;  %v12804_v60 = vld [vmem:[%s22029_s9 + $0x610] sm:$0xf0] }
 0xa7d   :  { %9645 = vmatpush.bf16.msra.mxu2 %v12551_v38  ;;  %9607 = vmatmul.bf16.vlgmr.msra.gmra.mxu3 %v19302_v50  ;;  %v12983_v10 = vor.u32 %v14590_v31, %v12980_v53  ;;  %v14578_v37 = vld [vmem:[%s22029_s9 + $0x704] sm:$0xf]  ;;  %v12932_v43 = vld [vmem:[%s22029_s9 + $0x710] sm:$0xf0] }
 0xa7e   :  { %9651 = vmatpush.bf16.msrb.mxu3 %v12791_v28  ;;  %v12852_v28 = vld [vmem:[%s22029_s9 + $0x670] sm:$0xf0]  ;;  %v14702_v5 = vld [vmem:[%s22029_s9 + $0xae4] sm:$0xf] }
 0xa7f   :  { %9620 = vmatmul.bf16.vlgmr.msra.gmra.mxu1 %v19304_v24  ;;  %9633 = vmatmul.bf16.vlgmr.msrb.gmra.mxu0 %v19306_v56  ;;  %v12855_v38 = vor.u32 %v14558_v15, %v12852_v28  ;;  %v13428_v42 = vld [vmem:[%s22029_s9 + $0xaf0] sm:$0xf0]  ;;  %v12807_v15 = vor.u32 %v14546_v49, %v12804_v60  ;;  %v14766_v31 = vld [vmem:[%s22029_s9 + $0xce4] sm:$0xf] }
 0xa80   :  { %9664 = vmatpush.bf16.msrb.mxu1 %v12919_v12  ;;  %9677 = vmatpush.bf16.msra.mxu0 %v13047_v57  ;;  %v14522_v12 = vld [vmem:[%s22029_s9 + $0x544] sm:$0xf]  ;;  %v13111_v57 = vor.u32 %v14622_v19, %v13108_v54  ;;  %v13556_v28 = vld [vmem:[%s22029_s9 + $0xbf0] sm:$0xf0]  ;;  %v12935_v19 = vor.u32 %v14578_v37, %v12932_v43  ;;  %v6983_v43 = vperm.slane %v20175_v51, 0 }
 0xa81   :  { %9690 = vmatpush.bf16.msrb.mxu2 %v13175_v23  ;;  %v14554_v23 = vld [vmem:[%s22029_s9 + $0x644] sm:$0xf]  ;;  %v12711_v26 = vor.u32 %v14522_v12, %v12708_v62  ;;  %v13684_v53 = vld [vmem:[%s22029_s9 + $0xcf0] sm:$0xf0] }
 0xa82   :  { %9646 = vmatmul.bf16.vlgmr.msra.gmra.mxu2 %v19406_v29  ;;  %9652 = vmatpush.bf16.msrb.mxu3 %v12775_v27  ;;  %v12839_v27 = vor.u32 %v14554_v23, %v12836_v11  ;;  %v13284_v12 = vld [vmem:[%s22029_s9 + $0x9d0] sm:$0xf0]  ;;  %v14730_v11 = vld [vmem:[%s22029_s9 + $0xbc4] sm:$0xf] }
 0xa83   :  { %v13412_v23 = vld [vmem:[%s22029_s9 + $0xad0] sm:$0xf0]  ;;  %v14762_v0 = vld [vmem:[%s22029_s9 + $0xcc4] sm:$0xf] }
 0xa84   :  { %9665 = vmatpush.bf16.msrb.mxu1 %v12903_v34  ;;  %9678 = vmatpush.bf16.msra.mxu0 %v13031_v3  ;;  %v14518_v34 = vld [vmem:[%s22029_s9 + $0x524] sm:$0xf]  ;;  %v13095_v3 = vor.u32 %v14618_v52, %v13092_v25  ;;  %v13540_v47 = vld [vmem:[%s22029_s9 + $0xbd0] sm:$0xf0] }
 0xa85   :  { %9691 = vmatpush.bf16.msrb.mxu2 %v13159_v48  ;;  %v14550_v48 = vld [vmem:[%s22029_s9 + $0x624] sm:$0xf]  ;;  %v12695_v9 = vor.u32 %v14518_v34, %v12692_v59  ;;  %v13668_v52 = vld [vmem:[%s22029_s9 + $0xcd0] sm:$0xf0] }
 0xa86   :  { %9653 = vmatpush.bf16.msrb.mxu3 %v12759_v36  ;;  %v14514_v36 = vld [vmem:[%s22029_s9 + $0x504] sm:$0xf]  ;;  %v13268_v34 = vld [vmem:[%s22029_s9 + $0x9b0] sm:$0xf0] }
 0xa87   :  { %v14694_v59 = vld [vmem:[%s22029_s9 + $0xaa4] sm:$0xf]  ;;  %v13652_v33 = vld [vmem:[%s22029_s9 + $0xcb0] sm:$0xf0] }
 0xa88   :  { %9666 = vmatpush.bf16.msrb.mxu1 %v12887_v32  ;;  %9679 = vmatpush.bf16.msra.mxu0 %v13015_v63  ;;  %v12823_v32 = vor.u32 %v14550_v48, %v12820_v16  ;;  %v13300_v63 = vld [vmem:[%s22029_s9 + $0x9f0] sm:$0xf0]  ;;  %v14726_v16 = vld [vmem:[%s22029_s9 + $0xba4] sm:$0xf] }
 0xa89   :  { %9692 = vmatpush.bf16.msrb.mxu2 %v13143_v39  ;;  %v12951_v39 = vor.u32 %v14582_v14, %v12948_v20  ;;  %v13396_v48 = vld [vmem:[%s22029_s9 + $0xab0] sm:$0xf0]  ;;  %v14758_v20 = vld [vmem:[%s22029_s9 + $0xca4] sm:$0xf] }
 0xa8a   :  { %9654 = vmatpush.bf16.msrb.mxu3 %v12743_v17  ;;  %v13060_v17 = vld [vmem:[%s22029_s9 + $0x810] sm:$0xf0]  ;;  %v13655_v49 = vor.u32 %v14758_v20, %v13652_v33  ;;  %v14722_v37 = vld [vmem:[%s22029_s9 + $0xb84] sm:$0xf] }
 0xa8b   :  { %v13063_v54 = vor.u32 %v14610_v61, %v13060_v17  ;;  %v13524_v14 = vld [vmem:[%s22029_s9 + $0xbb0] sm:$0xf0]  ;;  %v14754_v17 = vld [vmem:[%s22029_s9 + $0xc84] sm:$0xf] }
 0xa8c   :  { %9667 = vmatpush.bf16.msrb.mxu1 %v12871_v6  ;;  %9680 = vmatpush.bf16.msra.mxu0 %v12999_v21  ;;  %v12679_v6 = vor.u32 %v14514_v36, %v12676_v22  ;;  %v14734_v21 = vld [vmem:[%s22029_s9 + $0xbe4] sm:$0xf]  ;;  %v13399_v36 = vor.u32 %v14694_v59, %v13396_v48  ;;  %v13380_v60 = vld [vmem:[%s22029_s9 + $0xa90] sm:$0xf0] }
 0xa8d   :  { %9693 = vmatpush.bf16.msrb.mxu2 %v13127_v1  ;;  %v13303_v1 = vor.u32 %v14670_v18, %v13300_v63  ;;  %v13559_v62 = vor.u32 %v14734_v21, %v13556_v28  ;;  %v14658_v18 = vld [vmem:[%s22029_s9 + $0x984] sm:$0xf]  ;;  %v13252_v63 = vld [vmem:[%s22029_s9 + $0x990] sm:$0xf0] }
 0xa8e   :  { %9655 = vmatpush.bf16.msrb.mxu3 %v12727_v44  ;;  %v13431_v44 = vor.u32 %v14702_v5, %v13428_v42  ;;  %v13508_v61 = vld [vmem:[%s22029_s9 + $0xb90] sm:$0xf0]  ;;  %v13255_v5 = vor.u32 %v14658_v18, %v13252_v63  ;;  %v14682_v59 = vld [vmem:[%s22029_s9 + $0xa44] sm:$0xf] }
 0xa8f   :  { %v13511_v28 = vor.u32 %v14722_v37, %v13508_v61  ;;  %v13476_v48 = vld [vmem:[%s22029_s9 + $0xb50] sm:$0xf0]  ;;  %v14742_v37 = vld [vmem:[%s22029_s9 + $0xc24] sm:$0xf] }
 0xa90   :  { %9668 = vmatpush.bf16.msrb.mxu1 %v12855_v38  ;;  %9681 = vmatpush.bf16.msra.mxu0 %v12983_v10  ;;  %v14666_v38 = vld [vmem:[%s22029_s9 + $0x9c4] sm:$0xf]  ;;  %v13687_v10 = vor.u32 %v14766_v31, %v13684_v53 }
 0xa91   :  { %9694 = vmatpush.bf16.msrb.mxu2 %v13111_v57  ;;  %v14698_v57 = vld [vmem:[%s22029_s9 + $0xac4] sm:$0xf]  ;;  %v13287_v25 = vor.u32 %v14666_v38, %v13284_v12  ;;  %v13492_v38 = vld [vmem:[%s22029_s9 + $0xb70] sm:$0xf0] }
 0xa92   :  { %9656 = vmatpush.bf16.msrb.mxu3 %v12711_v26  ;;  %v13415_v26 = vor.u32 %v14698_v57, %v13412_v23  ;;  %v14750_v12 = vld [vmem:[%s22029_s9 + $0xc64] sm:$0xf] }
 0xa94   :  { %9669 = vmatpush.bf16.msrb.mxu1 %v12839_v27  ;;  %9682 = vmatpush.bf16.msra.mxu0 %v12967_v35  ;;  %v14662_v27 = vld [vmem:[%s22029_s9 + $0x9a4] sm:$0xf]  ;;  %v13543_v35 = vor.u32 %v14730_v11, %v13540_v47 }
 0xa95   :  { %9695 = vmatpush.bf16.msrb.mxu2 %v13095_v3  ;;  %v13671_v3 = vor.u32 %v14762_v0, %v13668_v52  ;;  %v14650_v52 = vld [vmem:[%s22029_s9 + $0x944] sm:$0xf] }
 0xa96   :  { %9657 = vmatpush.bf16.msrb.mxu3 %v12695_v9  ;;  %v13271_v9 = vor.u32 %v14662_v27, %v13268_v34 }
 0xa98   :  { %9670 = vmatpush.bf16.msrb.mxu1 %v12823_v32  ;;  %9683 = vmatpush.bf16.msra.mxu0 %v12951_v39  ;;  %v14690_v39 = vld [vmem:[%s22029_s9 + $0xa84] sm:$0xf] }
 0xa99   :  { %9696 = vmatpush.bf16.msrb.mxu2 %v13079_v7  ;;  %v13527_v7 = vor.u32 %v14726_v16, %v13524_v14  ;;  %v13383_v42 = vor.u32 %v14690_v39, %v13380_v60  ;;  %v14746_v16 = vld [vmem:[%s22029_s9 + $0xc44] sm:$0xf]  ;;  %v13604_v14 = vld [vmem:[%s22029_s9 + $0xc50] sm:$0xf0] }
 0xa9a   :  { %9658 = vmatpush.bf16.msrb.mxu3 %v12679_v6  ;;  %v13636_v6 = vld [vmem:[%s22029_s9 + $0xc90] sm:$0xf0]  ;;  %v13607_v63 = vor.u32 %v14746_v16, %v13604_v14  ;;  %v14678_v39 = vld [vmem:[%s22029_s9 + $0xa24] sm:$0xf] }
 0xa9b   :  { %v9413_v32 = vpop.f32.mrf.mxu1  ;;  %v9426_v22 = vpop.f32.mrf.mxu0  ;;  %v13639_v31 = vor.u32 %v14754_v17, %v13636_v6  ;;  %v13460_v60 = vld [vmem:[%s22029_s9 + $0xb30] sm:$0xf0]  ;;  %v14642_v6 = vld [vmem:[%s22029_s9 + $0x904] sm:$0xf] }
 0xa9c   :  { %9671 = vmatpush.bf16.msrb.mxu1 %v12807_v15  ;;  %9684 = vmatpush.bf16.msra.mxu0 %v12935_v19  ;;  %v13236_v15 = vld [vmem:[%s22029_s9 + $0x970] sm:$0xf0]  ;;  %v14686_v19 = vld [vmem:[%s22029_s9 + $0xa64] sm:$0xf] }
 0xa9d   :  { %9697 = vmatpush.bf16.msrb.mxu2 %v13063_v54  ;;  %9659 = vmatmul.bf16.vlgmr.msrb.gmra.mxu3 %v19414_v30  ;;  %v13364_v54 = vld [vmem:[%s22029_s9 + $0xa70] sm:$0xf0] }
 0xa9e   :  { %9703 = vmatpush.bf16.msra.mxu3 %v13303_v1  ;;  %v14654_v1 = vld [vmem:[%s22029_s9 + $0x964] sm:$0xf]  ;;  %v13367_v11 = vor.u32 %v14686_v19, %v13364_v54  ;;  %v13316_v54 = vld [vmem:[%s22029_s9 + $0xa10] sm:$0xf0] }
 0xa9f   :  { %9672 = vmatmul.bf16.vlgmr.msrb.gmra.mxu1 %v19420_v8  ;;  %9685 = vmatmul.bf16.vlgmr.msra.gmra.mxu0 %v19422_v55  ;;  %v9400_v21 = vpop.f32.mrf.mxu3  ;;  %v13239_v57 = vor.u32 %v14654_v1, %v13236_v15  ;;  %v14798_v1 = vld [vmem:[%s22029_s9 + $0xde4] sm:$0xf]  ;;  %v13812_v15 = vld [vmem:[%s22029_s9 + $0xdf0] sm:$0xf0] }
 0xaa0   :  { %9716 = vmatpush.bf16.msra.mxu1 %v13431_v44  ;;  %9729 = vmatpush.bf16.msrb.mxu0 %v13559_v62  ;;  %v9401_v53 = vadd.f32 %v9400_v21, %v6983_v43  ;;  %v14718_v44 = vld [vmem:[%s22029_s9 + $0xb64] sm:$0xf]  ;;  %v13620_v62 = vld [vmem:[%s22029_s9 + $0xc70] sm:$0xf0] }
 0xaa1   :  { %9742 = vmatpush.bf16.msra.mxu2 %v13687_v10  ;;  %v13495_v27 = vor.u32 %v14718_v44, %v13492_v38  ;;  %v13623_v34 = vor.u32 %v14750_v12, %v13620_v62  ;;  %v13588_v43 = vld [vmem:[%s22029_s9 + $0xc30] sm:$0xf0]  ;;  %v14674_v19 = vld [vmem:[%s22029_s9 + $0xa04] sm:$0xf] }
 0xaa2   :  { %9698 = vmatmul.bf16.vlgmr.msrb.gmra.mxu2 %v19542_v13  ;;  %9704 = vmatpush.bf16.msra.mxu3 %v13287_v25  ;;  %v9414_v10 = vadd.f32 %v9413_v32, %v9401_v53  ;;  %v9439_v23 = vpop.f32.mrf.mxu2  ;;  %v13220_v25 = vld [vmem:[%s22029_s9 + $0x950] sm:$0xf0]  ;;  %v14646_v32 = vld [vmem:[%s22029_s9 + $0x924] sm:$0xf] }
 0xaa3   :  { %v9415_v47 = vpop.f32.mrf.mxu1  ;;  %v9428_v0 = vpop.f32.mrf.mxu0  ;;  %v13223_v33 = vor.u32 %v14650_v52, %v13220_v25  ;;  %v13188_v21 = vld [vmem:[%s22029_s9 + $0x910] sm:$0xf0]  ;;  %v14706_v44 = vld [vmem:[%s22029_s9 + $0xb04] sm:$0xf]  ;;  %v14385_v52 = vld [vmem:[%s22029_s9 + $0xf4] sm:$0xf0] }
 0xaa4   :  { %9717 = vmatpush.bf16.msra.mxu1 %v13415_v26  ;;  %9730 = vmatpush.bf16.msrb.mxu0 %v13543_v35  ;;  %v9427_v26 = vadd.f32 %v9426_v22, %v9414_v10  ;;  %v13348_v35 = vld [vmem:[%s22029_s9 + $0xa50] sm:$0xf0]  ;;  %v14738_v12 = vld [vmem:[%s22029_s9 + $0xc04] sm:$0xf]  ;;  %v13191_v10 = vor.u32 %v14642_v6, %v13188_v21  ;;  %v13815_v47 = vor.u32 %v14798_v1, %v13812_v15  ;;  %v12282_v25 = vld [vmem:[%s22029_s9 + $0x1e8] sm:$0xf] }
 0xaa5   :  { %9743 = vmatpush.bf16.msra.mxu2 %v13671_v3  ;;  %v14714_v3 = vld [vmem:[%s22029_s9 + $0xb44] sm:$0xf]  ;;  %v13204_v22 = vld [vmem:[%s22029_s9 + $0x930] sm:$0xf0]  ;;  %v13319_v0 = vor.u32 %v14674_v19, %v13316_v54  ;;  %v12122_v1 = vld [vmem:[%s22029_s9 + $0xa8] sm:$0xf] }
 0xaa6   :  { %9705 = vmatpush.bf16.msra.mxu3 %v13271_v9  ;;  %v9440_v20 = vadd.f32 %v9439_v23, %v9427_v26  ;;  %v13351_v9 = vor.u32 %v14682_v59, %v13348_v35  ;;  %v13479_v18 = vor.u32 %v14714_v3, %v13476_v48  ;;  %v13207_v61 = vor.u32 %v14646_v32, %v13204_v22  ;;  %v13444_v38 = vld [vmem:[%s22029_s9 + $0xb10] sm:$0xf0]  ;;  %v14417_v26 = vld [vmem:[%s22029_s9 + $0x1f4] sm:$0xf0]  ;;  %v14794_v48 = vld [vmem:[%s22029_s9 + $0xdc4] sm:$0xf] }
 0xaa7   :  { %v13572_v62 = vld [vmem:[%s22029_s9 + $0xc10] sm:$0xf0]  ;;  %v12138_v32 = vld [vmem:[%s22029_s9 + $0xc8] sm:$0xf] }
 0xaa8   :  { %9718 = vmatpush.bf16.msra.mxu1 %v13399_v36  ;;  %9731 = vmatpush.bf16.msrb.mxu0 %v13527_v7  ;;  %v9402_v36 = vpop.f32.mrf.mxu3  ;;  %v13332_v7 = vld [vmem:[%s22029_s9 + $0xa30] sm:$0xf0] }
 0xaa9   :  { %9744 = vmatpush.bf16.msra.mxu2 %v13655_v49  ;;  %v14710_v49 = vld [vmem:[%s22029_s9 + $0xb24] sm:$0xf]  ;;  %v13940_v23 = vld [vmem:[%s22029_s9 + $0xef0] sm:$0xf0] }
 0xaaa   :  { %9706 = vmatpush.bf16.msra.mxu3 %v13255_v5  ;;  %v9441_v17 = vpop.f32.mrf.mxu2  ;;  %v13335_v5 = vor.u32 %v14678_v39, %v13332_v7  ;;  %v13796_v16 = vld [vmem:[%s22029_s9 + $0xdd0] sm:$0xf0]  ;;  %v14826_v36 = vld [vmem:[%s22029_s9 + $0xec4] sm:$0xf]  ;;  %v12266_v39 = vld [vmem:[%s22029_s9 + $0x1c8] sm:$0xf] }
 0xaab   :  { %v14413_v7 = vld [vmem:[%s22029_s9 + $0x1d4] sm:$0xf0]  ;;  %v13780_v17 = vld [vmem:[%s22029_s9 + $0xdb0] sm:$0xf0] }
 0xaac   :  { %9719 = vmatpush.bf16.msra.mxu1 %v13383_v42  ;;  %9732 = vmatpush.bf16.msrb.mxu0 %v13511_v28  ;;  %v9465_v42 = vpop.f32.mrf.mxu1  ;;  %v13463_v28 = vor.u32 %v14710_v49, %v13460_v60  ;;  %v9478_v53 = vpop.f32.mrf.mxu0  ;;  %v13799_v49 = vor.u32 %v14794_v48, %v13796_v16  ;;  %v13908_v21 = vld [vmem:[%s22029_s9 + $0xeb0] sm:$0xf0] }
 0xaad   :  { %9745 = vmatpush.bf16.msra.mxu2 %v13639_v31  ;;  %v13591_v31 = vor.u32 %v14742_v37, %v13588_v43 }
 0xaae   :  { %9707 = vmatpush.bf16.msra.mxu3 %v13239_v57  ;;  %v14830_v57 = vld [vmem:[%s22029_s9 + $0xee4] sm:$0xf] }
 0xaaf   :  { %v13943_v3 = vor.u32 %v14830_v57, %v13940_v23  ;;  %v14818_v23 = vld [vmem:[%s22029_s9 + $0xe84] sm:$0xf] }
 0xab0   :  { %9720 = vmatpush.bf16.msra.mxu1 %v13367_v11  ;;  %9733 = vmatpush.bf16.msrb.mxu0 %v13495_v27  ;;  %v12154_v11 = vld [vmem:[%s22029_s9 + $0xe8] sm:$0xf]  ;;  %v13447_v27 = vor.u32 %v14706_v44, %v13444_v38  ;;  %v9452_v59 = vpop.f32.mrf.mxu3  ;;  %v14786_v38 = vld [vmem:[%s22029_s9 + $0xd84] sm:$0xf] }
 0xab1   :  { %9746 = vmatpush.bf16.msra.mxu2 %v13623_v34  ;;  %v13575_v34 = vor.u32 %v14738_v12, %v13572_v62  ;;  %v9453_v35 = vadd.f32 %v9452_v59, %v9440_v20  ;;  %v12155_v14 = vor.u32 %v14385_v52, %v12154_v11  ;;  %v13924_v20 = vld [vmem:[%s22029_s9 + $0xed0] sm:$0xf0]  ;;  %v12234_v52 = vld [vmem:[%s22029_s9 + $0x188] sm:$0xf] }
 0xab2   :  { %9708 = vmatpush.bf16.msra.mxu3 %v13223_v33  ;;  %v12283_v33 = vor.u32 %v14417_v26, %v12282_v25  ;;  %v13927_v43 = vor.u32 %v14826_v36, %v13924_v20  ;;  %v13764_v12 = vld [vmem:[%s22029_s9 + $0xd90] sm:$0xf0]  ;;  %v14405_v25 = vld [vmem:[%s22029_s9 + $0x194] sm:$0xf0]  ;;  %v12218_v20 = vld [vmem:[%s22029_s9 + $0x168] sm:$0xf] }
 0xab3   :  { %v9466_v22 = vadd.f32 %v9465_v42, %v9453_v35  ;;  %v14822_v42 = vld [vmem:[%s22029_s9 + $0xea4] sm:$0xf]  ;;  %v13892_v11 = vld [vmem:[%s22029_s9 + $0xe90] sm:$0xf0]  ;;  %v13767_v26 = vor.u32 %v14786_v38, %v13764_v12  ;;  %v12235_v16 = vor.u32 %v14405_v25, %v12234_v52  ;;  %v14369_v36 = vld [vmem:[%s22029_s9 + $0x74] sm:$0xf0] }
 0xab4   :  { %9721 = vmatpush.bf16.msra.mxu1 %v13351_v9  ;;  %9734 = vmatpush.bf16.msrb.mxu0 %v13479_v18  ;;  %v9491_v9 = vpop.f32.mrf.mxu2  ;;  %v9467_v18 = vpop.f32.mrf.mxu1  ;;  %v13911_v44 = vor.u32 %v14822_v42, %v13908_v21  ;;  %v13895_v59 = vor.u32 %v14818_v23, %v13892_v11  ;;  %v14782_v35 = vld [vmem:[%s22029_s9 + $0xd64] sm:$0xf]  ;;  %v14397_v42 = vld [vmem:[%s22029_s9 + $0x154] sm:$0xf0]  ;;  %v12186_v11 = vld [vmem:[%s22029_s9 + $0x128] sm:$0xf] }
 0xab5   :  { %9747 = vmatpush.bf16.msra.mxu2 %v13607_v63  ;;  %v14381_v63 = vld [vmem:[%s22029_s9 + $0xd4] sm:$0xf0]  ;;  %v9480_v60 = vpop.f32.mrf.mxu0  ;;  %v9479_v37 = vadd.f32 %v9478_v53, %v9466_v22  ;;  %v14806_v12 = vld [vmem:[%s22029_s9 + $0xe24] sm:$0xf] }
 0xab6   :  { %9709 = vmatpush.bf16.msra.mxu3 %v13207_v61  ;;  %v14790_v61 = vld [vmem:[%s22029_s9 + $0xda4] sm:$0xf]  ;;  %v12139_v6 = vor.u32 %v14381_v63, %v12138_v32  ;;  %v14409_v53 = vld [vmem:[%s22029_s9 + $0x1b4] sm:$0xf0] }
 0xab7   :  { %v9492_v15 = vadd.f32 %v9491_v9, %v9479_v37  ;;  %v13783_v19 = vor.u32 %v14790_v61, %v13780_v17  ;;  %v12090_v9 = vld [vmem:[%s22029_s9 + $0x68] sm:$0xf]  ;;  %v14401_v32 = vld [vmem:[%s22029_s9 + $0x174] sm:$0xf0]  ;;  %v14778_v63 = vld [vmem:[%s22029_s9 + $0xd44] sm:$0xf] }
 0xab8   :  { %9722 = vmatpush.bf16.msra.mxu1 %v13335_v5  ;;  %9735 = vmatpush.bf16.msrb.mxu0 %v13463_v28  ;;  %v12267_v5 = vor.u32 %v14413_v7, %v12266_v39  ;;  %v14377_v28 = vld [vmem:[%s22029_s9 + $0xb4] sm:$0xf0]  ;;  %v9454_v54 = vpop.f32.mrf.mxu3  ;;  %v13732_v39 = vld [vmem:[%s22029_s9 + $0xd50] sm:$0xf0]  ;;  %v12219_v60 = vor.u32 %v14401_v32, %v12218_v20  ;;  %v14810_v37 = vld [vmem:[%s22029_s9 + $0xe44] sm:$0xf] }
 0xab9   :  { %9748 = vmatpush.bf16.msra.mxu2 %v13591_v31  ;;  %v12250_v31 = vld [vmem:[%s22029_s9 + $0x1a8] sm:$0xf]  ;;  %v12123_v62 = vor.u32 %v14377_v28, %v12122_v1  ;;  %v13735_v1 = vor.u32 %v14778_v63, %v13732_v39  ;;  %v13716_v54 = vld [vmem:[%s22029_s9 + $0xd30] sm:$0xf0]  ;;  %v14361_v23 = vld [vmem:[%s22029_s9 + $0x34] sm:$0xf0] }
 0xaba   :  { %9710 = vmatpush.bf16.msra.mxu3 %v13191_v10  ;;  %v12251_v10 = vor.u32 %v14409_v53, %v12250_v31  ;;  %v12074_v61 = vld [vmem:[%s22029_s9 + $0x48] sm:$0xf]  ;;  %v14770_v52 = vld [vmem:[%s22029_s9 + $0xd04] sm:$0xf]  ;;  %v14389_v20 = vld [vmem:[%s22029_s9 + $0x114] sm:$0xf0] }
 0xabb   :  { %v14481_v63 = vld [vmem:[%s22029_s9 + $0x3f4] sm:$0xf0]  ;;  %v12666_v39 = vld [vmem:[%s22029_s9 + $0x4e8] sm:$0xf] }
 0xabc   :  { %9723 = vmatpush.bf16.msra.mxu1 %v13319_v0  ;;  %9736 = vmatpush.bf16.msrb.mxu0 %v13447_v27  ;;  %v9493_v57 = vpop.f32.mrf.mxu2  ;;  %v14373_v0 = vld [vmem:[%s22029_s9 + $0x94] sm:$0xf0]  ;;  %v9517_v27 = vpop.f32.mrf.mxu1 }
 0xabd   :  { %9749 = vmatpush.bf16.msra.mxu2 %v13575_v34  ;;  %9711 = vmatmul.bf16.vlgmr.msra.gmra.mxu3 %v19544_v4  ;;  %v9530_v34 = vpop.f32.mrf.mxu0 }
 0xabe   :  { %9755 = vmatpush.bf16.msrb.mxu3 %v13815_v47  ;;  %v12106_v47 = vld [vmem:[%s22029_s9 + $0x88] sm:$0xf] }
 0xabf   :  { %9724 = vmatmul.bf16.vlgmr.msra.gmra.mxu1 %v19552_v45  ;;  %9737 = vmatmul.bf16.vlgmr.msrb.gmra.mxu0 %v19563_v58  ;;  %v12107_v48 = vor.u32 %v14373_v0, %v12106_v47  ;;  %v14393_v47 = vld [vmem:[%s22029_s9 + $0x134] sm:$0xf0] }
 0xac0   :  { %9768 = vmatpush.bf16.msrb.mxu1 %v13943_v3  ;;  %9781 = vmatpush.bf16.msra.mxu0 %v12155_v14  ;;  %v13748_v3 = vld [vmem:[%s22029_s9 + $0xd70] sm:$0xf0]  ;;  %v14814_v14 = vld [vmem:[%s22029_s9 + $0xe64] sm:$0xf]  ;;  %v9504_v7 = vpop.f32.mrf.mxu3 }
 0xac1   :  { %9794 = vmatpush.bf16.msrb.mxu2 %v12283_v33  ;;  %v13876_v33 = vld [vmem:[%s22029_s9 + $0xe70] sm:$0xf0]  ;;  %v13751_v22 = vor.u32 %v14782_v35, %v13748_v3  ;;  %v9505_v17 = vadd.f32 %v9504_v7, %v9492_v15 }
 0xac2   :  { %9750 = vmatmul.bf16.vlgmr.msra.gmra.mxu2 %v19738_v41  ;;  %9756 = vmatpush.bf16.msrb.mxu3 %v13799_v49  ;;  %v13879_v18 = vor.u32 %v14814_v14, %v13876_v33  ;;  %v12091_v49 = vor.u32 %v14369_v36, %v12090_v9  ;;  %v13828_v14 = vld [vmem:[%s22029_s9 + $0xe10] sm:$0xf0]  ;;  %v12042_v33 = vld [vmem:[%s22029_s9 + $0x8] sm:$0xf]  ;;  %v14357_v9 = vld [vmem:[%s22029_s9 + $0x14] sm:$0xf0] }
 0xac3   :  { %v9518_v31 = vadd.f32 %v9517_v27, %v9505_v17  ;;  %v13700_v27 = vld [vmem:[%s22029_s9 + $0xd10] sm:$0xf0]  ;;  %v12170_v36 = vld [vmem:[%s22029_s9 + $0x108] sm:$0xf] }
 0xac4   :  { %9769 = vmatpush.bf16.msrb.mxu1 %v13927_v43  ;;  %9782 = vmatpush.bf16.msra.mxu0 %v12139_v6  ;;  %v13860_v43 = vld [vmem:[%s22029_s9 + $0xe50] sm:$0xf0]  ;;  %v14365_v6 = vld [vmem:[%s22029_s9 + $0x54] sm:$0xf0]  ;;  %v9519_v28 = vpop.f32.mrf.mxu1  ;;  %v12171_v17 = vor.u32 %v14389_v20, %v12170_v36  ;;  %v12746_v36 = vld [vmem:[%s22029_s9 + $0x588] sm:$0xf] }
 0xac5   :  { %9795 = vmatpush.bf16.msrb.mxu2 %v12267_v5  ;;  %v12202_v5 = vld [vmem:[%s22029_s9 + $0x148] sm:$0xf]  ;;  %v9543_v21 = vpop.f32.mrf.mxu2  ;;  %v9532_v53 = vpop.f32.mrf.mxu0  ;;  %v13863_v15 = vor.u32 %v14810_v37, %v13860_v43  ;;  %v9531_v57 = vadd.f32 %v9530_v34, %v9518_v31  ;;  %v14545_v43 = vld [vmem:[%s22029_s9 + $0x5f4] sm:$0xf0] }
 0xac6   :  { %9757 = vmatpush.bf16.msrb.mxu3 %v13783_v19  ;;  %v14774_v19 = vld [vmem:[%s22029_s9 + $0xd24] sm:$0xf]  ;;  %v12203_v38 = vor.u32 %v14397_v42, %v12202_v5  ;;  %v12410_v34 = vld [vmem:[%s22029_s9 + $0x2e8] sm:$0xf]  ;;  %v14445_v42 = vld [vmem:[%s22029_s9 + $0x2d4] sm:$0xf0] }
 0xac7   :  { %v13719_v0 = vor.u32 %v14774_v19, %v13716_v54  ;;  %v20474_v25 = vadd.f32 %v9543_v21, %v9531_v57  ;;  %v12794_v37 = vld [vmem:[%s22029_s9 + $0x5e8] sm:$0xf]  ;;  %v14477_v31 = vld [vmem:[%s22029_s9 + $0x3d4] sm:$0xf0] }
 0xac8   :  { %9770 = vmatpush.bf16.msrb.mxu1 %v13911_v44  ;;  %9783 = vmatpush.bf16.msra.mxu0 %v12123_v62  ;;  %v12075_v44 = vor.u32 %v14365_v6, %v12074_v61  ;;  %v13844_v62 = vld [vmem:[%s22029_s9 + $0xe30] sm:$0xf0]  ;;  %v9506_v35 = vpop.f32.mrf.mxu3  ;;  %v12043_v61 = vor.u32 %v14357_v9, %v12042_v33  ;;  %v12394_v5 = vld [vmem:[%s22029_s9 + $0x2c8] sm:$0xf]  ;;  %v14541_v54 = vld [vmem:[%s22029_s9 + $0x5d4] sm:$0xf0] }
 0xac9   :  { %9796 = vmatpush.bf16.msrb.mxu2 %v12251_v10  ;;  %v12058_v10 = vld [vmem:[%s22029_s9 + $0x28] sm:$0xf]  ;;  %v14437_v35 = vld [vmem:[%s22029_s9 + $0x294] sm:$0xf0] }
 0xaca   :  { %9758 = vmatpush.bf16.msrb.mxu3 %v13767_v26  ;;  %v13847_v26 = vor.u32 %v14806_v12, %v13844_v62  ;;  %v12059_v3 = vor.u32 %v14361_v23, %v12058_v10  ;;  %v12522_v28 = vld [vmem:[%s22029_s9 + $0x3c8] sm:$0xf]  ;;  %v14441_v62 = vld [vmem:[%s22029_s9 + $0x2b4] sm:$0xf0] }
 0xacb   :  { %v12650_v53 = vld [vmem:[%s22029_s9 + $0x4c8] sm:$0xf]  ;;  %v14501_v9 = vld [vmem:[%s22029_s9 + $0x494] sm:$0xf0] }
 0xacc   :  { %9771 = vmatpush.bf16.msrb.mxu1 %v13895_v59  ;;  %9784 = vmatpush.bf16.msra.mxu0 %v12107_v48  ;;  %v14449_v59 = vld [vmem:[%s22029_s9 + $0x2f4] sm:$0xf0]  ;;  %v12187_v48 = vor.u32 %v14393_v47, %v12186_v11  ;;  %v12778_v19 = vld [vmem:[%s22029_s9 + $0x5c8] sm:$0xf] }
 0xacd   :  { %9797 = vmatpush.bf16.msrb.mxu2 %v12235_v16  ;;  %v14802_v16 = vld [vmem:[%s22029_s9 + $0xe04] sm:$0xf]  ;;  %v9545_v32 = vpop.f32.mrf.mxu2  ;;  %v12411_v7 = vor.u32 %v14449_v59, %v12410_v34  ;;  %v12378_v12 = vld [vmem:[%s22029_s9 + $0x2a8] sm:$0xf]  ;;  %v12779_v57 = vor.u32 %v14541_v54, %v12778_v19  ;;  %v14473_v11 = vld [vmem:[%s22029_s9 + $0x3b4] sm:$0xf0] }
 0xace   :  { %9759 = vmatpush.bf16.msrb.mxu3 %v13751_v22  ;;  %v13703_v22 = vor.u32 %v14770_v52, %v13700_v27  ;;  %v12506_v23 = vld [vmem:[%s22029_s9 + $0x3a8] sm:$0xf]  ;;  %v12379_v27 = vor.u32 %v14441_v62, %v12378_v12  ;;  %v14533_v20 = vld [vmem:[%s22029_s9 + $0x594] sm:$0xf0] }
 0xacf   :  { %v12634_v47 = vld [vmem:[%s22029_s9 + $0x4a8] sm:$0xf]  ;;  %v12507_v34 = vor.u32 %v14473_v11, %v12506_v23  ;;  %v14493_v62 = vld [vmem:[%s22029_s9 + $0x454] sm:$0xf0] }
 0xad0   :  { %9772 = vmatpush.bf16.msrb.mxu1 %v13879_v18  ;;  %9785 = vmatpush.bf16.msra.mxu0 %v12091_v49  ;;  %v12538_v18 = vld [vmem:[%s22029_s9 + $0x3e8] sm:$0xf]  ;;  %v13831_v49 = vor.u32 %v14802_v16, %v13828_v14  ;;  %v14469_v14 = vld [vmem:[%s22029_s9 + $0x394] sm:$0xf0] }
 0xad1   :  { %9798 = vmatpush.bf16.msrb.mxu2 %v12219_v60  ;;  %v14513_v60 = vld [vmem:[%s22029_s9 + $0x4f4] sm:$0xf0]  ;;  %v12539_v6 = vor.u32 %v14481_v63, %v12538_v18  ;;  %v12762_v52 = vld [vmem:[%s22029_s9 + $0x5a8] sm:$0xf] }
 0xad2   :  { %9760 = vmatpush.bf16.msrb.mxu3 %v13735_v1  ;;  %v12667_v21 = vor.u32 %v14513_v60, %v12666_v39  ;;  %v12795_v1 = vor.u32 %v14545_v43, %v12794_v37  ;;  %v12362_v59 = vld [vmem:[%s22029_s9 + $0x288] sm:$0xf]  ;;  %v12747_v60 = vor.u32 %v14533_v20, %v12746_v36  ;;  %v14465_v43 = vld [vmem:[%s22029_s9 + $0x374] sm:$0xf0] }
 0xad3   :  { %v12490_v16 = vld [vmem:[%s22029_s9 + $0x388] sm:$0xf]  ;;  %v12363_v32 = vor.u32 %v14437_v35, %v12362_v59 }
 0xad4   :  { %9773 = vmatpush.bf16.msrb.mxu1 %v13863_v15  ;;  %9786 = vmatpush.bf16.msra.mxu0 %v12075_v44  ;;  %v14509_v15 = vld [vmem:[%s22029_s9 + $0x4d4] sm:$0xf0]  ;;  %v12395_v44 = vor.u32 %v14445_v42, %v12394_v5  ;;  %v12618_v33 = vld [vmem:[%s22029_s9 + $0x488] sm:$0xf]  ;;  %v12491_v63 = vor.u32 %v14469_v14, %v12490_v16 }
 0xad5   :  { %9799 = vmatpush.bf16.msrb.mxu2 %v12203_v38  ;;  %v12523_v38 = vor.u32 %v14477_v31, %v12522_v28  ;;  %v12651_v10 = vor.u32 %v14509_v15, %v12650_v53  ;;  %v12346_v39 = vld [vmem:[%s22029_s9 + $0x268] sm:$0xf]  ;;  %v14529_v5 = vld [vmem:[%s22029_s9 + $0x574] sm:$0xf0] }
 0xad6   :  { %9761 = vmatpush.bf16.msrb.mxu3 %v13719_v0  ;;  %v14505_v0 = vld [vmem:[%s22029_s9 + $0x4b4] sm:$0xf0]  ;;  %v12474_v37 = vld [vmem:[%s22029_s9 + $0x368] sm:$0xf] }
 0xad7   :  { %v12475_v28 = vor.u32 %v14465_v43, %v12474_v37  ;;  %v12330_v31 = vld [vmem:[%s22029_s9 + $0x248] sm:$0xf]  ;;  %v14429_v53 = vld [vmem:[%s22029_s9 + $0x254] sm:$0xf0] }
 0xad8   :  { %9774 = vmatpush.bf16.msrb.mxu1 %v13847_v26  ;;  %9787 = vmatpush.bf16.msra.mxu0 %v12059_v3  ;;  %v14537_v26 = vld [vmem:[%s22029_s9 + $0x5b4] sm:$0xf0]  ;;  %v12635_v3 = vor.u32 %v14505_v0, %v12634_v47  ;;  %v12458_v54 = vld [vmem:[%s22029_s9 + $0x348] sm:$0xf]  ;;  %v12331_v23 = vor.u32 %v14429_v53, %v12330_v31 }
 0xad9   :  { %9800 = vmatpush.bf16.msrb.mxu2 %v12187_v48  ;;  %v12763_v48 = vor.u32 %v14537_v26, %v12762_v52  ;;  %v12314_v26 = vld [vmem:[%s22029_s9 + $0x228] sm:$0xf]  ;;  %v14489_v16 = vld [vmem:[%s22029_s9 + $0x434] sm:$0xf0] }
 0xada   :  { %9762 = vmatpush.bf16.msrb.mxu3 %v13703_v22  ;;  %v12442_v35 = vld [vmem:[%s22029_s9 + $0x328] sm:$0xf]  ;;  %v14641_v53 = vld [vmem:[%s22029_s9 + $0x8f4] sm:$0xf0] }
 0xadb   :  { %v12698_v14 = vld [vmem:[%s22029_s9 + $0x528] sm:$0xf] }
 0xadc   :  { %9775 = vmatpush.bf16.msrb.mxu1 %v13831_v49  ;;  %9788 = vmatpush.bf16.msra.mxu0 %v12043_v61  ;;  %v9569_v22 = vpop.f32.mrf.mxu1  ;;  %v9582_v18 = vpop.f32.mrf.mxu0  ;;  %v12619_v49 = vor.u32 %v14501_v9, %v12618_v33  ;;  %v12602_v61 = vld [vmem:[%s22029_s9 + $0x468] sm:$0xf]  ;;  %v14521_v33 = vld [vmem:[%s22029_s9 + $0x534] sm:$0xf0] }
 0xadd   :  { %9801 = vmatpush.bf16.msrb.mxu2 %v12171_v17  ;;  %9763 = vmatmul.bf16.vlgmr.msrb.gmra.mxu3 %v19749_v46  ;;  %v14497_v17 = vld [vmem:[%s22029_s9 + $0x474] sm:$0xf0]  ;;  %v12298_v20 = vld [vmem:[%s22029_s9 + $0x208] sm:$0xf] }
 0xade   :  { %9807 = vmatpush.bf16.msra.mxu3 %v12411_v7  ;;  %v14433_v7 = vld [vmem:[%s22029_s9 + $0x274] sm:$0xf0]  ;;  %v12603_v15 = vor.u32 %v14497_v17, %v12602_v61  ;;  %v12554_v37 = vld [vmem:[%s22029_s9 + $0x408] sm:$0xf] }
 0xadf   :  { %9776 = vmatmul.bf16.vlgmr.msrb.gmra.mxu1 %v19751_v40  ;;  %9789 = vmatmul.bf16.vlgmr.msra.gmra.mxu0 %v19296_v2  ;;  %v12347_v42 = vor.u32 %v14433_v7, %v12346_v39  ;;  %v12699_v7 = vor.u32 %v14521_v33, %v12698_v14  ;;  %v14485_v61 = vld [vmem:[%s22029_s9 + $0x414] sm:$0xf0]  ;;  %v12682_v17 = vld [vmem:[%s22029_s9 + $0x508] sm:$0xf] }
 0xae0   :  { %9820 = vmatpush.bf16.msra.mxu1 %v12539_v6  ;;  %9833 = vmatpush.bf16.msrb.mxu0 %v12667_v21  ;;  %v12730_v6 = vld [vmem:[%s22029_s9 + $0x568] sm:$0xf]  ;;  %v9556_v21 = vpop.f32.mrf.mxu3  ;;  %v14601_v33 = vld [vmem:[%s22029_s9 + $0x7b4] sm:$0xf0] }
 0xae1   :  { %9846 = vmatpush.bf16.msra.mxu2 %v12795_v1  ;;  %v9557_v1 = vadd.f32 %v9556_v21, %v20474_v25  ;;  %v12731_v19 = vor.u32 %v14529_v5, %v12730_v6  ;;  %v14461_v25 = vld [vmem:[%s22029_s9 + $0x354] sm:$0xf0]  ;;  %v13018_v14 = vld [vmem:[%s22029_s9 + $0x7a8] sm:$0xf] }
 0xae2   :  { %9802 = vmatmul.bf16.vlgmr.msrb.gmra.mxu2 %v19302_v50  ;;  %9808 = vmatpush.bf16.msra.mxu3 %v12395_v44  ;;  %v12586_v44 = vld [vmem:[%s22029_s9 + $0x448] sm:$0xf]  ;;  %v12459_v52 = vor.u32 %v14461_v25, %v12458_v54  ;;  %v14517_v6 = vld [vmem:[%s22029_s9 + $0x514] sm:$0xf0]  ;;  %v12555_v54 = vor.u32 %v14485_v61, %v12554_v37 }
 0xae3   :  { %v14609_v21 = vld [vmem:[%s22029_s9 + $0x7f4] sm:$0xf0]  ;;  %v12683_v25 = vor.u32 %v14517_v6, %v12682_v17  ;;  %v13002_v37 = vld [vmem:[%s22029_s9 + $0x788] sm:$0xf] }
 0xae4   :  { %9821 = vmatpush.bf16.msra.mxu1 %v12523_v38  ;;  %9834 = vmatpush.bf16.msrb.mxu0 %v12651_v10  ;;  %v9570_v38 = vadd.f32 %v9569_v22, %v9557_v1  ;;  %v12714_v10 = vld [vmem:[%s22029_s9 + $0x548] sm:$0xf]  ;;  %v9571_v11 = vpop.f32.mrf.mxu1  ;;  %v9584_v47 = vpop.f32.mrf.mxu0  ;;  %v14421_v22 = vld [vmem:[%s22029_s9 + $0x214] sm:$0xf0] }
 0xae5   :  { %9847 = vmatpush.bf16.msra.mxu2 %v12779_v57  ;;  %v20637_v12 = vpop.f32.mrf.mxu2  ;;  %v14525_v57 = vld [vmem:[%s22029_s9 + $0x554] sm:$0xf0]  ;;  %v12299_v5 = vor.u32 %v14421_v22, %v12298_v20  ;;  %v13178_v1 = vld [vmem:[%s22029_s9 + $0x8e8] sm:$0xf] }
 0xae6   :  { %9809 = vmatpush.bf16.msra.mxu3 %v12379_v27  ;;  %v20648_v0 = vadd.f32 %v9582_v18, %v9570_v38  ;;  %v14425_v27 = vld [vmem:[%s22029_s9 + $0x234] sm:$0xf0]  ;;  %v12715_v59 = vor.u32 %v14525_v57, %v12714_v10  ;;  %v12922_v18 = vld [vmem:[%s22029_s9 + $0x6e8] sm:$0xf]  ;;  %v13179_v10 = vor.u32 %v14641_v53, %v13178_v1 }
 0xae7   :  { %v12315_v9 = vor.u32 %v14425_v27, %v12314_v26  ;;  %v12906_v38 = vld [vmem:[%s22029_s9 + $0x6c8] sm:$0xf]  ;;  %v14605_v11 = vld [vmem:[%s22029_s9 + $0x7d4] sm:$0xf0] }
 0xae8   :  { %9822 = vmatpush.bf16.msra.mxu1 %v12507_v34  ;;  %9835 = vmatpush.bf16.msrb.mxu0 %v12635_v3  ;;  %v12587_v34 = vor.u32 %v14493_v62, %v12586_v44  ;;  %v14457_v3 = vld [vmem:[%s22029_s9 + $0x334] sm:$0xf0]  ;;  %v9558_v36 = vpop.f32.mrf.mxu3  ;;  %v13162_v47 = vld [vmem:[%s22029_s9 + $0x8c8] sm:$0xf] }
 0xae9   :  { %9848 = vmatpush.bf16.msra.mxu2 %v12763_v48  ;;  %v12570_v48 = vld [vmem:[%s22029_s9 + $0x428] sm:$0xf]  ;;  %v14573_v62 = vld [vmem:[%s22029_s9 + $0x6d4] sm:$0xf0] }
 0xaea   :  { %9810 = vmatpush.bf16.msra.mxu3 %v12363_v32  ;;  %v12443_v32 = vor.u32 %v14457_v3, %v12442_v35  ;;  %v12571_v39 = vor.u32 %v14489_v16, %v12570_v48  ;;  %v13290_v26 = vld [vmem:[%s22029_s9 + $0x9c8] sm:$0xf]  ;;  %v14669_v27 = vld [vmem:[%s22029_s9 + $0x9d4] sm:$0xf0] }
 0xaeb   :  { %v12890_v35 = vld [vmem:[%s22029_s9 + $0x6a8] sm:$0xf]  ;;  %v14569_v3 = vld [vmem:[%s22029_s9 + $0x6b4] sm:$0xf0]  ;;  %v13291_v16 = vor.u32 %v14669_v27, %v13290_v26 }
 0xaec   :  { %9823 = vmatpush.bf16.msra.mxu1 %v12491_v63  ;;  %9836 = vmatpush.bf16.msrb.mxu0 %v12619_v49  ;;  %v14577_v63 = vld [vmem:[%s22029_s9 + $0x6f4] sm:$0xf0]  ;;  %v12426_v49 = vld [vmem:[%s22029_s9 + $0x308] sm:$0xf]  ;;  %v12891_v22 = vor.u32 %v14569_v3, %v12890_v35 }
 0xaed   :  { %9849 = vmatpush.bf16.msra.mxu2 %v12747_v60  ;;  %v14453_v60 = vld [vmem:[%s22029_s9 + $0x314] sm:$0xf0]  ;;  %v9597_v43 = vpop.f32.mrf.mxu2  ;;  %v13274_v20 = vld [vmem:[%s22029_s9 + $0x9a8] sm:$0xf] }
 0xaee   :  { %9811 = vmatpush.bf16.msra.mxu3 %v12347_v42  ;;  %v13050_v42 = vld [vmem:[%s22029_s9 + $0x7e8] sm:$0xf]  ;;  %v12427_v31 = vor.u32 %v14453_v60, %v12426_v49  ;;  %v14633_v36 = vld [vmem:[%s22029_s9 + $0x8b4] sm:$0xf0] }
 0xaef   :  { %v13051_v44 = vor.u32 %v14609_v21, %v13050_v42  ;;  %v13130_v43 = vld [vmem:[%s22029_s9 + $0x888] sm:$0xf]  ;;  %v14629_v61 = vld [vmem:[%s22029_s9 + $0x894] sm:$0xf0] }
 0xaf0   :  { %9824 = vmatpush.bf16.msra.mxu1 %v12475_v28  ;;  %9837 = vmatpush.bf16.msrb.mxu0 %v12603_v15  ;;  %v12923_v28 = vor.u32 %v14577_v63, %v12922_v18  ;;  %v13306_v15 = vld [vmem:[%s22029_s9 + $0x9e8] sm:$0xf]  ;;  %v6984_v18 = vperm.slane %v20175_v51, 1  ;;  %v13019_v63 = vor.u32 %v14601_v33, %v13018_v14  ;;  %v14597_v51 = vld [vmem:[%s22029_s9 + $0x794] sm:$0xf0]  ;;  %v13131_v53 = vor.u32 %v14629_v61, %v13130_v43 }
 0xaf1   :  { %9850 = vmatpush.bf16.msra.mxu2 %v12731_v19  ;;  %v14673_v19 = vld [vmem:[%s22029_s9 + $0x9f4] sm:$0xf0]  ;;  %v13258_v17 = vld [vmem:[%s22029_s9 + $0x988] sm:$0xf]  ;;  %v13003_v1 = vor.u32 %v14597_v51, %v13002_v37 }
 0xaf2   :  { %9812 = vmatpush.bf16.msra.mxu3 %v12331_v23  ;;  %v13307_v57 = vor.u32 %v14673_v19, %v13306_v15  ;;  %v13034_v23 = vld [vmem:[%s22029_s9 + $0x7c8] sm:$0xf]  ;;  %v14661_v6 = vld [vmem:[%s22029_s9 + $0x994] sm:$0xf0] }
 0xaf3   :  { %v13259_v15 = vor.u32 %v14661_v6, %v13258_v17  ;;  %v12986_v19 = vld [vmem:[%s22029_s9 + $0x768] sm:$0xf]  ;;  %v14653_v33 = vld [vmem:[%s22029_s9 + $0x954] sm:$0xf0] }
 0xaf4   :  { %9825 = vmatpush.bf16.msra.mxu1 %v12459_v52  ;;  %9838 = vmatpush.bf16.msrb.mxu0 %v12587_v34  ;;  %v14637_v52 = vld [vmem:[%s22029_s9 + $0x8d4] sm:$0xf0]  ;;  %v12907_v34 = vor.u32 %v14573_v62, %v12906_v38  ;;  %v13242_v62 = vld [vmem:[%s22029_s9 + $0x968] sm:$0xf] }
 0xaf5   :  { %9851 = vmatpush.bf16.msra.mxu2 %v12715_v59  ;;  %v13035_v59 = vor.u32 %v14605_v11, %v13034_v23  ;;  %v13163_v48 = vor.u32 %v14637_v52, %v13162_v47  ;;  %v14625_v38 = vld [vmem:[%s22029_s9 + $0x874] sm:$0xf0]  ;;  %v13098_v35 = vld [vmem:[%s22029_s9 + $0x848] sm:$0xf] }
 0xaf6   :  { %9813 = vmatpush.bf16.msra.mxu3 %v12315_v9  ;;  %v13146_v9 = vld [vmem:[%s22029_s9 + $0x8a8] sm:$0xf]  ;;  %v14557_v52 = vld [vmem:[%s22029_s9 + $0x654] sm:$0xf0] }
 0xaf7   :  { %v13147_v49 = vor.u32 %v14633_v36, %v13146_v9  ;;  %v13226_v14 = vld [vmem:[%s22029_s9 + $0x948] sm:$0xf]  ;;  %v14617_v43 = vld [vmem:[%s22029_s9 + $0x834] sm:$0xf0] }
 0xaf8   :  { %9826 = vmatpush.bf16.msra.mxu1 %v12443_v32  ;;  %9839 = vmatpush.bf16.msrb.mxu0 %v12571_v39  ;;  %v14665_v32 = vld [vmem:[%s22029_s9 + $0x9b4] sm:$0xf0]  ;;  %v12874_v39 = vld [vmem:[%s22029_s9 + $0x688] sm:$0xf] }
 0xaf9   :  { %9852 = vmatpush.bf16.msra.mxu2 %v12699_v7  ;;  %v14565_v7 = vld [vmem:[%s22029_s9 + $0x694] sm:$0xf0]  ;;  %v13275_v60 = vor.u32 %v14665_v32, %v13274_v20  ;;  %v13082_v37 = vld [vmem:[%s22029_s9 + $0x828] sm:$0xf] }
 0xafa   :  { %9814 = vmatpush.bf16.msra.mxu3 %v12299_v5  ;;  %v12875_v5 = vor.u32 %v14565_v7, %v12874_v39  ;;  %v13227_v7 = vor.u32 %v14653_v33, %v13226_v14  ;;  %v13210_v61 = vld [vmem:[%s22029_s9 + $0x928] sm:$0xf]  ;;  %v14649_v17 = vld [vmem:[%s22029_s9 + $0x934] sm:$0xf0] }
 0xafc   :  { %9827 = vmatpush.bf16.msra.mxu1 %v12427_v31  ;;  %9840 = vmatpush.bf16.msrb.mxu0 %v12555_v54  ;;  %v9621_v42 = vpop.f32.mrf.mxu1  ;;  %v9634_v21 = vpop.f32.mrf.mxu0  ;;  %v14561_v31 = vld [vmem:[%s22029_s9 + $0x674] sm:$0xf0] }
 0xafd   :  { %9853 = vmatpush.bf16.msra.mxu2 %v12683_v25  ;;  %9815 = vmatmul.bf16.vlgmr.msra.gmra.mxu3 %v19304_v24  ;;  %v14593_v54 = vld [vmem:[%s22029_s9 + $0x774] sm:$0xf0]  ;;  %v13114_v25 = vld [vmem:[%s22029_s9 + $0x868] sm:$0xf] }
 0xafe   :  { %9859 = vmatpush.bf16.msrb.mxu3 %v12923_v28  ;;  %v12858_v28 = vld [vmem:[%s22029_s9 + $0x668] sm:$0xf]  ;;  %v12987_v47 = vor.u32 %v14593_v54, %v12986_v19  ;;  %v13115_v26 = vor.u32 %v14625_v38, %v13114_v25  ;;  %v14581_v54 = vld [vmem:[%s22029_s9 + $0x714] sm:$0xf0] }
 0xaff   :  { %9828 = vmatmul.bf16.vlgmr.msra.gmra.mxu1 %v19306_v56  ;;  %9841 = vmatmul.bf16.vlgmr.msrb.gmra.mxu0 %v19406_v29  ;;  %v12938_v19 = vld [vmem:[%s22029_s9 + $0x708] sm:$0xf]  ;;  %v14613_v38 = vld [vmem:[%s22029_s9 + $0x814] sm:$0xf0] }
 0xb00   :  { %9872 = vmatpush.bf16.msrb.mxu1 %v13051_v44  ;;  %9885 = vmatpush.bf16.msra.mxu0 %v13179_v10  ;;  %v9596_v44 = vadd.f32 %v20637_v12, %v6984_v18  ;;  %v14657_v10 = vld [vmem:[%s22029_s9 + $0x974] sm:$0xf0]  ;;  %v9608_v23 = vpop.f32.mrf.mxu3  ;;  %v12842_v12 = vld [vmem:[%s22029_s9 + $0x648] sm:$0xf] }
 0xb01   :  { %9898 = vmatpush.bf16.msrb.mxu2 %v13307_v57  ;;  %v12859_v57 = vor.u32 %v14561_v31, %v12858_v28  ;;  %v13243_v27 = vor.u32 %v14657_v10, %v13242_v62  ;;  %v12843_v9 = vor.u32 %v14557_v52, %v12842_v12  ;;  %v12826_v18 = vld [vmem:[%s22029_s9 + $0x628] sm:$0xf]  ;;  %v14705_v31 = vld [vmem:[%s22029_s9 + $0xaf4] sm:$0xf0]  ;;  %v12939_v52 = vor.u32 %v14581_v54, %v12938_v19 }
 0xb02   :  { %9854 = vmatmul.bf16.vlgmr.msra.gmra.mxu2 %v19414_v30  ;;  %9860 = vmatpush.bf16.msrb.mxu3 %v12907_v34  ;;  %v9609_v11 = vadd.f32 %v9608_v23, %v9596_v44  ;;  %v12970_v34 = vld [vmem:[%s22029_s9 + $0x748] sm:$0xf]  ;;  %v14645_v10 = vld [vmem:[%s22029_s9 + $0x914] sm:$0xf0] }
 0xb03   :  { %v13434_v28 = vld [vmem:[%s22029_s9 + $0xae8] sm:$0xf]  ;;  %v14725_v54 = vld [vmem:[%s22029_s9 + $0xb94] sm:$0xf0] }
 0xb04   :  { %9873 = vmatpush.bf16.msrb.mxu1 %v13035_v59  ;;  %9886 = vmatpush.bf16.msra.mxu0 %v13163_v48  ;;  %v14589_v59 = vld [vmem:[%s22029_s9 + $0x754] sm:$0xf0]  ;;  %v9622_v3 = vadd.f32 %v9621_v42, %v9609_v11  ;;  %v9623_v36 = vpop.f32.mrf.mxu1  ;;  %v9636_v20 = vpop.f32.mrf.mxu0  ;;  %v12810_v42 = vld [vmem:[%s22029_s9 + $0x608] sm:$0xf]  ;;  %v13435_v12 = vor.u32 %v14705_v31, %v13434_v28 }
 0xb05   :  { %9899 = vmatpush.bf16.msrb.mxu2 %v13291_v16  ;;  %v9647_v48 = vpop.f32.mrf.mxu2  ;;  %v14621_v16 = vld [vmem:[%s22029_s9 + $0x854] sm:$0xf0]  ;;  %v13066_v25 = vld [vmem:[%s22029_s9 + $0x808] sm:$0xf] }
 0xb06   :  { %9861 = vmatpush.bf16.msrb.mxu3 %v12891_v22  ;;  %v9635_v32 = vadd.f32 %v9634_v21, %v9622_v3  ;;  %v12971_v22 = vor.u32 %v14589_v59, %v12970_v34  ;;  %v13099_v39 = vor.u32 %v14621_v16, %v13098_v35  ;;  %v13194_v62 = vld [vmem:[%s22029_s9 + $0x908] sm:$0xf]  ;;  %v14737_v11 = vld [vmem:[%s22029_s9 + $0xbf4] sm:$0xf0]  ;;  %v13067_v59 = vor.u32 %v14613_v38, %v13066_v25 }
 0xb07   :  { %v13562_v23 = vld [vmem:[%s22029_s9 + $0xbe8] sm:$0xf]  ;;  %v14801_v34 = vld [vmem:[%s22029_s9 + $0xdf4] sm:$0xf0]  ;;  %v13195_v35 = vor.u32 %v14645_v10, %v13194_v62 }
 0xb08   :  { %9874 = vmatpush.bf16.msrb.mxu1 %v13019_v63  ;;  %9887 = vmatpush.bf16.msra.mxu0 %v13147_v49  ;;  %v14553_v63 = vld [vmem:[%s22029_s9 + $0x634] sm:$0xf0]  ;;  %v12954_v49 = vld [vmem:[%s22029_s9 + $0x728] sm:$0xf]  ;;  %v20863_v51 = vadd.f32 %v9647_v48, %v9635_v32  ;;  %v13563_v3 = vor.u32 %v14737_v11, %v13562_v23 }
 0xb09   :  { %9900 = vmatpush.bf16.msrb.mxu2 %v13275_v60  ;;  %v14585_v60 = vld [vmem:[%s22029_s9 + $0x734] sm:$0xf0]  ;;  %v12827_v6 = vor.u32 %v14553_v63, %v12826_v18  ;;  %v13418_v48 = vld [vmem:[%s22029_s9 + $0xac8] sm:$0xf] }
 0xb0a   :  { %9862 = vmatpush.bf16.msrb.mxu3 %v12875_v5  ;;  %v9610_v5 = vpop.f32.mrf.mxu3  ;;  %v12955_v21 = vor.u32 %v14585_v60, %v12954_v49  ;;  %v14701_v16 = vld [vmem:[%s22029_s9 + $0xad4] sm:$0xf0]  ;;  %v13674_v20 = vld [vmem:[%s22029_s9 + $0xcc8] sm:$0xf] }
 0xb0b   :  { %v14733_v36 = vld [vmem:[%s22029_s9 + $0xbd4] sm:$0xf0]  ;;  %v13419_v63 = vor.u32 %v14701_v16, %v13418_v48  ;;  %v13786_v5 = vld [vmem:[%s22029_s9 + $0xda8] sm:$0xf] }
 0xb0c   :  { %9875 = vmatpush.bf16.msrb.mxu1 %v13003_v1  ;;  %9888 = vmatpush.bf16.msra.mxu0 %v13131_v53  ;;  %v14549_v1 = vld [vmem:[%s22029_s9 + $0x614] sm:$0xf0]  ;;  %v13083_v53 = vor.u32 %v14617_v43, %v13082_v37  ;;  %v13530_v43 = vld [vmem:[%s22029_s9 + $0xba8] sm:$0xf] }
 0xb0d   :  { %9901 = vmatpush.bf16.msrb.mxu2 %v13259_v15  ;;  %v13211_v15 = vor.u32 %v14649_v17, %v13210_v61  ;;  %v9649_v44 = vpop.f32.mrf.mxu2  ;;  %v14765_v32 = vld [vmem:[%s22029_s9 + $0xcd4] sm:$0xf0]  ;;  %v13658_v17 = vld [vmem:[%s22029_s9 + $0xca8] sm:$0xf] }
 0xb0e   :  { %9863 = vmatpush.bf16.msrb.mxu3 %v12859_v57  ;;  %v12811_v57 = vor.u32 %v14549_v1, %v12810_v42  ;;  %v14797_v18 = vld [vmem:[%s22029_s9 + $0xdd4] sm:$0xf0]  ;;  %v13675_v60 = vor.u32 %v14765_v32, %v13674_v20  ;;  %v13386_v28 = vld [vmem:[%s22029_s9 + $0xa88] sm:$0xf] }
 0xb0f   :  { %v14697_v49 = vld [vmem:[%s22029_s9 + $0xab4] sm:$0xf0]  ;;  %v13514_v19 = vld [vmem:[%s22029_s9 + $0xb88] sm:$0xf] }
 0xb10   :  { %9876 = vmatpush.bf16.msrb.mxu1 %v12987_v47  ;;  %9889 = vmatpush.bf16.msra.mxu0 %v13115_v26  ;;  %v13690_v47 = vld [vmem:[%s22029_s9 + $0xce8] sm:$0xf]  ;;  %v14769_v26 = vld [vmem:[%s22029_s9 + $0xcf4] sm:$0xf0]  ;;  %v13515_v11 = vor.u32 %v14725_v54, %v13514_v19 }
 0xb11   :  { %9902 = vmatpush.bf16.msrb.mxu2 %v13243_v27  ;;  %v13818_v27 = vld [vmem:[%s22029_s9 + $0xde8] sm:$0xf]  ;;  %v13691_v14 = vor.u32 %v14769_v26, %v13690_v47  ;;  %v14729_v61 = vld [vmem:[%s22029_s9 + $0xbb4] sm:$0xf0] }
 0xb12   :  { %9864 = vmatpush.bf16.msrb.mxu3 %v12843_v9  ;;  %v13819_v33 = vor.u32 %v14801_v34, %v13818_v27  ;;  %v13546_v9 = vld [vmem:[%s22029_s9 + $0xbc8] sm:$0xf]  ;;  %v14793_v42 = vld [vmem:[%s22029_s9 + $0xdb4] sm:$0xf0]  ;;  %v13531_v1 = vor.u32 %v14729_v61, %v13530_v43 }
 0xb13   :  { %v14693_v31 = vld [vmem:[%s22029_s9 + $0xa94] sm:$0xf0]  ;;  %v13642_v25 = vld [vmem:[%s22029_s9 + $0xc88] sm:$0xf] }
 0xb14   :  { %9877 = vmatpush.bf16.msrb.mxu1 %v12971_v22  ;;  %9890 = vmatpush.bf16.msra.mxu0 %v13099_v39  ;;  %v13802_v22 = vld [vmem:[%s22029_s9 + $0xdc8] sm:$0xf]  ;;  %v13547_v39 = vor.u32 %v14733_v36, %v13546_v9  ;;  %v14757_v44 = vld [vmem:[%s22029_s9 + $0xc94] sm:$0xf0]  ;;  %v13387_v10 = vor.u32 %v14693_v31, %v13386_v28 }
 0xb15   :  { %9903 = vmatpush.bf16.msrb.mxu2 %v13227_v7  ;;  %v13402_v7 = vld [vmem:[%s22029_s9 + $0xaa8] sm:$0xf]  ;;  %v13803_v37 = vor.u32 %v14797_v18, %v13802_v22  ;;  %v14789_v62 = vld [vmem:[%s22029_s9 + $0xd94] sm:$0xf0] }
 0xb16   :  { %9865 = vmatpush.bf16.msrb.mxu3 %v12827_v6  ;;  %v14761_v6 = vld [vmem:[%s22029_s9 + $0xcb4] sm:$0xf0]  ;;  %v13770_v38 = vld [vmem:[%s22029_s9 + $0xd88] sm:$0xf] }
 0xb17   :  { %v13370_v47 = vld [vmem:[%s22029_s9 + $0xa68] sm:$0xf]  ;;  %v13771_v26 = vor.u32 %v14789_v62, %v13770_v38  ;;  %v14721_v34 = vld [vmem:[%s22029_s9 + $0xb74] sm:$0xf0] }
 0xb18   :  { %9878 = vmatpush.bf16.msrb.mxu1 %v12955_v21  ;;  %9891 = vmatpush.bf16.msra.mxu0 %v13083_v53  ;;  %v13403_v21 = vor.u32 %v14697_v49, %v13402_v7  ;;  %v13659_v53 = vor.u32 %v14761_v6, %v13658_v17  ;;  %v13498_v27 = vld [vmem:[%s22029_s9 + $0xb68] sm:$0xf]  ;;  %v14785_v48 = vld [vmem:[%s22029_s9 + $0xd74] sm:$0xf0] }
 0xb19   :  { %9904 = vmatpush.bf16.msrb.mxu2 %v13211_v15  ;;  %v13787_v15 = vor.u32 %v14793_v42, %v13786_v5  ;;  %v13499_v9 = vor.u32 %v14721_v34, %v13498_v27  ;;  %v13354_v36 = vld [vmem:[%s22029_s9 + $0xa48] sm:$0xf]  ;;  %v14685_v20 = vld [vmem:[%s22029_s9 + $0xa54] sm:$0xf0] }
 0xb1a   :  { %9866 = vmatpush.bf16.msrb.mxu3 %v12811_v57  ;;  %v13482_v18 = vld [vmem:[%s22029_s9 + $0xb48] sm:$0xf]  ;;  %v14749_v49 = vld [vmem:[%s22029_s9 + $0xc54] sm:$0xf0]  ;;  %v13355_v43 = vor.u32 %v14685_v20, %v13354_v36 }
 0xb1b   :  { %v13338_v42 = vld [vmem:[%s22029_s9 + $0xa28] sm:$0xf]  ;;  %v14745_v54 = vld [vmem:[%s22029_s9 + $0xc34] sm:$0xf0] }
 0xb1c   :  { %9879 = vmatpush.bf16.msrb.mxu1 %v12939_v52  ;;  %9892 = vmatpush.bf16.msra.mxu0 %v13067_v59  ;;  %v9673_v57 = vpop.f32.mrf.mxu1  ;;  %v9686_v23 = vpop.f32.mrf.mxu0  ;;  %v13643_v52 = vor.u32 %v14757_v44, %v13642_v25  ;;  %v13626_v59 = vld [vmem:[%s22029_s9 + $0xc68] sm:$0xf]  ;;  %v14777_v44 = vld [vmem:[%s22029_s9 + $0xd34] sm:$0xf0] }
 0xb1d   :  { %9905 = vmatpush.bf16.msrb.mxu2 %v13195_v35  ;;  %9867 = vmatmul.bf16.vlgmr.msrb.gmra.mxu3 %v19420_v8  ;;  %v14753_v35 = vld [vmem:[%s22029_s9 + $0xc74] sm:$0xf0]  ;;  %v13466_v31 = vld [vmem:[%s22029_s9 + $0xb28] sm:$0xf] }
 0xb1e   :  { %9911 = vmatpush.bf16.msra.mxu3 %v13435_v12  ;;  %v14689_v12 = vld [vmem:[%s22029_s9 + $0xa74] sm:$0xf0]  ;;  %v13627_v32 = vor.u32 %v14753_v35, %v13626_v59  ;;  %v13722_v25 = vld [vmem:[%s22029_s9 + $0xd28] sm:$0xf] }
 0xb1f   :  { %9880 = vmatmul.bf16.vlgmr.msrb.gmra.mxu1 %v19422_v55  ;;  %9893 = vmatmul.bf16.vlgmr.msra.gmra.mxu0 %v19542_v13  ;;  %v13371_v16 = vor.u32 %v14689_v12, %v13370_v47  ;;  %v14833_v47 = vld [vmem:[%s22029_s9 + $0xef4] sm:$0xf0]  ;;  %v13578_v34 = vld [vmem:[%s22029_s9 + $0xc08] sm:$0xf] }
 0xb20   :  { %9924 = vmatpush.bf16.msra.mxu1 %v13563_v3  ;;  %9937 = vmatpush.bf16.msrb.mxu0 %v13691_v14  ;;  %v13754_v3 = vld [vmem:[%s22029_s9 + $0xd68] sm:$0xf]  ;;  %v9660_v14 = vpop.f32.mrf.mxu3  ;;  %v14709_v27 = vld [vmem:[%s22029_s9 + $0xb14] sm:$0xf0] }
 0xb21   :  { %9950 = vmatpush.bf16.msra.mxu2 %v13819_v33  ;;  %v9661_v33 = vadd.f32 %v9660_v14, %v20863_v51  ;;  %v13755_v22 = vor.u32 %v14785_v48, %v13754_v3  ;;  %v14717_v51 = vld [vmem:[%s22029_s9 + $0xb54] sm:$0xf0]  ;;  %v13706_v3 = vld [vmem:[%s22029_s9 + $0xd08] sm:$0xf]  ;;  %v14383_v14 = vld [vmem:[%s22029_s9 + $0xec] sm:$0xf] }
 0xb22   :  { %9906 = vmatmul.bf16.vlgmr.msrb.gmra.mxu2 %v19544_v4  ;;  %9912 = vmatpush.bf16.msra.mxu3 %v13419_v63  ;;  %v13610_v63 = vld [vmem:[%s22029_s9 + $0xc48] sm:$0xf]  ;;  %v13483_v5 = vor.u32 %v14717_v51, %v13482_v18  ;;  %v14741_v35 = vld [vmem:[%s22029_s9 + $0xc14] sm:$0xf0]  ;;  %v12412_v18 = vld [vmem:[%s22029_s9 + $0x2f8] sm:$0xf0] }
 0xb23   :  { %v14773_v48 = vld [vmem:[%s22029_s9 + $0xd14] sm:$0xf0]  ;;  %v13579_v51 = vor.u32 %v14741_v35, %v13578_v34  ;;  %v14403_v34 = vld [vmem:[%s22029_s9 + $0x18c] sm:$0xf] }
 0xb24   :  { %9925 = vmatpush.bf16.msra.mxu1 %v13547_v39  ;;  %9938 = vmatpush.bf16.msrb.mxu0 %v13675_v60  ;;  %v9674_v39 = vadd.f32 %v9673_v57, %v9661_v33  ;;  %v13738_v60 = vld [vmem:[%s22029_s9 + $0xd48] sm:$0xf]  ;;  %v9675_v61 = vpop.f32.mrf.mxu1  ;;  %v9688_v17 = vpop.f32.mrf.mxu0  ;;  %v12156_v33 = vld [vmem:[%s22029_s9 + $0xf8] sm:$0xf0]  ;;  %v14435_v35 = vld [vmem:[%s22029_s9 + $0x28c] sm:$0xf] }
 0xb25   :  { %9951 = vmatpush.bf16.msra.mxu2 %v13803_v37  ;;  %v9699_v7 = vpop.f32.mrf.mxu2  ;;  %v14781_v37 = vld [vmem:[%s22029_s9 + $0xd54] sm:$0xf0]  ;;  %v12140_v61 = vld [vmem:[%s22029_s9 + $0xd8] sm:$0xf0]  ;;  %v14411_v17 = vld [vmem:[%s22029_s9 + $0x1cc] sm:$0xf] }
 0xb26   :  { %9913 = vmatpush.bf16.msra.mxu3 %v13403_v21  ;;  %v9687_v6 = vadd.f32 %v9686_v23, %v9674_v39  ;;  %v14681_v21 = vld [vmem:[%s22029_s9 + $0xa34] sm:$0xf0]  ;;  %v13739_v28 = vor.u32 %v14781_v37, %v13738_v60  ;;  %v12159_v39 = vor.u32 %v14383_v14, %v12156_v33 }
 0xb27   :  { %v13339_v38 = vor.u32 %v14681_v21, %v13338_v42  ;;  %v14677_v23 = vld [vmem:[%s22029_s9 + $0xa14] sm:$0xf0]  ;;  %v12396_v42 = vld [vmem:[%s22029_s9 + $0x2d8] sm:$0xf0] }
 0xb28   :  { %9926 = vmatpush.bf16.msra.mxu1 %v13531_v1  ;;  %9939 = vmatpush.bf16.msrb.mxu0 %v13659_v53  ;;  %v13611_v1 = vor.u32 %v14749_v49, %v13610_v63  ;;  %v14713_v53 = vld [vmem:[%s22029_s9 + $0xb34] sm:$0xf0]  ;;  %v21062_v19 = vadd.f32 %v9699_v7, %v9687_v6  ;;  %v9662_v62 = vpop.f32.mrf.mxu3  ;;  %v13707_v63 = vor.u32 %v14773_v48, %v13706_v3  ;;  %v13930_v7 = vld [vmem:[%s22029_s9 + $0xec8] sm:$0xf]  ;;  %v12268_v6 = vld [vmem:[%s22029_s9 + $0x1d8] sm:$0xf0] }
 0xb29   :  { %9952 = vmatpush.bf16.msra.mxu2 %v13787_v15  ;;  %v13594_v15 = vld [vmem:[%s22029_s9 + $0xc28] sm:$0xf]  ;;  %v13467_v57 = vor.u32 %v14713_v53, %v13466_v31  ;;  %v14829_v49 = vld [vmem:[%s22029_s9 + $0xed4] sm:$0xf0]  ;;  %v12271_v53 = vor.u32 %v14411_v17, %v12268_v6  ;;  %v14439_v62 = vld [vmem:[%s22029_s9 + $0x2ac] sm:$0xf] }
 0xb2a   :  { %9914 = vmatpush.bf16.msra.mxu3 %v13387_v10  ;;  %v13322_v10 = vld [vmem:[%s22029_s9 + $0xa08] sm:$0xf]  ;;  %v13595_v12 = vor.u32 %v14745_v54, %v13594_v15  ;;  %v13931_v21 = vor.u32 %v14829_v49, %v13930_v7  ;;  %v14825_v31 = vld [vmem:[%s22029_s9 + $0xeb4] sm:$0xf0]  ;;  %v14375_v54 = vld [vmem:[%s22029_s9 + $0xac] sm:$0xf] }
 0xb2b   :  { %v12364_v3 = vld [vmem:[%s22029_s9 + $0x298] sm:$0xf0]  ;;  %v14813_v17 = vld [vmem:[%s22029_s9 + $0xe54] sm:$0xf0] }
 0xb2c   :  { %9927 = vmatpush.bf16.msra.mxu1 %v13515_v11  ;;  %9940 = vmatpush.bf16.msrb.mxu0 %v13643_v52  ;;  %v13946_v11 = vld [vmem:[%s22029_s9 + $0xee8] sm:$0xf]  ;;  %v13723_v52 = vor.u32 %v14777_v44, %v13722_v25  ;;  %v12124_v25 = vld [vmem:[%s22029_s9 + $0xb8] sm:$0xf0]  ;;  %v14407_v44 = vld [vmem:[%s22029_s9 + $0x1ac] sm:$0xf] }
 0xb2d   :  { %9953 = vmatpush.bf16.msra.mxu2 %v13771_v26  ;;  %v13450_v26 = vld [vmem:[%s22029_s9 + $0xb08] sm:$0xf]  ;;  %v9701_v59 = vpop.f32.mrf.mxu2  ;;  %v13947_v36 = vor.u32 %v14833_v47, %v13946_v11  ;;  %v14821_v47 = vld [vmem:[%s22029_s9 + $0xe94] sm:$0xf0]  ;;  %v12348_v7 = vld [vmem:[%s22029_s9 + $0x278] sm:$0xf0] }
 0xb2e   :  { %9915 = vmatpush.bf16.msra.mxu3 %v13371_v16  ;;  %v13323_v16 = vor.u32 %v14677_v23, %v13322_v10  ;;  %v13451_v20 = vor.u32 %v14709_v27, %v13450_v26  ;;  %v12380_v10 = vld [vmem:[%s22029_s9 + $0x2b8] sm:$0xf0]  ;;  %v12127_v23 = vor.u32 %v14375_v54, %v12124_v25  ;;  %v13898_v11 = vld [vmem:[%s22029_s9 + $0xe88] sm:$0xf]  ;;  %v14371_v26 = vld [vmem:[%s22029_s9 + $0x8c] sm:$0xf] }
 0xb2f   :  { %v12108_v27 = vld [vmem:[%s22029_s9 + $0x98] sm:$0xf0]  ;;  %v13899_v48 = vor.u32 %v14821_v47, %v13898_v11  ;;  %v14359_v47 = vld [vmem:[%s22029_s9 + $0x2c] sm:$0xf] }
 0xb30   :  { %9928 = vmatpush.bf16.msra.mxu1 %v13499_v9  ;;  %9941 = vmatpush.bf16.msrb.mxu0 %v13627_v32  ;;  %v14415_v9 = vld [vmem:[%s22029_s9 + $0x1ec] sm:$0xf]  ;;  %v12284_v32 = vld [vmem:[%s22029_s9 + $0x1f8] sm:$0xf0]  ;;  %v12111_v33 = vor.u32 %v14371_v26, %v12108_v27 }
 0xb31   :  { %9954 = vmatpush.bf16.msra.mxu2 %v13755_v22  ;;  %v14447_v22 = vld [vmem:[%s22029_s9 + $0x2ec] sm:$0xf]  ;;  %v12287_v60 = vor.u32 %v14415_v9, %v12284_v32  ;;  %v12236_v59 = vld [vmem:[%s22029_s9 + $0x198] sm:$0xf0]  ;;  %v13882_v9 = vld [vmem:[%s22029_s9 + $0xe68] sm:$0xf]  ;;  %v12367_v32 = vor.u32 %v14435_v35, %v12364_v3 }
 0xb32   :  { %9916 = vmatpush.bf16.msra.mxu3 %v13355_v43  ;;  %v12415_v37 = vor.u32 %v14447_v22, %v12412_v18  ;;  %v14379_v43 = vld [vmem:[%s22029_s9 + $0xcc] sm:$0xf]  ;;  %v12092_v18 = vld [vmem:[%s22029_s9 + $0x78] sm:$0xf0] }
 0xb33   :  { %v14367_v22 = vld [vmem:[%s22029_s9 + $0x6c] sm:$0xf]  ;;  %v12188_v27 = vld [vmem:[%s22029_s9 + $0x138] sm:$0xf0] }
 0xb34   :  { %9929 = vmatpush.bf16.msra.mxu1 %v13483_v5  ;;  %9942 = vmatpush.bf16.msrb.mxu0 %v13611_v1  ;;  %v14443_v5 = vld [vmem:[%s22029_s9 + $0x2cc] sm:$0xf]  ;;  %v12143_v1 = vor.u32 %v14379_v43, %v12140_v61  ;;  %v12095_v43 = vor.u32 %v14367_v22, %v12092_v18  ;;  %v13866_v61 = vld [vmem:[%s22029_s9 + $0xe48] sm:$0xf]  ;;  %v12044_v22 = vld [vmem:[%s22029_s9 + $0x18] sm:$0xf0] }
 0xb35   :  { %9955 = vmatpush.bf16.msra.mxu2 %v13739_v28  ;;  %v13914_v28 = vld [vmem:[%s22029_s9 + $0xea8] sm:$0xf]  ;;  %v12399_v15 = vor.u32 %v14443_v5, %v12396_v42  ;;  %v14363_v42 = vld [vmem:[%s22029_s9 + $0x4c] sm:$0xf]  ;;  %v13867_v54 = vor.u32 %v14813_v17, %v13866_v61 }
 0xb36   :  { %9917 = vmatpush.bf16.msra.mxu3 %v13339_v38  ;;  %v12252_v38 = vld [vmem:[%s22029_s9 + $0x1b8] sm:$0xf0]  ;;  %v14387_v18 = vld [vmem:[%s22029_s9 + $0x10c] sm:$0xf] }
 0xb38   :  { %9930 = vmatpush.bf16.msra.mxu1 %v13467_v57  ;;  %9943 = vmatpush.bf16.msrb.mxu0 %v13595_v12  ;;  %v13915_v57 = vor.u32 %v14825_v31, %v13914_v28  ;;  %v12255_v12 = vor.u32 %v14407_v44, %v12252_v38  ;;  %v12204_v31 = vld [vmem:[%s22029_s9 + $0x158] sm:$0xf0] }
 0xb39   :  { %9956 = vmatpush.bf16.msra.mxu2 %v13723_v52  ;;  %v12383_v52 = vor.u32 %v14439_v62, %v12380_v10  ;;  %v13850_v10 = vld [vmem:[%s22029_s9 + $0xe28] sm:$0xf] }
 0xb3a   :  { %9918 = vmatpush.bf16.msra.mxu3 %v13323_v16 }
 0xb3c   :  { %9931 = vmatpush.bf16.msra.mxu1 %v13451_v20  ;;  %9944 = vmatpush.bf16.msrb.mxu0 %v13579_v51  ;;  %v9725_v16 = vpop.f32.mrf.mxu1  ;;  %v9738_v14 = vpop.f32.mrf.mxu0  ;;  %v12239_v20 = vor.u32 %v14403_v34, %v12236_v59  ;;  %v14399_v51 = vld [vmem:[%s22029_s9 + $0x16c] sm:$0xf]  ;;  %v12316_v59 = vld [vmem:[%s22029_s9 + $0x238] sm:$0xf0] }
 0xb3d   :  { %9957 = vmatpush.bf16.msra.mxu2 %v13707_v63  ;;  %9919 = vmatmul.bf16.vlgmr.msra.gmra.mxu3 %v19552_v45  ;;  %v12220_v63 = vld [vmem:[%s22029_s9 + $0x178] sm:$0xf0]  ;;  %v14423_v34 = vld [vmem:[%s22029_s9 + $0x22c] sm:$0xf] }
 0xb3e   :  { %9963 = vmatpush.bf16.msrb.mxu3 %v13947_v36  ;;  %v14817_v36 = vld [vmem:[%s22029_s9 + $0xe74] sm:$0xf0]  ;;  %v12223_v6 = vor.u32 %v14399_v51, %v12220_v63  ;;  %v12172_v63 = vld [vmem:[%s22029_s9 + $0x118] sm:$0xf0] }
 0xb3f   :  { %9932 = vmatmul.bf16.vlgmr.msra.gmra.mxu1 %v19563_v58  ;;  %9945 = vmatmul.bf16.vlgmr.msrb.gmra.mxu0 %v19738_v41  ;;  %v13883_v49 = vor.u32 %v14817_v36, %v13882_v9  ;;  %v12540_v9 = vld [vmem:[%s22029_s9 + $0x3f8] sm:$0xf0] }
 0xb40   :  { %9976 = vmatpush.bf16.msrb.mxu1 %v12159_v39  ;;  %9989 = vmatpush.bf16.msra.mxu0 %v12287_v60  ;;  %v14431_v39 = vld [vmem:[%s22029_s9 + $0x26c] sm:$0xf]  ;;  %v9712_v60 = vpop.f32.mrf.mxu3 }
 0xb41   :  { %10002 = vmatpush.bf16.msrb.mxu2 %v12415_v37  ;;  %v9713_v37 = vadd.f32 %v9712_v60, %v21062_v19  ;;  %v12351_v5 = vor.u32 %v14431_v39, %v12348_v7  ;;  %v12076_v19 = vld [vmem:[%s22029_s9 + $0x58] sm:$0xf0]  ;;  %v14419_v39 = vld [vmem:[%s22029_s9 + $0x20c] sm:$0xf] }
 0xb42   :  { %9958 = vmatmul.bf16.vlgmr.msra.gmra.mxu2 %v19749_v46  ;;  %9964 = vmatpush.bf16.msrb.mxu3 %v13931_v21  ;;  %v14395_v21 = vld [vmem:[%s22029_s9 + $0x14c] sm:$0xf]  ;;  %v12079_v62 = vor.u32 %v14363_v42, %v12076_v19  ;;  %v12300_v7 = vld [vmem:[%s22029_s9 + $0x218] sm:$0xf0]  ;;  %v12175_v19 = vor.u32 %v14387_v18, %v12172_v63 }
 0xb43   :  { %v14511_v60 = vld [vmem:[%s22029_s9 + $0x4ec] sm:$0xf]  ;;  %v12924_v42 = vld [vmem:[%s22029_s9 + $0x6f8] sm:$0xf0] }
 0xb44   :  { %9977 = vmatpush.bf16.msrb.mxu1 %v12143_v1  ;;  %9990 = vmatpush.bf16.msra.mxu0 %v12271_v53  ;;  %v9726_v1 = vadd.f32 %v9725_v16, %v9713_v37  ;;  %v14427_v53 = vld [vmem:[%s22029_s9 + $0x24c] sm:$0xf]  ;;  %v9727_v25 = vpop.f32.mrf.mxu1  ;;  %v9740_v44 = vpop.f32.mrf.mxu0  ;;  %v12668_v37 = vld [vmem:[%s22029_s9 + $0x4f8] sm:$0xf0] }
 0xb45   :  { %10003 = vmatpush.bf16.msrb.mxu2 %v12399_v15  ;;  %v9751_v28 = vpop.f32.mrf.mxu2  ;;  %v12332_v15 = vld [vmem:[%s22029_s9 + $0x258] sm:$0xf0]  ;;  %v14539_v44 = vld [vmem:[%s22029_s9 + $0x5cc] sm:$0xf] }
 0xb46   :  { %9965 = vmatpush.bf16.msrb.mxu3 %v13915_v57  ;;  %v9739_v38 = vadd.f32 %v9738_v14, %v9726_v1  ;;  %v14809_v57 = vld [vmem:[%s22029_s9 + $0xe34] sm:$0xf0]  ;;  %v12335_v11 = vor.u32 %v14427_v53, %v12332_v15  ;;  %v12671_v1 = vor.u32 %v14511_v60, %v12668_v37  ;;  %v12652_v25 = vld [vmem:[%s22029_s9 + $0x4d8] sm:$0xf0]  ;;  %v14463_v37 = vld [vmem:[%s22029_s9 + $0x36c] sm:$0xf] }
 0xb47   :  { %v13851_v35 = vor.u32 %v14809_v57, %v13850_v10  ;;  %v14805_v14 = vld [vmem:[%s22029_s9 + $0xe14] sm:$0xf0]  ;;  %v12908_v10 = vld [vmem:[%s22029_s9 + $0x6d8] sm:$0xf0] }
 0xb48   :  { %9978 = vmatpush.bf16.msrb.mxu1 %v12127_v23  ;;  %9991 = vmatpush.bf16.msra.mxu0 %v12255_v12  ;;  %v12207_v23 = vor.u32 %v14395_v21, %v12204_v31  ;;  %v12060_v12 = vld [vmem:[%s22029_s9 + $0x38] sm:$0xf0]  ;;  %v21261_v26 = vadd.f32 %v9751_v28, %v9739_v38  ;;  %v9714_v3 = vpop.f32.mrf.mxu3  ;;  %v12303_v21 = vor.u32 %v14419_v39, %v12300_v7  ;;  %v14475_v28 = vld [vmem:[%s22029_s9 + $0x3cc] sm:$0xf]  ;;  %v21399_v7 = vld [vmem:[%s22030_s10] sm:$0xf] }
 0xb49   :  { %10004 = vmatpush.bf16.msrb.mxu2 %v12383_v52  ;;  %v14391_v52 = vld [vmem:[%s22029_s9 + $0x12c] sm:$0xf]  ;;  %v12063_v16 = vor.u32 %v14359_v47, %v12060_v12  ;;  %v12524_v31 = vld [vmem:[%s22029_s9 + $0x3d8] sm:$0xf0] }
 0xb4a   :  { %9966 = vmatpush.bf16.msrb.mxu3 %v13899_v48  ;;  %v13834_v48 = vld [vmem:[%s22029_s9 + $0xe08] sm:$0xf]  ;;  %v12191_v36 = vor.u32 %v14391_v52, %v12188_v27  ;;  %v12780_v38 = vld [vmem:[%s22029_s9 + $0x5d8] sm:$0xf0]  ;;  %v12527_v57 = vor.u32 %v14475_v28, %v12524_v31  ;;  %v14503_v27 = vld [vmem:[%s22029_s9 + $0x4ac] sm:$0xf] }
 0xb4b   :  { %v12508_v47 = vld [vmem:[%s22029_s9 + $0x3b8] sm:$0xf0]  ;;  %v12783_v12 = vor.u32 %v14539_v44, %v12780_v38  ;;  %v14567_v3 = vld [vmem:[%s22029_s9 + $0x6ac] sm:$0xf] }
 0xb4c   :  { %9979 = vmatpush.bf16.msrb.mxu1 %v12111_v33  ;;  %9992 = vmatpush.bf16.msra.mxu0 %v12239_v20  ;;  %v14479_v33 = vld [vmem:[%s22029_s9 + $0x3ec] sm:$0xf]  ;;  %v12319_v20 = vor.u32 %v14423_v34, %v12316_v59  ;;  %v12636_v34 = vld [vmem:[%s22029_s9 + $0x4b8] sm:$0xf0] }
 0xb4d   :  { %10005 = vmatpush.bf16.msrb.mxu2 %v12367_v32  ;;  %v14355_v32 = vld [vmem:[%s22029_s9 + $0xc] sm:$0xf]  ;;  %v9753_v51 = vpop.f32.mrf.mxu2  ;;  %v12543_v61 = vor.u32 %v14479_v33, %v12540_v9  ;;  %v12876_v18 = vld [vmem:[%s22029_s9 + $0x698] sm:$0xf0] }
 0xb4e   :  { %9967 = vmatpush.bf16.msrb.mxu3 %v13883_v49  ;;  %v13835_v49 = vor.u32 %v14805_v14, %v13834_v48  ;;  %v12047_v17 = vor.u32 %v14355_v32, %v12044_v22  ;;  %v14535_v59 = vld [vmem:[%s22029_s9 + $0x5ac] sm:$0xf]  ;;  %v12892_v48 = vld [vmem:[%s22029_s9 + $0x6b8] sm:$0xf0] }
 0xb4f   :  { %v12492_v14 = vld [vmem:[%s22029_s9 + $0x398] sm:$0xf0]  ;;  %v12895_v9 = vor.u32 %v14567_v3, %v12892_v48  ;;  %v14563_v22 = vld [vmem:[%s22029_s9 + $0x68c] sm:$0xf] }
 0xb50   :  { %9980 = vmatpush.bf16.msrb.mxu1 %v12095_v43  ;;  %9993 = vmatpush.bf16.msra.mxu0 %v12223_v6  ;;  %v14543_v43 = vld [vmem:[%s22029_s9 + $0x5ec] sm:$0xf]  ;;  %v12796_v6 = vld [vmem:[%s22029_s9 + $0x5f8] sm:$0xf0] }
 0xb51   :  { %10006 = vmatpush.bf16.msrb.mxu2 %v12351_v5  ;;  %v14575_v5 = vld [vmem:[%s22029_s9 + $0x6ec] sm:$0xf]  ;;  %v12799_v53 = vor.u32 %v14543_v43, %v12796_v6  ;;  %v12748_v32 = vld [vmem:[%s22029_s9 + $0x598] sm:$0xf0] }
 0xb52   :  { %9968 = vmatpush.bf16.msrb.mxu3 %v13867_v54  ;;  %v12927_v15 = vor.u32 %v14575_v5, %v12924_v42  ;;  %v14507_v54 = vld [vmem:[%s22029_s9 + $0x4cc] sm:$0xf]  ;;  %v12476_v43 = vld [vmem:[%s22029_s9 + $0x378] sm:$0xf0] }
 0xb53   :  { %v14495_v6 = vld [vmem:[%s22029_s9 + $0x46c] sm:$0xf]  ;;  %v12604_v5 = vld [vmem:[%s22029_s9 + $0x478] sm:$0xf0]  ;;  %v12479_v28 = vor.u32 %v14463_v37, %v12476_v43 }
 0xb54   :  { %9981 = vmatpush.bf16.msrb.mxu1 %v12079_v62  ;;  %9994 = vmatpush.bf16.msra.mxu0 %v12207_v23  ;;  %v14571_v62 = vld [vmem:[%s22029_s9 + $0x6cc] sm:$0xf]  ;;  %v12655_v23 = vor.u32 %v14507_v54, %v12652_v25  ;;  %v12460_v25 = vld [vmem:[%s22029_s9 + $0x358] sm:$0xf0] }
 0xb55   :  { %10007 = vmatpush.bf16.msrb.mxu2 %v12335_v11  ;;  %v14471_v11 = vld [vmem:[%s22029_s9 + $0x3ac] sm:$0xf]  ;;  %v12911_v52 = vor.u32 %v14571_v62, %v12908_v10 }
 0xb56   :  { %9969 = vmatpush.bf16.msrb.mxu3 %v13851_v35  ;;  %v12764_v35 = vld [vmem:[%s22029_s9 + $0x5b8] sm:$0xf0]  ;;  %v14527_v42 = vld [vmem:[%s22029_s9 + $0x56c] sm:$0xf] }
 0xb57   :  { %v12767_v33 = vor.u32 %v14535_v59, %v12764_v35  ;;  %v14459_v54 = vld [vmem:[%s22029_s9 + $0x34c] sm:$0xf] }
 0xb58   :  { %9982 = vmatpush.bf16.msrb.mxu1 %v12063_v16  ;;  %9995 = vmatpush.bf16.msra.mxu0 %v12191_v36  ;;  %v12511_v16 = vor.u32 %v14471_v11, %v12508_v47  ;;  %v12620_v36 = vld [vmem:[%s22029_s9 + $0x498] sm:$0xf0]  ;;  %v14491_v10 = vld [vmem:[%s22029_s9 + $0x44c] sm:$0xf] }
 0xb59   :  { %10008 = vmatpush.bf16.msrb.mxu2 %v12319_v20  ;;  %v14531_v20 = vld [vmem:[%s22029_s9 + $0x58c] sm:$0xf]  ;;  %v12716_v47 = vld [vmem:[%s22029_s9 + $0x558] sm:$0xf0] }
 0xb5a   :  { %9970 = vmatpush.bf16.msrb.mxu3 %v13835_v49  ;;  %v6985_v49 = vperm.slane %v21399_v7, 2  ;;  %v14455_v48 = vld [vmem:[%s22029_s9 + $0x32c] sm:$0xf] }
 0xb5b   :  { %v14483_v43 = vld [vmem:[%s22029_s9 + $0x40c] sm:$0xf] }
 0xb5c   :  { %9983 = vmatpush.bf16.msrb.mxu1 %v12047_v17  ;;  %9996 = vmatpush.bf16.msra.mxu0 %v12175_v19  ;;  %v9777_v63 = vpop.f32.mrf.mxu1  ;;  %v9790_v39 = vpop.f32.mrf.mxu0  ;;  %v12879_v17 = vor.u32 %v14563_v22, %v12876_v18  ;;  %v12732_v19 = vld [vmem:[%s22029_s9 + $0x578] sm:$0xf0]  ;;  %v14451_v18 = vld [vmem:[%s22029_s9 + $0x30c] sm:$0xf] }
 0xb5d   :  { %10009 = vmatpush.bf16.msrb.mxu2 %v12303_v21  ;;  %9971 = vmatmul.bf16.vlgmr.msrb.gmra.mxu3 %v19751_v40  ;;  %v14559_v21 = vld [vmem:[%s22029_s9 + $0x66c] sm:$0xf]  ;;  %v9791_v44 = vadd.f32 %v9790_v39, %v6985_v49  ;;  %v12735_v38 = vor.u32 %v14527_v42, %v12732_v19  ;;  %v13052_v49 = vld [vmem:[%s22029_s9 + $0x7f8] sm:$0xf0] }
 0xb5e   :  { %10015 = vmatpush.bf16.msra.mxu3 %v12543_v61  ;;  %v12751_v61 = vor.u32 %v14531_v20, %v12748_v32  ;;  %v12828_v20 = vld [vmem:[%s22029_s9 + $0x638] sm:$0xf0]  ;;  %v14607_v39 = vld [vmem:[%s22029_s9 + $0x7ec] sm:$0xf] }
 0xb5f   :  { %9984 = vmatmul.bf16.vlgmr.msrb.gmra.mxu1 %v19296_v2  ;;  %9997 = vmatmul.bf16.vlgmr.msra.gmra.mxu0 %v19302_v50  ;;  %v12639_v2 = vor.u32 %v14503_v27, %v12636_v34  ;;  %v14467_v50 = vld [vmem:[%s22029_s9 + $0x38c] sm:$0xf]  ;;  %v12463_v34 = vor.u32 %v14459_v54, %v12460_v25  ;;  %v12812_v19 = vld [vmem:[%s22029_s9 + $0x618] sm:$0xf0] }
 0xb60   :  { %10028 = vmatpush.bf16.msra.mxu1 %v12671_v1  ;;  %10041 = vmatpush.bf16.msrb.mxu0 %v12799_v53  ;;  %v12495_v51 = vor.u32 %v14467_v50, %v12492_v14  ;;  %v12860_v1 = vld [vmem:[%s22029_s9 + $0x678] sm:$0xf0]  ;;  %v9764_v31 = vpop.f32.mrf.mxu3  ;;  %v14487_v14 = vld [vmem:[%s22029_s9 + $0x42c] sm:$0xf] }
 0xb61   :  { %10054 = vmatpush.bf16.msra.mxu2 %v12927_v15  ;;  %v9765_v53 = vadd.f32 %v9764_v31, %v21261_v26  ;;  %v12607_v15 = vor.u32 %v14495_v6, %v12604_v5  ;;  %v12863_v62 = vor.u32 %v14559_v21, %v12860_v1  ;;  %v12588_v26 = vld [vmem:[%s22029_s9 + $0x458] sm:$0xf0]  ;;  %v14547_v42 = vld [vmem:[%s22029_s9 + $0x60c] sm:$0xf] }
 0xb62   :  { %10010 = vmatmul.bf16.vlgmr.msrb.gmra.mxu2 %v19304_v24  ;;  %10016 = vmatpush.bf16.msra.mxu3 %v12527_v57  ;;  %v14499_v24 = vld [vmem:[%s22029_s9 + $0x48c] sm:$0xf]  ;;  %v12591_v3 = vor.u32 %v14491_v10, %v12588_v26  ;;  %v12684_v5 = vld [vmem:[%s22029_s9 + $0x518] sm:$0xf0] }
 0xb63   :  { %v12623_v60 = vor.u32 %v14499_v24, %v12620_v36  ;;  %v14523_v57 = vld [vmem:[%s22029_s9 + $0x54c] sm:$0xf]  ;;  %v12700_v24 = vld [vmem:[%s22029_s9 + $0x538] sm:$0xf0] }
 0xb64   :  { %10029 = vmatpush.bf16.msra.mxu1 %v12655_v23  ;;  %10042 = vmatpush.bf16.msrb.mxu0 %v12783_v12  ;;  %v21442_v23 = vadd.f32 %v9777_v63, %v9765_v53  ;;  %v14555_v12 = vld [vmem:[%s22029_s9 + $0x64c] sm:$0xf]  ;;  %v9779_v59 = vpop.f32.mrf.mxu1  ;;  %v9792_v35 = vpop.f32.mrf.mxu0  ;;  %v12428_v63 = vld [vmem:[%s22029_s9 + $0x318] sm:$0xf0]  ;;  %v13055_v53 = vor.u32 %v14607_v39, %v13052_v49 }
 0xb65   :  { %10055 = vmatpush.bf16.msra.mxu2 %v12911_v52  ;;  %v9803_v11 = vpop.f32.mrf.mxu2  ;;  %v12844_v52 = vld [vmem:[%s22029_s9 + $0x658] sm:$0xf0]  ;;  %v14551_v36 = vld [vmem:[%s22029_s9 + $0x62c] sm:$0xf]  ;;  %v12431_v21 = vor.u32 %v14451_v18, %v12428_v63 }
 0xb66   :  { %10017 = vmatpush.bf16.msra.mxu3 %v12511_v16  ;;  %v21453_v27 = vadd.f32 %v9803_v11, %v9791_v44  ;;  %v12444_v16 = vld [vmem:[%s22029_s9 + $0x338] sm:$0xf0]  ;;  %v12847_v50 = vor.u32 %v14555_v12, %v12844_v52  ;;  %v12831_v37 = vor.u32 %v14551_v36, %v12828_v20  ;;  %v14639_v1 = vld [vmem:[%s22029_s9 + $0x8ec] sm:$0xf] }
 0xb67   :  { %v12447_v32 = vor.u32 %v14455_v48, %v12444_v16  ;;  %v14671_v31 = vld [vmem:[%s22029_s9 + $0x9ec] sm:$0xf]  ;;  %v13308_v54 = vld [vmem:[%s22029_s9 + $0x9f8] sm:$0xf0] }
 0xb68   :  { %10030 = vmatpush.bf16.msra.mxu1 %v12639_v2  ;;  %10043 = vmatpush.bf16.msrb.mxu0 %v12767_v33  ;;  %v12719_v2 = vor.u32 %v14523_v57, %v12716_v47  ;;  %v12572_v33 = vld [vmem:[%s22029_s9 + $0x438] sm:$0xf0]  ;;  %v9766_v22 = vpop.f32.mrf.mxu3  ;;  %v14703_v25 = vld [vmem:[%s22029_s9 + $0xaec] sm:$0xf]  ;;  %v13311_v11 = vor.u32 %v14671_v31, %v13308_v54 }
 0xb69   :  { %10056 = vmatpush.bf16.msra.mxu2 %v12895_v9  ;;  %v14519_v9 = vld [vmem:[%s22029_s9 + $0x52c] sm:$0xf]  ;;  %v13436_v44 = vld [vmem:[%s22029_s9 + $0xaf8] sm:$0xf0] }
 0xb6a   :  { %10018 = vmatpush.bf16.msra.mxu3 %v12495_v51  ;;  %v12575_v51 = vor.u32 %v14487_v14, %v12572_v33  ;;  %v14603_v26 = vld [vmem:[%s22029_s9 + $0x7cc] sm:$0xf]  ;;  %v13036_v57 = vld [vmem:[%s22029_s9 + $0x7d8] sm:$0xf0]  ;;  %v13439_v47 = vor.u32 %v14703_v25, %v13436_v44 }
 0xb6b   :  { %v14635_v12 = vld [vmem:[%s22029_s9 + $0x8cc] sm:$0xf]  ;;  %v13164_v52 = vld [vmem:[%s22029_s9 + $0x8d8] sm:$0xf0]  ;;  %v13039_v48 = vor.u32 %v14603_v26, %v13036_v57 }
 0xb6c   :  { %10031 = vmatpush.bf16.msra.mxu1 %v12623_v60  ;;  %10044 = vmatpush.bf16.msrb.mxu0 %v12751_v61  ;;  %v12703_v60 = vor.u32 %v14519_v9, %v12700_v24  ;;  %v12556_v61 = vld [vmem:[%s22029_s9 + $0x418] sm:$0xf0]  ;;  %v14699_v35 = vld [vmem:[%s22029_s9 + $0xacc] sm:$0xf]  ;;  %v13167_v16 = vor.u32 %v14635_v12, %v13164_v52 }
 0xb6d   :  { %10057 = vmatpush.bf16.msra.mxu2 %v12879_v17  ;;  %v14515_v17 = vld [vmem:[%s22029_s9 + $0x50c] sm:$0xf]  ;;  %v9805_v6 = vpop.f32.mrf.mxu2  ;;  %v13292_v59 = vld [vmem:[%s22029_s9 + $0x9d8] sm:$0xf0] }
 0xb6e   :  { %10019 = vmatpush.bf16.msra.mxu3 %v12479_v28  ;;  %v13180_v28 = vld [vmem:[%s22029_s9 + $0x8f8] sm:$0xf0]  ;;  %v14631_v9 = vld [vmem:[%s22029_s9 + $0x8ac] sm:$0xf] }
 0xb6f   :  { %v13183_v10 = vor.u32 %v14639_v1, %v13180_v28  ;;  %v14663_v24 = vld [vmem:[%s22029_s9 + $0x9ac] sm:$0xf]  ;;  %v13276_v36 = vld [vmem:[%s22029_s9 + $0x9b8] sm:$0xf0] }
 0xb70   :  { %10032 = vmatpush.bf16.msra.mxu1 %v12607_v15  ;;  %10045 = vmatpush.bf16.msrb.mxu0 %v12735_v38  ;;  %v12559_v15 = vor.u32 %v14483_v43, %v12556_v61  ;;  %v12687_v38 = vor.u32 %v14515_v17, %v12684_v5  ;;  %v14695_v20 = vld [vmem:[%s22029_s9 + $0xaac] sm:$0xf]  ;;  %v13004_v18 = vld [vmem:[%s22029_s9 + $0x798] sm:$0xf0] }
 0xb71   :  { %10058 = vmatpush.bf16.msra.mxu2 %v12863_v62  ;;  %v12815_v62 = vor.u32 %v14547_v42, %v12812_v19  ;;  %v13132_v39 = vld [vmem:[%s22029_s9 + $0x898] sm:$0xf0]  ;;  %v14659_v49 = vld [vmem:[%s22029_s9 + $0x98c] sm:$0xf] }
 0xb72   :  { %10020 = vmatpush.bf16.msra.mxu3 %v12463_v34  ;;  %v14667_v34 = vld [vmem:[%s22029_s9 + $0x9cc] sm:$0xf]  ;;  %v13388_v43 = vld [vmem:[%s22029_s9 + $0xa98] sm:$0xf0] }
 0xb73   :  { %v13295_v14 = vor.u32 %v14667_v34, %v13292_v59  ;;  %v14591_v42 = vld [vmem:[%s22029_s9 + $0x76c] sm:$0xf]  ;;  %v12988_v19 = vld [vmem:[%s22029_s9 + $0x778] sm:$0xf0] }
 0xb74   :  { %10033 = vmatpush.bf16.msra.mxu1 %v12591_v3  ;;  %10046 = vmatpush.bf16.msrb.mxu0 %v12719_v2  ;;  %v13420_v3 = vld [vmem:[%s22029_s9 + $0xad8] sm:$0xf0]  ;;  %v14599_v2 = vld [vmem:[%s22029_s9 + $0x7ac] sm:$0xf]  ;;  %v12991_v44 = vor.u32 %v14591_v42, %v12988_v19 }
 0xb75   :  { %10059 = vmatpush.bf16.msra.mxu2 %v12847_v50  ;;  %v13020_v50 = vld [vmem:[%s22029_s9 + $0x7b8] sm:$0xf0]  ;;  %v13423_v33 = vor.u32 %v14699_v35, %v13420_v3  ;;  %v14623_v28 = vld [vmem:[%s22029_s9 + $0x86c] sm:$0xf] }
 0xb76   :  { %10021 = vmatpush.bf16.msra.mxu3 %v12447_v32  ;;  %v13404_v32 = vld [vmem:[%s22029_s9 + $0xab8] sm:$0xf0]  ;;  %v13023_v22 = vor.u32 %v14599_v2, %v13020_v50  ;;  %v14687_v54 = vld [vmem:[%s22029_s9 + $0xa6c] sm:$0xf] }
 0xb77   :  { %v13407_v63 = vor.u32 %v14695_v20, %v13404_v32  ;;  %v13116_v31 = vld [vmem:[%s22029_s9 + $0x878] sm:$0xf0]  ;;  %v14587_v26 = vld [vmem:[%s22029_s9 + $0x74c] sm:$0xf] }
 0xb78   :  { %10034 = vmatpush.bf16.msra.mxu1 %v12575_v51  ;;  %10047 = vmatpush.bf16.msrb.mxu0 %v12703_v60  ;;  %v13279_v51 = vor.u32 %v14663_v24, %v13276_v36  ;;  %v13260_v60 = vld [vmem:[%s22029_s9 + $0x998] sm:$0xf0]  ;;  %v14619_v12 = vld [vmem:[%s22029_s9 + $0x84c] sm:$0xf] }
 0xb79   :  { %10060 = vmatpush.bf16.msra.mxu2 %v12831_v37  ;;  %v14691_v37 = vld [vmem:[%s22029_s9 + $0xa8c] sm:$0xf]  ;;  %v13372_v25 = vld [vmem:[%s22029_s9 + $0xa78] sm:$0xf0] }
 0xb7a   :  { %10022 = vmatpush.bf16.msra.mxu3 %v12431_v21  ;;  %v13263_v21 = vor.u32 %v14659_v49, %v13260_v60  ;;  %v13391_v1 = vor.u32 %v14691_v37, %v13388_v43  ;;  %v12972_v57 = vld [vmem:[%s22029_s9 + $0x758] sm:$0xf0]  ;;  %v14651_v52 = vld [vmem:[%s22029_s9 + $0x94c] sm:$0xf] }
 0xb7b   :  { %v13228_v35 = vld [vmem:[%s22029_s9 + $0x958] sm:$0xf0]  ;;  %v14683_v3 = vld [vmem:[%s22029_s9 + $0xa4c] sm:$0xf] }
 0xb7c   :  { %10035 = vmatpush.bf16.msra.mxu1 %v12559_v15  ;;  %10048 = vmatpush.bf16.msrb.mxu0 %v12687_v38  ;;  %v9829_v17 = vpop.f32.mrf.mxu1  ;;  %v9842_v6 = vpop.f32.mrf.mxu0  ;;  %v13244_v15 = vld [vmem:[%s22029_s9 + $0x978] sm:$0xf0]  ;;  %v13231_v24 = vor.u32 %v14651_v52, %v13228_v35  ;;  %v14615_v20 = vld [vmem:[%s22029_s9 + $0x82c] sm:$0xf] }
 0xb7d   :  { %10061 = vmatpush.bf16.msra.mxu2 %v12815_v62  ;;  %10023 = vmatmul.bf16.vlgmr.msra.gmra.mxu3 %v19306_v56  ;;  %v13148_v56 = vld [vmem:[%s22029_s9 + $0x8b8] sm:$0xf0]  ;;  %v14735_v37 = vld [vmem:[%s22029_s9 + $0xbec] sm:$0xf] }
 0xb7e   :  { %10067 = vmatpush.bf16.msrb.mxu3 %v13055_v53  ;;  %v14655_v53 = vld [vmem:[%s22029_s9 + $0x96c] sm:$0xf]  ;;  %v13084_v32 = vld [vmem:[%s22029_s9 + $0x838] sm:$0xf0] }
 0xb7f   :  { %10036 = vmatmul.bf16.vlgmr.msra.gmra.mxu1 %v19406_v29  ;;  %10049 = vmatmul.bf16.vlgmr.msrb.gmra.mxu0 %v19414_v30  ;;  %v13151_v29 = vor.u32 %v14631_v9, %v13148_v56  ;;  %v14595_v30 = vld [vmem:[%s22029_s9 + $0x78c] sm:$0xf]  ;;  %v12956_v56 = vld [vmem:[%s22029_s9 + $0x738] sm:$0xf0]  ;;  %v13087_v49 = vor.u32 %v14615_v20, %v13084_v32 }
 0xb80   :  { %10080 = vmatpush.bf16.msrb.mxu1 %v13183_v10  ;;  %10093 = vmatpush.bf16.msra.mxu0 %v13311_v11  ;;  %v13007_v61 = vor.u32 %v14595_v30, %v13004_v18  ;;  %v9816_v38 = vpop.f32.mrf.mxu3  ;;  %v13119_v10 = vor.u32 %v14623_v28, %v13116_v31  ;;  %v13247_v11 = vor.u32 %v14655_v53, %v13244_v15  ;;  %v14583_v9 = vld [vmem:[%s22029_s9 + $0x72c] sm:$0xf]  ;;  %v13212_v30 = vld [vmem:[%s22029_s9 + $0x938] sm:$0xf0] }
 0xb81   :  { %10106 = vmatpush.bf16.msrb.mxu2 %v13439_v47  ;;  %v9817_v62 = vadd.f32 %v9816_v38, %v21453_v27  ;;  %v13375_v47 = vor.u32 %v14687_v54, %v13372_v25  ;;  %v13100_v27 = vld [vmem:[%s22029_s9 + $0x858] sm:$0xf0]  ;;  %v14679_v18 = vld [vmem:[%s22029_s9 + $0xa2c] sm:$0xf] }
 0xb82   :  { %10062 = vmatmul.bf16.vlgmr.msra.gmra.mxu2 %v19420_v8  ;;  %10068 = vmatpush.bf16.msrb.mxu3 %v13039_v48  ;;  %v14627_v8 = vld [vmem:[%s22029_s9 + $0x88c] sm:$0xf]  ;;  %v13356_v48 = vld [vmem:[%s22029_s9 + $0xa58] sm:$0xf0] }
 0xb83   :  { %v13135_v5 = vor.u32 %v14627_v8, %v13132_v39  ;;  %v9830_v34 = vadd.f32 %v9829_v17, %v9817_v62  ;;  %v13359_v36 = vor.u32 %v14683_v3, %v13356_v48  ;;  %v14579_v39 = vld [vmem:[%s22029_s9 + $0x70c] sm:$0xf]  ;;  %v12940_v60 = vld [vmem:[%s22029_s9 + $0x718] sm:$0xf0] }
 0xb84   :  { %10081 = vmatpush.bf16.msrb.mxu1 %v13167_v16  ;;  %10094 = vmatpush.bf16.msra.mxu0 %v13295_v14  ;;  %v12975_v16 = vor.u32 %v14587_v26, %v12972_v57  ;;  %v9831_v2 = vpop.f32.mrf.mxu1  ;;  %v9844_v50 = vpop.f32.mrf.mxu0  ;;  %v13564_v43 = vld [vmem:[%s22029_s9 + $0xbf8] sm:$0xf0]  ;;  %v14643_v42 = vld [vmem:[%s22029_s9 + $0x90c] sm:$0xf]  ;;  %v12943_v31 = vor.u32 %v14579_v39, %v12940_v60 }
 0xb85   :  { %10107 = vmatpush.bf16.msrb.mxu2 %v13423_v33  ;;  %v9855_v59 = vpop.f32.mrf.mxu2  ;;  %v9843_v14 = vadd.f32 %v9842_v6, %v9830_v34  ;;  %v13103_v33 = vor.u32 %v14619_v12, %v13100_v27  ;;  %v14611_v6 = vld [vmem:[%s22029_s9 + $0x80c] sm:$0xf]  ;;  %v13324_v28 = vld [vmem:[%s22029_s9 + $0xa18] sm:$0xf0]  ;;  %v13567_v25 = vor.u32 %v14735_v37, %v13564_v43 }
 0xb86   :  { %10069 = vmatpush.bf16.msrb.mxu3 %v13023_v22  ;;  %v14647_v22 = vld [vmem:[%s22029_s9 + $0x92c] sm:$0xf]  ;;  %v13692_v15 = vld [vmem:[%s22029_s9 + $0xcf8] sm:$0xf0] }
 0xb87   :  { %v14767_v53 = vld [vmem:[%s22029_s9 + $0xcec] sm:$0xf]  ;;  %v13820_v38 = vld [vmem:[%s22029_s9 + $0xdf8] sm:$0xf0] }
 0xb88   :  { %10082 = vmatpush.bf16.msrb.mxu1 %v13151_v29  ;;  %10095 = vmatpush.bf16.msra.mxu0 %v13279_v51  ;;  %v21667_v29 = vadd.f32 %v9855_v59, %v9843_v14  ;;  %v13340_v51 = vld [vmem:[%s22029_s9 + $0xa38] sm:$0xf0]  ;;  %v9818_v8 = vpop.f32.mrf.mxu3  ;;  %v14799_v54 = vld [vmem:[%s22029_s9 + $0xdec] sm:$0xf] }
 0xb89   :  { %10108 = vmatpush.bf16.msrb.mxu2 %v13407_v63  ;;  %v12959_v63 = vor.u32 %v14583_v9, %v12956_v56  ;;  %v13343_v17 = vor.u32 %v14679_v18, %v13340_v51  ;;  %v14831_v62 = vld [vmem:[%s22029_s9 + $0xeec] sm:$0xf]  ;;  %v13548_v12 = vld [vmem:[%s22029_s9 + $0xbd8] sm:$0xf0]  ;;  %v13823_v27 = vor.u32 %v14799_v54, %v13820_v38 }
 0xb8a   :  { %10070 = vmatpush.bf16.msrb.mxu3 %v13007_v61  ;;  %v13215_v61 = vor.u32 %v14647_v22, %v13212_v30  ;;  %v14763_v34 = vld [vmem:[%s22029_s9 + $0xccc] sm:$0xf]  ;;  %v13676_v59 = vld [vmem:[%s22029_s9 + $0xcd8] sm:$0xf0] }
 0xb8b   :  { %v14795_v35 = vld [vmem:[%s22029_s9 + $0xdcc] sm:$0xf]  ;;  %v13804_v3 = vld [vmem:[%s22029_s9 + $0xdd8] sm:$0xf0]  ;;  %v13679_v50 = vor.u32 %v14763_v34, %v13676_v59 }
 0xb8c   :  { %10083 = vmatpush.bf16.msrb.mxu1 %v13135_v5  ;;  %10096 = vmatpush.bf16.msra.mxu0 %v13263_v21  ;;  %v13068_v5 = vld [vmem:[%s22029_s9 + $0x818] sm:$0xf0]  ;;  %v14827_v48 = vld [vmem:[%s22029_s9 + $0xecc] sm:$0xf]  ;;  %v13807_v9 = vor.u32 %v14795_v35, %v13804_v3 }
 0xb8d   :  { %10109 = vmatpush.bf16.msrb.mxu2 %v13391_v1  ;;  %v9857_v19 = vpop.f32.mrf.mxu2  ;;  %v13196_v21 = vld [vmem:[%s22029_s9 + $0x918] sm:$0xf0]  ;;  %v14675_v1 = vld [vmem:[%s22029_s9 + $0xa0c] sm:$0xf] }
 0xb8e   :  { %10071 = vmatpush.bf16.msrb.mxu3 %v12991_v44  ;;  %v13071_v44 = vor.u32 %v14611_v6, %v13068_v5  ;;  %v13199_v26 = vor.u32 %v14643_v42, %v13196_v21  ;;  %v13327_v57 = vor.u32 %v14675_v1, %v13324_v28  ;;  %v14727_v14 = vld [vmem:[%s22029_s9 + $0xbac] sm:$0xf]  ;;  %v13788_v20 = vld [vmem:[%s22029_s9 + $0xdb8] sm:$0xf0] }
 0xb8f   :  { %v14823_v32 = vld [vmem:[%s22029_s9 + $0xeac] sm:$0xf]  ;;  %v13916_v22 = vld [vmem:[%s22029_s9 + $0xeb8] sm:$0xf0] }
 0xb90   :  { %10084 = vmatpush.bf16.msrb.mxu1 %v13119_v10  ;;  %10097 = vmatpush.bf16.msra.mxu0 %v13247_v11  ;;  %v13948_v10 = vld [vmem:[%s22029_s9 + $0xef8] sm:$0xf0]  ;;  %v13695_v11 = vor.u32 %v14767_v53, %v13692_v15  ;;  %v14787_v39 = vld [vmem:[%s22029_s9 + $0xd8c] sm:$0xf] }
 0xb91   :  { %10110 = vmatpush.bf16.msrb.mxu2 %v13375_v47  ;;  %v14731_v47 = vld [vmem:[%s22029_s9 + $0xbcc] sm:$0xf]  ;;  %v13951_v52 = vor.u32 %v14831_v62, %v13948_v10  ;;  %v13516_v18 = vld [vmem:[%s22029_s9 + $0xb98] sm:$0xf0] }
 0xb92   :  { %10072 = vmatpush.bf16.msrb.mxu3 %v12975_v16  ;;  %v13932_v16 = vld [vmem:[%s22029_s9 + $0xed8] sm:$0xf0]  ;;  %v13551_v2 = vor.u32 %v14731_v47, %v13548_v12  ;;  %v14819_v60 = vld [vmem:[%s22029_s9 + $0xe8c] sm:$0xf] }
 0xb93   :  { %v13935_v56 = vor.u32 %v14827_v48, %v13932_v16  ;;  %v13644_v8 = vld [vmem:[%s22029_s9 + $0xc98] sm:$0xf0]  ;;  %v14719_v5 = vld [vmem:[%s22029_s9 + $0xb6c] sm:$0xf] }
 0xb94   :  { %10085 = vmatpush.bf16.msrb.mxu1 %v13103_v33  ;;  %10098 = vmatpush.bf16.msra.mxu0 %v13231_v24  ;;  %v13532_v33 = vld [vmem:[%s22029_s9 + $0xbb8] sm:$0xf0]  ;;  %v14759_v24 = vld [vmem:[%s22029_s9 + $0xcac] sm:$0xf] }
 0xb95   :  { %10111 = vmatpush.bf16.msrb.mxu2 %v13359_v36  ;;  %v14791_v36 = vld [vmem:[%s22029_s9 + $0xdac] sm:$0xf]  ;;  %v13535_v30 = vor.u32 %v14727_v14, %v13532_v33  ;;  %v13900_v37 = vld [vmem:[%s22029_s9 + $0xe98] sm:$0xf0] }
 0xb96   :  { %10073 = vmatpush.bf16.msrb.mxu3 %v12959_v63  ;;  %v13791_v51 = vor.u32 %v14791_v36, %v13788_v20  ;;  %v13919_v63 = vor.u32 %v14823_v32, %v13916_v22  ;;  %v13500_v42 = vld [vmem:[%s22029_s9 + $0xb78] sm:$0xf0]  ;;  %v13903_v21 = vor.u32 %v14819_v60, %v13900_v37  ;;  %v14751_v1 = vld [vmem:[%s22029_s9 + $0xc6c] sm:$0xf] }
 0xb97   :  { %v13628_v28 = vld [vmem:[%s22029_s9 + $0xc78] sm:$0xf0]  ;;  %v14815_v15 = vld [vmem:[%s22029_s9 + $0xe6c] sm:$0xf] }
 0xb98   :  { %10086 = vmatpush.bf16.msrb.mxu1 %v13087_v49  ;;  %10099 = vmatpush.bf16.msra.mxu0 %v13215_v61  ;;  %v13772_v49 = vld [vmem:[%s22029_s9 + $0xd98] sm:$0xf0]  ;;  %v13631_v38 = vor.u32 %v14751_v1, %v13628_v28  ;;  %v14715_v62 = vld [vmem:[%s22029_s9 + $0xb4c] sm:$0xf]  ;;  %v14840_v28 = vld [vmem:[%s22031_s11 + $0x30] sm:$0xff] }
 0xb99   :  { %10112 = vmatpush.bf16.msrb.mxu2 %v13343_v17  ;;  %v13775_v19 = vor.u32 %v14787_v39, %v13772_v49  ;;  %v13756_v53 = vld [vmem:[%s22029_s9 + $0xd78] sm:$0xf0]  ;;  %v14779_v12 = vld [vmem:[%s22029_s9 + $0xd4c] sm:$0xf] }
 0xb9a   :  { %10074 = vmatpush.bf16.msrb.mxu3 %v12943_v31  ;;  %v14783_v31 = vld [vmem:[%s22029_s9 + $0xd6c] sm:$0xf]  ;;  %v13884_v54 = vld [vmem:[%s22029_s9 + $0xe78] sm:$0xf0] }
 0xb9b   :  { %v13484_v10 = vld [vmem:[%s22029_s9 + $0xb58] sm:$0xf0]  ;;  %v14811_v34 = vld [vmem:[%s22029_s9 + $0xe4c] sm:$0xf] }
 0xb9c   :  { %10087 = vmatpush.bf16.msrb.mxu1 %v13071_v44  ;;  %10100 = vmatpush.bf16.msra.mxu0 %v13199_v26  ;;  %v21802_v61 = vpop.f32.mrf.mxu1  ;;  %v21804_v17 = vpop.f32.mrf.mxu0  ;;  %v13759_v26 = vor.u32 %v14783_v31, %v13756_v53  ;;  %v13612_v47 = vld [vmem:[%s22029_s9 + $0xc58] sm:$0xf0]  ;;  %v13487_v35 = vor.u32 %v14715_v62, %v13484_v10  ;;  %v14807_v36 = vld [vmem:[%s22029_s9 + $0xe2c] sm:$0xf]  ;;  %v14848_v31 = vld [vmem:[%s22031_s11 + $0x70] sm:$0xff] }
 0xb9d   :  { %10113 = vmatpush.bf16.msrb.mxu2 %v13327_v57  ;;  %10075 = vmatmul.bf16.vlgmr.msrb.gmra.mxu3 %v19422_v55  ;;  %v13660_v55 = vld [vmem:[%s22029_s9 + $0xcb8] sm:$0xf0]  ;;  %v13887_v57 = vor.u32 %v14815_v15, %v13884_v54  ;;  %v14803_v60 = vld [vmem:[%s22029_s9 + $0xe0c] sm:$0xf]  ;;  %v14856_v53 = vld [vmem:[%s22031_s11 + $0xb0] sm:$0xff] }
 0xb9e   :  { %10119 = vmatpush.bf16.msra.mxu3 %v13567_v25  ;;  %v13503_v25 = vor.u32 %v14719_v5, %v13500_v42  ;;  %v13868_v59 = vld [vmem:[%s22029_s9 + $0xe58] sm:$0xf0]  ;;  %v14847_v15 = vld [vmem:[%s22031_s11 + $0x68] sm:$0xff] }
 0xb9f   :  { %10088 = vmatmul.bf16.vlgmr.msrb.gmra.mxu1 %v19542_v13  ;;  %10101 = vmatmul.bf16.vlgmr.msra.gmra.mxu0 %v19544_v4  ;;  %v13663_v13 = vor.u32 %v14759_v24, %v13660_v55  ;;  %v14723_v4 = vld [vmem:[%s22029_s9 + $0xb8c] sm:$0xf]  ;;  %v13871_v33 = vor.u32 %v14811_v34, %v13868_v59  ;;  %v13724_v55 = vld [vmem:[%s22029_s9 + $0xd38] sm:$0xf0]  ;;  %v14844_v59 = vld [vmem:[%s22031_s11 + $0x50] sm:$0xff] }
 0xba0   :  { %10132 = vmatpush.bf16.msra.mxu1 %v13695_v11  ;;  %10145 = vmatpush.bf16.msrb.mxu0 %v13823_v27  ;;  %v13519_v43 = vor.u32 %v14723_v4, %v13516_v18  ;;  %v21830_v44 = vpop.f32.mrf.mxu3  ;;  %v14747_v11 = vld [vmem:[%s22029_s9 + $0xc4c] sm:$0xf]  ;;  %v13852_v20 = vld [vmem:[%s22029_s9 + $0xe38] sm:$0xf0] }
 0xba1   :  { %10158 = vmatpush.bf16.msra.mxu2 %v13951_v52  ;;  %v13740_v52 = vld [vmem:[%s22029_s9 + $0xd58] sm:$0xf0]  ;;  %v13615_v16 = vor.u32 %v14747_v11, %v13612_v47  ;;  %v14775_v24 = vld [vmem:[%s22029_s9 + $0xd2c] sm:$0xf]  ;;  %v9869_v11 = vadd.f32 %v21830_v44, %v21667_v29 }
 0xba2   :  { %10114 = vmatmul.bf16.vlgmr.msrb.gmra.mxu2 %v19552_v45  ;;  %10120 = vmatpush.bf16.msra.mxu3 %v13551_v2  ;;  %v14755_v45 = vld [vmem:[%s22029_s9 + $0xc8c] sm:$0xf]  ;;  %v13743_v14 = vor.u32 %v14779_v12, %v13740_v52  ;;  %v13452_v4 = vld [vmem:[%s22029_s9 + $0xb18] sm:$0xf0]  ;;  %v13727_v18 = vor.u32 %v14775_v24, %v13724_v55  ;;  %v14836_v12 = vld [vmem:[%s22031_s11 + $0x10] sm:$0xff] }
 0xba3   :  { %v13647_v6 = vor.u32 %v14755_v45, %v13644_v8  ;;  %v14711_v2 = vld [vmem:[%s22029_s9 + $0xb2c] sm:$0xf]  ;;  %v13580_v45 = vld [vmem:[%s22029_s9 + $0xc18] sm:$0xf0]  ;;  %v9882_v29 = vadd.f32 %v21802_v61, %v9869_v11  ;;  %v14834_v61 = vld [vmem:[%s22031_s11] sm:$0xff] }
 0xba4   :  { %10133 = vmatpush.bf16.msra.mxu1 %v13679_v50  ;;  %10146 = vmatpush.bf16.msrb.mxu0 %v13807_v9  ;;  %v9883_v3 = vpop.f32.mrf.mxu1  ;;  %v9896_v48 = vpop.f32.mrf.mxu0  ;;  %v13468_v50 = vld [vmem:[%s22029_s9 + $0xb38] sm:$0xf0]  ;;  %v14743_v9 = vld [vmem:[%s22029_s9 + $0xc2c] sm:$0xf]  ;;  %v14858_v11 = vld [vmem:[%s22031_s11 + $0xc0] sm:$0xff] }
 0xba5   :  { %10159 = vmatpush.bf16.msra.mxu2 %v13935_v56  ;;  %v21847_v27 = vpop.f32.mrf.mxu2  ;;  %v13596_v56 = vld [vmem:[%s22029_s9 + $0xc38] sm:$0xf0]  ;;  %v13471_v32 = vor.u32 %v14711_v2, %v13468_v50  ;;  %v14771_v8 = vld [vmem:[%s22029_s9 + $0xd0c] sm:$0xf]  ;;  %v9895_v2 = vadd.f32 %v21804_v17, %v9882_v29  ;;  %v14850_v17 = vld [vmem:[%s22031_s11 + $0x80] sm:$0xff] }
 0xba6   :  { %10121 = vmatpush.bf16.msra.mxu3 %v13535_v30  ;;  %v13599_v30 = vor.u32 %v14743_v9, %v13596_v56  ;;  %v13708_v49 = vld [vmem:[%s22029_s9 + $0xd18] sm:$0xf0]  ;;  %v14835_v44 = vld [vmem:[%s22031_s11 + $0x8] sm:$0xff]  ;;  %v10172_v9 = vmax.f32 %v21442_v23, 0.0 }
 0xba7   :  { %v13836_v37 = vld [vmem:[%s22029_s9 + $0xe18] sm:$0xf0]  ;;  %v13711_v42 = vor.u32 %v14771_v8, %v13708_v49  ;;  %v14843_v48 = vld [vmem:[%s22031_s11 + $0x48] sm:$0xff]  ;;  %v9908_v56 = vadd.f32 %v21847_v27, %v9895_v2 }
 0xba8   :  { %10134 = vmatpush.bf16.msra.mxu1 %v13663_v13  ;;  %10147 = vmatpush.bf16.msrb.mxu0 %v13791_v51  ;;  %v9870_v22 = vpop.f32.mrf.mxu3  ;;  %v14707_v13 = vld [vmem:[%s22029_s9 + $0xb0c] sm:$0xf]  ;;  %v13855_v51 = vor.u32 %v14807_v36, %v13852_v20  ;;  %v14857_v1 = vld [vmem:[%s22031_s11 + $0xb8] sm:$0xff]  ;;  %v10176_v36 = vpack.c.bf16 %v10172_v9, %v10172_v9  ;;  %v6986_v20 = vperm.slane %v21399_v7, 3 }
 0xba9   :  { %10160 = vmatpush.bf16.msra.mxu2 %v13919_v63  ;;  %v14739_v63 = vld [vmem:[%s22029_s9 + $0xc0c] sm:$0xf]  ;;  %v14837_v62 = vld [vmem:[%s22031_s11 + $0x18] sm:$0xff] }
 0xbaa   :  { %10122 = vmatpush.bf16.msra.mxu3 %v13519_v43  ;;  %v13455_v43 = vor.u32 %v14707_v13, %v13452_v4  ;;  %v13583_v5 = vor.u32 %v14739_v63, %v13580_v45 }
 0xbac   :  { %10135 = vmatpush.bf16.msra.mxu1 %v13647_v6  ;;  %10148 = vmatpush.bf16.msrb.mxu0 %v13775_v19  ;;  %v14841_v6 = vld [vmem:[%s22031_s11 + $0x38] sm:$0xff]  ;;  %v13839_v19 = vor.u32 %v14803_v60, %v13836_v37 }
 0xbad   :  { %10161 = vmatpush.bf16.msra.mxu2 %v13903_v21  ;;  %v9909_v39 = vpop.f32.mrf.mxu2  ;;  %v14849_v21 = vld [vmem:[%s22031_s11 + $0x78] sm:$0xff] }
 0xbae   :  { %10123 = vmatpush.bf16.msra.mxu3 %v13503_v25  ;;  %v14846_v25 = vld [vmem:[%s22031_s11 + $0x60] sm:$0xff] }
 0xbb0   :  { %10136 = vmatpush.bf16.msra.mxu1 %v13631_v38  ;;  %10149 = vmatpush.bf16.msrb.mxu0 %v13759_v26  ;;  %v14854_v38 = vld [vmem:[%s22031_s11 + $0xa0] sm:$0xff]  ;;  %v14845_v26 = vld [vmem:[%s22031_s11 + $0x58] sm:$0xff] }
 0xbb1   :  { %10162 = vmatpush.bf16.msra.mxu2 %v13887_v57  ;;  %v14853_v57 = vld [vmem:[%s22031_s11 + $0x98] sm:$0xff] }
 0xbb2   :  { %10124 = vmatpush.bf16.msra.mxu3 %v13487_v35  ;;  %v14852_v35 = vld [vmem:[%s22031_s11 + $0x90] sm:$0xff] }
 0xbb4   :  { %10137 = vmatpush.bf16.msra.mxu1 %v13615_v16  ;;  %10150 = vmatpush.bf16.msrb.mxu0 %v13743_v14  ;;  %v14851_v16 = vld [vmem:[%s22031_s11 + $0x88] sm:$0xff]  ;;  %v10171_v14 = vmax.f32 %v20648_v0, 0.0 }
 0xbb5   :  { %10163 = vmatpush.bf16.msra.mxu2 %v13871_v33  ;;  %v14842_v33 = vld [vmem:[%s22031_s11 + $0x40] sm:$0xff] }
 0xbb6   :  { %10125 = vmatpush.bf16.msra.mxu3 %v13471_v32  ;;  %v10175_v24 = vpack.c.bf16 %v10171_v14, %v10171_v14 }
 0xbb8   :  { %10138 = vmatpush.bf16.msra.mxu1 %v13599_v30  ;;  %10151 = vmatpush.bf16.msrb.mxu0 %v13727_v18 }
 0xbb9   :  { %10164 = vmatpush.bf16.msra.mxu2 %v13855_v51 }
 0xbba   :  { %10126 = vmatpush.bf16.msra.mxu3 %v13455_v43 }
 0xbbc   :  { %10139 = vmatpush.bf16.msra.mxu1 %v13583_v5  ;;  %10152 = vmatpush.bf16.msrb.mxu0 %v13711_v42  ;;  %v9946_v54 = vpop.f32.mrf.mxu0 }
 0xbbd   :  { %10165 = vmatpush.bf16.msra.mxu2 %v13839_v19  ;;  %10127 = vmatmul.bf16.vlgmr.msra.gmra.mxu3 %v19563_v58  ;;  %v14839_v58 = vld [vmem:[%s22031_s11 + $0x28] sm:$0xff] }
 0xbbe   :  { %10439 = vmatpush.bf16.msrb.mxu3 %v14841_v6 }
 0xbbf   :  { %10140 = vmatmul.bf16.vlgmr.msra.gmra.mxu1 %v19738_v41  ;;  %10153 = vmatmul.bf16.vlgmr.msrb.gmra.mxu0 %v19749_v46  ;;  %v14855_v41 = vld [vmem:[%s22031_s11 + $0xa8] sm:$0xff]  ;;  %v14838_v46 = vld [vmem:[%s22031_s11 + $0x20] sm:$0xff] }
 0xbc0   :  { %10452 = vmatpush.bf16.msrb.mxu1 %v14849_v21  ;;  %10465 = vmatpush.bf16.msra.mxu0 %v14857_v1  ;;  %v9920_v10 = vpop.f32.mrf.mxu3  ;;  %v14865_v1 = vld [vmem:[%s22031_s11 + $0xf8] sm:$0xff] }
 0xbc1   :  { %10166 = vmatmul.bf16.vlgmr.msra.gmra.mxu2 %v19751_v40  ;;  %v9933_v40 = vpop.f32.mrf.mxu1  ;;  %v9921_v55 = vadd.f32 %v9920_v10, %v9908_v56 }
 0xbc2   :  { %10440 = vmatpush.bf16.msrb.mxu3 %v14840_v28  ;;  %10478 = vmatpush.bf16.msrb.mxu2 %v14865_v1 }
 0xbc3   :  { %v9934_v0 = vadd.f32 %v9933_v40, %v9921_v55  ;;  %v14860_v40 = vld [vmem:[%s22031_s11 + $0xd0] sm:$0xff] }
 0xbc4   :  { %10453 = vmatpush.bf16.msrb.mxu1 %v14848_v31  ;;  %10466 = vmatpush.bf16.msra.mxu0 %v14856_v53  ;;  %v9948_v34 = vpop.f32.mrf.mxu0  ;;  %v14864_v31 = vld [vmem:[%s22031_s11 + $0xf0] sm:$0xff]  ;;  %v14863_v53 = vld [vmem:[%s22031_s11 + $0xe8] sm:$0xff] }
 0xbc5   :  { %v9959_v47 = vpop.f32.mrf.mxu2  ;;  %v9947_v32 = vadd.f32 %v9946_v54, %v9934_v0 }
 0xbc6   :  { %10441 = vmatpush.bf16.msrb.mxu3 %v14839_v58  ;;  %10479 = vmatpush.bf16.msrb.mxu2 %v14864_v31  ;;  %v14862_v58 = vld [vmem:[%s22031_s11 + $0xe0] sm:$0xff] }
 0xbc7   :  { %v9960_v13 = vadd.f32 %v9959_v47, %v9947_v32 }
 0xbc8   :  { %10454 = vmatpush.bf16.msrb.mxu1 %v14847_v15  ;;  %10467 = vmatpush.bf16.msra.mxu0 %v14855_v41  ;;  %v9922_v3 = vpop.f32.mrf.mxu3  ;;  %v14861_v15 = vld [vmem:[%s22031_s11 + $0xd8] sm:$0xff] }
 0xbc9   :  { %v9935_v52 = vpop.f32.mrf.mxu1 }
 0xbca   :  { %10442 = vmatpush.bf16.msrb.mxu3 %v14838_v46  ;;  %10480 = vmatpush.bf16.msrb.mxu2 %v14863_v53 }
 0xbcc   :  { %10455 = vmatpush.bf16.msrb.mxu1 %v14846_v25  ;;  %10468 = vmatpush.bf16.msra.mxu0 %v14854_v38 }
 0xbcd   :  { %v9961_v50 = vpop.f32.mrf.mxu2 }
 0xbce   :  { %10443 = vmatpush.bf16.msrb.mxu3 %v14837_v62  ;;  %10481 = vmatpush.bf16.msrb.mxu2 %v14862_v58  ;;  %v14859_v62 = vld [vmem:[%s22031_s11 + $0xc8] sm:$0xff] }
 0xbd0   :  { %10456 = vmatpush.bf16.msrb.mxu1 %v14845_v26  ;;  %10469 = vmatpush.bf16.msra.mxu0 %v14853_v57 }
 0xbd2   :  { %10444 = vmatpush.bf16.msrb.mxu3 %v14836_v12  ;;  %10482 = vmatpush.bf16.msrb.mxu2 %v14861_v15 }
 0xbd4   :  { %10457 = vmatpush.bf16.msrb.mxu1 %v14844_v59  ;;  %10470 = vmatpush.bf16.msra.mxu0 %v14852_v35 }
 0xbd6   :  { %10445 = vmatpush.bf16.msrb.mxu3 %v14835_v44  ;;  %10483 = vmatpush.bf16.msrb.mxu2 %v14860_v40 }
 0xbd8   :  { %10458 = vmatpush.bf16.msrb.mxu1 %v14843_v48  ;;  %10471 = vmatpush.bf16.msra.mxu0 %v14851_v16 }
 0xbda   :  { %10446 = vmatpush.bf16.msrb.mxu3 %v14834_v61  ;;  %10484 = vmatpush.bf16.msrb.mxu2 %v14859_v62 }
 0xbdc   :  { %10459 = vmatpush.bf16.msrb.mxu1 %v14842_v33  ;;  %10472 = vmatpush.bf16.msra.mxu0 %v14850_v17  ;;  %v9985_v23 = vpop.f32.mrf.mxu1  ;;  %v9998_v22 = vpop.f32.mrf.mxu0 }
 0xbdd   :  { %10447 = vmatmul.bf16.vlgmr.msrb.gmra.mxu3 %v10175_v24  ;;  %v9986_v30 = vadd.f32 %v9985_v23, %v6986_v20  ;;  %v14872_v20 = vld [vmem:[%s22032_s12] ss:$0 sm:$0xff] }
 0xbde   :  { %10485 = vmatpush.bf16.msrb.mxu2 %v14858_v11 }
 0xbdf   :  { %10460 = vmatmul.bf16.vlgmr.msrb.gmra.mxu1 %v10176_v36  ;;  %v9999_v4 = vadd.f32 %v9998_v22, %v9986_v30 }
 0xbe0   :  { %v9972_v18 = vpop.f32.mrf.mxu3 }
 0xbe1   :  { %v9973_v51 = vadd.f32 %v9972_v18, %v9960_v13 }
 0xbe3   :  { %v10173_v27 = vmax.f32 %v9973_v51, 0.0 }
 0xbe4   :  { %v9987_v8 = vpop.f32.mrf.mxu1  ;;  %v10000_v39 = vpop.f32.mrf.mxu0 }
 0xbe5   :  { %v10011_v63 = vpop.f32.mrf.mxu2  ;;  %v10177_v49 = vpack.c.bf16 %v10173_v27, %v10173_v27 }
 0xbe6   :  { %v10012_v45 = vadd.f32 %v10011_v63, %v9999_v4 }
 0xbe7   :  { %10473 = vmatmul.bf16.vlgmr.msra.gmra.mxu0 %v10177_v49 }
 0xbe8   :  { %v9974_v60 = vpop.f32.mrf.mxu3 }
 0xbed   :  { %v10013_v37 = vpop.f32.mrf.mxu2 }
 0xbfc   :  { %v10037_v43 = vpop.f32.mrf.mxu1  ;;  %v10050_v6 = vpop.f32.mrf.mxu0 }
 0xc00   :  { %v10024_v7 = vpop.f32.mrf.mxu3 }
 0xc01   :  { %v10025_v25 = vadd.f32 %v10024_v7, %v10012_v45 }
 0xc03   :  { %v10038_v57 = vadd.f32 %v10037_v43, %v10025_v25 }
 0xc04   :  { %v10039_v42 = vpop.f32.mrf.mxu1  ;;  %v10052_v19 = vpop.f32.mrf.mxu0 }
 0xc05   :  { %v10063_v5 = vpop.f32.mrf.mxu2  ;;  %v10051_v12 = vadd.f32 %v10050_v6, %v10038_v57 }
 0xc07   :  { %v10064_v34 = vadd.f32 %v10063_v5, %v10051_v12 }
 0xc08   :  { %v10026_v21 = vpop.f32.mrf.mxu3 }
 0xc0d   :  { %v10065_v28 = vpop.f32.mrf.mxu2 }
 0xc1c   :  { %v10089_v41 = vpop.f32.mrf.mxu1  ;;  %v10102_v46 = vpop.f32.mrf.mxu0 }
 0xc20   :  { %v10076_v54 = vpop.f32.mrf.mxu3 }
 0xc21   :  { %v10077_v59 = vadd.f32 %v10076_v54, %v10064_v34 }
 0xc23   :  { %v10090_v35 = vadd.f32 %v10089_v41, %v10077_v59 }
 0xc24   :  { %v10091_v10 = vpop.f32.mrf.mxu1  ;;  %v10104_v26 = vpop.f32.mrf.mxu0 }
 0xc25   :  { %v10115_v38 = vpop.f32.mrf.mxu2  ;;  %v10103_v29 = vadd.f32 %v10102_v46, %v10090_v35 }
 0xc27   :  { %v10116_v48 = vadd.f32 %v10115_v38, %v10103_v29 }
 0xc28   :  { %v10078_v47 = vpop.f32.mrf.mxu3 }
 0xc2d   :  { %v10117_v52 = vpop.f32.mrf.mxu2 }
 0xc3c   :  { %v10141_v44 = vpop.f32.mrf.mxu1  ;;  %v10154_v3 = vpop.f32.mrf.mxu0 }
 0xc40   :  { %v10128_v16 = vpop.f32.mrf.mxu3 }
 0xc41   :  { %v10129_v2 = vadd.f32 %v10128_v16, %v10116_v48 }
 0xc43   :  { %v10142_v61 = vadd.f32 %v10141_v44, %v10129_v2 }
 0xc44   :  { %v10167_v50 = vpop.f32.mrf.mxu2  ;;  %v10143_v14 = vpop.f32.mrf.mxu1 }
 0xc45   :  { %v10156_v33 = vpop.f32.mrf.mxu0  ;;  %v10155_v9 = vadd.f32 %v10154_v3, %v10142_v61 }
 0xc47   :  { %v10168_v17 = vadd.f32 %v10167_v50, %v10155_v9 }
 0xc48   :  { %v10130_v56 = vpop.f32.mrf.mxu3 }
 0xc49   :  { %v10174_v24 = vmax.f32 %v10168_v17, 0.0 }
 0xc4b   :  { %v10178_v36 = vpack.c.bf16 %v10174_v24, %v10174_v24 }
 0xc4c   :  { %v10169_v55 = vpop.f32.mrf.mxu2 }
 0xc4d   :  { %10486 = vmatmul.bf16.vlgmr.msrb.gmra.mxu2 %v10178_v36 }
 0xc5c   :  { %v10461_v0 = vpop.f32.mrf.mxu1 }
 0xc60   :  { %v10448_v32 = vpop.f32.mrf.mxu3 }
 0xc61   :  { %v10449_v23 = vadd.f32 %v14872_v20, %v10448_v32 }
 0xc63   :  { %v10462_v30 = vadd.f32 %v10461_v0, %v10449_v23 }
 0xc64   :  { %v10463_v22 = vpop.f32.mrf.mxu1  ;;  %v10474_v4 = vpop.f32.mrf.mxu0 }
 0xc65   :  { %v10475_v18 = vadd.f32 %v10474_v4, %v10462_v30 }
 0xc68   :  { %v10450_v13 = vpop.f32.mrf.mxu3 }
 0xc6c   :  { %v10476_v51 = vpop.f32.mrf.mxu0 }
 0xcd0   :  { %v10487_v27 = vpop.f32.mrf.mxu2 }
 0xcd1   :  { %v10488_v63 = vadd.f32 %v10487_v27, %v10475_v18 }
 0xcd3   :  { %10491 = vst [vmem:[#allocation2] sm:$0x3] %v10488_v63 }
 0xcd4   :  { %10502 = dma.vmem_to_hbm [thread:$0]  %s10498_s14, 32, %s10500_s16, [#allocation3]  }
 0xcd8   :  { %v10489_v45 = vpop.f32.mrf.mxu2 }
 0xcd9   :  { %14898 = dma.done.wait [#allocation3], 32  }
 0xcda   :  { %14899 = vsyncadd [#allocation3], 4294967264 }
 0xcdb   :  { %10507 = vsyncpa [#allocation3], 1 }

</bundles_post_ra>
